<compile_context>
chip_gen: v7x
topology: tpu7x:2x2x1
jax: 0.10.0
libtpu: 0.0.40
codegen_flags: <defaults>
</compile_context>

<pallas_src>
import math

import jax
import jax.numpy as jnp
from jax.experimental import pallas as pl
from jax.experimental.pallas import tpu as pltpu

N_QUBITS = 4
N_STATES = 1 << N_QUBITS  # 16
LANES = 128
MAX_ROWS_PER_CHUNK = 8    # 8 sublanes x 128 lanes = 1024 tokens per inner chunk


def _apply_rx(amps, q, c, s):
    """RX(theta) on wire q: [[c, -i*s], [-i*s, c]] with c=cos(t/2), s=sin(t/2).

    `amps` is a list of 16 (re, im) pairs; c/s broadcast against them
    (either (rows, 128) arrays or rank-0 scalars)."""
    new = list(amps)
    for i in range(N_STATES):
        if (i >> q) & 1 == 0:
            j = i | (1 << q)
            ri, ii = amps[i]
            rj, ij = amps[j]
            new[i] = (c * ri + s * ij, c * ii - s * rj)
            new[j] = (c * rj + s * ii, c * ij - s * ri)
    return new


def _apply_cnot(amps, ctrl, tgt):
    """CNOT(ctrl -> tgt): pure amplitude relabeling (free, no arithmetic)."""
    new = list(amps)
    for i in range(N_STATES):
        if ((i >> ctrl) & 1) == 1 and ((i >> tgt) & 1) == 0:
            j = i | (1 << tgt)
            new[i], new[j] = amps[j], amps[i]
    return new


def quantum_ffn_kernel(x_ref, w_in_ref, b_in_ref, cp_ref, sp_ref,
                       w_out_t_ref, b_out_ref, o_ref):
    """One grid step processes a (d_model, tmr, 128) token-on-lanes tile.

    x_ref / o_ref: VMEM, shape (d_model, tmr, 128); token m = row*128 + lane.
    w_in_ref (4, d_model), b_in_ref (1, 4), cp_ref/sp_ref (1, 4),
    w_out_t_ref (4, d_model), b_out_ref (1, d_model): SMEM scalar tables.
    """
    d_model = x_ref.shape[0]
    tmr = x_ref.shape[1]

    for r0 in range(0, tmr, MAX_ROWS_PER_CHUNK):
        rc = min(MAX_ROWS_PER_CHUNK, tmr - r0)

        # ---- input projection: 4 rank-1 VPU updates over d_model ----
        xp = [None] * N_QUBITS
        for d in range(d_model):
            xd = x_ref[d, r0:r0 + rc, :]                       # (rc, 128)
            for q in range(N_QUBITS):
                t = w_in_ref[q, d] * xd
                xp[q] = t if xp[q] is None else xp[q] + t
        for q in range(N_QUBITS):
            xp[q] = xp[q] + b_in_ref[0, q]

        # ---- per-token rescale of the 4 encoded angles into [0, pi] ----
        mn = jnp.minimum(jnp.minimum(xp[0], xp[1]), jnp.minimum(xp[2], xp[3]))
        mx = jnp.maximum(jnp.maximum(xp[0], xp[1]), jnp.maximum(xp[2], xp[3]))
        half_scale = (0.5 * math.pi) / (mx - mn + 1e-8)        # -> theta/2
        c_in, s_in = [], []
        for q in range(N_QUBITS):
            h = (xp[q] - mn) * half_scale
            c_in.append(jnp.cos(h))
            s_in.append(jnp.sin(h))

        # ---- data-encoding RX layer applied analytically (product state) ----
        # amp(i) = prod_q (c_q if bit_q(i)==0 else s_q) * (-i)^popcount(i)
        zero = jnp.zeros_like(xp[0])
        p01 = {}
        for b1 in range(2):
            for b0 in range(2):
                p01[(b1, b0)] = ((c_in[0] if b0 == 0 else s_in[0]) *
                                 (c_in[1] if b1 == 0 else s_in[1]))
        p23 = {}
        for b3 in range(2):
            for b2 in range(2):
                p23[(b3, b2)] = ((c_in[2] if b2 == 0 else s_in[2]) *
                                 (c_in[3] if b3 == 0 else s_in[3]))
        amps = []
        for i in range(N_STATES):
            b0, b1 = (i >> 0) & 1, (i >> 1) & 1
            b2, b3 = (i >> 2) & 1, (i >> 3) & 1
            mag = p01[(b1, b0)] * p23[(b3, b2)]
            k = (b0 + b1 + b2 + b3) % 4                        # (-i)^k phase
            if k == 0:
                amps.append((mag, zero))
            elif k == 1:
                amps.append((zero, -mag))
            elif k == 2:
                amps.append((-mag, zero))
            else:
                amps.append((zero, mag))

        # ---- trainable layer: RX(params[q]) then CNOT(q, (q+1)%4), interleaved ----
        for q in range(N_QUBITS):
            amps = _apply_rx(amps, q, cp_ref[0, q], sp_ref[0, q])
            amps = _apply_cnot(amps, q, (q + 1) % N_QUBITS)

        # ---- probabilities once, then signed sums for the 4 <Z_q> ----
        probs = [re * re + im * im for re, im in amps]
        z = []
        for q in range(N_QUBITS):
            acc = probs[0]                                     # i=0 has bit q == 0
            for i in range(1, N_STATES):
                if ((i >> q) & 1) == 0:
                    acc = acc + probs[i]
                else:
                    acc = acc - probs[i]
            z.append(acc)

        # ---- output projection: rank-1 VPU updates, lane-dense stores ----
        # TODO(synk): nn.Dropout(0.1) is identity in eval mode; training-time
        # stochastic dropout is intentionally omitted.
        for d in range(d_model):
            acc = z[0] * w_out_t_ref[0, d]
            for q in range(1, N_QUBITS):
                acc = acc + z[q] * w_out_t_ref[q, d]
            o_ref[d, r0:r0 + rc, :] = acc + b_out_ref[0, d]


def _round_up(x, m):
    return (x + m - 1) // m * m


def quantum_feedforward(x, w_in, b_in, ffn_params, w_out, b_out,
                        *, tokens_per_tile=None):
    """x: (B, S, d_model); w_in: (4, d_model); b_in: (4,); ffn_params: (4,);
    w_out: (d_model, 4); b_out: (d_model,).  Returns (B, S, d_model)."""
    B, S, D = x.shape
    M = B * S
    f32 = jnp.float32

    if tokens_per_tile is None:
        tokens_per_tile = min(2048, _round_up(M, LANES))
    tm = tokens_per_tile
    assert tm % LANES == 0, "tokens_per_tile must be a multiple of 128"
    Mp = _round_up(M, tm)
    tmr = tm // LANES
    # (8,128) rule: block 2nd-minor must be a multiple of 8 or the full extent.
    assert tmr % 8 == 0 or tmr == Mp // LANES

    x2 = x.reshape(M, D).astype(f32)
    if Mp != M:
        x2 = jnp.pad(x2, ((0, Mp - M), (0, 0)))
    # Token-on-lanes layout (D, Mp//128, 128): the transpose is wrapper-side
    # layout plumbing; the trailing reshape is a free row-major reinterpret.
    x3 = x2.T.reshape(D, Mp // LANES, LANES)

    w_in2 = w_in.astype(f32)                                   # (4, D)
    b_in2 = b_in.reshape(1, N_QUBITS).astype(f32)
    half_params = 0.5 * ffn_params.astype(f32)
    cp = jnp.cos(half_params).reshape(1, N_QUBITS)             # hoisted out of kernel
    sp = jnp.sin(half_params).reshape(1, N_QUBITS)
    w_out_t = w_out.T.astype(f32)                              # (4, D)
    b_out2 = b_out.reshape(1, D).astype(f32)

    smem = pl.BlockSpec(memory_space=pltpu.MemorySpace.SMEM)

    out3 = pl.pallas_call(
        quantum_ffn_kernel,
        out_shape=jax.ShapeDtypeStruct((D, Mp // LANES, LANES), f32),
        grid_spec=pltpu.PrefetchScalarGridSpec(
            num_scalar_prefetch=0,
            grid=(Mp // tm,),
            in_specs=[
                pl.BlockSpec((D, tmr, LANES), lambda i: (0, i, 0)),   # x tokens
                smem,                                                 # W_in
                smem,                                                 # b_in
                smem,                                                 # cos(params/2)
                smem,                                                 # sin(params/2)
                smem,                                                 # W_out^T
                smem,                                                 # b_out
            ],
            out_specs=pl.BlockSpec((D, tmr, LANES), lambda i: (0, i, 0)),
        ),
        compiler_params=pltpu.CompilerParams(
            dimension_semantics=("parallel",)),
    )(x3, w_in2, b_in2, cp, sp, w_out_t, b_out2)

    out = out3.reshape(D, Mp).T[:M]
    return out.reshape(B, S, D)


def _reference(x, w_in, b_in, ffn_params, w_out, b_out):
    """Pure-JAX reference (same math as the PyTorch module, eval mode)."""
    B, S, D = x.shape
    M = B * S
    xp = x.reshape(M, D).astype(jnp.float32) @ w_in.T.astype(jnp.float32) + b_in
    mn = jnp.min(xp, axis=-1, keepdims=True)
    mx = jnp.max(xp, axis=-1, keepdims=True)
    ang = (xp - mn) / (mx - mn + 1e-8) * math.pi
    c = jnp.cos(0.5 * ang)
    s = jnp.sin(0.5 * ang)
    cp = jnp.cos(0.5 * ffn_params)
    sp = jnp.sin(0.5 * ffn_params)
    one = jnp.ones((M, 1), jnp.float32)
    zero = jnp.zeros((M, 1), jnp.float32)
    amps = [(one, zero)] + [(zero, zero)] * (N_STATES - 1)
    for q in range(N_QUBITS):
        amps = _apply_rx(amps, q, c[:, q:q + 1], s[:, q:q + 1])
    for q in range(N_QUBITS):
        amps = _apply_rx(amps, q, cp[q], sp[q])
        amps = _apply_cnot(amps, q, (q + 1) % N_QUBITS)
    probs = [re * re + im * im for re, im in amps]
    zs = []
    for q in range(N_QUBITS):
        acc = probs[0]
        for i in range(1, N_STATES):
            if ((i >> q) & 1) == 0:
                acc = acc + probs[i]
            else:
                acc = acc - probs[i]
        zs.append(acc)
    z = jnp.concatenate(zs, axis=-1)
    out = z @ w_out.T.astype(jnp.float32) + b_out
    return out.reshape(B, S, D)


if __name__ == "__main__":
    B, S, D = 2, 8, 32   # d_model = 32

    key = jax.random.PRNGKey(0)
    k = jax.random.split(key, 6)
    x = jax.random.normal(k[0], (B, S, D), jnp.float32)

    # deterministic parameter init (shapes follow the PyTorch module __init__)
    bound_in = 1.0 / math.sqrt(D)
    w_in = jax.random.uniform(k[1], (N_QUBITS, D), jnp.float32, -bound_in, bound_in)
    b_in = jax.random.uniform(k[2], (N_QUBITS,), jnp.float32, -bound_in, bound_in)
    ffn_params = 0.1 * jax.random.normal(k[3], (N_QUBITS,), jnp.float32)
    bound_out = 1.0 / math.sqrt(N_QUBITS)
    w_out = jax.random.uniform(k[4], (D, N_QUBITS), jnp.float32, -bound_out, bound_out)
    b_out = jax.random.uniform(k[5], (D,), jnp.float32, -bound_out, bound_out)

    out = quantum_feedforward(x, w_in, b_in, ffn_params, w_out, b_out)
    jax.block_until_ready(out)
    assert out.shape == (B, S, D)
    assert bool(jnp.all(jnp.isfinite(out)))

    ref = _reference(x, w_in, b_in, ffn_params, w_out, b_out)
    err = float(jnp.max(jnp.abs(out - ref)))
    assert err < 1e-3, f"kernel/reference mismatch: max abs err {err}"
    print("KERNEL_OK")
</pallas_src>

<mosaic_0001>
module attributes {stable_mosaic.version = 11 : i64} {
  func.func @quantum_ffn_kernel(%arg0: i32, %arg1: memref<32x1x128xf32, #tpu.memory_space<vmem>>, %arg2: memref<4x32xf32, #tpu.memory_space<smem>>, %arg3: memref<1x4xf32, #tpu.memory_space<smem>>, %arg4: memref<1x4xf32, #tpu.memory_space<smem>>, %arg5: memref<1x4xf32, #tpu.memory_space<smem>>, %arg6: memref<4x32xf32, #tpu.memory_space<smem>>, %arg7: memref<1x32xf32, #tpu.memory_space<smem>>, %arg8: memref<32x1x128xf32, #tpu.memory_space<vmem>>) attributes {dimension_semantics = [#tpu.dimension_semantics<parallel>], iteration_bounds = array<i64: 1>, scalar_prefetch = 0 : i64, scratch_operands = 0 : i64, tpu.core_type = #tpu.core_type<tc>, window_params = [{transform_indices = @transform_0, window_bounds = array<i64: 32, 1, 128>}, {transform_indices = @transform_1, window_bounds = array<i64: 4, 32>}, {transform_indices = @transform_2, window_bounds = array<i64: 1, 4>}, {transform_indices = @transform_3, window_bounds = array<i64: 1, 4>}, {transform_indices = @transform_4, window_bounds = array<i64: 1, 4>}, {transform_indices = @transform_5, window_bounds = array<i64: 4, 32>}, {transform_indices = @transform_6, window_bounds = array<i64: 1, 32>}, {transform_indices = @transform_7, window_bounds = array<i64: 32, 1, 128>}]} {
    %c0 = arith.constant 0 : index
    %c0_0 = arith.constant 0 : index
    %c0_1 = arith.constant 0 : index
    %0 = vector.load %arg1[%c0, %c0_0, %c0_1] : memref<32x1x128xf32, #tpu.memory_space<vmem>>, vector<1x1x128xf32>
    %1 = vector.shape_cast %0 : vector<1x1x128xf32> to vector<1x128xf32>
    %c0_2 = arith.constant 0 : index
    %c0_3 = arith.constant 0 : index
    %2 = memref.load %arg2[%c0_2, %c0_3] : memref<4x32xf32, #tpu.memory_space<smem>>
    %3 = vector.broadcast %2 : f32 to vector<1x128xf32>
    %4 = arith.mulf %3, %1 : vector<1x128xf32>
    %c1 = arith.constant 1 : index
    %c0_4 = arith.constant 0 : index
    %5 = memref.load %arg2[%c1, %c0_4] : memref<4x32xf32, #tpu.memory_space<smem>>
    %6 = vector.broadcast %5 : f32 to vector<1x128xf32>
    %7 = arith.mulf %6, %1 : vector<1x128xf32>
    %c2 = arith.constant 2 : index
    %c0_5 = arith.constant 0 : index
    %8 = memref.load %arg2[%c2, %c0_5] : memref<4x32xf32, #tpu.memory_space<smem>>
    %9 = vector.broadcast %8 : f32 to vector<1x128xf32>
    %10 = arith.mulf %9, %1 : vector<1x128xf32>
    %c3 = arith.constant 3 : index
    %c0_6 = arith.constant 0 : index
    %11 = memref.load %arg2[%c3, %c0_6] : memref<4x32xf32, #tpu.memory_space<smem>>
    %12 = vector.broadcast %11 : f32 to vector<1x128xf32>
    %13 = arith.mulf %12, %1 : vector<1x128xf32>
    %c1_7 = arith.constant 1 : index
    %c0_8 = arith.constant 0 : index
    %c0_9 = arith.constant 0 : index
    %14 = vector.load %arg1[%c1_7, %c0_8, %c0_9] : memref<32x1x128xf32, #tpu.memory_space<vmem>>, vector<1x1x128xf32>
    %15 = vector.shape_cast %14 : vector<1x1x128xf32> to vector<1x128xf32>
    %c0_10 = arith.constant 0 : index
    %c1_11 = arith.constant 1 : index
    %16 = memref.load %arg2[%c0_10, %c1_11] : memref<4x32xf32, #tpu.memory_space<smem>>
    %17 = vector.broadcast %16 : f32 to vector<1x128xf32>
    %18 = arith.mulf %17, %15 : vector<1x128xf32>
    %19 = arith.addf %4, %18 : vector<1x128xf32>
    %c1_12 = arith.constant 1 : index
    %c1_13 = arith.constant 1 : index
    %20 = memref.load %arg2[%c1_12, %c1_13] : memref<4x32xf32, #tpu.memory_space<smem>>
    %21 = vector.broadcast %20 : f32 to vector<1x128xf32>
    %22 = arith.mulf %21, %15 : vector<1x128xf32>
    %23 = arith.addf %7, %22 : vector<1x128xf32>
    %c2_14 = arith.constant 2 : index
    %c1_15 = arith.constant 1 : index
    %24 = memref.load %arg2[%c2_14, %c1_15] : memref<4x32xf32, #tpu.memory_space<smem>>
    %25 = vector.broadcast %24 : f32 to vector<1x128xf32>
    %26 = arith.mulf %25, %15 : vector<1x128xf32>
    %27 = arith.addf %10, %26 : vector<1x128xf32>
    %c3_16 = arith.constant 3 : index
    %c1_17 = arith.constant 1 : index
    %28 = memref.load %arg2[%c3_16, %c1_17] : memref<4x32xf32, #tpu.memory_space<smem>>
    %29 = vector.broadcast %28 : f32 to vector<1x128xf32>
    %30 = arith.mulf %29, %15 : vector<1x128xf32>
    %31 = arith.addf %13, %30 : vector<1x128xf32>
    %c2_18 = arith.constant 2 : index
    %c0_19 = arith.constant 0 : index
    %c0_20 = arith.constant 0 : index
    %32 = vector.load %arg1[%c2_18, %c0_19, %c0_20] : memref<32x1x128xf32, #tpu.memory_space<vmem>>, vector<1x1x128xf32>
    %33 = vector.shape_cast %32 : vector<1x1x128xf32> to vector<1x128xf32>
    %c0_21 = arith.constant 0 : index
    %c2_22 = arith.constant 2 : index
    %34 = memref.load %arg2[%c0_21, %c2_22] : memref<4x32xf32, #tpu.memory_space<smem>>
    %35 = vector.broadcast %34 : f32 to vector<1x128xf32>
    %36 = arith.mulf %35, %33 : vector<1x128xf32>
    %37 = arith.addf %19, %36 : vector<1x128xf32>
    %c1_23 = arith.constant 1 : index
    %c2_24 = arith.constant 2 : index
    %38 = memref.load %arg2[%c1_23, %c2_24] : memref<4x32xf32, #tpu.memory_space<smem>>
    %39 = vector.broadcast %38 : f32 to vector<1x128xf32>
    %40 = arith.mulf %39, %33 : vector<1x128xf32>
    %41 = arith.addf %23, %40 : vector<1x128xf32>
    %c2_25 = arith.constant 2 : index
    %c2_26 = arith.constant 2 : index
    %42 = memref.load %arg2[%c2_25, %c2_26] : memref<4x32xf32, #tpu.memory_space<smem>>
    %43 = vector.broadcast %42 : f32 to vector<1x128xf32>
    %44 = arith.mulf %43, %33 : vector<1x128xf32>
    %45 = arith.addf %27, %44 : vector<1x128xf32>
    %c3_27 = arith.constant 3 : index
    %c2_28 = arith.constant 2 : index
    %46 = memref.load %arg2[%c3_27, %c2_28] : memref<4x32xf32, #tpu.memory_space<smem>>
    %47 = vector.broadcast %46 : f32 to vector<1x128xf32>
    %48 = arith.mulf %47, %33 : vector<1x128xf32>
    %49 = arith.addf %31, %48 : vector<1x128xf32>
    %c3_29 = arith.constant 3 : index
    %c0_30 = arith.constant 0 : index
    %c0_31 = arith.constant 0 : index
    %50 = vector.load %arg1[%c3_29, %c0_30, %c0_31] : memref<32x1x128xf32, #tpu.memory_space<vmem>>, vector<1x1x128xf32>
    %51 = vector.shape_cast %50 : vector<1x1x128xf32> to vector<1x128xf32>
    %c0_32 = arith.constant 0 : index
    %c3_33 = arith.constant 3 : index
    %52 = memref.load %arg2[%c0_32, %c3_33] : memref<4x32xf32, #tpu.memory_space<smem>>
    %53 = vector.broadcast %52 : f32 to vector<1x128xf32>
    %54 = arith.mulf %53, %51 : vector<1x128xf32>
    %55 = arith.addf %37, %54 : vector<1x128xf32>
    %c1_34 = arith.constant 1 : index
    %c3_35 = arith.constant 3 : index
    %56 = memref.load %arg2[%c1_34, %c3_35] : memref<4x32xf32, #tpu.memory_space<smem>>
    %57 = vector.broadcast %56 : f32 to vector<1x128xf32>
    %58 = arith.mulf %57, %51 : vector<1x128xf32>
    %59 = arith.addf %41, %58 : vector<1x128xf32>
    %c2_36 = arith.constant 2 : index
    %c3_37 = arith.constant 3 : index
    %60 = memref.load %arg2[%c2_36, %c3_37] : memref<4x32xf32, #tpu.memory_space<smem>>
    %61 = vector.broadcast %60 : f32 to vector<1x128xf32>
    %62 = arith.mulf %61, %51 : vector<1x128xf32>
    %63 = arith.addf %45, %62 : vector<1x128xf32>
    %c3_38 = arith.constant 3 : index
    %c3_39 = arith.constant 3 : index
    %64 = memref.load %arg2[%c3_38, %c3_39] : memref<4x32xf32, #tpu.memory_space<smem>>
    %65 = vector.broadcast %64 : f32 to vector<1x128xf32>
    %66 = arith.mulf %65, %51 : vector<1x128xf32>
    %67 = arith.addf %49, %66 : vector<1x128xf32>
    %c4 = arith.constant 4 : index
    %c0_40 = arith.constant 0 : index
    %c0_41 = arith.constant 0 : index
    %68 = vector.load %arg1[%c4, %c0_40, %c0_41] : memref<32x1x128xf32, #tpu.memory_space<vmem>>, vector<1x1x128xf32>
    %69 = vector.shape_cast %68 : vector<1x1x128xf32> to vector<1x128xf32>
    %c0_42 = arith.constant 0 : index
    %c4_43 = arith.constant 4 : index
    %70 = memref.load %arg2[%c0_42, %c4_43] : memref<4x32xf32, #tpu.memory_space<smem>>
    %71 = vector.broadcast %70 : f32 to vector<1x128xf32>
    %72 = arith.mulf %71, %69 : vector<1x128xf32>
    %73 = arith.addf %55, %72 : vector<1x128xf32>
    %c1_44 = arith.constant 1 : index
    %c4_45 = arith.constant 4 : index
    %74 = memref.load %arg2[%c1_44, %c4_45] : memref<4x32xf32, #tpu.memory_space<smem>>
    %75 = vector.broadcast %74 : f32 to vector<1x128xf32>
    %76 = arith.mulf %75, %69 : vector<1x128xf32>
    %77 = arith.addf %59, %76 : vector<1x128xf32>
    %c2_46 = arith.constant 2 : index
    %c4_47 = arith.constant 4 : index
    %78 = memref.load %arg2[%c2_46, %c4_47] : memref<4x32xf32, #tpu.memory_space<smem>>
    %79 = vector.broadcast %78 : f32 to vector<1x128xf32>
    %80 = arith.mulf %79, %69 : vector<1x128xf32>
    %81 = arith.addf %63, %80 : vector<1x128xf32>
    %c3_48 = arith.constant 3 : index
    %c4_49 = arith.constant 4 : index
    %82 = memref.load %arg2[%c3_48, %c4_49] : memref<4x32xf32, #tpu.memory_space<smem>>
    %83 = vector.broadcast %82 : f32 to vector<1x128xf32>
    %84 = arith.mulf %83, %69 : vector<1x128xf32>
    %85 = arith.addf %67, %84 : vector<1x128xf32>
    %c5 = arith.constant 5 : index
    %c0_50 = arith.constant 0 : index
    %c0_51 = arith.constant 0 : index
    %86 = vector.load %arg1[%c5, %c0_50, %c0_51] : memref<32x1x128xf32, #tpu.memory_space<vmem>>, vector<1x1x128xf32>
    %87 = vector.shape_cast %86 : vector<1x1x128xf32> to vector<1x128xf32>
    %c0_52 = arith.constant 0 : index
    %c5_53 = arith.constant 5 : index
    %88 = memref.load %arg2[%c0_52, %c5_53] : memref<4x32xf32, #tpu.memory_space<smem>>
    %89 = vector.broadcast %88 : f32 to vector<1x128xf32>
    %90 = arith.mulf %89, %87 : vector<1x128xf32>
    %91 = arith.addf %73, %90 : vector<1x128xf32>
    %c1_54 = arith.constant 1 : index
    %c5_55 = arith.constant 5 : index
    %92 = memref.load %arg2[%c1_54, %c5_55] : memref<4x32xf32, #tpu.memory_space<smem>>
    %93 = vector.broadcast %92 : f32 to vector<1x128xf32>
    %94 = arith.mulf %93, %87 : vector<1x128xf32>
    %95 = arith.addf %77, %94 : vector<1x128xf32>
    %c2_56 = arith.constant 2 : index
    %c5_57 = arith.constant 5 : index
    %96 = memref.load %arg2[%c2_56, %c5_57] : memref<4x32xf32, #tpu.memory_space<smem>>
    %97 = vector.broadcast %96 : f32 to vector<1x128xf32>
    %98 = arith.mulf %97, %87 : vector<1x128xf32>
    %99 = arith.addf %81, %98 : vector<1x128xf32>
    %c3_58 = arith.constant 3 : index
    %c5_59 = arith.constant 5 : index
    %100 = memref.load %arg2[%c3_58, %c5_59] : memref<4x32xf32, #tpu.memory_space<smem>>
    %101 = vector.broadcast %100 : f32 to vector<1x128xf32>
    %102 = arith.mulf %101, %87 : vector<1x128xf32>
    %103 = arith.addf %85, %102 : vector<1x128xf32>
    %c6 = arith.constant 6 : index
    %c0_60 = arith.constant 0 : index
    %c0_61 = arith.constant 0 : index
    %104 = vector.load %arg1[%c6, %c0_60, %c0_61] : memref<32x1x128xf32, #tpu.memory_space<vmem>>, vector<1x1x128xf32>
    %105 = vector.shape_cast %104 : vector<1x1x128xf32> to vector<1x128xf32>
    %c0_62 = arith.constant 0 : index
    %c6_63 = arith.constant 6 : index
    %106 = memref.load %arg2[%c0_62, %c6_63] : memref<4x32xf32, #tpu.memory_space<smem>>
    %107 = vector.broadcast %106 : f32 to vector<1x128xf32>
    %108 = arith.mulf %107, %105 : vector<1x128xf32>
    %109 = arith.addf %91, %108 : vector<1x128xf32>
    %c1_64 = arith.constant 1 : index
    %c6_65 = arith.constant 6 : index
    %110 = memref.load %arg2[%c1_64, %c6_65] : memref<4x32xf32, #tpu.memory_space<smem>>
    %111 = vector.broadcast %110 : f32 to vector<1x128xf32>
    %112 = arith.mulf %111, %105 : vector<1x128xf32>
    %113 = arith.addf %95, %112 : vector<1x128xf32>
    %c2_66 = arith.constant 2 : index
    %c6_67 = arith.constant 6 : index
    %114 = memref.load %arg2[%c2_66, %c6_67] : memref<4x32xf32, #tpu.memory_space<smem>>
    %115 = vector.broadcast %114 : f32 to vector<1x128xf32>
    %116 = arith.mulf %115, %105 : vector<1x128xf32>
    %117 = arith.addf %99, %116 : vector<1x128xf32>
    %c3_68 = arith.constant 3 : index
    %c6_69 = arith.constant 6 : index
    %118 = memref.load %arg2[%c3_68, %c6_69] : memref<4x32xf32, #tpu.memory_space<smem>>
    %119 = vector.broadcast %118 : f32 to vector<1x128xf32>
    %120 = arith.mulf %119, %105 : vector<1x128xf32>
    %121 = arith.addf %103, %120 : vector<1x128xf32>
    %c7 = arith.constant 7 : index
    %c0_70 = arith.constant 0 : index
    %c0_71 = arith.constant 0 : index
    %122 = vector.load %arg1[%c7, %c0_70, %c0_71] : memref<32x1x128xf32, #tpu.memory_space<vmem>>, vector<1x1x128xf32>
    %123 = vector.shape_cast %122 : vector<1x1x128xf32> to vector<1x128xf32>
    %c0_72 = arith.constant 0 : index
    %c7_73 = arith.constant 7 : index
    %124 = memref.load %arg2[%c0_72, %c7_73] : memref<4x32xf32, #tpu.memory_space<smem>>
    %125 = vector.broadcast %124 : f32 to vector<1x128xf32>
    %126 = arith.mulf %125, %123 : vector<1x128xf32>
    %127 = arith.addf %109, %126 : vector<1x128xf32>
    %c1_74 = arith.constant 1 : index
    %c7_75 = arith.constant 7 : index
    %128 = memref.load %arg2[%c1_74, %c7_75] : memref<4x32xf32, #tpu.memory_space<smem>>
    %129 = vector.broadcast %128 : f32 to vector<1x128xf32>
    %130 = arith.mulf %129, %123 : vector<1x128xf32>
    %131 = arith.addf %113, %130 : vector<1x128xf32>
    %c2_76 = arith.constant 2 : index
    %c7_77 = arith.constant 7 : index
    %132 = memref.load %arg2[%c2_76, %c7_77] : memref<4x32xf32, #tpu.memory_space<smem>>
    %133 = vector.broadcast %132 : f32 to vector<1x128xf32>
    %134 = arith.mulf %133, %123 : vector<1x128xf32>
    %135 = arith.addf %117, %134 : vector<1x128xf32>
    %c3_78 = arith.constant 3 : index
    %c7_79 = arith.constant 7 : index
    %136 = memref.load %arg2[%c3_78, %c7_79] : memref<4x32xf32, #tpu.memory_space<smem>>
    %137 = vector.broadcast %136 : f32 to vector<1x128xf32>
    %138 = arith.mulf %137, %123 : vector<1x128xf32>
    %139 = arith.addf %121, %138 : vector<1x128xf32>
    %c8 = arith.constant 8 : index
    %c0_80 = arith.constant 0 : index
    %c0_81 = arith.constant 0 : index
    %140 = vector.load %arg1[%c8, %c0_80, %c0_81] : memref<32x1x128xf32, #tpu.memory_space<vmem>>, vector<1x1x128xf32>
    %141 = vector.shape_cast %140 : vector<1x1x128xf32> to vector<1x128xf32>
    %c0_82 = arith.constant 0 : index
    %c8_83 = arith.constant 8 : index
    %142 = memref.load %arg2[%c0_82, %c8_83] : memref<4x32xf32, #tpu.memory_space<smem>>
    %143 = vector.broadcast %142 : f32 to vector<1x128xf32>
    %144 = arith.mulf %143, %141 : vector<1x128xf32>
    %145 = arith.addf %127, %144 : vector<1x128xf32>
    %c1_84 = arith.constant 1 : index
    %c8_85 = arith.constant 8 : index
    %146 = memref.load %arg2[%c1_84, %c8_85] : memref<4x32xf32, #tpu.memory_space<smem>>
    %147 = vector.broadcast %146 : f32 to vector<1x128xf32>
    %148 = arith.mulf %147, %141 : vector<1x128xf32>
    %149 = arith.addf %131, %148 : vector<1x128xf32>
    %c2_86 = arith.constant 2 : index
    %c8_87 = arith.constant 8 : index
    %150 = memref.load %arg2[%c2_86, %c8_87] : memref<4x32xf32, #tpu.memory_space<smem>>
    %151 = vector.broadcast %150 : f32 to vector<1x128xf32>
    %152 = arith.mulf %151, %141 : vector<1x128xf32>
    %153 = arith.addf %135, %152 : vector<1x128xf32>
    %c3_88 = arith.constant 3 : index
    %c8_89 = arith.constant 8 : index
    %154 = memref.load %arg2[%c3_88, %c8_89] : memref<4x32xf32, #tpu.memory_space<smem>>
    %155 = vector.broadcast %154 : f32 to vector<1x128xf32>
    %156 = arith.mulf %155, %141 : vector<1x128xf32>
    %157 = arith.addf %139, %156 : vector<1x128xf32>
    %c9 = arith.constant 9 : index
    %c0_90 = arith.constant 0 : index
    %c0_91 = arith.constant 0 : index
    %158 = vector.load %arg1[%c9, %c0_90, %c0_91] : memref<32x1x128xf32, #tpu.memory_space<vmem>>, vector<1x1x128xf32>
    %159 = vector.shape_cast %158 : vector<1x1x128xf32> to vector<1x128xf32>
    %c0_92 = arith.constant 0 : index
    %c9_93 = arith.constant 9 : index
    %160 = memref.load %arg2[%c0_92, %c9_93] : memref<4x32xf32, #tpu.memory_space<smem>>
    %161 = vector.broadcast %160 : f32 to vector<1x128xf32>
    %162 = arith.mulf %161, %159 : vector<1x128xf32>
    %163 = arith.addf %145, %162 : vector<1x128xf32>
    %c1_94 = arith.constant 1 : index
    %c9_95 = arith.constant 9 : index
    %164 = memref.load %arg2[%c1_94, %c9_95] : memref<4x32xf32, #tpu.memory_space<smem>>
    %165 = vector.broadcast %164 : f32 to vector<1x128xf32>
    %166 = arith.mulf %165, %159 : vector<1x128xf32>
    %167 = arith.addf %149, %166 : vector<1x128xf32>
    %c2_96 = arith.constant 2 : index
    %c9_97 = arith.constant 9 : index
    %168 = memref.load %arg2[%c2_96, %c9_97] : memref<4x32xf32, #tpu.memory_space<smem>>
    %169 = vector.broadcast %168 : f32 to vector<1x128xf32>
    %170 = arith.mulf %169, %159 : vector<1x128xf32>
    %171 = arith.addf %153, %170 : vector<1x128xf32>
    %c3_98 = arith.constant 3 : index
    %c9_99 = arith.constant 9 : index
    %172 = memref.load %arg2[%c3_98, %c9_99] : memref<4x32xf32, #tpu.memory_space<smem>>
    %173 = vector.broadcast %172 : f32 to vector<1x128xf32>
    %174 = arith.mulf %173, %159 : vector<1x128xf32>
    %175 = arith.addf %157, %174 : vector<1x128xf32>
    %c10 = arith.constant 10 : index
    %c0_100 = arith.constant 0 : index
    %c0_101 = arith.constant 0 : index
    %176 = vector.load %arg1[%c10, %c0_100, %c0_101] : memref<32x1x128xf32, #tpu.memory_space<vmem>>, vector<1x1x128xf32>
    %177 = vector.shape_cast %176 : vector<1x1x128xf32> to vector<1x128xf32>
    %c0_102 = arith.constant 0 : index
    %c10_103 = arith.constant 10 : index
    %178 = memref.load %arg2[%c0_102, %c10_103] : memref<4x32xf32, #tpu.memory_space<smem>>
    %179 = vector.broadcast %178 : f32 to vector<1x128xf32>
    %180 = arith.mulf %179, %177 : vector<1x128xf32>
    %181 = arith.addf %163, %180 : vector<1x128xf32>
    %c1_104 = arith.constant 1 : index
    %c10_105 = arith.constant 10 : index
    %182 = memref.load %arg2[%c1_104, %c10_105] : memref<4x32xf32, #tpu.memory_space<smem>>
    %183 = vector.broadcast %182 : f32 to vector<1x128xf32>
    %184 = arith.mulf %183, %177 : vector<1x128xf32>
    %185 = arith.addf %167, %184 : vector<1x128xf32>
    %c2_106 = arith.constant 2 : index
    %c10_107 = arith.constant 10 : index
    %186 = memref.load %arg2[%c2_106, %c10_107] : memref<4x32xf32, #tpu.memory_space<smem>>
    %187 = vector.broadcast %186 : f32 to vector<1x128xf32>
    %188 = arith.mulf %187, %177 : vector<1x128xf32>
    %189 = arith.addf %171, %188 : vector<1x128xf32>
    %c3_108 = arith.constant 3 : index
    %c10_109 = arith.constant 10 : index
    %190 = memref.load %arg2[%c3_108, %c10_109] : memref<4x32xf32, #tpu.memory_space<smem>>
    %191 = vector.broadcast %190 : f32 to vector<1x128xf32>
    %192 = arith.mulf %191, %177 : vector<1x128xf32>
    %193 = arith.addf %175, %192 : vector<1x128xf32>
    %c11 = arith.constant 11 : index
    %c0_110 = arith.constant 0 : index
    %c0_111 = arith.constant 0 : index
    %194 = vector.load %arg1[%c11, %c0_110, %c0_111] : memref<32x1x128xf32, #tpu.memory_space<vmem>>, vector<1x1x128xf32>
    %195 = vector.shape_cast %194 : vector<1x1x128xf32> to vector<1x128xf32>
    %c0_112 = arith.constant 0 : index
    %c11_113 = arith.constant 11 : index
    %196 = memref.load %arg2[%c0_112, %c11_113] : memref<4x32xf32, #tpu.memory_space<smem>>
    %197 = vector.broadcast %196 : f32 to vector<1x128xf32>
    %198 = arith.mulf %197, %195 : vector<1x128xf32>
    %199 = arith.addf %181, %198 : vector<1x128xf32>
    %c1_114 = arith.constant 1 : index
    %c11_115 = arith.constant 11 : index
    %200 = memref.load %arg2[%c1_114, %c11_115] : memref<4x32xf32, #tpu.memory_space<smem>>
    %201 = vector.broadcast %200 : f32 to vector<1x128xf32>
    %202 = arith.mulf %201, %195 : vector<1x128xf32>
    %203 = arith.addf %185, %202 : vector<1x128xf32>
    %c2_116 = arith.constant 2 : index
    %c11_117 = arith.constant 11 : index
    %204 = memref.load %arg2[%c2_116, %c11_117] : memref<4x32xf32, #tpu.memory_space<smem>>
    %205 = vector.broadcast %204 : f32 to vector<1x128xf32>
    %206 = arith.mulf %205, %195 : vector<1x128xf32>
    %207 = arith.addf %189, %206 : vector<1x128xf32>
    %c3_118 = arith.constant 3 : index
    %c11_119 = arith.constant 11 : index
    %208 = memref.load %arg2[%c3_118, %c11_119] : memref<4x32xf32, #tpu.memory_space<smem>>
    %209 = vector.broadcast %208 : f32 to vector<1x128xf32>
    %210 = arith.mulf %209, %195 : vector<1x128xf32>
    %211 = arith.addf %193, %210 : vector<1x128xf32>
    %c12 = arith.constant 12 : index
    %c0_120 = arith.constant 0 : index
    %c0_121 = arith.constant 0 : index
    %212 = vector.load %arg1[%c12, %c0_120, %c0_121] : memref<32x1x128xf32, #tpu.memory_space<vmem>>, vector<1x1x128xf32>
    %213 = vector.shape_cast %212 : vector<1x1x128xf32> to vector<1x128xf32>
    %c0_122 = arith.constant 0 : index
    %c12_123 = arith.constant 12 : index
    %214 = memref.load %arg2[%c0_122, %c12_123] : memref<4x32xf32, #tpu.memory_space<smem>>
    %215 = vector.broadcast %214 : f32 to vector<1x128xf32>
    %216 = arith.mulf %215, %213 : vector<1x128xf32>
    %217 = arith.addf %199, %216 : vector<1x128xf32>
    %c1_124 = arith.constant 1 : index
    %c12_125 = arith.constant 12 : index
    %218 = memref.load %arg2[%c1_124, %c12_125] : memref<4x32xf32, #tpu.memory_space<smem>>
    %219 = vector.broadcast %218 : f32 to vector<1x128xf32>
    %220 = arith.mulf %219, %213 : vector<1x128xf32>
    %221 = arith.addf %203, %220 : vector<1x128xf32>
    %c2_126 = arith.constant 2 : index
    %c12_127 = arith.constant 12 : index
    %222 = memref.load %arg2[%c2_126, %c12_127] : memref<4x32xf32, #tpu.memory_space<smem>>
    %223 = vector.broadcast %222 : f32 to vector<1x128xf32>
    %224 = arith.mulf %223, %213 : vector<1x128xf32>
    %225 = arith.addf %207, %224 : vector<1x128xf32>
    %c3_128 = arith.constant 3 : index
    %c12_129 = arith.constant 12 : index
    %226 = memref.load %arg2[%c3_128, %c12_129] : memref<4x32xf32, #tpu.memory_space<smem>>
    %227 = vector.broadcast %226 : f32 to vector<1x128xf32>
    %228 = arith.mulf %227, %213 : vector<1x128xf32>
    %229 = arith.addf %211, %228 : vector<1x128xf32>
    %c13 = arith.constant 13 : index
    %c0_130 = arith.constant 0 : index
    %c0_131 = arith.constant 0 : index
    %230 = vector.load %arg1[%c13, %c0_130, %c0_131] : memref<32x1x128xf32, #tpu.memory_space<vmem>>, vector<1x1x128xf32>
    %231 = vector.shape_cast %230 : vector<1x1x128xf32> to vector<1x128xf32>
    %c0_132 = arith.constant 0 : index
    %c13_133 = arith.constant 13 : index
    %232 = memref.load %arg2[%c0_132, %c13_133] : memref<4x32xf32, #tpu.memory_space<smem>>
    %233 = vector.broadcast %232 : f32 to vector<1x128xf32>
    %234 = arith.mulf %233, %231 : vector<1x128xf32>
    %235 = arith.addf %217, %234 : vector<1x128xf32>
    %c1_134 = arith.constant 1 : index
    %c13_135 = arith.constant 13 : index
    %236 = memref.load %arg2[%c1_134, %c13_135] : memref<4x32xf32, #tpu.memory_space<smem>>
    %237 = vector.broadcast %236 : f32 to vector<1x128xf32>
    %238 = arith.mulf %237, %231 : vector<1x128xf32>
    %239 = arith.addf %221, %238 : vector<1x128xf32>
    %c2_136 = arith.constant 2 : index
    %c13_137 = arith.constant 13 : index
    %240 = memref.load %arg2[%c2_136, %c13_137] : memref<4x32xf32, #tpu.memory_space<smem>>
    %241 = vector.broadcast %240 : f32 to vector<1x128xf32>
    %242 = arith.mulf %241, %231 : vector<1x128xf32>
    %243 = arith.addf %225, %242 : vector<1x128xf32>
    %c3_138 = arith.constant 3 : index
    %c13_139 = arith.constant 13 : index
    %244 = memref.load %arg2[%c3_138, %c13_139] : memref<4x32xf32, #tpu.memory_space<smem>>
    %245 = vector.broadcast %244 : f32 to vector<1x128xf32>
    %246 = arith.mulf %245, %231 : vector<1x128xf32>
    %247 = arith.addf %229, %246 : vector<1x128xf32>
    %c14 = arith.constant 14 : index
    %c0_140 = arith.constant 0 : index
    %c0_141 = arith.constant 0 : index
    %248 = vector.load %arg1[%c14, %c0_140, %c0_141] : memref<32x1x128xf32, #tpu.memory_space<vmem>>, vector<1x1x128xf32>
    %249 = vector.shape_cast %248 : vector<1x1x128xf32> to vector<1x128xf32>
    %c0_142 = arith.constant 0 : index
    %c14_143 = arith.constant 14 : index
    %250 = memref.load %arg2[%c0_142, %c14_143] : memref<4x32xf32, #tpu.memory_space<smem>>
    %251 = vector.broadcast %250 : f32 to vector<1x128xf32>
    %252 = arith.mulf %251, %249 : vector<1x128xf32>
    %253 = arith.addf %235, %252 : vector<1x128xf32>
    %c1_144 = arith.constant 1 : index
    %c14_145 = arith.constant 14 : index
    %254 = memref.load %arg2[%c1_144, %c14_145] : memref<4x32xf32, #tpu.memory_space<smem>>
    %255 = vector.broadcast %254 : f32 to vector<1x128xf32>
    %256 = arith.mulf %255, %249 : vector<1x128xf32>
    %257 = arith.addf %239, %256 : vector<1x128xf32>
    %c2_146 = arith.constant 2 : index
    %c14_147 = arith.constant 14 : index
    %258 = memref.load %arg2[%c2_146, %c14_147] : memref<4x32xf32, #tpu.memory_space<smem>>
    %259 = vector.broadcast %258 : f32 to vector<1x128xf32>
    %260 = arith.mulf %259, %249 : vector<1x128xf32>
    %261 = arith.addf %243, %260 : vector<1x128xf32>
    %c3_148 = arith.constant 3 : index
    %c14_149 = arith.constant 14 : index
    %262 = memref.load %arg2[%c3_148, %c14_149] : memref<4x32xf32, #tpu.memory_space<smem>>
    %263 = vector.broadcast %262 : f32 to vector<1x128xf32>
    %264 = arith.mulf %263, %249 : vector<1x128xf32>
    %265 = arith.addf %247, %264 : vector<1x128xf32>
    %c15 = arith.constant 15 : index
    %c0_150 = arith.constant 0 : index
    %c0_151 = arith.constant 0 : index
    %266 = vector.load %arg1[%c15, %c0_150, %c0_151] : memref<32x1x128xf32, #tpu.memory_space<vmem>>, vector<1x1x128xf32>
    %267 = vector.shape_cast %266 : vector<1x1x128xf32> to vector<1x128xf32>
    %c0_152 = arith.constant 0 : index
    %c15_153 = arith.constant 15 : index
    %268 = memref.load %arg2[%c0_152, %c15_153] : memref<4x32xf32, #tpu.memory_space<smem>>
    %269 = vector.broadcast %268 : f32 to vector<1x128xf32>
    %270 = arith.mulf %269, %267 : vector<1x128xf32>
    %271 = arith.addf %253, %270 : vector<1x128xf32>
    %c1_154 = arith.constant 1 : index
    %c15_155 = arith.constant 15 : index
    %272 = memref.load %arg2[%c1_154, %c15_155] : memref<4x32xf32, #tpu.memory_space<smem>>
    %273 = vector.broadcast %272 : f32 to vector<1x128xf32>
    %274 = arith.mulf %273, %267 : vector<1x128xf32>
    %275 = arith.addf %257, %274 : vector<1x128xf32>
    %c2_156 = arith.constant 2 : index
    %c15_157 = arith.constant 15 : index
    %276 = memref.load %arg2[%c2_156, %c15_157] : memref<4x32xf32, #tpu.memory_space<smem>>
    %277 = vector.broadcast %276 : f32 to vector<1x128xf32>
    %278 = arith.mulf %277, %267 : vector<1x128xf32>
    %279 = arith.addf %261, %278 : vector<1x128xf32>
    %c3_158 = arith.constant 3 : index
    %c15_159 = arith.constant 15 : index
    %280 = memref.load %arg2[%c3_158, %c15_159] : memref<4x32xf32, #tpu.memory_space<smem>>
    %281 = vector.broadcast %280 : f32 to vector<1x128xf32>
    %282 = arith.mulf %281, %267 : vector<1x128xf32>
    %283 = arith.addf %265, %282 : vector<1x128xf32>
    %c16 = arith.constant 16 : index
    %c0_160 = arith.constant 0 : index
    %c0_161 = arith.constant 0 : index
    %284 = vector.load %arg1[%c16, %c0_160, %c0_161] : memref<32x1x128xf32, #tpu.memory_space<vmem>>, vector<1x1x128xf32>
    %285 = vector.shape_cast %284 : vector<1x1x128xf32> to vector<1x128xf32>
    %c0_162 = arith.constant 0 : index
    %c16_163 = arith.constant 16 : index
    %286 = memref.load %arg2[%c0_162, %c16_163] : memref<4x32xf32, #tpu.memory_space<smem>>
    %287 = vector.broadcast %286 : f32 to vector<1x128xf32>
    %288 = arith.mulf %287, %285 : vector<1x128xf32>
    %289 = arith.addf %271, %288 : vector<1x128xf32>
    %c1_164 = arith.constant 1 : index
    %c16_165 = arith.constant 16 : index
    %290 = memref.load %arg2[%c1_164, %c16_165] : memref<4x32xf32, #tpu.memory_space<smem>>
    %291 = vector.broadcast %290 : f32 to vector<1x128xf32>
    %292 = arith.mulf %291, %285 : vector<1x128xf32>
    %293 = arith.addf %275, %292 : vector<1x128xf32>
    %c2_166 = arith.constant 2 : index
    %c16_167 = arith.constant 16 : index
    %294 = memref.load %arg2[%c2_166, %c16_167] : memref<4x32xf32, #tpu.memory_space<smem>>
    %295 = vector.broadcast %294 : f32 to vector<1x128xf32>
    %296 = arith.mulf %295, %285 : vector<1x128xf32>
    %297 = arith.addf %279, %296 : vector<1x128xf32>
    %c3_168 = arith.constant 3 : index
    %c16_169 = arith.constant 16 : index
    %298 = memref.load %arg2[%c3_168, %c16_169] : memref<4x32xf32, #tpu.memory_space<smem>>
    %299 = vector.broadcast %298 : f32 to vector<1x128xf32>
    %300 = arith.mulf %299, %285 : vector<1x128xf32>
    %301 = arith.addf %283, %300 : vector<1x128xf32>
    %c17 = arith.constant 17 : index
    %c0_170 = arith.constant 0 : index
    %c0_171 = arith.constant 0 : index
    %302 = vector.load %arg1[%c17, %c0_170, %c0_171] : memref<32x1x128xf32, #tpu.memory_space<vmem>>, vector<1x1x128xf32>
    %303 = vector.shape_cast %302 : vector<1x1x128xf32> to vector<1x128xf32>
    %c0_172 = arith.constant 0 : index
    %c17_173 = arith.constant 17 : index
    %304 = memref.load %arg2[%c0_172, %c17_173] : memref<4x32xf32, #tpu.memory_space<smem>>
    %305 = vector.broadcast %304 : f32 to vector<1x128xf32>
    %306 = arith.mulf %305, %303 : vector<1x128xf32>
    %307 = arith.addf %289, %306 : vector<1x128xf32>
    %c1_174 = arith.constant 1 : index
    %c17_175 = arith.constant 17 : index
    %308 = memref.load %arg2[%c1_174, %c17_175] : memref<4x32xf32, #tpu.memory_space<smem>>
    %309 = vector.broadcast %308 : f32 to vector<1x128xf32>
    %310 = arith.mulf %309, %303 : vector<1x128xf32>
    %311 = arith.addf %293, %310 : vector<1x128xf32>
    %c2_176 = arith.constant 2 : index
    %c17_177 = arith.constant 17 : index
    %312 = memref.load %arg2[%c2_176, %c17_177] : memref<4x32xf32, #tpu.memory_space<smem>>
    %313 = vector.broadcast %312 : f32 to vector<1x128xf32>
    %314 = arith.mulf %313, %303 : vector<1x128xf32>
    %315 = arith.addf %297, %314 : vector<1x128xf32>
    %c3_178 = arith.constant 3 : index
    %c17_179 = arith.constant 17 : index
    %316 = memref.load %arg2[%c3_178, %c17_179] : memref<4x32xf32, #tpu.memory_space<smem>>
    %317 = vector.broadcast %316 : f32 to vector<1x128xf32>
    %318 = arith.mulf %317, %303 : vector<1x128xf32>
    %319 = arith.addf %301, %318 : vector<1x128xf32>
    %c18 = arith.constant 18 : index
    %c0_180 = arith.constant 0 : index
    %c0_181 = arith.constant 0 : index
    %320 = vector.load %arg1[%c18, %c0_180, %c0_181] : memref<32x1x128xf32, #tpu.memory_space<vmem>>, vector<1x1x128xf32>
    %321 = vector.shape_cast %320 : vector<1x1x128xf32> to vector<1x128xf32>
    %c0_182 = arith.constant 0 : index
    %c18_183 = arith.constant 18 : index
    %322 = memref.load %arg2[%c0_182, %c18_183] : memref<4x32xf32, #tpu.memory_space<smem>>
    %323 = vector.broadcast %322 : f32 to vector<1x128xf32>
    %324 = arith.mulf %323, %321 : vector<1x128xf32>
    %325 = arith.addf %307, %324 : vector<1x128xf32>
    %c1_184 = arith.constant 1 : index
    %c18_185 = arith.constant 18 : index
    %326 = memref.load %arg2[%c1_184, %c18_185] : memref<4x32xf32, #tpu.memory_space<smem>>
    %327 = vector.broadcast %326 : f32 to vector<1x128xf32>
    %328 = arith.mulf %327, %321 : vector<1x128xf32>
    %329 = arith.addf %311, %328 : vector<1x128xf32>
    %c2_186 = arith.constant 2 : index
    %c18_187 = arith.constant 18 : index
    %330 = memref.load %arg2[%c2_186, %c18_187] : memref<4x32xf32, #tpu.memory_space<smem>>
    %331 = vector.broadcast %330 : f32 to vector<1x128xf32>
    %332 = arith.mulf %331, %321 : vector<1x128xf32>
    %333 = arith.addf %315, %332 : vector<1x128xf32>
    %c3_188 = arith.constant 3 : index
    %c18_189 = arith.constant 18 : index
    %334 = memref.load %arg2[%c3_188, %c18_189] : memref<4x32xf32, #tpu.memory_space<smem>>
    %335 = vector.broadcast %334 : f32 to vector<1x128xf32>
    %336 = arith.mulf %335, %321 : vector<1x128xf32>
    %337 = arith.addf %319, %336 : vector<1x128xf32>
    %c19 = arith.constant 19 : index
    %c0_190 = arith.constant 0 : index
    %c0_191 = arith.constant 0 : index
    %338 = vector.load %arg1[%c19, %c0_190, %c0_191] : memref<32x1x128xf32, #tpu.memory_space<vmem>>, vector<1x1x128xf32>
    %339 = vector.shape_cast %338 : vector<1x1x128xf32> to vector<1x128xf32>
    %c0_192 = arith.constant 0 : index
    %c19_193 = arith.constant 19 : index
    %340 = memref.load %arg2[%c0_192, %c19_193] : memref<4x32xf32, #tpu.memory_space<smem>>
    %341 = vector.broadcast %340 : f32 to vector<1x128xf32>
    %342 = arith.mulf %341, %339 : vector<1x128xf32>
    %343 = arith.addf %325, %342 : vector<1x128xf32>
    %c1_194 = arith.constant 1 : index
    %c19_195 = arith.constant 19 : index
    %344 = memref.load %arg2[%c1_194, %c19_195] : memref<4x32xf32, #tpu.memory_space<smem>>
    %345 = vector.broadcast %344 : f32 to vector<1x128xf32>
    %346 = arith.mulf %345, %339 : vector<1x128xf32>
    %347 = arith.addf %329, %346 : vector<1x128xf32>
    %c2_196 = arith.constant 2 : index
    %c19_197 = arith.constant 19 : index
    %348 = memref.load %arg2[%c2_196, %c19_197] : memref<4x32xf32, #tpu.memory_space<smem>>
    %349 = vector.broadcast %348 : f32 to vector<1x128xf32>
    %350 = arith.mulf %349, %339 : vector<1x128xf32>
    %351 = arith.addf %333, %350 : vector<1x128xf32>
    %c3_198 = arith.constant 3 : index
    %c19_199 = arith.constant 19 : index
    %352 = memref.load %arg2[%c3_198, %c19_199] : memref<4x32xf32, #tpu.memory_space<smem>>
    %353 = vector.broadcast %352 : f32 to vector<1x128xf32>
    %354 = arith.mulf %353, %339 : vector<1x128xf32>
    %355 = arith.addf %337, %354 : vector<1x128xf32>
    %c20 = arith.constant 20 : index
    %c0_200 = arith.constant 0 : index
    %c0_201 = arith.constant 0 : index
    %356 = vector.load %arg1[%c20, %c0_200, %c0_201] : memref<32x1x128xf32, #tpu.memory_space<vmem>>, vector<1x1x128xf32>
    %357 = vector.shape_cast %356 : vector<1x1x128xf32> to vector<1x128xf32>
    %c0_202 = arith.constant 0 : index
    %c20_203 = arith.constant 20 : index
    %358 = memref.load %arg2[%c0_202, %c20_203] : memref<4x32xf32, #tpu.memory_space<smem>>
    %359 = vector.broadcast %358 : f32 to vector<1x128xf32>
    %360 = arith.mulf %359, %357 : vector<1x128xf32>
    %361 = arith.addf %343, %360 : vector<1x128xf32>
    %c1_204 = arith.constant 1 : index
    %c20_205 = arith.constant 20 : index
    %362 = memref.load %arg2[%c1_204, %c20_205] : memref<4x32xf32, #tpu.memory_space<smem>>
    %363 = vector.broadcast %362 : f32 to vector<1x128xf32>
    %364 = arith.mulf %363, %357 : vector<1x128xf32>
    %365 = arith.addf %347, %364 : vector<1x128xf32>
    %c2_206 = arith.constant 2 : index
    %c20_207 = arith.constant 20 : index
    %366 = memref.load %arg2[%c2_206, %c20_207] : memref<4x32xf32, #tpu.memory_space<smem>>
    %367 = vector.broadcast %366 : f32 to vector<1x128xf32>
    %368 = arith.mulf %367, %357 : vector<1x128xf32>
    %369 = arith.addf %351, %368 : vector<1x128xf32>
    %c3_208 = arith.constant 3 : index
    %c20_209 = arith.constant 20 : index
    %370 = memref.load %arg2[%c3_208, %c20_209] : memref<4x32xf32, #tpu.memory_space<smem>>
    %371 = vector.broadcast %370 : f32 to vector<1x128xf32>
    %372 = arith.mulf %371, %357 : vector<1x128xf32>
    %373 = arith.addf %355, %372 : vector<1x128xf32>
    %c21 = arith.constant 21 : index
    %c0_210 = arith.constant 0 : index
    %c0_211 = arith.constant 0 : index
    %374 = vector.load %arg1[%c21, %c0_210, %c0_211] : memref<32x1x128xf32, #tpu.memory_space<vmem>>, vector<1x1x128xf32>
    %375 = vector.shape_cast %374 : vector<1x1x128xf32> to vector<1x128xf32>
    %c0_212 = arith.constant 0 : index
    %c21_213 = arith.constant 21 : index
    %376 = memref.load %arg2[%c0_212, %c21_213] : memref<4x32xf32, #tpu.memory_space<smem>>
    %377 = vector.broadcast %376 : f32 to vector<1x128xf32>
    %378 = arith.mulf %377, %375 : vector<1x128xf32>
    %379 = arith.addf %361, %378 : vector<1x128xf32>
    %c1_214 = arith.constant 1 : index
    %c21_215 = arith.constant 21 : index
    %380 = memref.load %arg2[%c1_214, %c21_215] : memref<4x32xf32, #tpu.memory_space<smem>>
    %381 = vector.broadcast %380 : f32 to vector<1x128xf32>
    %382 = arith.mulf %381, %375 : vector<1x128xf32>
    %383 = arith.addf %365, %382 : vector<1x128xf32>
    %c2_216 = arith.constant 2 : index
    %c21_217 = arith.constant 21 : index
    %384 = memref.load %arg2[%c2_216, %c21_217] : memref<4x32xf32, #tpu.memory_space<smem>>
    %385 = vector.broadcast %384 : f32 to vector<1x128xf32>
    %386 = arith.mulf %385, %375 : vector<1x128xf32>
    %387 = arith.addf %369, %386 : vector<1x128xf32>
    %c3_218 = arith.constant 3 : index
    %c21_219 = arith.constant 21 : index
    %388 = memref.load %arg2[%c3_218, %c21_219] : memref<4x32xf32, #tpu.memory_space<smem>>
    %389 = vector.broadcast %388 : f32 to vector<1x128xf32>
    %390 = arith.mulf %389, %375 : vector<1x128xf32>
    %391 = arith.addf %373, %390 : vector<1x128xf32>
    %c22 = arith.constant 22 : index
    %c0_220 = arith.constant 0 : index
    %c0_221 = arith.constant 0 : index
    %392 = vector.load %arg1[%c22, %c0_220, %c0_221] : memref<32x1x128xf32, #tpu.memory_space<vmem>>, vector<1x1x128xf32>
    %393 = vector.shape_cast %392 : vector<1x1x128xf32> to vector<1x128xf32>
    %c0_222 = arith.constant 0 : index
    %c22_223 = arith.constant 22 : index
    %394 = memref.load %arg2[%c0_222, %c22_223] : memref<4x32xf32, #tpu.memory_space<smem>>
    %395 = vector.broadcast %394 : f32 to vector<1x128xf32>
    %396 = arith.mulf %395, %393 : vector<1x128xf32>
    %397 = arith.addf %379, %396 : vector<1x128xf32>
    %c1_224 = arith.constant 1 : index
    %c22_225 = arith.constant 22 : index
    %398 = memref.load %arg2[%c1_224, %c22_225] : memref<4x32xf32, #tpu.memory_space<smem>>
    %399 = vector.broadcast %398 : f32 to vector<1x128xf32>
    %400 = arith.mulf %399, %393 : vector<1x128xf32>
    %401 = arith.addf %383, %400 : vector<1x128xf32>
    %c2_226 = arith.constant 2 : index
    %c22_227 = arith.constant 22 : index
    %402 = memref.load %arg2[%c2_226, %c22_227] : memref<4x32xf32, #tpu.memory_space<smem>>
    %403 = vector.broadcast %402 : f32 to vector<1x128xf32>
    %404 = arith.mulf %403, %393 : vector<1x128xf32>
    %405 = arith.addf %387, %404 : vector<1x128xf32>
    %c3_228 = arith.constant 3 : index
    %c22_229 = arith.constant 22 : index
    %406 = memref.load %arg2[%c3_228, %c22_229] : memref<4x32xf32, #tpu.memory_space<smem>>
    %407 = vector.broadcast %406 : f32 to vector<1x128xf32>
    %408 = arith.mulf %407, %393 : vector<1x128xf32>
    %409 = arith.addf %391, %408 : vector<1x128xf32>
    %c23 = arith.constant 23 : index
    %c0_230 = arith.constant 0 : index
    %c0_231 = arith.constant 0 : index
    %410 = vector.load %arg1[%c23, %c0_230, %c0_231] : memref<32x1x128xf32, #tpu.memory_space<vmem>>, vector<1x1x128xf32>
    %411 = vector.shape_cast %410 : vector<1x1x128xf32> to vector<1x128xf32>
    %c0_232 = arith.constant 0 : index
    %c23_233 = arith.constant 23 : index
    %412 = memref.load %arg2[%c0_232, %c23_233] : memref<4x32xf32, #tpu.memory_space<smem>>
    %413 = vector.broadcast %412 : f32 to vector<1x128xf32>
    %414 = arith.mulf %413, %411 : vector<1x128xf32>
    %415 = arith.addf %397, %414 : vector<1x128xf32>
    %c1_234 = arith.constant 1 : index
    %c23_235 = arith.constant 23 : index
    %416 = memref.load %arg2[%c1_234, %c23_235] : memref<4x32xf32, #tpu.memory_space<smem>>
    %417 = vector.broadcast %416 : f32 to vector<1x128xf32>
    %418 = arith.mulf %417, %411 : vector<1x128xf32>
    %419 = arith.addf %401, %418 : vector<1x128xf32>
    %c2_236 = arith.constant 2 : index
    %c23_237 = arith.constant 23 : index
    %420 = memref.load %arg2[%c2_236, %c23_237] : memref<4x32xf32, #tpu.memory_space<smem>>
    %421 = vector.broadcast %420 : f32 to vector<1x128xf32>
    %422 = arith.mulf %421, %411 : vector<1x128xf32>
    %423 = arith.addf %405, %422 : vector<1x128xf32>
    %c3_238 = arith.constant 3 : index
    %c23_239 = arith.constant 23 : index
    %424 = memref.load %arg2[%c3_238, %c23_239] : memref<4x32xf32, #tpu.memory_space<smem>>
    %425 = vector.broadcast %424 : f32 to vector<1x128xf32>
    %426 = arith.mulf %425, %411 : vector<1x128xf32>
    %427 = arith.addf %409, %426 : vector<1x128xf32>
    %c24 = arith.constant 24 : index
    %c0_240 = arith.constant 0 : index
    %c0_241 = arith.constant 0 : index
    %428 = vector.load %arg1[%c24, %c0_240, %c0_241] : memref<32x1x128xf32, #tpu.memory_space<vmem>>, vector<1x1x128xf32>
    %429 = vector.shape_cast %428 : vector<1x1x128xf32> to vector<1x128xf32>
    %c0_242 = arith.constant 0 : index
    %c24_243 = arith.constant 24 : index
    %430 = memref.load %arg2[%c0_242, %c24_243] : memref<4x32xf32, #tpu.memory_space<smem>>
    %431 = vector.broadcast %430 : f32 to vector<1x128xf32>
    %432 = arith.mulf %431, %429 : vector<1x128xf32>
    %433 = arith.addf %415, %432 : vector<1x128xf32>
    %c1_244 = arith.constant 1 : index
    %c24_245 = arith.constant 24 : index
    %434 = memref.load %arg2[%c1_244, %c24_245] : memref<4x32xf32, #tpu.memory_space<smem>>
    %435 = vector.broadcast %434 : f32 to vector<1x128xf32>
    %436 = arith.mulf %435, %429 : vector<1x128xf32>
    %437 = arith.addf %419, %436 : vector<1x128xf32>
    %c2_246 = arith.constant 2 : index
    %c24_247 = arith.constant 24 : index
    %438 = memref.load %arg2[%c2_246, %c24_247] : memref<4x32xf32, #tpu.memory_space<smem>>
    %439 = vector.broadcast %438 : f32 to vector<1x128xf32>
    %440 = arith.mulf %439, %429 : vector<1x128xf32>
    %441 = arith.addf %423, %440 : vector<1x128xf32>
    %c3_248 = arith.constant 3 : index
    %c24_249 = arith.constant 24 : index
    %442 = memref.load %arg2[%c3_248, %c24_249] : memref<4x32xf32, #tpu.memory_space<smem>>
    %443 = vector.broadcast %442 : f32 to vector<1x128xf32>
    %444 = arith.mulf %443, %429 : vector<1x128xf32>
    %445 = arith.addf %427, %444 : vector<1x128xf32>
    %c25 = arith.constant 25 : index
    %c0_250 = arith.constant 0 : index
    %c0_251 = arith.constant 0 : index
    %446 = vector.load %arg1[%c25, %c0_250, %c0_251] : memref<32x1x128xf32, #tpu.memory_space<vmem>>, vector<1x1x128xf32>
    %447 = vector.shape_cast %446 : vector<1x1x128xf32> to vector<1x128xf32>
    %c0_252 = arith.constant 0 : index
    %c25_253 = arith.constant 25 : index
    %448 = memref.load %arg2[%c0_252, %c25_253] : memref<4x32xf32, #tpu.memory_space<smem>>
    %449 = vector.broadcast %448 : f32 to vector<1x128xf32>
    %450 = arith.mulf %449, %447 : vector<1x128xf32>
    %451 = arith.addf %433, %450 : vector<1x128xf32>
    %c1_254 = arith.constant 1 : index
    %c25_255 = arith.constant 25 : index
    %452 = memref.load %arg2[%c1_254, %c25_255] : memref<4x32xf32, #tpu.memory_space<smem>>
    %453 = vector.broadcast %452 : f32 to vector<1x128xf32>
    %454 = arith.mulf %453, %447 : vector<1x128xf32>
    %455 = arith.addf %437, %454 : vector<1x128xf32>
    %c2_256 = arith.constant 2 : index
    %c25_257 = arith.constant 25 : index
    %456 = memref.load %arg2[%c2_256, %c25_257] : memref<4x32xf32, #tpu.memory_space<smem>>
    %457 = vector.broadcast %456 : f32 to vector<1x128xf32>
    %458 = arith.mulf %457, %447 : vector<1x128xf32>
    %459 = arith.addf %441, %458 : vector<1x128xf32>
    %c3_258 = arith.constant 3 : index
    %c25_259 = arith.constant 25 : index
    %460 = memref.load %arg2[%c3_258, %c25_259] : memref<4x32xf32, #tpu.memory_space<smem>>
    %461 = vector.broadcast %460 : f32 to vector<1x128xf32>
    %462 = arith.mulf %461, %447 : vector<1x128xf32>
    %463 = arith.addf %445, %462 : vector<1x128xf32>
    %c26 = arith.constant 26 : index
    %c0_260 = arith.constant 0 : index
    %c0_261 = arith.constant 0 : index
    %464 = vector.load %arg1[%c26, %c0_260, %c0_261] : memref<32x1x128xf32, #tpu.memory_space<vmem>>, vector<1x1x128xf32>
    %465 = vector.shape_cast %464 : vector<1x1x128xf32> to vector<1x128xf32>
    %c0_262 = arith.constant 0 : index
    %c26_263 = arith.constant 26 : index
    %466 = memref.load %arg2[%c0_262, %c26_263] : memref<4x32xf32, #tpu.memory_space<smem>>
    %467 = vector.broadcast %466 : f32 to vector<1x128xf32>
    %468 = arith.mulf %467, %465 : vector<1x128xf32>
    %469 = arith.addf %451, %468 : vector<1x128xf32>
    %c1_264 = arith.constant 1 : index
    %c26_265 = arith.constant 26 : index
    %470 = memref.load %arg2[%c1_264, %c26_265] : memref<4x32xf32, #tpu.memory_space<smem>>
    %471 = vector.broadcast %470 : f32 to vector<1x128xf32>
    %472 = arith.mulf %471, %465 : vector<1x128xf32>
    %473 = arith.addf %455, %472 : vector<1x128xf32>
    %c2_266 = arith.constant 2 : index
    %c26_267 = arith.constant 26 : index
    %474 = memref.load %arg2[%c2_266, %c26_267] : memref<4x32xf32, #tpu.memory_space<smem>>
    %475 = vector.broadcast %474 : f32 to vector<1x128xf32>
    %476 = arith.mulf %475, %465 : vector<1x128xf32>
    %477 = arith.addf %459, %476 : vector<1x128xf32>
    %c3_268 = arith.constant 3 : index
    %c26_269 = arith.constant 26 : index
    %478 = memref.load %arg2[%c3_268, %c26_269] : memref<4x32xf32, #tpu.memory_space<smem>>
    %479 = vector.broadcast %478 : f32 to vector<1x128xf32>
    %480 = arith.mulf %479, %465 : vector<1x128xf32>
    %481 = arith.addf %463, %480 : vector<1x128xf32>
    %c27 = arith.constant 27 : index
    %c0_270 = arith.constant 0 : index
    %c0_271 = arith.constant 0 : index
    %482 = vector.load %arg1[%c27, %c0_270, %c0_271] : memref<32x1x128xf32, #tpu.memory_space<vmem>>, vector<1x1x128xf32>
    %483 = vector.shape_cast %482 : vector<1x1x128xf32> to vector<1x128xf32>
    %c0_272 = arith.constant 0 : index
    %c27_273 = arith.constant 27 : index
    %484 = memref.load %arg2[%c0_272, %c27_273] : memref<4x32xf32, #tpu.memory_space<smem>>
    %485 = vector.broadcast %484 : f32 to vector<1x128xf32>
    %486 = arith.mulf %485, %483 : vector<1x128xf32>
    %487 = arith.addf %469, %486 : vector<1x128xf32>
    %c1_274 = arith.constant 1 : index
    %c27_275 = arith.constant 27 : index
    %488 = memref.load %arg2[%c1_274, %c27_275] : memref<4x32xf32, #tpu.memory_space<smem>>
    %489 = vector.broadcast %488 : f32 to vector<1x128xf32>
    %490 = arith.mulf %489, %483 : vector<1x128xf32>
    %491 = arith.addf %473, %490 : vector<1x128xf32>
    %c2_276 = arith.constant 2 : index
    %c27_277 = arith.constant 27 : index
    %492 = memref.load %arg2[%c2_276, %c27_277] : memref<4x32xf32, #tpu.memory_space<smem>>
    %493 = vector.broadcast %492 : f32 to vector<1x128xf32>
    %494 = arith.mulf %493, %483 : vector<1x128xf32>
    %495 = arith.addf %477, %494 : vector<1x128xf32>
    %c3_278 = arith.constant 3 : index
    %c27_279 = arith.constant 27 : index
    %496 = memref.load %arg2[%c3_278, %c27_279] : memref<4x32xf32, #tpu.memory_space<smem>>
    %497 = vector.broadcast %496 : f32 to vector<1x128xf32>
    %498 = arith.mulf %497, %483 : vector<1x128xf32>
    %499 = arith.addf %481, %498 : vector<1x128xf32>
    %c28 = arith.constant 28 : index
    %c0_280 = arith.constant 0 : index
    %c0_281 = arith.constant 0 : index
    %500 = vector.load %arg1[%c28, %c0_280, %c0_281] : memref<32x1x128xf32, #tpu.memory_space<vmem>>, vector<1x1x128xf32>
    %501 = vector.shape_cast %500 : vector<1x1x128xf32> to vector<1x128xf32>
    %c0_282 = arith.constant 0 : index
    %c28_283 = arith.constant 28 : index
    %502 = memref.load %arg2[%c0_282, %c28_283] : memref<4x32xf32, #tpu.memory_space<smem>>
    %503 = vector.broadcast %502 : f32 to vector<1x128xf32>
    %504 = arith.mulf %503, %501 : vector<1x128xf32>
    %505 = arith.addf %487, %504 : vector<1x128xf32>
    %c1_284 = arith.constant 1 : index
    %c28_285 = arith.constant 28 : index
    %506 = memref.load %arg2[%c1_284, %c28_285] : memref<4x32xf32, #tpu.memory_space<smem>>
    %507 = vector.broadcast %506 : f32 to vector<1x128xf32>
    %508 = arith.mulf %507, %501 : vector<1x128xf32>
    %509 = arith.addf %491, %508 : vector<1x128xf32>
    %c2_286 = arith.constant 2 : index
    %c28_287 = arith.constant 28 : index
    %510 = memref.load %arg2[%c2_286, %c28_287] : memref<4x32xf32, #tpu.memory_space<smem>>
    %511 = vector.broadcast %510 : f32 to vector<1x128xf32>
    %512 = arith.mulf %511, %501 : vector<1x128xf32>
    %513 = arith.addf %495, %512 : vector<1x128xf32>
    %c3_288 = arith.constant 3 : index
    %c28_289 = arith.constant 28 : index
    %514 = memref.load %arg2[%c3_288, %c28_289] : memref<4x32xf32, #tpu.memory_space<smem>>
    %515 = vector.broadcast %514 : f32 to vector<1x128xf32>
    %516 = arith.mulf %515, %501 : vector<1x128xf32>
    %517 = arith.addf %499, %516 : vector<1x128xf32>
    %c29 = arith.constant 29 : index
    %c0_290 = arith.constant 0 : index
    %c0_291 = arith.constant 0 : index
    %518 = vector.load %arg1[%c29, %c0_290, %c0_291] : memref<32x1x128xf32, #tpu.memory_space<vmem>>, vector<1x1x128xf32>
    %519 = vector.shape_cast %518 : vector<1x1x128xf32> to vector<1x128xf32>
    %c0_292 = arith.constant 0 : index
    %c29_293 = arith.constant 29 : index
    %520 = memref.load %arg2[%c0_292, %c29_293] : memref<4x32xf32, #tpu.memory_space<smem>>
    %521 = vector.broadcast %520 : f32 to vector<1x128xf32>
    %522 = arith.mulf %521, %519 : vector<1x128xf32>
    %523 = arith.addf %505, %522 : vector<1x128xf32>
    %c1_294 = arith.constant 1 : index
    %c29_295 = arith.constant 29 : index
    %524 = memref.load %arg2[%c1_294, %c29_295] : memref<4x32xf32, #tpu.memory_space<smem>>
    %525 = vector.broadcast %524 : f32 to vector<1x128xf32>
    %526 = arith.mulf %525, %519 : vector<1x128xf32>
    %527 = arith.addf %509, %526 : vector<1x128xf32>
    %c2_296 = arith.constant 2 : index
    %c29_297 = arith.constant 29 : index
    %528 = memref.load %arg2[%c2_296, %c29_297] : memref<4x32xf32, #tpu.memory_space<smem>>
    %529 = vector.broadcast %528 : f32 to vector<1x128xf32>
    %530 = arith.mulf %529, %519 : vector<1x128xf32>
    %531 = arith.addf %513, %530 : vector<1x128xf32>
    %c3_298 = arith.constant 3 : index
    %c29_299 = arith.constant 29 : index
    %532 = memref.load %arg2[%c3_298, %c29_299] : memref<4x32xf32, #tpu.memory_space<smem>>
    %533 = vector.broadcast %532 : f32 to vector<1x128xf32>
    %534 = arith.mulf %533, %519 : vector<1x128xf32>
    %535 = arith.addf %517, %534 : vector<1x128xf32>
    %c30 = arith.constant 30 : index
    %c0_300 = arith.constant 0 : index
    %c0_301 = arith.constant 0 : index
    %536 = vector.load %arg1[%c30, %c0_300, %c0_301] : memref<32x1x128xf32, #tpu.memory_space<vmem>>, vector<1x1x128xf32>
    %537 = vector.shape_cast %536 : vector<1x1x128xf32> to vector<1x128xf32>
    %c0_302 = arith.constant 0 : index
    %c30_303 = arith.constant 30 : index
    %538 = memref.load %arg2[%c0_302, %c30_303] : memref<4x32xf32, #tpu.memory_space<smem>>
    %539 = vector.broadcast %538 : f32 to vector<1x128xf32>
    %540 = arith.mulf %539, %537 : vector<1x128xf32>
    %541 = arith.addf %523, %540 : vector<1x128xf32>
    %c1_304 = arith.constant 1 : index
    %c30_305 = arith.constant 30 : index
    %542 = memref.load %arg2[%c1_304, %c30_305] : memref<4x32xf32, #tpu.memory_space<smem>>
    %543 = vector.broadcast %542 : f32 to vector<1x128xf32>
    %544 = arith.mulf %543, %537 : vector<1x128xf32>
    %545 = arith.addf %527, %544 : vector<1x128xf32>
    %c2_306 = arith.constant 2 : index
    %c30_307 = arith.constant 30 : index
    %546 = memref.load %arg2[%c2_306, %c30_307] : memref<4x32xf32, #tpu.memory_space<smem>>
    %547 = vector.broadcast %546 : f32 to vector<1x128xf32>
    %548 = arith.mulf %547, %537 : vector<1x128xf32>
    %549 = arith.addf %531, %548 : vector<1x128xf32>
    %c3_308 = arith.constant 3 : index
    %c30_309 = arith.constant 30 : index
    %550 = memref.load %arg2[%c3_308, %c30_309] : memref<4x32xf32, #tpu.memory_space<smem>>
    %551 = vector.broadcast %550 : f32 to vector<1x128xf32>
    %552 = arith.mulf %551, %537 : vector<1x128xf32>
    %553 = arith.addf %535, %552 : vector<1x128xf32>
    %c31 = arith.constant 31 : index
    %c0_310 = arith.constant 0 : index
    %c0_311 = arith.constant 0 : index
    %554 = vector.load %arg1[%c31, %c0_310, %c0_311] : memref<32x1x128xf32, #tpu.memory_space<vmem>>, vector<1x1x128xf32>
    %555 = vector.shape_cast %554 : vector<1x1x128xf32> to vector<1x128xf32>
    %c0_312 = arith.constant 0 : index
    %c31_313 = arith.constant 31 : index
    %556 = memref.load %arg2[%c0_312, %c31_313] : memref<4x32xf32, #tpu.memory_space<smem>>
    %557 = vector.broadcast %556 : f32 to vector<1x128xf32>
    %558 = arith.mulf %557, %555 : vector<1x128xf32>
    %559 = arith.addf %541, %558 : vector<1x128xf32>
    %c1_314 = arith.constant 1 : index
    %c31_315 = arith.constant 31 : index
    %560 = memref.load %arg2[%c1_314, %c31_315] : memref<4x32xf32, #tpu.memory_space<smem>>
    %561 = vector.broadcast %560 : f32 to vector<1x128xf32>
    %562 = arith.mulf %561, %555 : vector<1x128xf32>
    %563 = arith.addf %545, %562 : vector<1x128xf32>
    %c2_316 = arith.constant 2 : index
    %c31_317 = arith.constant 31 : index
    %564 = memref.load %arg2[%c2_316, %c31_317] : memref<4x32xf32, #tpu.memory_space<smem>>
    %565 = vector.broadcast %564 : f32 to vector<1x128xf32>
    %566 = arith.mulf %565, %555 : vector<1x128xf32>
    %567 = arith.addf %549, %566 : vector<1x128xf32>
    %c3_318 = arith.constant 3 : index
    %c31_319 = arith.constant 31 : index
    %568 = memref.load %arg2[%c3_318, %c31_319] : memref<4x32xf32, #tpu.memory_space<smem>>
    %569 = vector.broadcast %568 : f32 to vector<1x128xf32>
    %570 = arith.mulf %569, %555 : vector<1x128xf32>
    %571 = arith.addf %553, %570 : vector<1x128xf32>
    %c0_320 = arith.constant 0 : index
    %c0_321 = arith.constant 0 : index
    %572 = memref.load %arg3[%c0_320, %c0_321] : memref<1x4xf32, #tpu.memory_space<smem>>
    %573 = vector.broadcast %572 : f32 to vector<1x128xf32>
    %574 = arith.addf %559, %573 : vector<1x128xf32>
    %c0_322 = arith.constant 0 : index
    %c1_323 = arith.constant 1 : index
    %575 = memref.load %arg3[%c0_322, %c1_323] : memref<1x4xf32, #tpu.memory_space<smem>>
    %576 = vector.broadcast %575 : f32 to vector<1x128xf32>
    %577 = arith.addf %563, %576 : vector<1x128xf32>
    %c0_324 = arith.constant 0 : index
    %c2_325 = arith.constant 2 : index
    %578 = memref.load %arg3[%c0_324, %c2_325] : memref<1x4xf32, #tpu.memory_space<smem>>
    %579 = vector.broadcast %578 : f32 to vector<1x128xf32>
    %580 = arith.addf %567, %579 : vector<1x128xf32>
    %c0_326 = arith.constant 0 : index
    %c3_327 = arith.constant 3 : index
    %581 = memref.load %arg3[%c0_326, %c3_327] : memref<1x4xf32, #tpu.memory_space<smem>>
    %582 = vector.broadcast %581 : f32 to vector<1x128xf32>
    %583 = arith.addf %571, %582 : vector<1x128xf32>
    %584 = arith.minimumf %574, %577 : vector<1x128xf32>
    %585 = arith.minimumf %580, %583 : vector<1x128xf32>
    %586 = arith.minimumf %584, %585 : vector<1x128xf32>
    %587 = arith.maximumf %574, %577 : vector<1x128xf32>
    %588 = arith.maximumf %580, %583 : vector<1x128xf32>
    %589 = arith.maximumf %587, %588 : vector<1x128xf32>
    %590 = arith.subf %589, %586 : vector<1x128xf32>
    %cst = arith.constant 9.99999993E-9 : f32
    %591 = vector.broadcast %cst : f32 to vector<1x128xf32>
    %592 = arith.addf %590, %591 : vector<1x128xf32>
    %cst_328 = arith.constant 1.57079637 : f32
    %593 = vector.broadcast %cst_328 : f32 to vector<1x128xf32>
    %594 = arith.divf %593, %592 : vector<1x128xf32>
    %595 = arith.subf %574, %586 : vector<1x128xf32>
    %596 = arith.mulf %595, %594 : vector<1x128xf32>
    %597 = math.cos %596 : vector<1x128xf32>
    %598 = math.sin %596 : vector<1x128xf32>
    %599 = arith.subf %577, %586 : vector<1x128xf32>
    %600 = arith.mulf %599, %594 : vector<1x128xf32>
    %601 = math.cos %600 : vector<1x128xf32>
    %602 = math.sin %600 : vector<1x128xf32>
    %603 = arith.subf %580, %586 : vector<1x128xf32>
    %604 = arith.mulf %603, %594 : vector<1x128xf32>
    %605 = math.cos %604 : vector<1x128xf32>
    %606 = math.sin %604 : vector<1x128xf32>
    %607 = arith.subf %583, %586 : vector<1x128xf32>
    %608 = arith.mulf %607, %594 : vector<1x128xf32>
    %609 = math.cos %608 : vector<1x128xf32>
    %610 = math.sin %608 : vector<1x128xf32>
    %cst_329 = arith.constant 0.000000e+00 : f32
    %611 = vector.broadcast %cst_329 : f32 to vector<1x128xf32>
    %612 = arith.mulf %597, %601 : vector<1x128xf32>
    %613 = arith.mulf %598, %601 : vector<1x128xf32>
    %614 = arith.mulf %597, %602 : vector<1x128xf32>
    %615 = arith.mulf %598, %602 : vector<1x128xf32>
    %616 = arith.mulf %605, %609 : vector<1x128xf32>
    %617 = arith.mulf %606, %609 : vector<1x128xf32>
    %618 = arith.mulf %605, %610 : vector<1x128xf32>
    %619 = arith.mulf %606, %610 : vector<1x128xf32>
    %620 = arith.mulf %612, %616 : vector<1x128xf32>
    %621 = arith.mulf %613, %616 : vector<1x128xf32>
    %cst_330 = arith.constant 0.000000e+00 : f32
    %622 = vector.broadcast %cst_330 : f32 to vector<1x128xf32>
    %623 = arith.subf %622, %621 : vector<1x128xf32>
    %624 = arith.mulf %614, %616 : vector<1x128xf32>
    %cst_331 = arith.constant 0.000000e+00 : f32
    %625 = vector.broadcast %cst_331 : f32 to vector<1x128xf32>
    %626 = arith.subf %625, %624 : vector<1x128xf32>
    %627 = arith.mulf %615, %616 : vector<1x128xf32>
    %cst_332 = arith.constant 0.000000e+00 : f32
    %628 = vector.broadcast %cst_332 : f32 to vector<1x128xf32>
    %629 = arith.subf %628, %627 : vector<1x128xf32>
    %630 = arith.mulf %612, %617 : vector<1x128xf32>
    %cst_333 = arith.constant 0.000000e+00 : f32
    %631 = vector.broadcast %cst_333 : f32 to vector<1x128xf32>
    %632 = arith.subf %631, %630 : vector<1x128xf32>
    %633 = arith.mulf %613, %617 : vector<1x128xf32>
    %cst_334 = arith.constant 0.000000e+00 : f32
    %634 = vector.broadcast %cst_334 : f32 to vector<1x128xf32>
    %635 = arith.subf %634, %633 : vector<1x128xf32>
    %636 = arith.mulf %614, %617 : vector<1x128xf32>
    %cst_335 = arith.constant 0.000000e+00 : f32
    %637 = vector.broadcast %cst_335 : f32 to vector<1x128xf32>
    %638 = arith.subf %637, %636 : vector<1x128xf32>
    %639 = arith.mulf %615, %617 : vector<1x128xf32>
    %640 = arith.mulf %612, %618 : vector<1x128xf32>
    %cst_336 = arith.constant 0.000000e+00 : f32
    %641 = vector.broadcast %cst_336 : f32 to vector<1x128xf32>
    %642 = arith.subf %641, %640 : vector<1x128xf32>
    %643 = arith.mulf %613, %618 : vector<1x128xf32>
    %cst_337 = arith.constant 0.000000e+00 : f32
    %644 = vector.broadcast %cst_337 : f32 to vector<1x128xf32>
    %645 = arith.subf %644, %643 : vector<1x128xf32>
    %646 = arith.mulf %614, %618 : vector<1x128xf32>
    %cst_338 = arith.constant 0.000000e+00 : f32
    %647 = vector.broadcast %cst_338 : f32 to vector<1x128xf32>
    %648 = arith.subf %647, %646 : vector<1x128xf32>
    %649 = arith.mulf %615, %618 : vector<1x128xf32>
    %650 = arith.mulf %612, %619 : vector<1x128xf32>
    %cst_339 = arith.constant 0.000000e+00 : f32
    %651 = vector.broadcast %cst_339 : f32 to vector<1x128xf32>
    %652 = arith.subf %651, %650 : vector<1x128xf32>
    %653 = arith.mulf %613, %619 : vector<1x128xf32>
    %654 = arith.mulf %614, %619 : vector<1x128xf32>
    %655 = arith.mulf %615, %619 : vector<1x128xf32>
    %c0_340 = arith.constant 0 : index
    %c0_341 = arith.constant 0 : index
    %656 = memref.load %arg4[%c0_340, %c0_341] : memref<1x4xf32, #tpu.memory_space<smem>>
    %c0_342 = arith.constant 0 : index
    %c0_343 = arith.constant 0 : index
    %657 = memref.load %arg5[%c0_342, %c0_343] : memref<1x4xf32, #tpu.memory_space<smem>>
    %658 = vector.broadcast %656 : f32 to vector<1x128xf32>
    %659 = arith.mulf %658, %620 : vector<1x128xf32>
    %660 = vector.broadcast %657 : f32 to vector<1x128xf32>
    %661 = arith.mulf %660, %623 : vector<1x128xf32>
    %662 = arith.addf %659, %661 : vector<1x128xf32>
    %663 = vector.broadcast %656 : f32 to vector<1x128xf32>
    %664 = arith.mulf %663, %611 : vector<1x128xf32>
    %665 = vector.broadcast %657 : f32 to vector<1x128xf32>
    %666 = arith.mulf %665, %611 : vector<1x128xf32>
    %667 = arith.subf %664, %666 : vector<1x128xf32>
    %668 = vector.broadcast %656 : f32 to vector<1x128xf32>
    %669 = arith.mulf %668, %611 : vector<1x128xf32>
    %670 = vector.broadcast %657 : f32 to vector<1x128xf32>
    %671 = arith.mulf %670, %611 : vector<1x128xf32>
    %672 = arith.addf %669, %671 : vector<1x128xf32>
    %673 = vector.broadcast %656 : f32 to vector<1x128xf32>
    %674 = arith.mulf %673, %623 : vector<1x128xf32>
    %675 = vector.broadcast %657 : f32 to vector<1x128xf32>
    %676 = arith.mulf %675, %620 : vector<1x128xf32>
    %677 = arith.subf %674, %676 : vector<1x128xf32>
    %678 = vector.broadcast %656 : f32 to vector<1x128xf32>
    %679 = arith.mulf %678, %611 : vector<1x128xf32>
    %680 = vector.broadcast %657 : f32 to vector<1x128xf32>
    %681 = arith.mulf %680, %611 : vector<1x128xf32>
    %682 = arith.addf %679, %681 : vector<1x128xf32>
    %683 = vector.broadcast %656 : f32 to vector<1x128xf32>
    %684 = arith.mulf %683, %626 : vector<1x128xf32>
    %685 = vector.broadcast %657 : f32 to vector<1x128xf32>
    %686 = arith.mulf %685, %629 : vector<1x128xf32>
    %687 = arith.subf %684, %686 : vector<1x128xf32>
    %688 = vector.broadcast %656 : f32 to vector<1x128xf32>
    %689 = arith.mulf %688, %629 : vector<1x128xf32>
    %690 = vector.broadcast %657 : f32 to vector<1x128xf32>
    %691 = arith.mulf %690, %626 : vector<1x128xf32>
    %692 = arith.addf %689, %691 : vector<1x128xf32>
    %693 = vector.broadcast %656 : f32 to vector<1x128xf32>
    %694 = arith.mulf %693, %611 : vector<1x128xf32>
    %695 = vector.broadcast %657 : f32 to vector<1x128xf32>
    %696 = arith.mulf %695, %611 : vector<1x128xf32>
    %697 = arith.subf %694, %696 : vector<1x128xf32>
    %698 = vector.broadcast %656 : f32 to vector<1x128xf32>
    %699 = arith.mulf %698, %611 : vector<1x128xf32>
    %700 = vector.broadcast %657 : f32 to vector<1x128xf32>
    %701 = arith.mulf %700, %611 : vector<1x128xf32>
    %702 = arith.addf %699, %701 : vector<1x128xf32>
    %703 = vector.broadcast %656 : f32 to vector<1x128xf32>
    %704 = arith.mulf %703, %632 : vector<1x128xf32>
    %705 = vector.broadcast %657 : f32 to vector<1x128xf32>
    %706 = arith.mulf %705, %635 : vector<1x128xf32>
    %707 = arith.subf %704, %706 : vector<1x128xf32>
    %708 = vector.broadcast %656 : f32 to vector<1x128xf32>
    %709 = arith.mulf %708, %635 : vector<1x128xf32>
    %710 = vector.broadcast %657 : f32 to vector<1x128xf32>
    %711 = arith.mulf %710, %632 : vector<1x128xf32>
    %712 = arith.addf %709, %711 : vector<1x128xf32>
    %713 = vector.broadcast %656 : f32 to vector<1x128xf32>
    %714 = arith.mulf %713, %611 : vector<1x128xf32>
    %715 = vector.broadcast %657 : f32 to vector<1x128xf32>
    %716 = arith.mulf %715, %611 : vector<1x128xf32>
    %717 = arith.subf %714, %716 : vector<1x128xf32>
    %718 = vector.broadcast %656 : f32 to vector<1x128xf32>
    %719 = arith.mulf %718, %638 : vector<1x128xf32>
    %720 = vector.broadcast %657 : f32 to vector<1x128xf32>
    %721 = arith.mulf %720, %639 : vector<1x128xf32>
    %722 = arith.addf %719, %721 : vector<1x128xf32>
    %723 = vector.broadcast %656 : f32 to vector<1x128xf32>
    %724 = arith.mulf %723, %611 : vector<1x128xf32>
    %725 = vector.broadcast %657 : f32 to vector<1x128xf32>
    %726 = arith.mulf %725, %611 : vector<1x128xf32>
    %727 = arith.subf %724, %726 : vector<1x128xf32>
    %728 = vector.broadcast %656 : f32 to vector<1x128xf32>
    %729 = arith.mulf %728, %611 : vector<1x128xf32>
    %730 = vector.broadcast %657 : f32 to vector<1x128xf32>
    %731 = arith.mulf %730, %611 : vector<1x128xf32>
    %732 = arith.addf %729, %731 : vector<1x128xf32>
    %733 = vector.broadcast %656 : f32 to vector<1x128xf32>
    %734 = arith.mulf %733, %639 : vector<1x128xf32>
    %735 = vector.broadcast %657 : f32 to vector<1x128xf32>
    %736 = arith.mulf %735, %638 : vector<1x128xf32>
    %737 = arith.subf %734, %736 : vector<1x128xf32>
    %738 = vector.broadcast %656 : f32 to vector<1x128xf32>
    %739 = arith.mulf %738, %611 : vector<1x128xf32>
    %740 = vector.broadcast %657 : f32 to vector<1x128xf32>
    %741 = arith.mulf %740, %611 : vector<1x128xf32>
    %742 = arith.addf %739, %741 : vector<1x128xf32>
    %743 = vector.broadcast %656 : f32 to vector<1x128xf32>
    %744 = arith.mulf %743, %642 : vector<1x128xf32>
    %745 = vector.broadcast %657 : f32 to vector<1x128xf32>
    %746 = arith.mulf %745, %645 : vector<1x128xf32>
    %747 = arith.subf %744, %746 : vector<1x128xf32>
    %748 = vector.broadcast %656 : f32 to vector<1x128xf32>
    %749 = arith.mulf %748, %645 : vector<1x128xf32>
    %750 = vector.broadcast %657 : f32 to vector<1x128xf32>
    %751 = arith.mulf %750, %642 : vector<1x128xf32>
    %752 = arith.addf %749, %751 : vector<1x128xf32>
    %753 = vector.broadcast %656 : f32 to vector<1x128xf32>
    %754 = arith.mulf %753, %611 : vector<1x128xf32>
    %755 = vector.broadcast %657 : f32 to vector<1x128xf32>
    %756 = arith.mulf %755, %611 : vector<1x128xf32>
    %757 = arith.subf %754, %756 : vector<1x128xf32>
    %758 = vector.broadcast %656 : f32 to vector<1x128xf32>
    %759 = arith.mulf %758, %648 : vector<1x128xf32>
    %760 = vector.broadcast %657 : f32 to vector<1x128xf32>
    %761 = arith.mulf %760, %649 : vector<1x128xf32>
    %762 = arith.addf %759, %761 : vector<1x128xf32>
    %763 = vector.broadcast %656 : f32 to vector<1x128xf32>
    %764 = arith.mulf %763, %611 : vector<1x128xf32>
    %765 = vector.broadcast %657 : f32 to vector<1x128xf32>
    %766 = arith.mulf %765, %611 : vector<1x128xf32>
    %767 = arith.subf %764, %766 : vector<1x128xf32>
    %768 = vector.broadcast %656 : f32 to vector<1x128xf32>
    %769 = arith.mulf %768, %611 : vector<1x128xf32>
    %770 = vector.broadcast %657 : f32 to vector<1x128xf32>
    %771 = arith.mulf %770, %611 : vector<1x128xf32>
    %772 = arith.addf %769, %771 : vector<1x128xf32>
    %773 = vector.broadcast %656 : f32 to vector<1x128xf32>
    %774 = arith.mulf %773, %649 : vector<1x128xf32>
    %775 = vector.broadcast %657 : f32 to vector<1x128xf32>
    %776 = arith.mulf %775, %648 : vector<1x128xf32>
    %777 = arith.subf %774, %776 : vector<1x128xf32>
    %778 = vector.broadcast %656 : f32 to vector<1x128xf32>
    %779 = arith.mulf %778, %652 : vector<1x128xf32>
    %780 = vector.broadcast %657 : f32 to vector<1x128xf32>
    %781 = arith.mulf %780, %653 : vector<1x128xf32>
    %782 = arith.addf %779, %781 : vector<1x128xf32>
    %783 = vector.broadcast %656 : f32 to vector<1x128xf32>
    %784 = arith.mulf %783, %611 : vector<1x128xf32>
    %785 = vector.broadcast %657 : f32 to vector<1x128xf32>
    %786 = arith.mulf %785, %611 : vector<1x128xf32>
    %787 = arith.subf %784, %786 : vector<1x128xf32>
    %788 = vector.broadcast %656 : f32 to vector<1x128xf32>
    %789 = arith.mulf %788, %611 : vector<1x128xf32>
    %790 = vector.broadcast %657 : f32 to vector<1x128xf32>
    %791 = arith.mulf %790, %611 : vector<1x128xf32>
    %792 = arith.addf %789, %791 : vector<1x128xf32>
    %793 = vector.broadcast %656 : f32 to vector<1x128xf32>
    %794 = arith.mulf %793, %653 : vector<1x128xf32>
    %795 = vector.broadcast %657 : f32 to vector<1x128xf32>
    %796 = arith.mulf %795, %652 : vector<1x128xf32>
    %797 = arith.subf %794, %796 : vector<1x128xf32>
    %798 = vector.broadcast %656 : f32 to vector<1x128xf32>
    %799 = arith.mulf %798, %611 : vector<1x128xf32>
    %800 = vector.broadcast %657 : f32 to vector<1x128xf32>
    %801 = arith.mulf %800, %611 : vector<1x128xf32>
    %802 = arith.addf %799, %801 : vector<1x128xf32>
    %803 = vector.broadcast %656 : f32 to vector<1x128xf32>
    %804 = arith.mulf %803, %654 : vector<1x128xf32>
    %805 = vector.broadcast %657 : f32 to vector<1x128xf32>
    %806 = arith.mulf %805, %655 : vector<1x128xf32>
    %807 = arith.subf %804, %806 : vector<1x128xf32>
    %808 = vector.broadcast %656 : f32 to vector<1x128xf32>
    %809 = arith.mulf %808, %655 : vector<1x128xf32>
    %810 = vector.broadcast %657 : f32 to vector<1x128xf32>
    %811 = arith.mulf %810, %654 : vector<1x128xf32>
    %812 = arith.addf %809, %811 : vector<1x128xf32>
    %813 = vector.broadcast %656 : f32 to vector<1x128xf32>
    %814 = arith.mulf %813, %611 : vector<1x128xf32>
    %815 = vector.broadcast %657 : f32 to vector<1x128xf32>
    %816 = arith.mulf %815, %611 : vector<1x128xf32>
    %817 = arith.subf %814, %816 : vector<1x128xf32>
    %c0_344 = arith.constant 0 : index
    %c1_345 = arith.constant 1 : index
    %818 = memref.load %arg4[%c0_344, %c1_345] : memref<1x4xf32, #tpu.memory_space<smem>>
    %c0_346 = arith.constant 0 : index
    %c1_347 = arith.constant 1 : index
    %819 = memref.load %arg5[%c0_346, %c1_347] : memref<1x4xf32, #tpu.memory_space<smem>>
    %820 = vector.broadcast %818 : f32 to vector<1x128xf32>
    %821 = arith.mulf %820, %662 : vector<1x128xf32>
    %822 = vector.broadcast %819 : f32 to vector<1x128xf32>
    %823 = arith.mulf %822, %687 : vector<1x128xf32>
    %824 = arith.addf %821, %823 : vector<1x128xf32>
    %825 = vector.broadcast %818 : f32 to vector<1x128xf32>
    %826 = arith.mulf %825, %667 : vector<1x128xf32>
    %827 = vector.broadcast %819 : f32 to vector<1x128xf32>
    %828 = arith.mulf %827, %682 : vector<1x128xf32>
    %829 = arith.subf %826, %828 : vector<1x128xf32>
    %830 = vector.broadcast %818 : f32 to vector<1x128xf32>
    %831 = arith.mulf %830, %682 : vector<1x128xf32>
    %832 = vector.broadcast %819 : f32 to vector<1x128xf32>
    %833 = arith.mulf %832, %667 : vector<1x128xf32>
    %834 = arith.addf %831, %833 : vector<1x128xf32>
    %835 = vector.broadcast %818 : f32 to vector<1x128xf32>
    %836 = arith.mulf %835, %687 : vector<1x128xf32>
    %837 = vector.broadcast %819 : f32 to vector<1x128xf32>
    %838 = arith.mulf %837, %662 : vector<1x128xf32>
    %839 = arith.subf %836, %838 : vector<1x128xf32>
    %840 = vector.broadcast %818 : f32 to vector<1x128xf32>
    %841 = arith.mulf %840, %692 : vector<1x128xf32>
    %842 = vector.broadcast %819 : f32 to vector<1x128xf32>
    %843 = arith.mulf %842, %677 : vector<1x128xf32>
    %844 = arith.addf %841, %843 : vector<1x128xf32>
    %845 = vector.broadcast %818 : f32 to vector<1x128xf32>
    %846 = arith.mulf %845, %697 : vector<1x128xf32>
    %847 = vector.broadcast %819 : f32 to vector<1x128xf32>
    %848 = arith.mulf %847, %672 : vector<1x128xf32>
    %849 = arith.subf %846, %848 : vector<1x128xf32>
    %850 = vector.broadcast %818 : f32 to vector<1x128xf32>
    %851 = arith.mulf %850, %672 : vector<1x128xf32>
    %852 = vector.broadcast %819 : f32 to vector<1x128xf32>
    %853 = arith.mulf %852, %697 : vector<1x128xf32>
    %854 = arith.addf %851, %853 : vector<1x128xf32>
    %855 = vector.broadcast %818 : f32 to vector<1x128xf32>
    %856 = arith.mulf %855, %677 : vector<1x128xf32>
    %857 = vector.broadcast %819 : f32 to vector<1x128xf32>
    %858 = arith.mulf %857, %692 : vector<1x128xf32>
    %859 = arith.subf %856, %858 : vector<1x128xf32>
    %860 = vector.broadcast %818 : f32 to vector<1x128xf32>
    %861 = arith.mulf %860, %702 : vector<1x128xf32>
    %862 = vector.broadcast %819 : f32 to vector<1x128xf32>
    %863 = arith.mulf %862, %727 : vector<1x128xf32>
    %864 = arith.addf %861, %863 : vector<1x128xf32>
    %865 = vector.broadcast %818 : f32 to vector<1x128xf32>
    %866 = arith.mulf %865, %707 : vector<1x128xf32>
    %867 = vector.broadcast %819 : f32 to vector<1x128xf32>
    %868 = arith.mulf %867, %722 : vector<1x128xf32>
    %869 = arith.subf %866, %868 : vector<1x128xf32>
    %870 = vector.broadcast %818 : f32 to vector<1x128xf32>
    %871 = arith.mulf %870, %722 : vector<1x128xf32>
    %872 = vector.broadcast %819 : f32 to vector<1x128xf32>
    %873 = arith.mulf %872, %707 : vector<1x128xf32>
    %874 = arith.addf %871, %873 : vector<1x128xf32>
    %875 = vector.broadcast %818 : f32 to vector<1x128xf32>
    %876 = arith.mulf %875, %727 : vector<1x128xf32>
    %877 = vector.broadcast %819 : f32 to vector<1x128xf32>
    %878 = arith.mulf %877, %702 : vector<1x128xf32>
    %879 = arith.subf %876, %878 : vector<1x128xf32>
    %880 = vector.broadcast %818 : f32 to vector<1x128xf32>
    %881 = arith.mulf %880, %732 : vector<1x128xf32>
    %882 = vector.broadcast %819 : f32 to vector<1x128xf32>
    %883 = arith.mulf %882, %717 : vector<1x128xf32>
    %884 = arith.addf %881, %883 : vector<1x128xf32>
    %885 = vector.broadcast %818 : f32 to vector<1x128xf32>
    %886 = arith.mulf %885, %737 : vector<1x128xf32>
    %887 = vector.broadcast %819 : f32 to vector<1x128xf32>
    %888 = arith.mulf %887, %712 : vector<1x128xf32>
    %889 = arith.subf %886, %888 : vector<1x128xf32>
    %890 = vector.broadcast %818 : f32 to vector<1x128xf32>
    %891 = arith.mulf %890, %712 : vector<1x128xf32>
    %892 = vector.broadcast %819 : f32 to vector<1x128xf32>
    %893 = arith.mulf %892, %737 : vector<1x128xf32>
    %894 = arith.addf %891, %893 : vector<1x128xf32>
    %895 = vector.broadcast %818 : f32 to vector<1x128xf32>
    %896 = arith.mulf %895, %717 : vector<1x128xf32>
    %897 = vector.broadcast %819 : f32 to vector<1x128xf32>
    %898 = arith.mulf %897, %732 : vector<1x128xf32>
    %899 = arith.subf %896, %898 : vector<1x128xf32>
    %900 = vector.broadcast %818 : f32 to vector<1x128xf32>
    %901 = arith.mulf %900, %742 : vector<1x128xf32>
    %902 = vector.broadcast %819 : f32 to vector<1x128xf32>
    %903 = arith.mulf %902, %767 : vector<1x128xf32>
    %904 = arith.addf %901, %903 : vector<1x128xf32>
    %905 = vector.broadcast %818 : f32 to vector<1x128xf32>
    %906 = arith.mulf %905, %747 : vector<1x128xf32>
    %907 = vector.broadcast %819 : f32 to vector<1x128xf32>
    %908 = arith.mulf %907, %762 : vector<1x128xf32>
    %909 = arith.subf %906, %908 : vector<1x128xf32>
    %910 = vector.broadcast %818 : f32 to vector<1x128xf32>
    %911 = arith.mulf %910, %762 : vector<1x128xf32>
    %912 = vector.broadcast %819 : f32 to vector<1x128xf32>
    %913 = arith.mulf %912, %747 : vector<1x128xf32>
    %914 = arith.addf %911, %913 : vector<1x128xf32>
    %915 = vector.broadcast %818 : f32 to vector<1x128xf32>
    %916 = arith.mulf %915, %767 : vector<1x128xf32>
    %917 = vector.broadcast %819 : f32 to vector<1x128xf32>
    %918 = arith.mulf %917, %742 : vector<1x128xf32>
    %919 = arith.subf %916, %918 : vector<1x128xf32>
    %920 = vector.broadcast %818 : f32 to vector<1x128xf32>
    %921 = arith.mulf %920, %772 : vector<1x128xf32>
    %922 = vector.broadcast %819 : f32 to vector<1x128xf32>
    %923 = arith.mulf %922, %757 : vector<1x128xf32>
    %924 = arith.addf %921, %923 : vector<1x128xf32>
    %925 = vector.broadcast %818 : f32 to vector<1x128xf32>
    %926 = arith.mulf %925, %777 : vector<1x128xf32>
    %927 = vector.broadcast %819 : f32 to vector<1x128xf32>
    %928 = arith.mulf %927, %752 : vector<1x128xf32>
    %929 = arith.subf %926, %928 : vector<1x128xf32>
    %930 = vector.broadcast %818 : f32 to vector<1x128xf32>
    %931 = arith.mulf %930, %752 : vector<1x128xf32>
    %932 = vector.broadcast %819 : f32 to vector<1x128xf32>
    %933 = arith.mulf %932, %777 : vector<1x128xf32>
    %934 = arith.addf %931, %933 : vector<1x128xf32>
    %935 = vector.broadcast %818 : f32 to vector<1x128xf32>
    %936 = arith.mulf %935, %757 : vector<1x128xf32>
    %937 = vector.broadcast %819 : f32 to vector<1x128xf32>
    %938 = arith.mulf %937, %772 : vector<1x128xf32>
    %939 = arith.subf %936, %938 : vector<1x128xf32>
    %940 = vector.broadcast %818 : f32 to vector<1x128xf32>
    %941 = arith.mulf %940, %782 : vector<1x128xf32>
    %942 = vector.broadcast %819 : f32 to vector<1x128xf32>
    %943 = arith.mulf %942, %807 : vector<1x128xf32>
    %944 = arith.addf %941, %943 : vector<1x128xf32>
    %945 = vector.broadcast %818 : f32 to vector<1x128xf32>
    %946 = arith.mulf %945, %787 : vector<1x128xf32>
    %947 = vector.broadcast %819 : f32 to vector<1x128xf32>
    %948 = arith.mulf %947, %802 : vector<1x128xf32>
    %949 = arith.subf %946, %948 : vector<1x128xf32>
    %950 = vector.broadcast %818 : f32 to vector<1x128xf32>
    %951 = arith.mulf %950, %802 : vector<1x128xf32>
    %952 = vector.broadcast %819 : f32 to vector<1x128xf32>
    %953 = arith.mulf %952, %787 : vector<1x128xf32>
    %954 = arith.addf %951, %953 : vector<1x128xf32>
    %955 = vector.broadcast %818 : f32 to vector<1x128xf32>
    %956 = arith.mulf %955, %807 : vector<1x128xf32>
    %957 = vector.broadcast %819 : f32 to vector<1x128xf32>
    %958 = arith.mulf %957, %782 : vector<1x128xf32>
    %959 = arith.subf %956, %958 : vector<1x128xf32>
    %960 = vector.broadcast %818 : f32 to vector<1x128xf32>
    %961 = arith.mulf %960, %812 : vector<1x128xf32>
    %962 = vector.broadcast %819 : f32 to vector<1x128xf32>
    %963 = arith.mulf %962, %797 : vector<1x128xf32>
    %964 = arith.addf %961, %963 : vector<1x128xf32>
    %965 = vector.broadcast %818 : f32 to vector<1x128xf32>
    %966 = arith.mulf %965, %817 : vector<1x128xf32>
    %967 = vector.broadcast %819 : f32 to vector<1x128xf32>
    %968 = arith.mulf %967, %792 : vector<1x128xf32>
    %969 = arith.subf %966, %968 : vector<1x128xf32>
    %970 = vector.broadcast %818 : f32 to vector<1x128xf32>
    %971 = arith.mulf %970, %792 : vector<1x128xf32>
    %972 = vector.broadcast %819 : f32 to vector<1x128xf32>
    %973 = arith.mulf %972, %817 : vector<1x128xf32>
    %974 = arith.addf %971, %973 : vector<1x128xf32>
    %975 = vector.broadcast %818 : f32 to vector<1x128xf32>
    %976 = arith.mulf %975, %797 : vector<1x128xf32>
    %977 = vector.broadcast %819 : f32 to vector<1x128xf32>
    %978 = arith.mulf %977, %812 : vector<1x128xf32>
    %979 = arith.subf %976, %978 : vector<1x128xf32>
    %c0_348 = arith.constant 0 : index
    %c2_349 = arith.constant 2 : index
    %980 = memref.load %arg4[%c0_348, %c2_349] : memref<1x4xf32, #tpu.memory_space<smem>>
    %c0_350 = arith.constant 0 : index
    %c2_351 = arith.constant 2 : index
    %981 = memref.load %arg5[%c0_350, %c2_351] : memref<1x4xf32, #tpu.memory_space<smem>>
    %982 = vector.broadcast %980 : f32 to vector<1x128xf32>
    %983 = arith.mulf %982, %824 : vector<1x128xf32>
    %984 = vector.broadcast %981 : f32 to vector<1x128xf32>
    %985 = arith.mulf %984, %869 : vector<1x128xf32>
    %986 = arith.addf %983, %985 : vector<1x128xf32>
    %987 = vector.broadcast %980 : f32 to vector<1x128xf32>
    %988 = arith.mulf %987, %829 : vector<1x128xf32>
    %989 = vector.broadcast %981 : f32 to vector<1x128xf32>
    %990 = arith.mulf %989, %864 : vector<1x128xf32>
    %991 = arith.subf %988, %990 : vector<1x128xf32>
    %992 = vector.broadcast %980 : f32 to vector<1x128xf32>
    %993 = arith.mulf %992, %864 : vector<1x128xf32>
    %994 = vector.broadcast %981 : f32 to vector<1x128xf32>
    %995 = arith.mulf %994, %829 : vector<1x128xf32>
    %996 = arith.addf %993, %995 : vector<1x128xf32>
    %997 = vector.broadcast %980 : f32 to vector<1x128xf32>
    %998 = arith.mulf %997, %869 : vector<1x128xf32>
    %999 = vector.broadcast %981 : f32 to vector<1x128xf32>
    %1000 = arith.mulf %999, %824 : vector<1x128xf32>
    %1001 = arith.subf %998, %1000 : vector<1x128xf32>
    %1002 = vector.broadcast %980 : f32 to vector<1x128xf32>
    %1003 = arith.mulf %1002, %844 : vector<1x128xf32>
    %1004 = vector.broadcast %981 : f32 to vector<1x128xf32>
    %1005 = arith.mulf %1004, %889 : vector<1x128xf32>
    %1006 = arith.addf %1003, %1005 : vector<1x128xf32>
    %1007 = vector.broadcast %980 : f32 to vector<1x128xf32>
    %1008 = arith.mulf %1007, %849 : vector<1x128xf32>
    %1009 = vector.broadcast %981 : f32 to vector<1x128xf32>
    %1010 = arith.mulf %1009, %884 : vector<1x128xf32>
    %1011 = arith.subf %1008, %1010 : vector<1x128xf32>
    %1012 = vector.broadcast %980 : f32 to vector<1x128xf32>
    %1013 = arith.mulf %1012, %884 : vector<1x128xf32>
    %1014 = vector.broadcast %981 : f32 to vector<1x128xf32>
    %1015 = arith.mulf %1014, %849 : vector<1x128xf32>
    %1016 = arith.addf %1013, %1015 : vector<1x128xf32>
    %1017 = vector.broadcast %980 : f32 to vector<1x128xf32>
    %1018 = arith.mulf %1017, %889 : vector<1x128xf32>
    %1019 = vector.broadcast %981 : f32 to vector<1x128xf32>
    %1020 = arith.mulf %1019, %844 : vector<1x128xf32>
    %1021 = arith.subf %1018, %1020 : vector<1x128xf32>
    %1022 = vector.broadcast %980 : f32 to vector<1x128xf32>
    %1023 = arith.mulf %1022, %874 : vector<1x128xf32>
    %1024 = vector.broadcast %981 : f32 to vector<1x128xf32>
    %1025 = arith.mulf %1024, %839 : vector<1x128xf32>
    %1026 = arith.addf %1023, %1025 : vector<1x128xf32>
    %1027 = vector.broadcast %980 : f32 to vector<1x128xf32>
    %1028 = arith.mulf %1027, %879 : vector<1x128xf32>
    %1029 = vector.broadcast %981 : f32 to vector<1x128xf32>
    %1030 = arith.mulf %1029, %834 : vector<1x128xf32>
    %1031 = arith.subf %1028, %1030 : vector<1x128xf32>
    %1032 = vector.broadcast %980 : f32 to vector<1x128xf32>
    %1033 = arith.mulf %1032, %834 : vector<1x128xf32>
    %1034 = vector.broadcast %981 : f32 to vector<1x128xf32>
    %1035 = arith.mulf %1034, %879 : vector<1x128xf32>
    %1036 = arith.addf %1033, %1035 : vector<1x128xf32>
    %1037 = vector.broadcast %980 : f32 to vector<1x128xf32>
    %1038 = arith.mulf %1037, %839 : vector<1x128xf32>
    %1039 = vector.broadcast %981 : f32 to vector<1x128xf32>
    %1040 = arith.mulf %1039, %874 : vector<1x128xf32>
    %1041 = arith.subf %1038, %1040 : vector<1x128xf32>
    %1042 = vector.broadcast %980 : f32 to vector<1x128xf32>
    %1043 = arith.mulf %1042, %894 : vector<1x128xf32>
    %1044 = vector.broadcast %981 : f32 to vector<1x128xf32>
    %1045 = arith.mulf %1044, %859 : vector<1x128xf32>
    %1046 = arith.addf %1043, %1045 : vector<1x128xf32>
    %1047 = vector.broadcast %980 : f32 to vector<1x128xf32>
    %1048 = arith.mulf %1047, %899 : vector<1x128xf32>
    %1049 = vector.broadcast %981 : f32 to vector<1x128xf32>
    %1050 = arith.mulf %1049, %854 : vector<1x128xf32>
    %1051 = arith.subf %1048, %1050 : vector<1x128xf32>
    %1052 = vector.broadcast %980 : f32 to vector<1x128xf32>
    %1053 = arith.mulf %1052, %854 : vector<1x128xf32>
    %1054 = vector.broadcast %981 : f32 to vector<1x128xf32>
    %1055 = arith.mulf %1054, %899 : vector<1x128xf32>
    %1056 = arith.addf %1053, %1055 : vector<1x128xf32>
    %1057 = vector.broadcast %980 : f32 to vector<1x128xf32>
    %1058 = arith.mulf %1057, %859 : vector<1x128xf32>
    %1059 = vector.broadcast %981 : f32 to vector<1x128xf32>
    %1060 = arith.mulf %1059, %894 : vector<1x128xf32>
    %1061 = arith.subf %1058, %1060 : vector<1x128xf32>
    %1062 = vector.broadcast %980 : f32 to vector<1x128xf32>
    %1063 = arith.mulf %1062, %904 : vector<1x128xf32>
    %1064 = vector.broadcast %981 : f32 to vector<1x128xf32>
    %1065 = arith.mulf %1064, %949 : vector<1x128xf32>
    %1066 = arith.addf %1063, %1065 : vector<1x128xf32>
    %1067 = vector.broadcast %980 : f32 to vector<1x128xf32>
    %1068 = arith.mulf %1067, %909 : vector<1x128xf32>
    %1069 = vector.broadcast %981 : f32 to vector<1x128xf32>
    %1070 = arith.mulf %1069, %944 : vector<1x128xf32>
    %1071 = arith.subf %1068, %1070 : vector<1x128xf32>
    %1072 = vector.broadcast %980 : f32 to vector<1x128xf32>
    %1073 = arith.mulf %1072, %944 : vector<1x128xf32>
    %1074 = vector.broadcast %981 : f32 to vector<1x128xf32>
    %1075 = arith.mulf %1074, %909 : vector<1x128xf32>
    %1076 = arith.addf %1073, %1075 : vector<1x128xf32>
    %1077 = vector.broadcast %980 : f32 to vector<1x128xf32>
    %1078 = arith.mulf %1077, %949 : vector<1x128xf32>
    %1079 = vector.broadcast %981 : f32 to vector<1x128xf32>
    %1080 = arith.mulf %1079, %904 : vector<1x128xf32>
    %1081 = arith.subf %1078, %1080 : vector<1x128xf32>
    %1082 = vector.broadcast %980 : f32 to vector<1x128xf32>
    %1083 = arith.mulf %1082, %924 : vector<1x128xf32>
    %1084 = vector.broadcast %981 : f32 to vector<1x128xf32>
    %1085 = arith.mulf %1084, %969 : vector<1x128xf32>
    %1086 = arith.addf %1083, %1085 : vector<1x128xf32>
    %1087 = vector.broadcast %980 : f32 to vector<1x128xf32>
    %1088 = arith.mulf %1087, %929 : vector<1x128xf32>
    %1089 = vector.broadcast %981 : f32 to vector<1x128xf32>
    %1090 = arith.mulf %1089, %964 : vector<1x128xf32>
    %1091 = arith.subf %1088, %1090 : vector<1x128xf32>
    %1092 = vector.broadcast %980 : f32 to vector<1x128xf32>
    %1093 = arith.mulf %1092, %964 : vector<1x128xf32>
    %1094 = vector.broadcast %981 : f32 to vector<1x128xf32>
    %1095 = arith.mulf %1094, %929 : vector<1x128xf32>
    %1096 = arith.addf %1093, %1095 : vector<1x128xf32>
    %1097 = vector.broadcast %980 : f32 to vector<1x128xf32>
    %1098 = arith.mulf %1097, %969 : vector<1x128xf32>
    %1099 = vector.broadcast %981 : f32 to vector<1x128xf32>
    %1100 = arith.mulf %1099, %924 : vector<1x128xf32>
    %1101 = arith.subf %1098, %1100 : vector<1x128xf32>
    %1102 = vector.broadcast %980 : f32 to vector<1x128xf32>
    %1103 = arith.mulf %1102, %954 : vector<1x128xf32>
    %1104 = vector.broadcast %981 : f32 to vector<1x128xf32>
    %1105 = arith.mulf %1104, %919 : vector<1x128xf32>
    %1106 = arith.addf %1103, %1105 : vector<1x128xf32>
    %1107 = vector.broadcast %980 : f32 to vector<1x128xf32>
    %1108 = arith.mulf %1107, %959 : vector<1x128xf32>
    %1109 = vector.broadcast %981 : f32 to vector<1x128xf32>
    %1110 = arith.mulf %1109, %914 : vector<1x128xf32>
    %1111 = arith.subf %1108, %1110 : vector<1x128xf32>
    %1112 = vector.broadcast %980 : f32 to vector<1x128xf32>
    %1113 = arith.mulf %1112, %914 : vector<1x128xf32>
    %1114 = vector.broadcast %981 : f32 to vector<1x128xf32>
    %1115 = arith.mulf %1114, %959 : vector<1x128xf32>
    %1116 = arith.addf %1113, %1115 : vector<1x128xf32>
    %1117 = vector.broadcast %980 : f32 to vector<1x128xf32>
    %1118 = arith.mulf %1117, %919 : vector<1x128xf32>
    %1119 = vector.broadcast %981 : f32 to vector<1x128xf32>
    %1120 = arith.mulf %1119, %954 : vector<1x128xf32>
    %1121 = arith.subf %1118, %1120 : vector<1x128xf32>
    %1122 = vector.broadcast %980 : f32 to vector<1x128xf32>
    %1123 = arith.mulf %1122, %974 : vector<1x128xf32>
    %1124 = vector.broadcast %981 : f32 to vector<1x128xf32>
    %1125 = arith.mulf %1124, %939 : vector<1x128xf32>
    %1126 = arith.addf %1123, %1125 : vector<1x128xf32>
    %1127 = vector.broadcast %980 : f32 to vector<1x128xf32>
    %1128 = arith.mulf %1127, %979 : vector<1x128xf32>
    %1129 = vector.broadcast %981 : f32 to vector<1x128xf32>
    %1130 = arith.mulf %1129, %934 : vector<1x128xf32>
    %1131 = arith.subf %1128, %1130 : vector<1x128xf32>
    %1132 = vector.broadcast %980 : f32 to vector<1x128xf32>
    %1133 = arith.mulf %1132, %934 : vector<1x128xf32>
    %1134 = vector.broadcast %981 : f32 to vector<1x128xf32>
    %1135 = arith.mulf %1134, %979 : vector<1x128xf32>
    %1136 = arith.addf %1133, %1135 : vector<1x128xf32>
    %1137 = vector.broadcast %980 : f32 to vector<1x128xf32>
    %1138 = arith.mulf %1137, %939 : vector<1x128xf32>
    %1139 = vector.broadcast %981 : f32 to vector<1x128xf32>
    %1140 = arith.mulf %1139, %974 : vector<1x128xf32>
    %1141 = arith.subf %1138, %1140 : vector<1x128xf32>
    %c0_352 = arith.constant 0 : index
    %c3_353 = arith.constant 3 : index
    %1142 = memref.load %arg4[%c0_352, %c3_353] : memref<1x4xf32, #tpu.memory_space<smem>>
    %c0_354 = arith.constant 0 : index
    %c3_355 = arith.constant 3 : index
    %1143 = memref.load %arg5[%c0_354, %c3_355] : memref<1x4xf32, #tpu.memory_space<smem>>
    %1144 = vector.broadcast %1142 : f32 to vector<1x128xf32>
    %1145 = arith.mulf %1144, %986 : vector<1x128xf32>
    %1146 = vector.broadcast %1143 : f32 to vector<1x128xf32>
    %1147 = arith.mulf %1146, %1071 : vector<1x128xf32>
    %1148 = arith.addf %1145, %1147 : vector<1x128xf32>
    %1149 = vector.broadcast %1142 : f32 to vector<1x128xf32>
    %1150 = arith.mulf %1149, %991 : vector<1x128xf32>
    %1151 = vector.broadcast %1143 : f32 to vector<1x128xf32>
    %1152 = arith.mulf %1151, %1066 : vector<1x128xf32>
    %1153 = arith.subf %1150, %1152 : vector<1x128xf32>
    %1154 = vector.broadcast %1142 : f32 to vector<1x128xf32>
    %1155 = arith.mulf %1154, %1066 : vector<1x128xf32>
    %1156 = vector.broadcast %1143 : f32 to vector<1x128xf32>
    %1157 = arith.mulf %1156, %991 : vector<1x128xf32>
    %1158 = arith.addf %1155, %1157 : vector<1x128xf32>
    %1159 = vector.broadcast %1142 : f32 to vector<1x128xf32>
    %1160 = arith.mulf %1159, %1071 : vector<1x128xf32>
    %1161 = vector.broadcast %1143 : f32 to vector<1x128xf32>
    %1162 = arith.mulf %1161, %986 : vector<1x128xf32>
    %1163 = arith.subf %1160, %1162 : vector<1x128xf32>
    %1164 = vector.broadcast %1142 : f32 to vector<1x128xf32>
    %1165 = arith.mulf %1164, %1006 : vector<1x128xf32>
    %1166 = vector.broadcast %1143 : f32 to vector<1x128xf32>
    %1167 = arith.mulf %1166, %1091 : vector<1x128xf32>
    %1168 = arith.addf %1165, %1167 : vector<1x128xf32>
    %1169 = vector.broadcast %1142 : f32 to vector<1x128xf32>
    %1170 = arith.mulf %1169, %1011 : vector<1x128xf32>
    %1171 = vector.broadcast %1143 : f32 to vector<1x128xf32>
    %1172 = arith.mulf %1171, %1086 : vector<1x128xf32>
    %1173 = arith.subf %1170, %1172 : vector<1x128xf32>
    %1174 = vector.broadcast %1142 : f32 to vector<1x128xf32>
    %1175 = arith.mulf %1174, %1086 : vector<1x128xf32>
    %1176 = vector.broadcast %1143 : f32 to vector<1x128xf32>
    %1177 = arith.mulf %1176, %1011 : vector<1x128xf32>
    %1178 = arith.addf %1175, %1177 : vector<1x128xf32>
    %1179 = vector.broadcast %1142 : f32 to vector<1x128xf32>
    %1180 = arith.mulf %1179, %1091 : vector<1x128xf32>
    %1181 = vector.broadcast %1143 : f32 to vector<1x128xf32>
    %1182 = arith.mulf %1181, %1006 : vector<1x128xf32>
    %1183 = arith.subf %1180, %1182 : vector<1x128xf32>
    %1184 = vector.broadcast %1142 : f32 to vector<1x128xf32>
    %1185 = arith.mulf %1184, %1026 : vector<1x128xf32>
    %1186 = vector.broadcast %1143 : f32 to vector<1x128xf32>
    %1187 = arith.mulf %1186, %1111 : vector<1x128xf32>
    %1188 = arith.addf %1185, %1187 : vector<1x128xf32>
    %1189 = vector.broadcast %1142 : f32 to vector<1x128xf32>
    %1190 = arith.mulf %1189, %1031 : vector<1x128xf32>
    %1191 = vector.broadcast %1143 : f32 to vector<1x128xf32>
    %1192 = arith.mulf %1191, %1106 : vector<1x128xf32>
    %1193 = arith.subf %1190, %1192 : vector<1x128xf32>
    %1194 = vector.broadcast %1142 : f32 to vector<1x128xf32>
    %1195 = arith.mulf %1194, %1106 : vector<1x128xf32>
    %1196 = vector.broadcast %1143 : f32 to vector<1x128xf32>
    %1197 = arith.mulf %1196, %1031 : vector<1x128xf32>
    %1198 = arith.addf %1195, %1197 : vector<1x128xf32>
    %1199 = vector.broadcast %1142 : f32 to vector<1x128xf32>
    %1200 = arith.mulf %1199, %1111 : vector<1x128xf32>
    %1201 = vector.broadcast %1143 : f32 to vector<1x128xf32>
    %1202 = arith.mulf %1201, %1026 : vector<1x128xf32>
    %1203 = arith.subf %1200, %1202 : vector<1x128xf32>
    %1204 = vector.broadcast %1142 : f32 to vector<1x128xf32>
    %1205 = arith.mulf %1204, %1046 : vector<1x128xf32>
    %1206 = vector.broadcast %1143 : f32 to vector<1x128xf32>
    %1207 = arith.mulf %1206, %1131 : vector<1x128xf32>
    %1208 = arith.addf %1205, %1207 : vector<1x128xf32>
    %1209 = vector.broadcast %1142 : f32 to vector<1x128xf32>
    %1210 = arith.mulf %1209, %1051 : vector<1x128xf32>
    %1211 = vector.broadcast %1143 : f32 to vector<1x128xf32>
    %1212 = arith.mulf %1211, %1126 : vector<1x128xf32>
    %1213 = arith.subf %1210, %1212 : vector<1x128xf32>
    %1214 = vector.broadcast %1142 : f32 to vector<1x128xf32>
    %1215 = arith.mulf %1214, %1126 : vector<1x128xf32>
    %1216 = vector.broadcast %1143 : f32 to vector<1x128xf32>
    %1217 = arith.mulf %1216, %1051 : vector<1x128xf32>
    %1218 = arith.addf %1215, %1217 : vector<1x128xf32>
    %1219 = vector.broadcast %1142 : f32 to vector<1x128xf32>
    %1220 = arith.mulf %1219, %1131 : vector<1x128xf32>
    %1221 = vector.broadcast %1143 : f32 to vector<1x128xf32>
    %1222 = arith.mulf %1221, %1046 : vector<1x128xf32>
    %1223 = arith.subf %1220, %1222 : vector<1x128xf32>
    %1224 = vector.broadcast %1142 : f32 to vector<1x128xf32>
    %1225 = arith.mulf %1224, %1076 : vector<1x128xf32>
    %1226 = vector.broadcast %1143 : f32 to vector<1x128xf32>
    %1227 = arith.mulf %1226, %1001 : vector<1x128xf32>
    %1228 = arith.addf %1225, %1227 : vector<1x128xf32>
    %1229 = vector.broadcast %1142 : f32 to vector<1x128xf32>
    %1230 = arith.mulf %1229, %1081 : vector<1x128xf32>
    %1231 = vector.broadcast %1143 : f32 to vector<1x128xf32>
    %1232 = arith.mulf %1231, %996 : vector<1x128xf32>
    %1233 = arith.subf %1230, %1232 : vector<1x128xf32>
    %1234 = vector.broadcast %1142 : f32 to vector<1x128xf32>
    %1235 = arith.mulf %1234, %996 : vector<1x128xf32>
    %1236 = vector.broadcast %1143 : f32 to vector<1x128xf32>
    %1237 = arith.mulf %1236, %1081 : vector<1x128xf32>
    %1238 = arith.addf %1235, %1237 : vector<1x128xf32>
    %1239 = vector.broadcast %1142 : f32 to vector<1x128xf32>
    %1240 = arith.mulf %1239, %1001 : vector<1x128xf32>
    %1241 = vector.broadcast %1143 : f32 to vector<1x128xf32>
    %1242 = arith.mulf %1241, %1076 : vector<1x128xf32>
    %1243 = arith.subf %1240, %1242 : vector<1x128xf32>
    %1244 = vector.broadcast %1142 : f32 to vector<1x128xf32>
    %1245 = arith.mulf %1244, %1096 : vector<1x128xf32>
    %1246 = vector.broadcast %1143 : f32 to vector<1x128xf32>
    %1247 = arith.mulf %1246, %1021 : vector<1x128xf32>
    %1248 = arith.addf %1245, %1247 : vector<1x128xf32>
    %1249 = vector.broadcast %1142 : f32 to vector<1x128xf32>
    %1250 = arith.mulf %1249, %1101 : vector<1x128xf32>
    %1251 = vector.broadcast %1143 : f32 to vector<1x128xf32>
    %1252 = arith.mulf %1251, %1016 : vector<1x128xf32>
    %1253 = arith.subf %1250, %1252 : vector<1x128xf32>
    %1254 = vector.broadcast %1142 : f32 to vector<1x128xf32>
    %1255 = arith.mulf %1254, %1016 : vector<1x128xf32>
    %1256 = vector.broadcast %1143 : f32 to vector<1x128xf32>
    %1257 = arith.mulf %1256, %1101 : vector<1x128xf32>
    %1258 = arith.addf %1255, %1257 : vector<1x128xf32>
    %1259 = vector.broadcast %1142 : f32 to vector<1x128xf32>
    %1260 = arith.mulf %1259, %1021 : vector<1x128xf32>
    %1261 = vector.broadcast %1143 : f32 to vector<1x128xf32>
    %1262 = arith.mulf %1261, %1096 : vector<1x128xf32>
    %1263 = arith.subf %1260, %1262 : vector<1x128xf32>
    %1264 = vector.broadcast %1142 : f32 to vector<1x128xf32>
    %1265 = arith.mulf %1264, %1116 : vector<1x128xf32>
    %1266 = vector.broadcast %1143 : f32 to vector<1x128xf32>
    %1267 = arith.mulf %1266, %1041 : vector<1x128xf32>
    %1268 = arith.addf %1265, %1267 : vector<1x128xf32>
    %1269 = vector.broadcast %1142 : f32 to vector<1x128xf32>
    %1270 = arith.mulf %1269, %1121 : vector<1x128xf32>
    %1271 = vector.broadcast %1143 : f32 to vector<1x128xf32>
    %1272 = arith.mulf %1271, %1036 : vector<1x128xf32>
    %1273 = arith.subf %1270, %1272 : vector<1x128xf32>
    %1274 = vector.broadcast %1142 : f32 to vector<1x128xf32>
    %1275 = arith.mulf %1274, %1036 : vector<1x128xf32>
    %1276 = vector.broadcast %1143 : f32 to vector<1x128xf32>
    %1277 = arith.mulf %1276, %1121 : vector<1x128xf32>
    %1278 = arith.addf %1275, %1277 : vector<1x128xf32>
    %1279 = vector.broadcast %1142 : f32 to vector<1x128xf32>
    %1280 = arith.mulf %1279, %1041 : vector<1x128xf32>
    %1281 = vector.broadcast %1143 : f32 to vector<1x128xf32>
    %1282 = arith.mulf %1281, %1116 : vector<1x128xf32>
    %1283 = arith.subf %1280, %1282 : vector<1x128xf32>
    %1284 = vector.broadcast %1142 : f32 to vector<1x128xf32>
    %1285 = arith.mulf %1284, %1136 : vector<1x128xf32>
    %1286 = vector.broadcast %1143 : f32 to vector<1x128xf32>
    %1287 = arith.mulf %1286, %1061 : vector<1x128xf32>
    %1288 = arith.addf %1285, %1287 : vector<1x128xf32>
    %1289 = vector.broadcast %1142 : f32 to vector<1x128xf32>
    %1290 = arith.mulf %1289, %1141 : vector<1x128xf32>
    %1291 = vector.broadcast %1143 : f32 to vector<1x128xf32>
    %1292 = arith.mulf %1291, %1056 : vector<1x128xf32>
    %1293 = arith.subf %1290, %1292 : vector<1x128xf32>
    %1294 = vector.broadcast %1142 : f32 to vector<1x128xf32>
    %1295 = arith.mulf %1294, %1056 : vector<1x128xf32>
    %1296 = vector.broadcast %1143 : f32 to vector<1x128xf32>
    %1297 = arith.mulf %1296, %1141 : vector<1x128xf32>
    %1298 = arith.addf %1295, %1297 : vector<1x128xf32>
    %1299 = vector.broadcast %1142 : f32 to vector<1x128xf32>
    %1300 = arith.mulf %1299, %1061 : vector<1x128xf32>
    %1301 = vector.broadcast %1143 : f32 to vector<1x128xf32>
    %1302 = arith.mulf %1301, %1136 : vector<1x128xf32>
    %1303 = arith.subf %1300, %1302 : vector<1x128xf32>
    %1304 = arith.mulf %1148, %1148 : vector<1x128xf32>
    %1305 = arith.mulf %1153, %1153 : vector<1x128xf32>
    %1306 = arith.addf %1304, %1305 : vector<1x128xf32>
    %1307 = arith.mulf %1168, %1168 : vector<1x128xf32>
    %1308 = arith.mulf %1173, %1173 : vector<1x128xf32>
    %1309 = arith.addf %1307, %1308 : vector<1x128xf32>
    %1310 = arith.mulf %1188, %1188 : vector<1x128xf32>
    %1311 = arith.mulf %1193, %1193 : vector<1x128xf32>
    %1312 = arith.addf %1310, %1311 : vector<1x128xf32>
    %1313 = arith.mulf %1208, %1208 : vector<1x128xf32>
    %1314 = arith.mulf %1213, %1213 : vector<1x128xf32>
    %1315 = arith.addf %1313, %1314 : vector<1x128xf32>
    %1316 = arith.mulf %1228, %1228 : vector<1x128xf32>
    %1317 = arith.mulf %1233, %1233 : vector<1x128xf32>
    %1318 = arith.addf %1316, %1317 : vector<1x128xf32>
    %1319 = arith.mulf %1248, %1248 : vector<1x128xf32>
    %1320 = arith.mulf %1253, %1253 : vector<1x128xf32>
    %1321 = arith.addf %1319, %1320 : vector<1x128xf32>
    %1322 = arith.mulf %1268, %1268 : vector<1x128xf32>
    %1323 = arith.mulf %1273, %1273 : vector<1x128xf32>
    %1324 = arith.addf %1322, %1323 : vector<1x128xf32>
    %1325 = arith.mulf %1288, %1288 : vector<1x128xf32>
    %1326 = arith.mulf %1293, %1293 : vector<1x128xf32>
    %1327 = arith.addf %1325, %1326 : vector<1x128xf32>
    %1328 = arith.mulf %1178, %1178 : vector<1x128xf32>
    %1329 = arith.mulf %1183, %1183 : vector<1x128xf32>
    %1330 = arith.addf %1328, %1329 : vector<1x128xf32>
    %1331 = arith.mulf %1158, %1158 : vector<1x128xf32>
    %1332 = arith.mulf %1163, %1163 : vector<1x128xf32>
    %1333 = arith.addf %1331, %1332 : vector<1x128xf32>
    %1334 = arith.mulf %1218, %1218 : vector<1x128xf32>
    %1335 = arith.mulf %1223, %1223 : vector<1x128xf32>
    %1336 = arith.addf %1334, %1335 : vector<1x128xf32>
    %1337 = arith.mulf %1198, %1198 : vector<1x128xf32>
    %1338 = arith.mulf %1203, %1203 : vector<1x128xf32>
    %1339 = arith.addf %1337, %1338 : vector<1x128xf32>
    %1340 = arith.mulf %1258, %1258 : vector<1x128xf32>
    %1341 = arith.mulf %1263, %1263 : vector<1x128xf32>
    %1342 = arith.addf %1340, %1341 : vector<1x128xf32>
    %1343 = arith.mulf %1238, %1238 : vector<1x128xf32>
    %1344 = arith.mulf %1243, %1243 : vector<1x128xf32>
    %1345 = arith.addf %1343, %1344 : vector<1x128xf32>
    %1346 = arith.mulf %1298, %1298 : vector<1x128xf32>
    %1347 = arith.mulf %1303, %1303 : vector<1x128xf32>
    %1348 = arith.addf %1346, %1347 : vector<1x128xf32>
    %1349 = arith.mulf %1278, %1278 : vector<1x128xf32>
    %1350 = arith.mulf %1283, %1283 : vector<1x128xf32>
    %1351 = arith.addf %1349, %1350 : vector<1x128xf32>
    %1352 = arith.subf %1306, %1309 : vector<1x128xf32>
    %1353 = arith.addf %1352, %1312 : vector<1x128xf32>
    %1354 = arith.subf %1353, %1315 : vector<1x128xf32>
    %1355 = arith.addf %1354, %1318 : vector<1x128xf32>
    %1356 = arith.subf %1355, %1321 : vector<1x128xf32>
    %1357 = arith.addf %1356, %1324 : vector<1x128xf32>
    %1358 = arith.subf %1357, %1327 : vector<1x128xf32>
    %1359 = arith.addf %1358, %1330 : vector<1x128xf32>
    %1360 = arith.subf %1359, %1333 : vector<1x128xf32>
    %1361 = arith.addf %1360, %1336 : vector<1x128xf32>
    %1362 = arith.subf %1361, %1339 : vector<1x128xf32>
    %1363 = arith.addf %1362, %1342 : vector<1x128xf32>
    %1364 = arith.subf %1363, %1345 : vector<1x128xf32>
    %1365 = arith.addf %1364, %1348 : vector<1x128xf32>
    %1366 = arith.subf %1365, %1351 : vector<1x128xf32>
    %1367 = arith.addf %1306, %1309 : vector<1x128xf32>
    %1368 = arith.subf %1367, %1312 : vector<1x128xf32>
    %1369 = arith.subf %1368, %1315 : vector<1x128xf32>
    %1370 = arith.addf %1369, %1318 : vector<1x128xf32>
    %1371 = arith.addf %1370, %1321 : vector<1x128xf32>
    %1372 = arith.subf %1371, %1324 : vector<1x128xf32>
    %1373 = arith.subf %1372, %1327 : vector<1x128xf32>
    %1374 = arith.addf %1373, %1330 : vector<1x128xf32>
    %1375 = arith.addf %1374, %1333 : vector<1x128xf32>
    %1376 = arith.subf %1375, %1336 : vector<1x128xf32>
    %1377 = arith.subf %1376, %1339 : vector<1x128xf32>
    %1378 = arith.addf %1377, %1342 : vector<1x128xf32>
    %1379 = arith.addf %1378, %1345 : vector<1x128xf32>
    %1380 = arith.subf %1379, %1348 : vector<1x128xf32>
    %1381 = arith.subf %1380, %1351 : vector<1x128xf32>
    %1382 = arith.addf %1306, %1309 : vector<1x128xf32>
    %1383 = arith.addf %1382, %1312 : vector<1x128xf32>
    %1384 = arith.addf %1383, %1315 : vector<1x128xf32>
    %1385 = arith.subf %1384, %1318 : vector<1x128xf32>
    %1386 = arith.subf %1385, %1321 : vector<1x128xf32>
    %1387 = arith.subf %1386, %1324 : vector<1x128xf32>
    %1388 = arith.subf %1387, %1327 : vector<1x128xf32>
    %1389 = arith.addf %1388, %1330 : vector<1x128xf32>
    %1390 = arith.addf %1389, %1333 : vector<1x128xf32>
    %1391 = arith.addf %1390, %1336 : vector<1x128xf32>
    %1392 = arith.addf %1391, %1339 : vector<1x128xf32>
    %1393 = arith.subf %1392, %1342 : vector<1x128xf32>
    %1394 = arith.subf %1393, %1345 : vector<1x128xf32>
    %1395 = arith.subf %1394, %1348 : vector<1x128xf32>
    %1396 = arith.subf %1395, %1351 : vector<1x128xf32>
    %1397 = arith.addf %1306, %1309 : vector<1x128xf32>
    %1398 = arith.addf %1397, %1312 : vector<1x128xf32>
    %1399 = arith.addf %1398, %1315 : vector<1x128xf32>
    %1400 = arith.addf %1399, %1318 : vector<1x128xf32>
    %1401 = arith.addf %1400, %1321 : vector<1x128xf32>
    %1402 = arith.addf %1401, %1324 : vector<1x128xf32>
    %1403 = arith.addf %1402, %1327 : vector<1x128xf32>
    %1404 = arith.subf %1403, %1330 : vector<1x128xf32>
    %1405 = arith.subf %1404, %1333 : vector<1x128xf32>
    %1406 = arith.subf %1405, %1336 : vector<1x128xf32>
    %1407 = arith.subf %1406, %1339 : vector<1x128xf32>
    %1408 = arith.subf %1407, %1342 : vector<1x128xf32>
    %1409 = arith.subf %1408, %1345 : vector<1x128xf32>
    %1410 = arith.subf %1409, %1348 : vector<1x128xf32>
    %1411 = arith.subf %1410, %1351 : vector<1x128xf32>
    %c0_356 = arith.constant 0 : index
    %c0_357 = arith.constant 0 : index
    %1412 = memref.load %arg6[%c0_356, %c0_357] : memref<4x32xf32, #tpu.memory_space<smem>>
    %1413 = vector.broadcast %1412 : f32 to vector<1x128xf32>
    %1414 = arith.mulf %1366, %1413 : vector<1x128xf32>
    %c1_358 = arith.constant 1 : index
    %c0_359 = arith.constant 0 : index
    %1415 = memref.load %arg6[%c1_358, %c0_359] : memref<4x32xf32, #tpu.memory_space<smem>>
    %1416 = vector.broadcast %1415 : f32 to vector<1x128xf32>
    %1417 = arith.mulf %1381, %1416 : vector<1x128xf32>
    %1418 = arith.addf %1414, %1417 : vector<1x128xf32>
    %c2_360 = arith.constant 2 : index
    %c0_361 = arith.constant 0 : index
    %1419 = memref.load %arg6[%c2_360, %c0_361] : memref<4x32xf32, #tpu.memory_space<smem>>
    %1420 = vector.broadcast %1419 : f32 to vector<1x128xf32>
    %1421 = arith.mulf %1396, %1420 : vector<1x128xf32>
    %1422 = arith.addf %1418, %1421 : vector<1x128xf32>
    %c3_362 = arith.constant 3 : index
    %c0_363 = arith.constant 0 : index
    %1423 = memref.load %arg6[%c3_362, %c0_363] : memref<4x32xf32, #tpu.memory_space<smem>>
    %1424 = vector.broadcast %1423 : f32 to vector<1x128xf32>
    %1425 = arith.mulf %1411, %1424 : vector<1x128xf32>
    %1426 = arith.addf %1422, %1425 : vector<1x128xf32>
    %c0_364 = arith.constant 0 : index
    %c0_365 = arith.constant 0 : index
    %1427 = memref.load %arg7[%c0_364, %c0_365] : memref<1x32xf32, #tpu.memory_space<smem>>
    %1428 = vector.broadcast %1427 : f32 to vector<1x128xf32>
    %1429 = arith.addf %1426, %1428 : vector<1x128xf32>
    %c0_366 = arith.constant 0 : index
    %c0_367 = arith.constant 0 : index
    %c0_368 = arith.constant 0 : index
    %1430 = vector.load %arg8[%c0_366, %c0_367, %c0_368] : memref<32x1x128xf32, #tpu.memory_space<vmem>>, vector<1x1x128xf32>
    %1431 = vector.shape_cast %1430 : vector<1x1x128xf32> to vector<1x128xf32>
    %1432 = vector.shape_cast %1429 : vector<1x128xf32> to vector<1x1x128xf32>
    tpu.vector_store %arg8[%c0_366, %c0_367, %c0_368], %1432 {strides = array<i32>} : memref<32x1x128xf32, #tpu.memory_space<vmem>>, vector<1x1x128xf32>,
    %c0_369 = arith.constant 0 : index
    %c1_370 = arith.constant 1 : index
    %1433 = memref.load %arg6[%c0_369, %c1_370] : memref<4x32xf32, #tpu.memory_space<smem>>
    %1434 = vector.broadcast %1433 : f32 to vector<1x128xf32>
    %1435 = arith.mulf %1366, %1434 : vector<1x128xf32>
    %c1_371 = arith.constant 1 : index
    %c1_372 = arith.constant 1 : index
    %1436 = memref.load %arg6[%c1_371, %c1_372] : memref<4x32xf32, #tpu.memory_space<smem>>
    %1437 = vector.broadcast %1436 : f32 to vector<1x128xf32>
    %1438 = arith.mulf %1381, %1437 : vector<1x128xf32>
    %1439 = arith.addf %1435, %1438 : vector<1x128xf32>
    %c2_373 = arith.constant 2 : index
    %c1_374 = arith.constant 1 : index
    %1440 = memref.load %arg6[%c2_373, %c1_374] : memref<4x32xf32, #tpu.memory_space<smem>>
    %1441 = vector.broadcast %1440 : f32 to vector<1x128xf32>
    %1442 = arith.mulf %1396, %1441 : vector<1x128xf32>
    %1443 = arith.addf %1439, %1442 : vector<1x128xf32>
    %c3_375 = arith.constant 3 : index
    %c1_376 = arith.constant 1 : index
    %1444 = memref.load %arg6[%c3_375, %c1_376] : memref<4x32xf32, #tpu.memory_space<smem>>
    %1445 = vector.broadcast %1444 : f32 to vector<1x128xf32>
    %1446 = arith.mulf %1411, %1445 : vector<1x128xf32>
    %1447 = arith.addf %1443, %1446 : vector<1x128xf32>
    %c0_377 = arith.constant 0 : index
    %c1_378 = arith.constant 1 : index
    %1448 = memref.load %arg7[%c0_377, %c1_378] : memref<1x32xf32, #tpu.memory_space<smem>>
    %1449 = vector.broadcast %1448 : f32 to vector<1x128xf32>
    %1450 = arith.addf %1447, %1449 : vector<1x128xf32>
    %c1_379 = arith.constant 1 : index
    %c0_380 = arith.constant 0 : index
    %c0_381 = arith.constant 0 : index
    %1451 = vector.load %arg8[%c1_379, %c0_380, %c0_381] : memref<32x1x128xf32, #tpu.memory_space<vmem>>, vector<1x1x128xf32>
    %1452 = vector.shape_cast %1451 : vector<1x1x128xf32> to vector<1x128xf32>
    %1453 = vector.shape_cast %1450 : vector<1x128xf32> to vector<1x1x128xf32>
    tpu.vector_store %arg8[%c1_379, %c0_380, %c0_381], %1453 {strides = array<i32>} : memref<32x1x128xf32, #tpu.memory_space<vmem>>, vector<1x1x128xf32>,
    %c0_382 = arith.constant 0 : index
    %c2_383 = arith.constant 2 : index
    %1454 = memref.load %arg6[%c0_382, %c2_383] : memref<4x32xf32, #tpu.memory_space<smem>>
    %1455 = vector.broadcast %1454 : f32 to vector<1x128xf32>
    %1456 = arith.mulf %1366, %1455 : vector<1x128xf32>
    %c1_384 = arith.constant 1 : index
    %c2_385 = arith.constant 2 : index
    %1457 = memref.load %arg6[%c1_384, %c2_385] : memref<4x32xf32, #tpu.memory_space<smem>>
    %1458 = vector.broadcast %1457 : f32 to vector<1x128xf32>
    %1459 = arith.mulf %1381, %1458 : vector<1x128xf32>
    %1460 = arith.addf %1456, %1459 : vector<1x128xf32>
    %c2_386 = arith.constant 2 : index
    %c2_387 = arith.constant 2 : index
    %1461 = memref.load %arg6[%c2_386, %c2_387] : memref<4x32xf32, #tpu.memory_space<smem>>
    %1462 = vector.broadcast %1461 : f32 to vector<1x128xf32>
    %1463 = arith.mulf %1396, %1462 : vector<1x128xf32>
    %1464 = arith.addf %1460, %1463 : vector<1x128xf32>
    %c3_388 = arith.constant 3 : index
    %c2_389 = arith.constant 2 : index
    %1465 = memref.load %arg6[%c3_388, %c2_389] : memref<4x32xf32, #tpu.memory_space<smem>>
    %1466 = vector.broadcast %1465 : f32 to vector<1x128xf32>
    %1467 = arith.mulf %1411, %1466 : vector<1x128xf32>
    %1468 = arith.addf %1464, %1467 : vector<1x128xf32>
    %c0_390 = arith.constant 0 : index
    %c2_391 = arith.constant 2 : index
    %1469 = memref.load %arg7[%c0_390, %c2_391] : memref<1x32xf32, #tpu.memory_space<smem>>
    %1470 = vector.broadcast %1469 : f32 to vector<1x128xf32>
    %1471 = arith.addf %1468, %1470 : vector<1x128xf32>
    %c2_392 = arith.constant 2 : index
    %c0_393 = arith.constant 0 : index
    %c0_394 = arith.constant 0 : index
    %1472 = vector.load %arg8[%c2_392, %c0_393, %c0_394] : memref<32x1x128xf32, #tpu.memory_space<vmem>>, vector<1x1x128xf32>
    %1473 = vector.shape_cast %1472 : vector<1x1x128xf32> to vector<1x128xf32>
    %1474 = vector.shape_cast %1471 : vector<1x128xf32> to vector<1x1x128xf32>
    tpu.vector_store %arg8[%c2_392, %c0_393, %c0_394], %1474 {strides = array<i32>} : memref<32x1x128xf32, #tpu.memory_space<vmem>>, vector<1x1x128xf32>,
    %c0_395 = arith.constant 0 : index
    %c3_396 = arith.constant 3 : index
    %1475 = memref.load %arg6[%c0_395, %c3_396] : memref<4x32xf32, #tpu.memory_space<smem>>
    %1476 = vector.broadcast %1475 : f32 to vector<1x128xf32>
    %1477 = arith.mulf %1366, %1476 : vector<1x128xf32>
    %c1_397 = arith.constant 1 : index
    %c3_398 = arith.constant 3 : index
    %1478 = memref.load %arg6[%c1_397, %c3_398] : memref<4x32xf32, #tpu.memory_space<smem>>
    %1479 = vector.broadcast %1478 : f32 to vector<1x128xf32>
    %1480 = arith.mulf %1381, %1479 : vector<1x128xf32>
    %1481 = arith.addf %1477, %1480 : vector<1x128xf32>
    %c2_399 = arith.constant 2 : index
    %c3_400 = arith.constant 3 : index
    %1482 = memref.load %arg6[%c2_399, %c3_400] : memref<4x32xf32, #tpu.memory_space<smem>>
    %1483 = vector.broadcast %1482 : f32 to vector<1x128xf32>
    %1484 = arith.mulf %1396, %1483 : vector<1x128xf32>
    %1485 = arith.addf %1481, %1484 : vector<1x128xf32>
    %c3_401 = arith.constant 3 : index
    %c3_402 = arith.constant 3 : index
    %1486 = memref.load %arg6[%c3_401, %c3_402] : memref<4x32xf32, #tpu.memory_space<smem>>
    %1487 = vector.broadcast %1486 : f32 to vector<1x128xf32>
    %1488 = arith.mulf %1411, %1487 : vector<1x128xf32>
    %1489 = arith.addf %1485, %1488 : vector<1x128xf32>
    %c0_403 = arith.constant 0 : index
    %c3_404 = arith.constant 3 : index
    %1490 = memref.load %arg7[%c0_403, %c3_404] : memref<1x32xf32, #tpu.memory_space<smem>>
    %1491 = vector.broadcast %1490 : f32 to vector<1x128xf32>
    %1492 = arith.addf %1489, %1491 : vector<1x128xf32>
    %c3_405 = arith.constant 3 : index
    %c0_406 = arith.constant 0 : index
    %c0_407 = arith.constant 0 : index
    %1493 = vector.load %arg8[%c3_405, %c0_406, %c0_407] : memref<32x1x128xf32, #tpu.memory_space<vmem>>, vector<1x1x128xf32>
    %1494 = vector.shape_cast %1493 : vector<1x1x128xf32> to vector<1x128xf32>
    %1495 = vector.shape_cast %1492 : vector<1x128xf32> to vector<1x1x128xf32>
    tpu.vector_store %arg8[%c3_405, %c0_406, %c0_407], %1495 {strides = array<i32>} : memref<32x1x128xf32, #tpu.memory_space<vmem>>, vector<1x1x128xf32>,
    %c0_408 = arith.constant 0 : index
    %c4_409 = arith.constant 4 : index
    %1496 = memref.load %arg6[%c0_408, %c4_409] : memref<4x32xf32, #tpu.memory_space<smem>>
    %1497 = vector.broadcast %1496 : f32 to vector<1x128xf32>
    %1498 = arith.mulf %1366, %1497 : vector<1x128xf32>
    %c1_410 = arith.constant 1 : index
    %c4_411 = arith.constant 4 : index
    %1499 = memref.load %arg6[%c1_410, %c4_411] : memref<4x32xf32, #tpu.memory_space<smem>>
    %1500 = vector.broadcast %1499 : f32 to vector<1x128xf32>
    %1501 = arith.mulf %1381, %1500 : vector<1x128xf32>
    %1502 = arith.addf %1498, %1501 : vector<1x128xf32>
    %c2_412 = arith.constant 2 : index
    %c4_413 = arith.constant 4 : index
    %1503 = memref.load %arg6[%c2_412, %c4_413] : memref<4x32xf32, #tpu.memory_space<smem>>
    %1504 = vector.broadcast %1503 : f32 to vector<1x128xf32>
    %1505 = arith.mulf %1396, %1504 : vector<1x128xf32>
    %1506 = arith.addf %1502, %1505 : vector<1x128xf32>
    %c3_414 = arith.constant 3 : index
    %c4_415 = arith.constant 4 : index
    %1507 = memref.load %arg6[%c3_414, %c4_415] : memref<4x32xf32, #tpu.memory_space<smem>>
    %1508 = vector.broadcast %1507 : f32 to vector<1x128xf32>
    %1509 = arith.mulf %1411, %1508 : vector<1x128xf32>
    %1510 = arith.addf %1506, %1509 : vector<1x128xf32>
    %c0_416 = arith.constant 0 : index
    %c4_417 = arith.constant 4 : index
    %1511 = memref.load %arg7[%c0_416, %c4_417] : memref<1x32xf32, #tpu.memory_space<smem>>
    %1512 = vector.broadcast %1511 : f32 to vector<1x128xf32>
    %1513 = arith.addf %1510, %1512 : vector<1x128xf32>
    %c4_418 = arith.constant 4 : index
    %c0_419 = arith.constant 0 : index
    %c0_420 = arith.constant 0 : index
    %1514 = vector.load %arg8[%c4_418, %c0_419, %c0_420] : memref<32x1x128xf32, #tpu.memory_space<vmem>>, vector<1x1x128xf32>
    %1515 = vector.shape_cast %1514 : vector<1x1x128xf32> to vector<1x128xf32>
    %1516 = vector.shape_cast %1513 : vector<1x128xf32> to vector<1x1x128xf32>
    tpu.vector_store %arg8[%c4_418, %c0_419, %c0_420], %1516 {strides = array<i32>} : memref<32x1x128xf32, #tpu.memory_space<vmem>>, vector<1x1x128xf32>,
    %c0_421 = arith.constant 0 : index
    %c5_422 = arith.constant 5 : index
    %1517 = memref.load %arg6[%c0_421, %c5_422] : memref<4x32xf32, #tpu.memory_space<smem>>
    %1518 = vector.broadcast %1517 : f32 to vector<1x128xf32>
    %1519 = arith.mulf %1366, %1518 : vector<1x128xf32>
    %c1_423 = arith.constant 1 : index
    %c5_424 = arith.constant 5 : index
    %1520 = memref.load %arg6[%c1_423, %c5_424] : memref<4x32xf32, #tpu.memory_space<smem>>
    %1521 = vector.broadcast %1520 : f32 to vector<1x128xf32>
    %1522 = arith.mulf %1381, %1521 : vector<1x128xf32>
    %1523 = arith.addf %1519, %1522 : vector<1x128xf32>
    %c2_425 = arith.constant 2 : index
    %c5_426 = arith.constant 5 : index
    %1524 = memref.load %arg6[%c2_425, %c5_426] : memref<4x32xf32, #tpu.memory_space<smem>>
    %1525 = vector.broadcast %1524 : f32 to vector<1x128xf32>
    %1526 = arith.mulf %1396, %1525 : vector<1x128xf32>
    %1527 = arith.addf %1523, %1526 : vector<1x128xf32>
    %c3_427 = arith.constant 3 : index
    %c5_428 = arith.constant 5 : index
    %1528 = memref.load %arg6[%c3_427, %c5_428] : memref<4x32xf32, #tpu.memory_space<smem>>
    %1529 = vector.broadcast %1528 : f32 to vector<1x128xf32>
    %1530 = arith.mulf %1411, %1529 : vector<1x128xf32>
    %1531 = arith.addf %1527, %1530 : vector<1x128xf32>
    %c0_429 = arith.constant 0 : index
    %c5_430 = arith.constant 5 : index
    %1532 = memref.load %arg7[%c0_429, %c5_430] : memref<1x32xf32, #tpu.memory_space<smem>>
    %1533 = vector.broadcast %1532 : f32 to vector<1x128xf32>
    %1534 = arith.addf %1531, %1533 : vector<1x128xf32>
    %c5_431 = arith.constant 5 : index
    %c0_432 = arith.constant 0 : index
    %c0_433 = arith.constant 0 : index
    %1535 = vector.load %arg8[%c5_431, %c0_432, %c0_433] : memref<32x1x128xf32, #tpu.memory_space<vmem>>, vector<1x1x128xf32>
    %1536 = vector.shape_cast %1535 : vector<1x1x128xf32> to vector<1x128xf32>
    %1537 = vector.shape_cast %1534 : vector<1x128xf32> to vector<1x1x128xf32>
    tpu.vector_store %arg8[%c5_431, %c0_432, %c0_433], %1537 {strides = array<i32>} : memref<32x1x128xf32, #tpu.memory_space<vmem>>, vector<1x1x128xf32>,
    %c0_434 = arith.constant 0 : index
    %c6_435 = arith.constant 6 : index
    %1538 = memref.load %arg6[%c0_434, %c6_435] : memref<4x32xf32, #tpu.memory_space<smem>>
    %1539 = vector.broadcast %1538 : f32 to vector<1x128xf32>
    %1540 = arith.mulf %1366, %1539 : vector<1x128xf32>
    %c1_436 = arith.constant 1 : index
    %c6_437 = arith.constant 6 : index
    %1541 = memref.load %arg6[%c1_436, %c6_437] : memref<4x32xf32, #tpu.memory_space<smem>>
    %1542 = vector.broadcast %1541 : f32 to vector<1x128xf32>
    %1543 = arith.mulf %1381, %1542 : vector<1x128xf32>
    %1544 = arith.addf %1540, %1543 : vector<1x128xf32>
    %c2_438 = arith.constant 2 : index
    %c6_439 = arith.constant 6 : index
    %1545 = memref.load %arg6[%c2_438, %c6_439] : memref<4x32xf32, #tpu.memory_space<smem>>
    %1546 = vector.broadcast %1545 : f32 to vector<1x128xf32>
    %1547 = arith.mulf %1396, %1546 : vector<1x128xf32>
    %1548 = arith.addf %1544, %1547 : vector<1x128xf32>
    %c3_440 = arith.constant 3 : index
    %c6_441 = arith.constant 6 : index
    %1549 = memref.load %arg6[%c3_440, %c6_441] : memref<4x32xf32, #tpu.memory_space<smem>>
    %1550 = vector.broadcast %1549 : f32 to vector<1x128xf32>
    %1551 = arith.mulf %1411, %1550 : vector<1x128xf32>
    %1552 = arith.addf %1548, %1551 : vector<1x128xf32>
    %c0_442 = arith.constant 0 : index
    %c6_443 = arith.constant 6 : index
    %1553 = memref.load %arg7[%c0_442, %c6_443] : memref<1x32xf32, #tpu.memory_space<smem>>
    %1554 = vector.broadcast %1553 : f32 to vector<1x128xf32>
    %1555 = arith.addf %1552, %1554 : vector<1x128xf32>
    %c6_444 = arith.constant 6 : index
    %c0_445 = arith.constant 0 : index
    %c0_446 = arith.constant 0 : index
    %1556 = vector.load %arg8[%c6_444, %c0_445, %c0_446] : memref<32x1x128xf32, #tpu.memory_space<vmem>>, vector<1x1x128xf32>
    %1557 = vector.shape_cast %1556 : vector<1x1x128xf32> to vector<1x128xf32>
    %1558 = vector.shape_cast %1555 : vector<1x128xf32> to vector<1x1x128xf32>
    tpu.vector_store %arg8[%c6_444, %c0_445, %c0_446], %1558 {strides = array<i32>} : memref<32x1x128xf32, #tpu.memory_space<vmem>>, vector<1x1x128xf32>,
    %c0_447 = arith.constant 0 : index
    %c7_448 = arith.constant 7 : index
    %1559 = memref.load %arg6[%c0_447, %c7_448] : memref<4x32xf32, #tpu.memory_space<smem>>
    %1560 = vector.broadcast %1559 : f32 to vector<1x128xf32>
    %1561 = arith.mulf %1366, %1560 : vector<1x128xf32>
    %c1_449 = arith.constant 1 : index
    %c7_450 = arith.constant 7 : index
    %1562 = memref.load %arg6[%c1_449, %c7_450] : memref<4x32xf32, #tpu.memory_space<smem>>
    %1563 = vector.broadcast %1562 : f32 to vector<1x128xf32>
    %1564 = arith.mulf %1381, %1563 : vector<1x128xf32>
    %1565 = arith.addf %1561, %1564 : vector<1x128xf32>
    %c2_451 = arith.constant 2 : index
    %c7_452 = arith.constant 7 : index
    %1566 = memref.load %arg6[%c2_451, %c7_452] : memref<4x32xf32, #tpu.memory_space<smem>>
    %1567 = vector.broadcast %1566 : f32 to vector<1x128xf32>
    %1568 = arith.mulf %1396, %1567 : vector<1x128xf32>
    %1569 = arith.addf %1565, %1568 : vector<1x128xf32>
    %c3_453 = arith.constant 3 : index
    %c7_454 = arith.constant 7 : index
    %1570 = memref.load %arg6[%c3_453, %c7_454] : memref<4x32xf32, #tpu.memory_space<smem>>
    %1571 = vector.broadcast %1570 : f32 to vector<1x128xf32>
    %1572 = arith.mulf %1411, %1571 : vector<1x128xf32>
    %1573 = arith.addf %1569, %1572 : vector<1x128xf32>
    %c0_455 = arith.constant 0 : index
    %c7_456 = arith.constant 7 : index
    %1574 = memref.load %arg7[%c0_455, %c7_456] : memref<1x32xf32, #tpu.memory_space<smem>>
    %1575 = vector.broadcast %1574 : f32 to vector<1x128xf32>
    %1576 = arith.addf %1573, %1575 : vector<1x128xf32>
    %c7_457 = arith.constant 7 : index
    %c0_458 = arith.constant 0 : index
    %c0_459 = arith.constant 0 : index
    %1577 = vector.load %arg8[%c7_457, %c0_458, %c0_459] : memref<32x1x128xf32, #tpu.memory_space<vmem>>, vector<1x1x128xf32>
    %1578 = vector.shape_cast %1577 : vector<1x1x128xf32> to vector<1x128xf32>
    %1579 = vector.shape_cast %1576 : vector<1x128xf32> to vector<1x1x128xf32>
    tpu.vector_store %arg8[%c7_457, %c0_458, %c0_459], %1579 {strides = array<i32>} : memref<32x1x128xf32, #tpu.memory_space<vmem>>, vector<1x1x128xf32>,
    %c0_460 = arith.constant 0 : index
    %c8_461 = arith.constant 8 : index
    %1580 = memref.load %arg6[%c0_460, %c8_461] : memref<4x32xf32, #tpu.memory_space<smem>>
    %1581 = vector.broadcast %1580 : f32 to vector<1x128xf32>
    %1582 = arith.mulf %1366, %1581 : vector<1x128xf32>
    %c1_462 = arith.constant 1 : index
    %c8_463 = arith.constant 8 : index
    %1583 = memref.load %arg6[%c1_462, %c8_463] : memref<4x32xf32, #tpu.memory_space<smem>>
    %1584 = vector.broadcast %1583 : f32 to vector<1x128xf32>
    %1585 = arith.mulf %1381, %1584 : vector<1x128xf32>
    %1586 = arith.addf %1582, %1585 : vector<1x128xf32>
    %c2_464 = arith.constant 2 : index
    %c8_465 = arith.constant 8 : index
    %1587 = memref.load %arg6[%c2_464, %c8_465] : memref<4x32xf32, #tpu.memory_space<smem>>
    %1588 = vector.broadcast %1587 : f32 to vector<1x128xf32>
    %1589 = arith.mulf %1396, %1588 : vector<1x128xf32>
    %1590 = arith.addf %1586, %1589 : vector<1x128xf32>
    %c3_466 = arith.constant 3 : index
    %c8_467 = arith.constant 8 : index
    %1591 = memref.load %arg6[%c3_466, %c8_467] : memref<4x32xf32, #tpu.memory_space<smem>>
    %1592 = vector.broadcast %1591 : f32 to vector<1x128xf32>
    %1593 = arith.mulf %1411, %1592 : vector<1x128xf32>
    %1594 = arith.addf %1590, %1593 : vector<1x128xf32>
    %c0_468 = arith.constant 0 : index
    %c8_469 = arith.constant 8 : index
    %1595 = memref.load %arg7[%c0_468, %c8_469] : memref<1x32xf32, #tpu.memory_space<smem>>
    %1596 = vector.broadcast %1595 : f32 to vector<1x128xf32>
    %1597 = arith.addf %1594, %1596 : vector<1x128xf32>
    %c8_470 = arith.constant 8 : index
    %c0_471 = arith.constant 0 : index
    %c0_472 = arith.constant 0 : index
    %1598 = vector.load %arg8[%c8_470, %c0_471, %c0_472] : memref<32x1x128xf32, #tpu.memory_space<vmem>>, vector<1x1x128xf32>
    %1599 = vector.shape_cast %1598 : vector<1x1x128xf32> to vector<1x128xf32>
    %1600 = vector.shape_cast %1597 : vector<1x128xf32> to vector<1x1x128xf32>
    tpu.vector_store %arg8[%c8_470, %c0_471, %c0_472], %1600 {strides = array<i32>} : memref<32x1x128xf32, #tpu.memory_space<vmem>>, vector<1x1x128xf32>,
    %c0_473 = arith.constant 0 : index
    %c9_474 = arith.constant 9 : index
    %1601 = memref.load %arg6[%c0_473, %c9_474] : memref<4x32xf32, #tpu.memory_space<smem>>
    %1602 = vector.broadcast %1601 : f32 to vector<1x128xf32>
    %1603 = arith.mulf %1366, %1602 : vector<1x128xf32>
    %c1_475 = arith.constant 1 : index
    %c9_476 = arith.constant 9 : index
    %1604 = memref.load %arg6[%c1_475, %c9_476] : memref<4x32xf32, #tpu.memory_space<smem>>
    %1605 = vector.broadcast %1604 : f32 to vector<1x128xf32>
    %1606 = arith.mulf %1381, %1605 : vector<1x128xf32>
    %1607 = arith.addf %1603, %1606 : vector<1x128xf32>
    %c2_477 = arith.constant 2 : index
    %c9_478 = arith.constant 9 : index
    %1608 = memref.load %arg6[%c2_477, %c9_478] : memref<4x32xf32, #tpu.memory_space<smem>>
    %1609 = vector.broadcast %1608 : f32 to vector<1x128xf32>
    %1610 = arith.mulf %1396, %1609 : vector<1x128xf32>
    %1611 = arith.addf %1607, %1610 : vector<1x128xf32>
    %c3_479 = arith.constant 3 : index
    %c9_480 = arith.constant 9 : index
    %1612 = memref.load %arg6[%c3_479, %c9_480] : memref<4x32xf32, #tpu.memory_space<smem>>
    %1613 = vector.broadcast %1612 : f32 to vector<1x128xf32>
    %1614 = arith.mulf %1411, %1613 : vector<1x128xf32>
    %1615 = arith.addf %1611, %1614 : vector<1x128xf32>
    %c0_481 = arith.constant 0 : index
    %c9_482 = arith.constant 9 : index
    %1616 = memref.load %arg7[%c0_481, %c9_482] : memref<1x32xf32, #tpu.memory_space<smem>>
    %1617 = vector.broadcast %1616 : f32 to vector<1x128xf32>
    %1618 = arith.addf %1615, %1617 : vector<1x128xf32>
    %c9_483 = arith.constant 9 : index
    %c0_484 = arith.constant 0 : index
    %c0_485 = arith.constant 0 : index
    %1619 = vector.load %arg8[%c9_483, %c0_484, %c0_485] : memref<32x1x128xf32, #tpu.memory_space<vmem>>, vector<1x1x128xf32>
    %1620 = vector.shape_cast %1619 : vector<1x1x128xf32> to vector<1x128xf32>
    %1621 = vector.shape_cast %1618 : vector<1x128xf32> to vector<1x1x128xf32>
    tpu.vector_store %arg8[%c9_483, %c0_484, %c0_485], %1621 {strides = array<i32>} : memref<32x1x128xf32, #tpu.memory_space<vmem>>, vector<1x1x128xf32>,
    %c0_486 = arith.constant 0 : index
    %c10_487 = arith.constant 10 : index
    %1622 = memref.load %arg6[%c0_486, %c10_487] : memref<4x32xf32, #tpu.memory_space<smem>>
    %1623 = vector.broadcast %1622 : f32 to vector<1x128xf32>
    %1624 = arith.mulf %1366, %1623 : vector<1x128xf32>
    %c1_488 = arith.constant 1 : index
    %c10_489 = arith.constant 10 : index
    %1625 = memref.load %arg6[%c1_488, %c10_489] : memref<4x32xf32, #tpu.memory_space<smem>>
    %1626 = vector.broadcast %1625 : f32 to vector<1x128xf32>
    %1627 = arith.mulf %1381, %1626 : vector<1x128xf32>
    %1628 = arith.addf %1624, %1627 : vector<1x128xf32>
    %c2_490 = arith.constant 2 : index
    %c10_491 = arith.constant 10 : index
    %1629 = memref.load %arg6[%c2_490, %c10_491] : memref<4x32xf32, #tpu.memory_space<smem>>
    %1630 = vector.broadcast %1629 : f32 to vector<1x128xf32>
    %1631 = arith.mulf %1396, %1630 : vector<1x128xf32>
    %1632 = arith.addf %1628, %1631 : vector<1x128xf32>
    %c3_492 = arith.constant 3 : index
    %c10_493 = arith.constant 10 : index
    %1633 = memref.load %arg6[%c3_492, %c10_493] : memref<4x32xf32, #tpu.memory_space<smem>>
    %1634 = vector.broadcast %1633 : f32 to vector<1x128xf32>
    %1635 = arith.mulf %1411, %1634 : vector<1x128xf32>
    %1636 = arith.addf %1632, %1635 : vector<1x128xf32>
    %c0_494 = arith.constant 0 : index
    %c10_495 = arith.constant 10 : index
    %1637 = memref.load %arg7[%c0_494, %c10_495] : memref<1x32xf32, #tpu.memory_space<smem>>
    %1638 = vector.broadcast %1637 : f32 to vector<1x128xf32>
    %1639 = arith.addf %1636, %1638 : vector<1x128xf32>
    %c10_496 = arith.constant 10 : index
    %c0_497 = arith.constant 0 : index
    %c0_498 = arith.constant 0 : index
    %1640 = vector.load %arg8[%c10_496, %c0_497, %c0_498] : memref<32x1x128xf32, #tpu.memory_space<vmem>>, vector<1x1x128xf32>
    %1641 = vector.shape_cast %1640 : vector<1x1x128xf32> to vector<1x128xf32>
    %1642 = vector.shape_cast %1639 : vector<1x128xf32> to vector<1x1x128xf32>
    tpu.vector_store %arg8[%c10_496, %c0_497, %c0_498], %1642 {strides = array<i32>} : memref<32x1x128xf32, #tpu.memory_space<vmem>>, vector<1x1x128xf32>,
    %c0_499 = arith.constant 0 : index
    %c11_500 = arith.constant 11 : index
    %1643 = memref.load %arg6[%c0_499, %c11_500] : memref<4x32xf32, #tpu.memory_space<smem>>
    %1644 = vector.broadcast %1643 : f32 to vector<1x128xf32>
    %1645 = arith.mulf %1366, %1644 : vector<1x128xf32>
    %c1_501 = arith.constant 1 : index
    %c11_502 = arith.constant 11 : index
    %1646 = memref.load %arg6[%c1_501, %c11_502] : memref<4x32xf32, #tpu.memory_space<smem>>
    %1647 = vector.broadcast %1646 : f32 to vector<1x128xf32>
    %1648 = arith.mulf %1381, %1647 : vector<1x128xf32>
    %1649 = arith.addf %1645, %1648 : vector<1x128xf32>
    %c2_503 = arith.constant 2 : index
    %c11_504 = arith.constant 11 : index
    %1650 = memref.load %arg6[%c2_503, %c11_504] : memref<4x32xf32, #tpu.memory_space<smem>>
    %1651 = vector.broadcast %1650 : f32 to vector<1x128xf32>
    %1652 = arith.mulf %1396, %1651 : vector<1x128xf32>
    %1653 = arith.addf %1649, %1652 : vector<1x128xf32>
    %c3_505 = arith.constant 3 : index
    %c11_506 = arith.constant 11 : index
    %1654 = memref.load %arg6[%c3_505, %c11_506] : memref<4x32xf32, #tpu.memory_space<smem>>
    %1655 = vector.broadcast %1654 : f32 to vector<1x128xf32>
    %1656 = arith.mulf %1411, %1655 : vector<1x128xf32>
    %1657 = arith.addf %1653, %1656 : vector<1x128xf32>
    %c0_507 = arith.constant 0 : index
    %c11_508 = arith.constant 11 : index
    %1658 = memref.load %arg7[%c0_507, %c11_508] : memref<1x32xf32, #tpu.memory_space<smem>>
    %1659 = vector.broadcast %1658 : f32 to vector<1x128xf32>
    %1660 = arith.addf %1657, %1659 : vector<1x128xf32>
    %c11_509 = arith.constant 11 : index
    %c0_510 = arith.constant 0 : index
    %c0_511 = arith.constant 0 : index
    %1661 = vector.load %arg8[%c11_509, %c0_510, %c0_511] : memref<32x1x128xf32, #tpu.memory_space<vmem>>, vector<1x1x128xf32>
    %1662 = vector.shape_cast %1661 : vector<1x1x128xf32> to vector<1x128xf32>
    %1663 = vector.shape_cast %1660 : vector<1x128xf32> to vector<1x1x128xf32>
    tpu.vector_store %arg8[%c11_509, %c0_510, %c0_511], %1663 {strides = array<i32>} : memref<32x1x128xf32, #tpu.memory_space<vmem>>, vector<1x1x128xf32>,
    %c0_512 = arith.constant 0 : index
    %c12_513 = arith.constant 12 : index
    %1664 = memref.load %arg6[%c0_512, %c12_513] : memref<4x32xf32, #tpu.memory_space<smem>>
    %1665 = vector.broadcast %1664 : f32 to vector<1x128xf32>
    %1666 = arith.mulf %1366, %1665 : vector<1x128xf32>
    %c1_514 = arith.constant 1 : index
    %c12_515 = arith.constant 12 : index
    %1667 = memref.load %arg6[%c1_514, %c12_515] : memref<4x32xf32, #tpu.memory_space<smem>>
    %1668 = vector.broadcast %1667 : f32 to vector<1x128xf32>
    %1669 = arith.mulf %1381, %1668 : vector<1x128xf32>
    %1670 = arith.addf %1666, %1669 : vector<1x128xf32>
    %c2_516 = arith.constant 2 : index
    %c12_517 = arith.constant 12 : index
    %1671 = memref.load %arg6[%c2_516, %c12_517] : memref<4x32xf32, #tpu.memory_space<smem>>
    %1672 = vector.broadcast %1671 : f32 to vector<1x128xf32>
    %1673 = arith.mulf %1396, %1672 : vector<1x128xf32>
    %1674 = arith.addf %1670, %1673 : vector<1x128xf32>
    %c3_518 = arith.constant 3 : index
    %c12_519 = arith.constant 12 : index
    %1675 = memref.load %arg6[%c3_518, %c12_519] : memref<4x32xf32, #tpu.memory_space<smem>>
    %1676 = vector.broadcast %1675 : f32 to vector<1x128xf32>
    %1677 = arith.mulf %1411, %1676 : vector<1x128xf32>
    %1678 = arith.addf %1674, %1677 : vector<1x128xf32>
    %c0_520 = arith.constant 0 : index
    %c12_521 = arith.constant 12 : index
    %1679 = memref.load %arg7[%c0_520, %c12_521] : memref<1x32xf32, #tpu.memory_space<smem>>
    %1680 = vector.broadcast %1679 : f32 to vector<1x128xf32>
    %1681 = arith.addf %1678, %1680 : vector<1x128xf32>
    %c12_522 = arith.constant 12 : index
    %c0_523 = arith.constant 0 : index
    %c0_524 = arith.constant 0 : index
    %1682 = vector.load %arg8[%c12_522, %c0_523, %c0_524] : memref<32x1x128xf32, #tpu.memory_space<vmem>>, vector<1x1x128xf32>
    %1683 = vector.shape_cast %1682 : vector<1x1x128xf32> to vector<1x128xf32>
    %1684 = vector.shape_cast %1681 : vector<1x128xf32> to vector<1x1x128xf32>
    tpu.vector_store %arg8[%c12_522, %c0_523, %c0_524], %1684 {strides = array<i32>} : memref<32x1x128xf32, #tpu.memory_space<vmem>>, vector<1x1x128xf32>,
    %c0_525 = arith.constant 0 : index
    %c13_526 = arith.constant 13 : index
    %1685 = memref.load %arg6[%c0_525, %c13_526] : memref<4x32xf32, #tpu.memory_space<smem>>
    %1686 = vector.broadcast %1685 : f32 to vector<1x128xf32>
    %1687 = arith.mulf %1366, %1686 : vector<1x128xf32>
    %c1_527 = arith.constant 1 : index
    %c13_528 = arith.constant 13 : index
    %1688 = memref.load %arg6[%c1_527, %c13_528] : memref<4x32xf32, #tpu.memory_space<smem>>
    %1689 = vector.broadcast %1688 : f32 to vector<1x128xf32>
    %1690 = arith.mulf %1381, %1689 : vector<1x128xf32>
    %1691 = arith.addf %1687, %1690 : vector<1x128xf32>
    %c2_529 = arith.constant 2 : index
    %c13_530 = arith.constant 13 : index
    %1692 = memref.load %arg6[%c2_529, %c13_530] : memref<4x32xf32, #tpu.memory_space<smem>>
    %1693 = vector.broadcast %1692 : f32 to vector<1x128xf32>
    %1694 = arith.mulf %1396, %1693 : vector<1x128xf32>
    %1695 = arith.addf %1691, %1694 : vector<1x128xf32>
    %c3_531 = arith.constant 3 : index
    %c13_532 = arith.constant 13 : index
    %1696 = memref.load %arg6[%c3_531, %c13_532] : memref<4x32xf32, #tpu.memory_space<smem>>
    %1697 = vector.broadcast %1696 : f32 to vector<1x128xf32>
    %1698 = arith.mulf %1411, %1697 : vector<1x128xf32>
    %1699 = arith.addf %1695, %1698 : vector<1x128xf32>
    %c0_533 = arith.constant 0 : index
    %c13_534 = arith.constant 13 : index
    %1700 = memref.load %arg7[%c0_533, %c13_534] : memref<1x32xf32, #tpu.memory_space<smem>>
    %1701 = vector.broadcast %1700 : f32 to vector<1x128xf32>
    %1702 = arith.addf %1699, %1701 : vector<1x128xf32>
    %c13_535 = arith.constant 13 : index
    %c0_536 = arith.constant 0 : index
    %c0_537 = arith.constant 0 : index
    %1703 = vector.load %arg8[%c13_535, %c0_536, %c0_537] : memref<32x1x128xf32, #tpu.memory_space<vmem>>, vector<1x1x128xf32>
    %1704 = vector.shape_cast %1703 : vector<1x1x128xf32> to vector<1x128xf32>
    %1705 = vector.shape_cast %1702 : vector<1x128xf32> to vector<1x1x128xf32>
    tpu.vector_store %arg8[%c13_535, %c0_536, %c0_537], %1705 {strides = array<i32>} : memref<32x1x128xf32, #tpu.memory_space<vmem>>, vector<1x1x128xf32>,
    %c0_538 = arith.constant 0 : index
    %c14_539 = arith.constant 14 : index
    %1706 = memref.load %arg6[%c0_538, %c14_539] : memref<4x32xf32, #tpu.memory_space<smem>>
    %1707 = vector.broadcast %1706 : f32 to vector<1x128xf32>
    %1708 = arith.mulf %1366, %1707 : vector<1x128xf32>
    %c1_540 = arith.constant 1 : index
    %c14_541 = arith.constant 14 : index
    %1709 = memref.load %arg6[%c1_540, %c14_541] : memref<4x32xf32, #tpu.memory_space<smem>>
    %1710 = vector.broadcast %1709 : f32 to vector<1x128xf32>
    %1711 = arith.mulf %1381, %1710 : vector<1x128xf32>
    %1712 = arith.addf %1708, %1711 : vector<1x128xf32>
    %c2_542 = arith.constant 2 : index
    %c14_543 = arith.constant 14 : index
    %1713 = memref.load %arg6[%c2_542, %c14_543] : memref<4x32xf32, #tpu.memory_space<smem>>
    %1714 = vector.broadcast %1713 : f32 to vector<1x128xf32>
    %1715 = arith.mulf %1396, %1714 : vector<1x128xf32>
    %1716 = arith.addf %1712, %1715 : vector<1x128xf32>
    %c3_544 = arith.constant 3 : index
    %c14_545 = arith.constant 14 : index
    %1717 = memref.load %arg6[%c3_544, %c14_545] : memref<4x32xf32, #tpu.memory_space<smem>>
    %1718 = vector.broadcast %1717 : f32 to vector<1x128xf32>
    %1719 = arith.mulf %1411, %1718 : vector<1x128xf32>
    %1720 = arith.addf %1716, %1719 : vector<1x128xf32>
    %c0_546 = arith.constant 0 : index
    %c14_547 = arith.constant 14 : index
    %1721 = memref.load %arg7[%c0_546, %c14_547] : memref<1x32xf32, #tpu.memory_space<smem>>
    %1722 = vector.broadcast %1721 : f32 to vector<1x128xf32>
    %1723 = arith.addf %1720, %1722 : vector<1x128xf32>
    %c14_548 = arith.constant 14 : index
    %c0_549 = arith.constant 0 : index
    %c0_550 = arith.constant 0 : index
    %1724 = vector.load %arg8[%c14_548, %c0_549, %c0_550] : memref<32x1x128xf32, #tpu.memory_space<vmem>>, vector<1x1x128xf32>
    %1725 = vector.shape_cast %1724 : vector<1x1x128xf32> to vector<1x128xf32>
    %1726 = vector.shape_cast %1723 : vector<1x128xf32> to vector<1x1x128xf32>
    tpu.vector_store %arg8[%c14_548, %c0_549, %c0_550], %1726 {strides = array<i32>} : memref<32x1x128xf32, #tpu.memory_space<vmem>>, vector<1x1x128xf32>,
    %c0_551 = arith.constant 0 : index
    %c15_552 = arith.constant 15 : index
    %1727 = memref.load %arg6[%c0_551, %c15_552] : memref<4x32xf32, #tpu.memory_space<smem>>
    %1728 = vector.broadcast %1727 : f32 to vector<1x128xf32>
    %1729 = arith.mulf %1366, %1728 : vector<1x128xf32>
    %c1_553 = arith.constant 1 : index
    %c15_554 = arith.constant 15 : index
    %1730 = memref.load %arg6[%c1_553, %c15_554] : memref<4x32xf32, #tpu.memory_space<smem>>
    %1731 = vector.broadcast %1730 : f32 to vector<1x128xf32>
    %1732 = arith.mulf %1381, %1731 : vector<1x128xf32>
    %1733 = arith.addf %1729, %1732 : vector<1x128xf32>
    %c2_555 = arith.constant 2 : index
    %c15_556 = arith.constant 15 : index
    %1734 = memref.load %arg6[%c2_555, %c15_556] : memref<4x32xf32, #tpu.memory_space<smem>>
    %1735 = vector.broadcast %1734 : f32 to vector<1x128xf32>
    %1736 = arith.mulf %1396, %1735 : vector<1x128xf32>
    %1737 = arith.addf %1733, %1736 : vector<1x128xf32>
    %c3_557 = arith.constant 3 : index
    %c15_558 = arith.constant 15 : index
    %1738 = memref.load %arg6[%c3_557, %c15_558] : memref<4x32xf32, #tpu.memory_space<smem>>
    %1739 = vector.broadcast %1738 : f32 to vector<1x128xf32>
    %1740 = arith.mulf %1411, %1739 : vector<1x128xf32>
    %1741 = arith.addf %1737, %1740 : vector<1x128xf32>
    %c0_559 = arith.constant 0 : index
    %c15_560 = arith.constant 15 : index
    %1742 = memref.load %arg7[%c0_559, %c15_560] : memref<1x32xf32, #tpu.memory_space<smem>>
    %1743 = vector.broadcast %1742 : f32 to vector<1x128xf32>
    %1744 = arith.addf %1741, %1743 : vector<1x128xf32>
    %c15_561 = arith.constant 15 : index
    %c0_562 = arith.constant 0 : index
    %c0_563 = arith.constant 0 : index
    %1745 = vector.load %arg8[%c15_561, %c0_562, %c0_563] : memref<32x1x128xf32, #tpu.memory_space<vmem>>, vector<1x1x128xf32>
    %1746 = vector.shape_cast %1745 : vector<1x1x128xf32> to vector<1x128xf32>
    %1747 = vector.shape_cast %1744 : vector<1x128xf32> to vector<1x1x128xf32>
    tpu.vector_store %arg8[%c15_561, %c0_562, %c0_563], %1747 {strides = array<i32>} : memref<32x1x128xf32, #tpu.memory_space<vmem>>, vector<1x1x128xf32>,
    %c0_564 = arith.constant 0 : index
    %c16_565 = arith.constant 16 : index
    %1748 = memref.load %arg6[%c0_564, %c16_565] : memref<4x32xf32, #tpu.memory_space<smem>>
    %1749 = vector.broadcast %1748 : f32 to vector<1x128xf32>
    %1750 = arith.mulf %1366, %1749 : vector<1x128xf32>
    %c1_566 = arith.constant 1 : index
    %c16_567 = arith.constant 16 : index
    %1751 = memref.load %arg6[%c1_566, %c16_567] : memref<4x32xf32, #tpu.memory_space<smem>>
    %1752 = vector.broadcast %1751 : f32 to vector<1x128xf32>
    %1753 = arith.mulf %1381, %1752 : vector<1x128xf32>
    %1754 = arith.addf %1750, %1753 : vector<1x128xf32>
    %c2_568 = arith.constant 2 : index
    %c16_569 = arith.constant 16 : index
    %1755 = memref.load %arg6[%c2_568, %c16_569] : memref<4x32xf32, #tpu.memory_space<smem>>
    %1756 = vector.broadcast %1755 : f32 to vector<1x128xf32>
    %1757 = arith.mulf %1396, %1756 : vector<1x128xf32>
    %1758 = arith.addf %1754, %1757 : vector<1x128xf32>
    %c3_570 = arith.constant 3 : index
    %c16_571 = arith.constant 16 : index
    %1759 = memref.load %arg6[%c3_570, %c16_571] : memref<4x32xf32, #tpu.memory_space<smem>>
    %1760 = vector.broadcast %1759 : f32 to vector<1x128xf32>
    %1761 = arith.mulf %1411, %1760 : vector<1x128xf32>
    %1762 = arith.addf %1758, %1761 : vector<1x128xf32>
    %c0_572 = arith.constant 0 : index
    %c16_573 = arith.constant 16 : index
    %1763 = memref.load %arg7[%c0_572, %c16_573] : memref<1x32xf32, #tpu.memory_space<smem>>
    %1764 = vector.broadcast %1763 : f32 to vector<1x128xf32>
    %1765 = arith.addf %1762, %1764 : vector<1x128xf32>
    %c16_574 = arith.constant 16 : index
    %c0_575 = arith.constant 0 : index
    %c0_576 = arith.constant 0 : index
    %1766 = vector.load %arg8[%c16_574, %c0_575, %c0_576] : memref<32x1x128xf32, #tpu.memory_space<vmem>>, vector<1x1x128xf32>
    %1767 = vector.shape_cast %1766 : vector<1x1x128xf32> to vector<1x128xf32>
    %1768 = vector.shape_cast %1765 : vector<1x128xf32> to vector<1x1x128xf32>
    tpu.vector_store %arg8[%c16_574, %c0_575, %c0_576], %1768 {strides = array<i32>} : memref<32x1x128xf32, #tpu.memory_space<vmem>>, vector<1x1x128xf32>,
    %c0_577 = arith.constant 0 : index
    %c17_578 = arith.constant 17 : index
    %1769 = memref.load %arg6[%c0_577, %c17_578] : memref<4x32xf32, #tpu.memory_space<smem>>
    %1770 = vector.broadcast %1769 : f32 to vector<1x128xf32>
    %1771 = arith.mulf %1366, %1770 : vector<1x128xf32>
    %c1_579 = arith.constant 1 : index
    %c17_580 = arith.constant 17 : index
    %1772 = memref.load %arg6[%c1_579, %c17_580] : memref<4x32xf32, #tpu.memory_space<smem>>
    %1773 = vector.broadcast %1772 : f32 to vector<1x128xf32>
    %1774 = arith.mulf %1381, %1773 : vector<1x128xf32>
    %1775 = arith.addf %1771, %1774 : vector<1x128xf32>
    %c2_581 = arith.constant 2 : index
    %c17_582 = arith.constant 17 : index
    %1776 = memref.load %arg6[%c2_581, %c17_582] : memref<4x32xf32, #tpu.memory_space<smem>>
    %1777 = vector.broadcast %1776 : f32 to vector<1x128xf32>
    %1778 = arith.mulf %1396, %1777 : vector<1x128xf32>
    %1779 = arith.addf %1775, %1778 : vector<1x128xf32>
    %c3_583 = arith.constant 3 : index
    %c17_584 = arith.constant 17 : index
    %1780 = memref.load %arg6[%c3_583, %c17_584] : memref<4x32xf32, #tpu.memory_space<smem>>
    %1781 = vector.broadcast %1780 : f32 to vector<1x128xf32>
    %1782 = arith.mulf %1411, %1781 : vector<1x128xf32>
    %1783 = arith.addf %1779, %1782 : vector<1x128xf32>
    %c0_585 = arith.constant 0 : index
    %c17_586 = arith.constant 17 : index
    %1784 = memref.load %arg7[%c0_585, %c17_586] : memref<1x32xf32, #tpu.memory_space<smem>>
    %1785 = vector.broadcast %1784 : f32 to vector<1x128xf32>
    %1786 = arith.addf %1783, %1785 : vector<1x128xf32>
    %c17_587 = arith.constant 17 : index
    %c0_588 = arith.constant 0 : index
    %c0_589 = arith.constant 0 : index
    %1787 = vector.load %arg8[%c17_587, %c0_588, %c0_589] : memref<32x1x128xf32, #tpu.memory_space<vmem>>, vector<1x1x128xf32>
    %1788 = vector.shape_cast %1787 : vector<1x1x128xf32> to vector<1x128xf32>
    %1789 = vector.shape_cast %1786 : vector<1x128xf32> to vector<1x1x128xf32>
    tpu.vector_store %arg8[%c17_587, %c0_588, %c0_589], %1789 {strides = array<i32>} : memref<32x1x128xf32, #tpu.memory_space<vmem>>, vector<1x1x128xf32>,
    %c0_590 = arith.constant 0 : index
    %c18_591 = arith.constant 18 : index
    %1790 = memref.load %arg6[%c0_590, %c18_591] : memref<4x32xf32, #tpu.memory_space<smem>>
    %1791 = vector.broadcast %1790 : f32 to vector<1x128xf32>
    %1792 = arith.mulf %1366, %1791 : vector<1x128xf32>
    %c1_592 = arith.constant 1 : index
    %c18_593 = arith.constant 18 : index
    %1793 = memref.load %arg6[%c1_592, %c18_593] : memref<4x32xf32, #tpu.memory_space<smem>>
    %1794 = vector.broadcast %1793 : f32 to vector<1x128xf32>
    %1795 = arith.mulf %1381, %1794 : vector<1x128xf32>
    %1796 = arith.addf %1792, %1795 : vector<1x128xf32>
    %c2_594 = arith.constant 2 : index
    %c18_595 = arith.constant 18 : index
    %1797 = memref.load %arg6[%c2_594, %c18_595] : memref<4x32xf32, #tpu.memory_space<smem>>
    %1798 = vector.broadcast %1797 : f32 to vector<1x128xf32>
    %1799 = arith.mulf %1396, %1798 : vector<1x128xf32>
    %1800 = arith.addf %1796, %1799 : vector<1x128xf32>
    %c3_596 = arith.constant 3 : index
    %c18_597 = arith.constant 18 : index
    %1801 = memref.load %arg6[%c3_596, %c18_597] : memref<4x32xf32, #tpu.memory_space<smem>>
    %1802 = vector.broadcast %1801 : f32 to vector<1x128xf32>
    %1803 = arith.mulf %1411, %1802 : vector<1x128xf32>
    %1804 = arith.addf %1800, %1803 : vector<1x128xf32>
    %c0_598 = arith.constant 0 : index
    %c18_599 = arith.constant 18 : index
    %1805 = memref.load %arg7[%c0_598, %c18_599] : memref<1x32xf32, #tpu.memory_space<smem>>
    %1806 = vector.broadcast %1805 : f32 to vector<1x128xf32>
    %1807 = arith.addf %1804, %1806 : vector<1x128xf32>
    %c18_600 = arith.constant 18 : index
    %c0_601 = arith.constant 0 : index
    %c0_602 = arith.constant 0 : index
    %1808 = vector.load %arg8[%c18_600, %c0_601, %c0_602] : memref<32x1x128xf32, #tpu.memory_space<vmem>>, vector<1x1x128xf32>
    %1809 = vector.shape_cast %1808 : vector<1x1x128xf32> to vector<1x128xf32>
    %1810 = vector.shape_cast %1807 : vector<1x128xf32> to vector<1x1x128xf32>
    tpu.vector_store %arg8[%c18_600, %c0_601, %c0_602], %1810 {strides = array<i32>} : memref<32x1x128xf32, #tpu.memory_space<vmem>>, vector<1x1x128xf32>,
    %c0_603 = arith.constant 0 : index
    %c19_604 = arith.constant 19 : index
    %1811 = memref.load %arg6[%c0_603, %c19_604] : memref<4x32xf32, #tpu.memory_space<smem>>
    %1812 = vector.broadcast %1811 : f32 to vector<1x128xf32>
    %1813 = arith.mulf %1366, %1812 : vector<1x128xf32>
    %c1_605 = arith.constant 1 : index
    %c19_606 = arith.constant 19 : index
    %1814 = memref.load %arg6[%c1_605, %c19_606] : memref<4x32xf32, #tpu.memory_space<smem>>
    %1815 = vector.broadcast %1814 : f32 to vector<1x128xf32>
    %1816 = arith.mulf %1381, %1815 : vector<1x128xf32>
    %1817 = arith.addf %1813, %1816 : vector<1x128xf32>
    %c2_607 = arith.constant 2 : index
    %c19_608 = arith.constant 19 : index
    %1818 = memref.load %arg6[%c2_607, %c19_608] : memref<4x32xf32, #tpu.memory_space<smem>>
    %1819 = vector.broadcast %1818 : f32 to vector<1x128xf32>
    %1820 = arith.mulf %1396, %1819 : vector<1x128xf32>
    %1821 = arith.addf %1817, %1820 : vector<1x128xf32>
    %c3_609 = arith.constant 3 : index
    %c19_610 = arith.constant 19 : index
    %1822 = memref.load %arg6[%c3_609, %c19_610] : memref<4x32xf32, #tpu.memory_space<smem>>
    %1823 = vector.broadcast %1822 : f32 to vector<1x128xf32>
    %1824 = arith.mulf %1411, %1823 : vector<1x128xf32>
    %1825 = arith.addf %1821, %1824 : vector<1x128xf32>
    %c0_611 = arith.constant 0 : index
    %c19_612 = arith.constant 19 : index
    %1826 = memref.load %arg7[%c0_611, %c19_612] : memref<1x32xf32, #tpu.memory_space<smem>>
    %1827 = vector.broadcast %1826 : f32 to vector<1x128xf32>
    %1828 = arith.addf %1825, %1827 : vector<1x128xf32>
    %c19_613 = arith.constant 19 : index
    %c0_614 = arith.constant 0 : index
    %c0_615 = arith.constant 0 : index
    %1829 = vector.load %arg8[%c19_613, %c0_614, %c0_615] : memref<32x1x128xf32, #tpu.memory_space<vmem>>, vector<1x1x128xf32>
    %1830 = vector.shape_cast %1829 : vector<1x1x128xf32> to vector<1x128xf32>
    %1831 = vector.shape_cast %1828 : vector<1x128xf32> to vector<1x1x128xf32>
    tpu.vector_store %arg8[%c19_613, %c0_614, %c0_615], %1831 {strides = array<i32>} : memref<32x1x128xf32, #tpu.memory_space<vmem>>, vector<1x1x128xf32>,
    %c0_616 = arith.constant 0 : index
    %c20_617 = arith.constant 20 : index
    %1832 = memref.load %arg6[%c0_616, %c20_617] : memref<4x32xf32, #tpu.memory_space<smem>>
    %1833 = vector.broadcast %1832 : f32 to vector<1x128xf32>
    %1834 = arith.mulf %1366, %1833 : vector<1x128xf32>
    %c1_618 = arith.constant 1 : index
    %c20_619 = arith.constant 20 : index
    %1835 = memref.load %arg6[%c1_618, %c20_619] : memref<4x32xf32, #tpu.memory_space<smem>>
    %1836 = vector.broadcast %1835 : f32 to vector<1x128xf32>
    %1837 = arith.mulf %1381, %1836 : vector<1x128xf32>
    %1838 = arith.addf %1834, %1837 : vector<1x128xf32>
    %c2_620 = arith.constant 2 : index
    %c20_621 = arith.constant 20 : index
    %1839 = memref.load %arg6[%c2_620, %c20_621] : memref<4x32xf32, #tpu.memory_space<smem>>
    %1840 = vector.broadcast %1839 : f32 to vector<1x128xf32>
    %1841 = arith.mulf %1396, %1840 : vector<1x128xf32>
    %1842 = arith.addf %1838, %1841 : vector<1x128xf32>
    %c3_622 = arith.constant 3 : index
    %c20_623 = arith.constant 20 : index
    %1843 = memref.load %arg6[%c3_622, %c20_623] : memref<4x32xf32, #tpu.memory_space<smem>>
    %1844 = vector.broadcast %1843 : f32 to vector<1x128xf32>
    %1845 = arith.mulf %1411, %1844 : vector<1x128xf32>
    %1846 = arith.addf %1842, %1845 : vector<1x128xf32>
    %c0_624 = arith.constant 0 : index
    %c20_625 = arith.constant 20 : index
    %1847 = memref.load %arg7[%c0_624, %c20_625] : memref<1x32xf32, #tpu.memory_space<smem>>
    %1848 = vector.broadcast %1847 : f32 to vector<1x128xf32>
    %1849 = arith.addf %1846, %1848 : vector<1x128xf32>
    %c20_626 = arith.constant 20 : index
    %c0_627 = arith.constant 0 : index
    %c0_628 = arith.constant 0 : index
    %1850 = vector.load %arg8[%c20_626, %c0_627, %c0_628] : memref<32x1x128xf32, #tpu.memory_space<vmem>>, vector<1x1x128xf32>
    %1851 = vector.shape_cast %1850 : vector<1x1x128xf32> to vector<1x128xf32>
    %1852 = vector.shape_cast %1849 : vector<1x128xf32> to vector<1x1x128xf32>
    tpu.vector_store %arg8[%c20_626, %c0_627, %c0_628], %1852 {strides = array<i32>} : memref<32x1x128xf32, #tpu.memory_space<vmem>>, vector<1x1x128xf32>,
    %c0_629 = arith.constant 0 : index
    %c21_630 = arith.constant 21 : index
    %1853 = memref.load %arg6[%c0_629, %c21_630] : memref<4x32xf32, #tpu.memory_space<smem>>
    %1854 = vector.broadcast %1853 : f32 to vector<1x128xf32>
    %1855 = arith.mulf %1366, %1854 : vector<1x128xf32>
    %c1_631 = arith.constant 1 : index
    %c21_632 = arith.constant 21 : index
    %1856 = memref.load %arg6[%c1_631, %c21_632] : memref<4x32xf32, #tpu.memory_space<smem>>
    %1857 = vector.broadcast %1856 : f32 to vector<1x128xf32>
    %1858 = arith.mulf %1381, %1857 : vector<1x128xf32>
    %1859 = arith.addf %1855, %1858 : vector<1x128xf32>
    %c2_633 = arith.constant 2 : index
    %c21_634 = arith.constant 21 : index
    %1860 = memref.load %arg6[%c2_633, %c21_634] : memref<4x32xf32, #tpu.memory_space<smem>>
    %1861 = vector.broadcast %1860 : f32 to vector<1x128xf32>
    %1862 = arith.mulf %1396, %1861 : vector<1x128xf32>
    %1863 = arith.addf %1859, %1862 : vector<1x128xf32>
    %c3_635 = arith.constant 3 : index
    %c21_636 = arith.constant 21 : index
    %1864 = memref.load %arg6[%c3_635, %c21_636] : memref<4x32xf32, #tpu.memory_space<smem>>
    %1865 = vector.broadcast %1864 : f32 to vector<1x128xf32>
    %1866 = arith.mulf %1411, %1865 : vector<1x128xf32>
    %1867 = arith.addf %1863, %1866 : vector<1x128xf32>
    %c0_637 = arith.constant 0 : index
    %c21_638 = arith.constant 21 : index
    %1868 = memref.load %arg7[%c0_637, %c21_638] : memref<1x32xf32, #tpu.memory_space<smem>>
    %1869 = vector.broadcast %1868 : f32 to vector<1x128xf32>
    %1870 = arith.addf %1867, %1869 : vector<1x128xf32>
    %c21_639 = arith.constant 21 : index
    %c0_640 = arith.constant 0 : index
    %c0_641 = arith.constant 0 : index
    %1871 = vector.load %arg8[%c21_639, %c0_640, %c0_641] : memref<32x1x128xf32, #tpu.memory_space<vmem>>, vector<1x1x128xf32>
    %1872 = vector.shape_cast %1871 : vector<1x1x128xf32> to vector<1x128xf32>
    %1873 = vector.shape_cast %1870 : vector<1x128xf32> to vector<1x1x128xf32>
    tpu.vector_store %arg8[%c21_639, %c0_640, %c0_641], %1873 {strides = array<i32>} : memref<32x1x128xf32, #tpu.memory_space<vmem>>, vector<1x1x128xf32>,
    %c0_642 = arith.constant 0 : index
    %c22_643 = arith.constant 22 : index
    %1874 = memref.load %arg6[%c0_642, %c22_643] : memref<4x32xf32, #tpu.memory_space<smem>>
    %1875 = vector.broadcast %1874 : f32 to vector<1x128xf32>
    %1876 = arith.mulf %1366, %1875 : vector<1x128xf32>
    %c1_644 = arith.constant 1 : index
    %c22_645 = arith.constant 22 : index
    %1877 = memref.load %arg6[%c1_644, %c22_645] : memref<4x32xf32, #tpu.memory_space<smem>>
    %1878 = vector.broadcast %1877 : f32 to vector<1x128xf32>
    %1879 = arith.mulf %1381, %1878 : vector<1x128xf32>
    %1880 = arith.addf %1876, %1879 : vector<1x128xf32>
    %c2_646 = arith.constant 2 : index
    %c22_647 = arith.constant 22 : index
    %1881 = memref.load %arg6[%c2_646, %c22_647] : memref<4x32xf32, #tpu.memory_space<smem>>
    %1882 = vector.broadcast %1881 : f32 to vector<1x128xf32>
    %1883 = arith.mulf %1396, %1882 : vector<1x128xf32>
    %1884 = arith.addf %1880, %1883 : vector<1x128xf32>
    %c3_648 = arith.constant 3 : index
    %c22_649 = arith.constant 22 : index
    %1885 = memref.load %arg6[%c3_648, %c22_649] : memref<4x32xf32, #tpu.memory_space<smem>>
    %1886 = vector.broadcast %1885 : f32 to vector<1x128xf32>
    %1887 = arith.mulf %1411, %1886 : vector<1x128xf32>
    %1888 = arith.addf %1884, %1887 : vector<1x128xf32>
    %c0_650 = arith.constant 0 : index
    %c22_651 = arith.constant 22 : index
    %1889 = memref.load %arg7[%c0_650, %c22_651] : memref<1x32xf32, #tpu.memory_space<smem>>
    %1890 = vector.broadcast %1889 : f32 to vector<1x128xf32>
    %1891 = arith.addf %1888, %1890 : vector<1x128xf32>
    %c22_652 = arith.constant 22 : index
    %c0_653 = arith.constant 0 : index
    %c0_654 = arith.constant 0 : index
    %1892 = vector.load %arg8[%c22_652, %c0_653, %c0_654] : memref<32x1x128xf32, #tpu.memory_space<vmem>>, vector<1x1x128xf32>
    %1893 = vector.shape_cast %1892 : vector<1x1x128xf32> to vector<1x128xf32>
    %1894 = vector.shape_cast %1891 : vector<1x128xf32> to vector<1x1x128xf32>
    tpu.vector_store %arg8[%c22_652, %c0_653, %c0_654], %1894 {strides = array<i32>} : memref<32x1x128xf32, #tpu.memory_space<vmem>>, vector<1x1x128xf32>,
    %c0_655 = arith.constant 0 : index
    %c23_656 = arith.constant 23 : index
    %1895 = memref.load %arg6[%c0_655, %c23_656] : memref<4x32xf32, #tpu.memory_space<smem>>
    %1896 = vector.broadcast %1895 : f32 to vector<1x128xf32>
    %1897 = arith.mulf %1366, %1896 : vector<1x128xf32>
    %c1_657 = arith.constant 1 : index
    %c23_658 = arith.constant 23 : index
    %1898 = memref.load %arg6[%c1_657, %c23_658] : memref<4x32xf32, #tpu.memory_space<smem>>
    %1899 = vector.broadcast %1898 : f32 to vector<1x128xf32>
    %1900 = arith.mulf %1381, %1899 : vector<1x128xf32>
    %1901 = arith.addf %1897, %1900 : vector<1x128xf32>
    %c2_659 = arith.constant 2 : index
    %c23_660 = arith.constant 23 : index
    %1902 = memref.load %arg6[%c2_659, %c23_660] : memref<4x32xf32, #tpu.memory_space<smem>>
    %1903 = vector.broadcast %1902 : f32 to vector<1x128xf32>
    %1904 = arith.mulf %1396, %1903 : vector<1x128xf32>
    %1905 = arith.addf %1901, %1904 : vector<1x128xf32>
    %c3_661 = arith.constant 3 : index
    %c23_662 = arith.constant 23 : index
    %1906 = memref.load %arg6[%c3_661, %c23_662] : memref<4x32xf32, #tpu.memory_space<smem>>
    %1907 = vector.broadcast %1906 : f32 to vector<1x128xf32>
    %1908 = arith.mulf %1411, %1907 : vector<1x128xf32>
    %1909 = arith.addf %1905, %1908 : vector<1x128xf32>
    %c0_663 = arith.constant 0 : index
    %c23_664 = arith.constant 23 : index
    %1910 = memref.load %arg7[%c0_663, %c23_664] : memref<1x32xf32, #tpu.memory_space<smem>>
    %1911 = vector.broadcast %1910 : f32 to vector<1x128xf32>
    %1912 = arith.addf %1909, %1911 : vector<1x128xf32>
    %c23_665 = arith.constant 23 : index
    %c0_666 = arith.constant 0 : index
    %c0_667 = arith.constant 0 : index
    %1913 = vector.load %arg8[%c23_665, %c0_666, %c0_667] : memref<32x1x128xf32, #tpu.memory_space<vmem>>, vector<1x1x128xf32>
    %1914 = vector.shape_cast %1913 : vector<1x1x128xf32> to vector<1x128xf32>
    %1915 = vector.shape_cast %1912 : vector<1x128xf32> to vector<1x1x128xf32>
    tpu.vector_store %arg8[%c23_665, %c0_666, %c0_667], %1915 {strides = array<i32>} : memref<32x1x128xf32, #tpu.memory_space<vmem>>, vector<1x1x128xf32>,
    %c0_668 = arith.constant 0 : index
    %c24_669 = arith.constant 24 : index
    %1916 = memref.load %arg6[%c0_668, %c24_669] : memref<4x32xf32, #tpu.memory_space<smem>>
    %1917 = vector.broadcast %1916 : f32 to vector<1x128xf32>
    %1918 = arith.mulf %1366, %1917 : vector<1x128xf32>
    %c1_670 = arith.constant 1 : index
    %c24_671 = arith.constant 24 : index
    %1919 = memref.load %arg6[%c1_670, %c24_671] : memref<4x32xf32, #tpu.memory_space<smem>>
    %1920 = vector.broadcast %1919 : f32 to vector<1x128xf32>
    %1921 = arith.mulf %1381, %1920 : vector<1x128xf32>
    %1922 = arith.addf %1918, %1921 : vector<1x128xf32>
    %c2_672 = arith.constant 2 : index
    %c24_673 = arith.constant 24 : index
    %1923 = memref.load %arg6[%c2_672, %c24_673] : memref<4x32xf32, #tpu.memory_space<smem>>
    %1924 = vector.broadcast %1923 : f32 to vector<1x128xf32>
    %1925 = arith.mulf %1396, %1924 : vector<1x128xf32>
    %1926 = arith.addf %1922, %1925 : vector<1x128xf32>
    %c3_674 = arith.constant 3 : index
    %c24_675 = arith.constant 24 : index
    %1927 = memref.load %arg6[%c3_674, %c24_675] : memref<4x32xf32, #tpu.memory_space<smem>>
    %1928 = vector.broadcast %1927 : f32 to vector<1x128xf32>
    %1929 = arith.mulf %1411, %1928 : vector<1x128xf32>
    %1930 = arith.addf %1926, %1929 : vector<1x128xf32>
    %c0_676 = arith.constant 0 : index
    %c24_677 = arith.constant 24 : index
    %1931 = memref.load %arg7[%c0_676, %c24_677] : memref<1x32xf32, #tpu.memory_space<smem>>
    %1932 = vector.broadcast %1931 : f32 to vector<1x128xf32>
    %1933 = arith.addf %1930, %1932 : vector<1x128xf32>
    %c24_678 = arith.constant 24 : index
    %c0_679 = arith.constant 0 : index
    %c0_680 = arith.constant 0 : index
    %1934 = vector.load %arg8[%c24_678, %c0_679, %c0_680] : memref<32x1x128xf32, #tpu.memory_space<vmem>>, vector<1x1x128xf32>
    %1935 = vector.shape_cast %1934 : vector<1x1x128xf32> to vector<1x128xf32>
    %1936 = vector.shape_cast %1933 : vector<1x128xf32> to vector<1x1x128xf32>
    tpu.vector_store %arg8[%c24_678, %c0_679, %c0_680], %1936 {strides = array<i32>} : memref<32x1x128xf32, #tpu.memory_space<vmem>>, vector<1x1x128xf32>,
    %c0_681 = arith.constant 0 : index
    %c25_682 = arith.constant 25 : index
    %1937 = memref.load %arg6[%c0_681, %c25_682] : memref<4x32xf32, #tpu.memory_space<smem>>
    %1938 = vector.broadcast %1937 : f32 to vector<1x128xf32>
    %1939 = arith.mulf %1366, %1938 : vector<1x128xf32>
    %c1_683 = arith.constant 1 : index
    %c25_684 = arith.constant 25 : index
    %1940 = memref.load %arg6[%c1_683, %c25_684] : memref<4x32xf32, #tpu.memory_space<smem>>
    %1941 = vector.broadcast %1940 : f32 to vector<1x128xf32>
    %1942 = arith.mulf %1381, %1941 : vector<1x128xf32>
    %1943 = arith.addf %1939, %1942 : vector<1x128xf32>
    %c2_685 = arith.constant 2 : index
    %c25_686 = arith.constant 25 : index
    %1944 = memref.load %arg6[%c2_685, %c25_686] : memref<4x32xf32, #tpu.memory_space<smem>>
    %1945 = vector.broadcast %1944 : f32 to vector<1x128xf32>
    %1946 = arith.mulf %1396, %1945 : vector<1x128xf32>
    %1947 = arith.addf %1943, %1946 : vector<1x128xf32>
    %c3_687 = arith.constant 3 : index
    %c25_688 = arith.constant 25 : index
    %1948 = memref.load %arg6[%c3_687, %c25_688] : memref<4x32xf32, #tpu.memory_space<smem>>
    %1949 = vector.broadcast %1948 : f32 to vector<1x128xf32>
    %1950 = arith.mulf %1411, %1949 : vector<1x128xf32>
    %1951 = arith.addf %1947, %1950 : vector<1x128xf32>
    %c0_689 = arith.constant 0 : index
    %c25_690 = arith.constant 25 : index
    %1952 = memref.load %arg7[%c0_689, %c25_690] : memref<1x32xf32, #tpu.memory_space<smem>>
    %1953 = vector.broadcast %1952 : f32 to vector<1x128xf32>
    %1954 = arith.addf %1951, %1953 : vector<1x128xf32>
    %c25_691 = arith.constant 25 : index
    %c0_692 = arith.constant 0 : index
    %c0_693 = arith.constant 0 : index
    %1955 = vector.load %arg8[%c25_691, %c0_692, %c0_693] : memref<32x1x128xf32, #tpu.memory_space<vmem>>, vector<1x1x128xf32>
    %1956 = vector.shape_cast %1955 : vector<1x1x128xf32> to vector<1x128xf32>
    %1957 = vector.shape_cast %1954 : vector<1x128xf32> to vector<1x1x128xf32>
    tpu.vector_store %arg8[%c25_691, %c0_692, %c0_693], %1957 {strides = array<i32>} : memref<32x1x128xf32, #tpu.memory_space<vmem>>, vector<1x1x128xf32>,
    %c0_694 = arith.constant 0 : index
    %c26_695 = arith.constant 26 : index
    %1958 = memref.load %arg6[%c0_694, %c26_695] : memref<4x32xf32, #tpu.memory_space<smem>>
    %1959 = vector.broadcast %1958 : f32 to vector<1x128xf32>
    %1960 = arith.mulf %1366, %1959 : vector<1x128xf32>
    %c1_696 = arith.constant 1 : index
    %c26_697 = arith.constant 26 : index
    %1961 = memref.load %arg6[%c1_696, %c26_697] : memref<4x32xf32, #tpu.memory_space<smem>>
    %1962 = vector.broadcast %1961 : f32 to vector<1x128xf32>
    %1963 = arith.mulf %1381, %1962 : vector<1x128xf32>
    %1964 = arith.addf %1960, %1963 : vector<1x128xf32>
    %c2_698 = arith.constant 2 : index
    %c26_699 = arith.constant 26 : index
    %1965 = memref.load %arg6[%c2_698, %c26_699] : memref<4x32xf32, #tpu.memory_space<smem>>
    %1966 = vector.broadcast %1965 : f32 to vector<1x128xf32>
    %1967 = arith.mulf %1396, %1966 : vector<1x128xf32>
    %1968 = arith.addf %1964, %1967 : vector<1x128xf32>
    %c3_700 = arith.constant 3 : index
    %c26_701 = arith.constant 26 : index
    %1969 = memref.load %arg6[%c3_700, %c26_701] : memref<4x32xf32, #tpu.memory_space<smem>>
    %1970 = vector.broadcast %1969 : f32 to vector<1x128xf32>
    %1971 = arith.mulf %1411, %1970 : vector<1x128xf32>
    %1972 = arith.addf %1968, %1971 : vector<1x128xf32>
    %c0_702 = arith.constant 0 : index
    %c26_703 = arith.constant 26 : index
    %1973 = memref.load %arg7[%c0_702, %c26_703] : memref<1x32xf32, #tpu.memory_space<smem>>
    %1974 = vector.broadcast %1973 : f32 to vector<1x128xf32>
    %1975 = arith.addf %1972, %1974 : vector<1x128xf32>
    %c26_704 = arith.constant 26 : index
    %c0_705 = arith.constant 0 : index
    %c0_706 = arith.constant 0 : index
    %1976 = vector.load %arg8[%c26_704, %c0_705, %c0_706] : memref<32x1x128xf32, #tpu.memory_space<vmem>>, vector<1x1x128xf32>
    %1977 = vector.shape_cast %1976 : vector<1x1x128xf32> to vector<1x128xf32>
    %1978 = vector.shape_cast %1975 : vector<1x128xf32> to vector<1x1x128xf32>
    tpu.vector_store %arg8[%c26_704, %c0_705, %c0_706], %1978 {strides = array<i32>} : memref<32x1x128xf32, #tpu.memory_space<vmem>>, vector<1x1x128xf32>,
    %c0_707 = arith.constant 0 : index
    %c27_708 = arith.constant 27 : index
    %1979 = memref.load %arg6[%c0_707, %c27_708] : memref<4x32xf32, #tpu.memory_space<smem>>
    %1980 = vector.broadcast %1979 : f32 to vector<1x128xf32>
    %1981 = arith.mulf %1366, %1980 : vector<1x128xf32>
    %c1_709 = arith.constant 1 : index
    %c27_710 = arith.constant 27 : index
    %1982 = memref.load %arg6[%c1_709, %c27_710] : memref<4x32xf32, #tpu.memory_space<smem>>
    %1983 = vector.broadcast %1982 : f32 to vector<1x128xf32>
    %1984 = arith.mulf %1381, %1983 : vector<1x128xf32>
    %1985 = arith.addf %1981, %1984 : vector<1x128xf32>
    %c2_711 = arith.constant 2 : index
    %c27_712 = arith.constant 27 : index
    %1986 = memref.load %arg6[%c2_711, %c27_712] : memref<4x32xf32, #tpu.memory_space<smem>>
    %1987 = vector.broadcast %1986 : f32 to vector<1x128xf32>
    %1988 = arith.mulf %1396, %1987 : vector<1x128xf32>
    %1989 = arith.addf %1985, %1988 : vector<1x128xf32>
    %c3_713 = arith.constant 3 : index
    %c27_714 = arith.constant 27 : index
    %1990 = memref.load %arg6[%c3_713, %c27_714] : memref<4x32xf32, #tpu.memory_space<smem>>
    %1991 = vector.broadcast %1990 : f32 to vector<1x128xf32>
    %1992 = arith.mulf %1411, %1991 : vector<1x128xf32>
    %1993 = arith.addf %1989, %1992 : vector<1x128xf32>
    %c0_715 = arith.constant 0 : index
    %c27_716 = arith.constant 27 : index
    %1994 = memref.load %arg7[%c0_715, %c27_716] : memref<1x32xf32, #tpu.memory_space<smem>>
    %1995 = vector.broadcast %1994 : f32 to vector<1x128xf32>
    %1996 = arith.addf %1993, %1995 : vector<1x128xf32>
    %c27_717 = arith.constant 27 : index
    %c0_718 = arith.constant 0 : index
    %c0_719 = arith.constant 0 : index
    %1997 = vector.load %arg8[%c27_717, %c0_718, %c0_719] : memref<32x1x128xf32, #tpu.memory_space<vmem>>, vector<1x1x128xf32>
    %1998 = vector.shape_cast %1997 : vector<1x1x128xf32> to vector<1x128xf32>
    %1999 = vector.shape_cast %1996 : vector<1x128xf32> to vector<1x1x128xf32>
    tpu.vector_store %arg8[%c27_717, %c0_718, %c0_719], %1999 {strides = array<i32>} : memref<32x1x128xf32, #tpu.memory_space<vmem>>, vector<1x1x128xf32>,
    %c0_720 = arith.constant 0 : index
    %c28_721 = arith.constant 28 : index
    %2000 = memref.load %arg6[%c0_720, %c28_721] : memref<4x32xf32, #tpu.memory_space<smem>>
    %2001 = vector.broadcast %2000 : f32 to vector<1x128xf32>
    %2002 = arith.mulf %1366, %2001 : vector<1x128xf32>
    %c1_722 = arith.constant 1 : index
    %c28_723 = arith.constant 28 : index
    %2003 = memref.load %arg6[%c1_722, %c28_723] : memref<4x32xf32, #tpu.memory_space<smem>>
    %2004 = vector.broadcast %2003 : f32 to vector<1x128xf32>
    %2005 = arith.mulf %1381, %2004 : vector<1x128xf32>
    %2006 = arith.addf %2002, %2005 : vector<1x128xf32>
    %c2_724 = arith.constant 2 : index
    %c28_725 = arith.constant 28 : index
    %2007 = memref.load %arg6[%c2_724, %c28_725] : memref<4x32xf32, #tpu.memory_space<smem>>
    %2008 = vector.broadcast %2007 : f32 to vector<1x128xf32>
    %2009 = arith.mulf %1396, %2008 : vector<1x128xf32>
    %2010 = arith.addf %2006, %2009 : vector<1x128xf32>
    %c3_726 = arith.constant 3 : index
    %c28_727 = arith.constant 28 : index
    %2011 = memref.load %arg6[%c3_726, %c28_727] : memref<4x32xf32, #tpu.memory_space<smem>>
    %2012 = vector.broadcast %2011 : f32 to vector<1x128xf32>
    %2013 = arith.mulf %1411, %2012 : vector<1x128xf32>
    %2014 = arith.addf %2010, %2013 : vector<1x128xf32>
    %c0_728 = arith.constant 0 : index
    %c28_729 = arith.constant 28 : index
    %2015 = memref.load %arg7[%c0_728, %c28_729] : memref<1x32xf32, #tpu.memory_space<smem>>
    %2016 = vector.broadcast %2015 : f32 to vector<1x128xf32>
    %2017 = arith.addf %2014, %2016 : vector<1x128xf32>
    %c28_730 = arith.constant 28 : index
    %c0_731 = arith.constant 0 : index
    %c0_732 = arith.constant 0 : index
    %2018 = vector.load %arg8[%c28_730, %c0_731, %c0_732] : memref<32x1x128xf32, #tpu.memory_space<vmem>>, vector<1x1x128xf32>
    %2019 = vector.shape_cast %2018 : vector<1x1x128xf32> to vector<1x128xf32>
    %2020 = vector.shape_cast %2017 : vector<1x128xf32> to vector<1x1x128xf32>
    tpu.vector_store %arg8[%c28_730, %c0_731, %c0_732], %2020 {strides = array<i32>} : memref<32x1x128xf32, #tpu.memory_space<vmem>>, vector<1x1x128xf32>,
    %c0_733 = arith.constant 0 : index
    %c29_734 = arith.constant 29 : index
    %2021 = memref.load %arg6[%c0_733, %c29_734] : memref<4x32xf32, #tpu.memory_space<smem>>
    %2022 = vector.broadcast %2021 : f32 to vector<1x128xf32>
    %2023 = arith.mulf %1366, %2022 : vector<1x128xf32>
    %c1_735 = arith.constant 1 : index
    %c29_736 = arith.constant 29 : index
    %2024 = memref.load %arg6[%c1_735, %c29_736] : memref<4x32xf32, #tpu.memory_space<smem>>
    %2025 = vector.broadcast %2024 : f32 to vector<1x128xf32>
    %2026 = arith.mulf %1381, %2025 : vector<1x128xf32>
    %2027 = arith.addf %2023, %2026 : vector<1x128xf32>
    %c2_737 = arith.constant 2 : index
    %c29_738 = arith.constant 29 : index
    %2028 = memref.load %arg6[%c2_737, %c29_738] : memref<4x32xf32, #tpu.memory_space<smem>>
    %2029 = vector.broadcast %2028 : f32 to vector<1x128xf32>
    %2030 = arith.mulf %1396, %2029 : vector<1x128xf32>
    %2031 = arith.addf %2027, %2030 : vector<1x128xf32>
    %c3_739 = arith.constant 3 : index
    %c29_740 = arith.constant 29 : index
    %2032 = memref.load %arg6[%c3_739, %c29_740] : memref<4x32xf32, #tpu.memory_space<smem>>
    %2033 = vector.broadcast %2032 : f32 to vector<1x128xf32>
    %2034 = arith.mulf %1411, %2033 : vector<1x128xf32>
    %2035 = arith.addf %2031, %2034 : vector<1x128xf32>
    %c0_741 = arith.constant 0 : index
    %c29_742 = arith.constant 29 : index
    %2036 = memref.load %arg7[%c0_741, %c29_742] : memref<1x32xf32, #tpu.memory_space<smem>>
    %2037 = vector.broadcast %2036 : f32 to vector<1x128xf32>
    %2038 = arith.addf %2035, %2037 : vector<1x128xf32>
    %c29_743 = arith.constant 29 : index
    %c0_744 = arith.constant 0 : index
    %c0_745 = arith.constant 0 : index
    %2039 = vector.load %arg8[%c29_743, %c0_744, %c0_745] : memref<32x1x128xf32, #tpu.memory_space<vmem>>, vector<1x1x128xf32>
    %2040 = vector.shape_cast %2039 : vector<1x1x128xf32> to vector<1x128xf32>
    %2041 = vector.shape_cast %2038 : vector<1x128xf32> to vector<1x1x128xf32>
    tpu.vector_store %arg8[%c29_743, %c0_744, %c0_745], %2041 {strides = array<i32>} : memref<32x1x128xf32, #tpu.memory_space<vmem>>, vector<1x1x128xf32>,
    %c0_746 = arith.constant 0 : index
    %c30_747 = arith.constant 30 : index
    %2042 = memref.load %arg6[%c0_746, %c30_747] : memref<4x32xf32, #tpu.memory_space<smem>>
    %2043 = vector.broadcast %2042 : f32 to vector<1x128xf32>
    %2044 = arith.mulf %1366, %2043 : vector<1x128xf32>
    %c1_748 = arith.constant 1 : index
    %c30_749 = arith.constant 30 : index
    %2045 = memref.load %arg6[%c1_748, %c30_749] : memref<4x32xf32, #tpu.memory_space<smem>>
    %2046 = vector.broadcast %2045 : f32 to vector<1x128xf32>
    %2047 = arith.mulf %1381, %2046 : vector<1x128xf32>
    %2048 = arith.addf %2044, %2047 : vector<1x128xf32>
    %c2_750 = arith.constant 2 : index
    %c30_751 = arith.constant 30 : index
    %2049 = memref.load %arg6[%c2_750, %c30_751] : memref<4x32xf32, #tpu.memory_space<smem>>
    %2050 = vector.broadcast %2049 : f32 to vector<1x128xf32>
    %2051 = arith.mulf %1396, %2050 : vector<1x128xf32>
    %2052 = arith.addf %2048, %2051 : vector<1x128xf32>
    %c3_752 = arith.constant 3 : index
    %c30_753 = arith.constant 30 : index
    %2053 = memref.load %arg6[%c3_752, %c30_753] : memref<4x32xf32, #tpu.memory_space<smem>>
    %2054 = vector.broadcast %2053 : f32 to vector<1x128xf32>
    %2055 = arith.mulf %1411, %2054 : vector<1x128xf32>
    %2056 = arith.addf %2052, %2055 : vector<1x128xf32>
    %c0_754 = arith.constant 0 : index
    %c30_755 = arith.constant 30 : index
    %2057 = memref.load %arg7[%c0_754, %c30_755] : memref<1x32xf32, #tpu.memory_space<smem>>
    %2058 = vector.broadcast %2057 : f32 to vector<1x128xf32>
    %2059 = arith.addf %2056, %2058 : vector<1x128xf32>
    %c30_756 = arith.constant 30 : index
    %c0_757 = arith.constant 0 : index
    %c0_758 = arith.constant 0 : index
    %2060 = vector.load %arg8[%c30_756, %c0_757, %c0_758] : memref<32x1x128xf32, #tpu.memory_space<vmem>>, vector<1x1x128xf32>
    %2061 = vector.shape_cast %2060 : vector<1x1x128xf32> to vector<1x128xf32>
    %2062 = vector.shape_cast %2059 : vector<1x128xf32> to vector<1x1x128xf32>
    tpu.vector_store %arg8[%c30_756, %c0_757, %c0_758], %2062 {strides = array<i32>} : memref<32x1x128xf32, #tpu.memory_space<vmem>>, vector<1x1x128xf32>,
    %c0_759 = arith.constant 0 : index
    %c31_760 = arith.constant 31 : index
    %2063 = memref.load %arg6[%c0_759, %c31_760] : memref<4x32xf32, #tpu.memory_space<smem>>
    %2064 = vector.broadcast %2063 : f32 to vector<1x128xf32>
    %2065 = arith.mulf %1366, %2064 : vector<1x128xf32>
    %c1_761 = arith.constant 1 : index
    %c31_762 = arith.constant 31 : index
    %2066 = memref.load %arg6[%c1_761, %c31_762] : memref<4x32xf32, #tpu.memory_space<smem>>
    %2067 = vector.broadcast %2066 : f32 to vector<1x128xf32>
    %2068 = arith.mulf %1381, %2067 : vector<1x128xf32>
    %2069 = arith.addf %2065, %2068 : vector<1x128xf32>
    %c2_763 = arith.constant 2 : index
    %c31_764 = arith.constant 31 : index
    %2070 = memref.load %arg6[%c2_763, %c31_764] : memref<4x32xf32, #tpu.memory_space<smem>>
    %2071 = vector.broadcast %2070 : f32 to vector<1x128xf32>
    %2072 = arith.mulf %1396, %2071 : vector<1x128xf32>
    %2073 = arith.addf %2069, %2072 : vector<1x128xf32>
    %c3_765 = arith.constant 3 : index
    %c31_766 = arith.constant 31 : index
    %2074 = memref.load %arg6[%c3_765, %c31_766] : memref<4x32xf32, #tpu.memory_space<smem>>
    %2075 = vector.broadcast %2074 : f32 to vector<1x128xf32>
    %2076 = arith.mulf %1411, %2075 : vector<1x128xf32>
    %2077 = arith.addf %2073, %2076 : vector<1x128xf32>
    %c0_767 = arith.constant 0 : index
    %c31_768 = arith.constant 31 : index
    %2078 = memref.load %arg7[%c0_767, %c31_768] : memref<1x32xf32, #tpu.memory_space<smem>>
    %2079 = vector.broadcast %2078 : f32 to vector<1x128xf32>
    %2080 = arith.addf %2077, %2079 : vector<1x128xf32>
    %c31_769 = arith.constant 31 : index
    %c0_770 = arith.constant 0 : index
    %c0_771 = arith.constant 0 : index
    %2081 = vector.load %arg8[%c31_769, %c0_770, %c0_771] : memref<32x1x128xf32, #tpu.memory_space<vmem>>, vector<1x1x128xf32>
    %2082 = vector.shape_cast %2081 : vector<1x1x128xf32> to vector<1x128xf32>
    %2083 = vector.shape_cast %2080 : vector<1x128xf32> to vector<1x1x128xf32>
    tpu.vector_store %arg8[%c31_769, %c0_770, %c0_771], %2083 {strides = array<i32>} : memref<32x1x128xf32, #tpu.memory_space<vmem>>, vector<1x1x128xf32>,
    return
  }
  func.func @transform_0(%arg0: i32) -> (i32, i32, i32) {
    %c0_i32 = arith.constant 0 : i32
    %c0_i32_0 = arith.constant 0 : i32
    %c0_i32_1 = arith.constant 0 : i32
    return %c0_i32, %arg0, %c0_i32_0 : i32, i32, i32
  }
  func.func @transform_1(%arg0: i32) -> (i32, i32) {
    %c0_i32 = arith.constant 0 : i32
    %c0_i32_0 = arith.constant 0 : i32
    %c0_i32_1 = arith.constant 0 : i32
    return %c0_i32, %c0_i32_0 : i32, i32
  }
  func.func @transform_2(%arg0: i32) -> (i32, i32) {
    %c0_i32 = arith.constant 0 : i32
    %c0_i32_0 = arith.constant 0 : i32
    %c0_i32_1 = arith.constant 0 : i32
    return %c0_i32, %c0_i32_0 : i32, i32
  }
  func.func @transform_3(%arg0: i32) -> (i32, i32) {
    %c0_i32 = arith.constant 0 : i32
    %c0_i32_0 = arith.constant 0 : i32
    %c0_i32_1 = arith.constant 0 : i32
    return %c0_i32, %c0_i32_0 : i32, i32
  }
  func.func @transform_4(%arg0: i32) -> (i32, i32) {
    %c0_i32 = arith.constant 0 : i32
    %c0_i32_0 = arith.constant 0 : i32
    %c0_i32_1 = arith.constant 0 : i32
    return %c0_i32, %c0_i32_0 : i32, i32
  }
  func.func @transform_5(%arg0: i32) -> (i32, i32) {
    %c0_i32 = arith.constant 0 : i32
    %c0_i32_0 = arith.constant 0 : i32
    %c0_i32_1 = arith.constant 0 : i32
    return %c0_i32, %c0_i32_0 : i32, i32
  }
  func.func @transform_6(%arg0: i32) -> (i32, i32) {
    %c0_i32 = arith.constant 0 : i32
    %c0_i32_0 = arith.constant 0 : i32
    %c0_i32_1 = arith.constant 0 : i32
    return %c0_i32, %c0_i32_0 : i32, i32
  }
  func.func @transform_7(%arg0: i32) -> (i32, i32, i32) {
    %c0_i32 = arith.constant 0 : i32
    %c0_i32_0 = arith.constant 0 : i32
    %c0_i32_1 = arith.constant 0 : i32
    return %c0_i32, %arg0, %c0_i32_0 : i32, i32, i32
  }
}

</mosaic_0001>

<bundles_post_ra>
// kernel: tpu_custom_call.1
= control target key start
LH: loop header
LB: loop body
LE: loop exit
PB: predicated region body
PF: predicated region fallthrough
CT: control target
= control target key end

     0   :  { %s5136_s0 = inlined_call_operand.hbm [shape: f32[32,1,128], index: 0, kind: input, shape index: {}]   ;;  %s5137_s1 = inlined_call_operand.hbm [shape: f32[4,32], index: 1, kind: input, shape index: {}]   ;;  %s5138_s2 = inlined_call_operand.vmem [shape: f32[1,4], index: 2, kind: input, shape index: {}]   ;;  %s5139_s3 = inlined_call_operand.vmem [shape: f32[1,4], index: 3, kind: input, shape index: {}]   ;;  %s5140_s4 = inlined_call_operand.vmem [shape: f32[1,4], index: 4, kind: input, shape index: {}]   ;;  %s5141_s5 = inlined_call_operand.vmem [shape: f32[4,32], index: 5, kind: input, shape index: {}]   ;;  %s5142_s6 = inlined_call_operand.vmem [shape: f32[1,32], index: 6, kind: input, shape index: {}]   ;;  %s5143_s7 = inlined_call_operand.hbm [shape: f32[32,1,128], index: 7, kind: output, shape index: {}]  }
   0x1   :  { %5262 = sst [smem:[#allocation134_spill]] %s5143_s7 }
   0x2   :  { %12 = vsyncpa [#allocation3], 0 }
   0x3   :  { %13 = vsyncpa [#allocation5], 0 }
   0x4   :  { %14 = vsyncpa [#allocation6], 0 }
   0x5   :  { %15 = vsyncpa [#allocation10], 0 }
   0x6   :  { %16 = vsyncpa [#allocation13], 0  ;;  %s54_s26 = sshll.u32 %s5139_s3, 4  ;;  %s55_s26 = int_to_ptr.vmem [resolvable:$true] %s54_s26 }
   0x7   :  { %17 = vsyncpa [#allocation4], 0  ;;  %s74_s29 = sshll.u32 %s5141_s5, 4  ;;  %s2929_s30 = scalar_lea.vmem %s55_s26, 16  ;;  %s75_s29 = int_to_ptr.vmem [resolvable:$true] %s74_s29 }
   0x8   :  { %p2930_p0 = scmp.ne.s32.totalorder %s55_s26, %s2929_s30  ;;  %p2934_p1 = scmp.lt.s32.totalorder %s55_s26, %s55_s26 }
   0x9   :  { %p2935_p2 = scmp.lt.s32.totalorder %s2929_s30, %s2929_s30 }
   0xb   :  { %p2936_p3 = por %p2935_p2, %p2934_p1 }
   0xd   :  { %p2937_p4 = pnand %p2936_p3, %p2930_p0 }
   0xf   :  { %2940 = shalt.err (!%p2937_p4)
}
  0x10   :  { %s3055_s8 = smov [#allocation9]   ;;  %s2941_s9 = scalar_lea.vmem %s75_s29, 64 }
  0x11   :  { %57 = dma.vmem_to_smem %s55_s26, 16, %s3055_s8, [#allocation10]  }
  0x12   :  { %p2942_p5 = scmp.ne.s32.totalorder %s75_s29, %s2941_s9  ;;  %p2946_p6 = scmp.lt.s32.totalorder %s75_s29, %s75_s29 }
  0x13   :  { %p2947_p7 = scmp.lt.s32.totalorder %s2941_s9, %s2941_s9 }
  0x15   :  { %p2948_p8 = por %p2947_p7, %p2946_p6 }
  0x17   :  { %p2949_p9 = pnand %p2948_p8, %p2942_p5 }
  0x19   :  { %2952 = shalt.err (!%p2949_p9)
}
  0x1a   :  { %s3056_s3 = smov [#allocation12]   ;;  %s3057_s5 = smov [#allocation2]  }
  0x1b   :  { %77 = dma.vmem_to_smem %s75_s29, 64, %s3056_s3, [#allocation13]  }
  0x1c   :  { %s23_s10 = sshll.u32 %s3057_s5, 4  ;;  %s2953_s13 = scalar_lea.hbm %s5136_s0, 512  ;;  %s24_s10 = int_to_ptr.vmem [resolvable:$true] %s23_s10 }
  0x1d   :  { %p2954_p10 = scmp.ne.s32.totalorder %s5136_s0, %s2953_s13  ;;  %p2957_p11 = scmp.lt.u32.totalorder %s2953_s13, %s5136_s0 }
  0x1f   :  { %p2959_p12 = pnand %p2957_p11, %p2954_p10 }
  0x21   :  { %2962 = shalt.err (!%p2959_p12)
}
  0x22   :  { %s2963_s18 = scalar_lea.vmem %s24_s10, 512  ;;  %p2968_p0 = scmp.lt.s32.totalorder %s24_s10, %s24_s10 }
  0x23   :  { %p2964_p13 = scmp.ne.s32.totalorder %s24_s10, %s2963_s18  ;;  %p2969_p1 = scmp.lt.s32.totalorder %s2963_s18, %s2963_s18 }
  0x25   :  { %p2970_p2 = por %p2969_p1, %p2968_p0 }
  0x27   :  { %p2971_p3 = pnand %p2970_p2, %p2964_p13 }
  0x29   :  { %2974 = shalt.err (!%p2971_p3)
}
  0x2a   :  { %s5144_s19 = smov 16   ;;  %s5145_s20 = smov 1  }
  0x2b   :  { %29 = dma.hbm_to_vmem [thread:$0]  %s5136_s0, 512, %s24_s10, [#allocation3], %s5144_s19, %s5144_s19, %s5145_s20  }
  0x2c   :  { %s2975_s25 = scalar_lea.hbm %s5137_s1, 64 }
  0x2d   :  { %p2976_p4 = scmp.ne.s32.totalorder %s5137_s1, %s2975_s25  ;;  %p2979_p5 = scmp.lt.u32.totalorder %s2975_s25, %s5137_s1 }
  0x2f   :  { %p2981_p6 = pnand %p2979_p5, %p2976_p4 }
  0x31   :  { %2984 = shalt.err (!%p2981_p6)
}
  0x32   :  { %s3060_s30 = smov [#allocation7]   ;;  %s44_s5 = sshll.u32 %s5138_s2, 4  ;;  %s45_s5 = int_to_ptr.vmem [resolvable:$true] %s44_s5 }
  0x33   :  { %37 = dma.hbm_to_smem %s5137_s1, 64, %s3060_s30, [#allocation5]  }
  0x34   :  { %s64_s12 = sshll.u32 %s5140_s4, 4  ;;  %s2985_s13 = scalar_lea.vmem %s45_s5, 16  ;;  %s65_s12 = int_to_ptr.vmem [resolvable:$true] %s64_s12 }
  0x35   :  { %p2986_p7 = scmp.ne.s32.totalorder %s45_s5, %s2985_s13  ;;  %p2990_p8 = scmp.lt.s32.totalorder %s45_s5, %s45_s5 }
  0x36   :  { %p2991_p9 = scmp.lt.s32.totalorder %s2985_s13, %s2985_s13 }
  0x38   :  { %p2992_p10 = por %p2991_p9, %p2990_p8 }
  0x3a   :  { %p2993_p11 = pnand %p2992_p10, %p2986_p7 }
  0x3c   :  { %2996 = shalt.err (!%p2993_p11)
}
  0x3d   :  { %s3061_s14 = smov [#allocation8]   ;;  %s2997_s1 = scalar_lea.vmem %s65_s12, 16 }
  0x3e   :  { %47 = dma.vmem_to_smem %s45_s5, 16, %s3061_s14, [#allocation6]  }
  0x3f   :  { %p2998_p12 = scmp.ne.s32.totalorder %s65_s12, %s2997_s1  ;;  %p3002_p13 = scmp.lt.s32.totalorder %s65_s12, %s65_s12 }
  0x40   :  { %p3003_p0 = scmp.lt.s32.totalorder %s2997_s1, %s2997_s1 }
  0x42   :  { %p3004_p1 = por %p3003_p0, %p3002_p13 }
  0x44   :  { %p3005_p2 = pnand %p3004_p1, %p2998_p12 }
  0x46   :  { %3008 = shalt.err (!%p3005_p2)
}
  0x47   :  { %s3062_s2 = smov [#allocation11]   ;;  %s84_s16 = sshll.u32 %s5142_s6, 4  ;;  %s85_s16 = int_to_ptr.vmem [resolvable:$true] %s84_s16 }
  0x48   :  { %67 = dma.vmem_to_smem %s65_s12, 16, %s3062_s2, [#allocation10]  }
  0x49   :  { %s3009_s17 = scalar_lea.vmem %s85_s16, 16  ;;  %p3014_p4 = scmp.lt.s32.totalorder %s85_s16, %s85_s16 }
  0x4a   :  { %p3010_p3 = scmp.ne.s32.totalorder %s85_s16, %s3009_s17  ;;  %p3015_p5 = scmp.lt.s32.totalorder %s3009_s17, %s3009_s17 }
  0x4c   :  { %p3016_p6 = por %p3015_p5, %p3014_p4 }
  0x4e   :  { %p3017_p7 = pnand %p3016_p6, %p3010_p3 }
  0x50   :  { %3020 = shalt.err (!%p3017_p7)
}
  0x51   :  { %s3063_s18 = smov [#allocation14]  }
  0x52   :  { %87 = dma.vmem_to_smem %s85_s16, 16, %s3063_s18, [#allocation13]  }
  0x53   :  { %3043 = dma.done.wait [#allocation3], 512  }
  0x54   :  { %3044 = vsyncadd [#allocation3], 4294966784 }
  0x55   :  { %3045 = dma.done.wait [#allocation5], 64  }
  0x56   :  { %3046 = vsyncadd [#allocation5], 4294967232 }
  0x57   :  { %3047 = dma.done.wait [#allocation6], 16  }
  0x58   :  { %3048 = vsyncadd [#allocation6], 4294967280 }
  0x59   :  { %3049 = dma.done.wait [#allocation10], 32  }
  0x5a   :  { %3050 = vsyncadd [#allocation10], 4294967264 }
  0x5b   :  { %3051 = dma.done.wait [#allocation13], 80  }
  0x5c   :  { %3052 = vsyncadd [#allocation13], 4294967216 }
  0x5d   :  { %109 = sfence }
  0x5e   :  { %s111_s6 = sld [smem:[#allocation7]]  ;;  %s2556_s24 = sld [smem:[#allocation7 + $0x1]]  ;;  %v110_v0 = vld [vmem:[#allocation2] sm:$0x1]  ;;  %v124_v3 = vld [vmem:[#allocation2 + $0x1] sm:$0x1] }
  0x5f   :  { %s2553_s21 = sld [smem:[#allocation7 + $0x80]]  ;;  %s2557_s25 = sld [smem:[#allocation7 + $0x81]]  ;;  %v142_v12 = vld [vmem:[#allocation2 + $0x2] sm:$0x1]  ;;  %v160_v29 = vld [vmem:[#allocation2 + $0x3] sm:$0x1] }
  0x60   :  { %s2554_s22 = sld [smem:[#allocation7 + $0x100]]  ;;  %s2558_s26 = sld [smem:[#allocation7 + $0x101]]  ;;  %v178_v38 = vld [vmem:[#allocation2 + $0x4] sm:$0x1]  ;;  %v196_v55 = vld [vmem:[#allocation2 + $0x5] sm:$0x1] }
  0x61   :  { %s2555_s23 = sld [smem:[#allocation7 + $0x180]]  ;;  %s2559_s27 = sld [smem:[#allocation7 + $0x181]] }
  0x62   :  { %s3153_s28 = sld [smem:[#allocation7 + $0x2]]  ;;  %s3161_s9 = sld [smem:[#allocation7 + $0x3]] }
  0x63   :  { %s3155_s29 = sld [smem:[#allocation7 + $0x82]]  ;;  %s3163_s0 = sld [smem:[#allocation7 + $0x83]] }
  0x64   :  { %s3157_s30 = sld [smem:[#allocation7 + $0x102]]  ;;  %v112_v1 = vstv %s111_s6  ;;  %s3165_s3 = sld [smem:[#allocation7 + $0x103]]  ;;  %v126_v10 = vstv %s2556_s24 }
  0x65   :  { %s3159_s8 = sld [smem:[#allocation7 + $0x182]]  ;;  %v115_v2 = vstv %s2553_s21  ;;  %v113_v4 = vmul.f32 %v112_v1, %v110_v0  ;;  %s3167_s5 = sld [smem:[#allocation7 + $0x183]]  ;;  %v130_v11 = vstv %s2557_s25  ;;  %v127_v13 = vmul.f32 %v126_v10, %v124_v3 }
  0x66   :  { %v116_v5 = vmul.f32 %v115_v2, %v110_v0  ;;  %v118_v6 = vstv %s2554_s22  ;;  %s3169_s10 = sld [smem:[#allocation7 + $0x4]]  ;;  %v131_v14 = vmul.f32 %v130_v11, %v124_v3  ;;  %v134_v15 = vstv %s2558_s26  ;;  %s3179_s14 = sld [smem:[#allocation7 + $0x5]] }
  0x67   :  { %v121_v7 = vstv %s2555_s23  ;;  %v119_v8 = vmul.f32 %v118_v6, %v110_v0  ;;  %s3171_s11 = sld [smem:[#allocation7 + $0x84]]  ;;  %v138_v16 = vstv %s2559_s27  ;;  %v135_v17 = vmul.f32 %v134_v15, %v124_v3  ;;  %s3181_s1 = sld [smem:[#allocation7 + $0x85]] }
  0x68   :  { %v122_v9 = vmul.f32 %v121_v7, %v110_v0  ;;  %v139_v18 = vmul.f32 %v138_v16, %v124_v3  ;;  %v144_v19 = vstv %s3153_s28  ;;  %s3175_s12 = sld [smem:[#allocation7 + $0x104]]  ;;  %v128_v21 = vadd.f32 %v127_v13, %v113_v4  ;;  %s3185_s2 = sld [smem:[#allocation7 + $0x105]]  ;;  %v214_v0 = vld [vmem:[#allocation2 + $0x6] sm:$0x1] }
  0x69   :  { %v148_v20 = vstv %s3155_s29  ;;  %s3177_s13 = sld [smem:[#allocation7 + $0x184]]  ;;  %v132_v22 = vadd.f32 %v131_v14, %v116_v5  ;;  %v145_v23 = vmul.f32 %v144_v19, %v142_v12  ;;  %v136_v25 = vadd.f32 %v135_v17, %v119_v8  ;;  %s3187_s4 = sld [smem:[#allocation7 + $0x185]]  ;;  %v232_v17 = vld [vmem:[#allocation2 + $0x7] sm:$0x1] }
  0x6a   :  { %v149_v24 = vmul.f32 %v148_v20, %v142_v12  ;;  %v140_v26 = vadd.f32 %v139_v18, %v122_v9  ;;  %v152_v27 = vstv %s3157_s30  ;;  %v162_v34 = vstv %s3161_s9  ;;  %s3193_s15 = sld [smem:[#allocation7 + $0x6]]  ;;  %s3203_s6 = sld [smem:[#allocation7 + $0x7]] }
  0x6b   :  { %v156_v28 = vstv %s3159_s8  ;;  %v146_v30 = vadd.f32 %v145_v23, %v128_v21  ;;  %v153_v32 = vmul.f32 %v152_v27, %v142_v12  ;;  %v166_v35 = vstv %s3163_s0  ;;  %s3195_s16 = sld [smem:[#allocation7 + $0x86]]  ;;  %s3205_s21 = sld [smem:[#allocation7 + $0x87]] }
  0x6c   :  { %v150_v31 = vadd.f32 %v149_v24, %v132_v22  ;;  %v157_v33 = vmul.f32 %v156_v28, %v142_v12  ;;  %v170_v36 = vstv %s3165_s3  ;;  %v174_v37 = vstv %s3167_s5  ;;  %s3199_s17 = sld [smem:[#allocation7 + $0x106]]  ;;  %s3209_s22 = sld [smem:[#allocation7 + $0x107]] }
  0x6d   :  { %v154_v39 = vadd.f32 %v153_v32, %v136_v25  ;;  %v163_v41 = vmul.f32 %v162_v34, %v160_v29  ;;  %v167_v42 = vmul.f32 %v166_v35, %v160_v29  ;;  %v171_v43 = vmul.f32 %v170_v36, %v160_v29  ;;  %s3201_s18 = sld [smem:[#allocation7 + $0x186]]  ;;  %s3211_s23 = sld [smem:[#allocation7 + $0x187]] }
  0x6e   :  { %v158_v40 = vadd.f32 %v157_v33, %v140_v26  ;;  %v175_v44 = vmul.f32 %v174_v37, %v160_v29  ;;  %v180_v45 = vstv %s3169_s10  ;;  %v184_v46 = vstv %s3171_s11  ;;  %s3217_s24 = sld [smem:[#allocation7 + $0x8]]  ;;  %s3227_s28 = sld [smem:[#allocation7 + $0x9]]  ;;  %v250_v26 = vld [vmem:[#allocation2 + $0x8] sm:$0x1] }
  0x6f   :  { %v164_v47 = vadd.f32 %v163_v41, %v146_v30  ;;  %v168_v48 = vadd.f32 %v167_v42, %v150_v31  ;;  %v181_v49 = vmul.f32 %v180_v45, %v178_v38  ;;  %v185_v50 = vmul.f32 %v184_v46, %v178_v38  ;;  %s3219_s25 = sld [smem:[#allocation7 + $0x88]]  ;;  %s3229_s29 = sld [smem:[#allocation7 + $0x89]] }
  0x70   :  { %v172_v51 = vadd.f32 %v171_v43, %v154_v39  ;;  %v176_v52 = vadd.f32 %v175_v44, %v158_v40  ;;  %v188_v53 = vstv %s3175_s12  ;;  %v192_v54 = vstv %s3177_s13  ;;  %s3223_s26 = sld [smem:[#allocation7 + $0x108]]  ;;  %s3233_s30 = sld [smem:[#allocation7 + $0x109]]  ;;  %v268_v43 = vld [vmem:[#allocation2 + $0x9] sm:$0x1] }
  0x71   :  { %v182_v56 = vadd.f32 %v181_v49, %v164_v47  ;;  %v186_v57 = vadd.f32 %v185_v50, %v168_v48  ;;  %v189_v58 = vmul.f32 %v188_v53, %v178_v38  ;;  %v193_v59 = vmul.f32 %v192_v54, %v178_v38  ;;  %s3225_s27 = sld [smem:[#allocation7 + $0x188]]  ;;  %s3235_s8 = sld [smem:[#allocation7 + $0x189]] }
  0x72   :  { %v198_v60 = vstv %s3179_s14  ;;  %v202_v61 = vstv %s3181_s1  ;;  %v206_v62 = vstv %s3185_s2  ;;  %v210_v63 = vstv %s3187_s4  ;;  %s3241_s9 = sld [smem:[#allocation7 + $0xa]]  ;;  %s3251_s10 = sld [smem:[#allocation7 + $0xb]] }
  0x73   :  { %v190_v1 = vadd.f32 %v189_v58, %v172_v51  ;;  %v194_v2 = vadd.f32 %v193_v59, %v176_v52  ;;  %v199_v3 = vmul.f32 %v198_v60, %v196_v55  ;;  %v203_v4 = vmul.f32 %v202_v61, %v196_v55  ;;  %s3243_s0 = sld [smem:[#allocation7 + $0x8a]]  ;;  %s3253_s11 = sld [smem:[#allocation7 + $0x8b]]  ;;  %v286_v52 = vld [vmem:[#allocation2 + $0xa] sm:$0x1] }
  0x74   :  { %v207_v5 = vmul.f32 %v206_v62, %v196_v55  ;;  %v211_v6 = vmul.f32 %v210_v63, %v196_v55  ;;  %v216_v7 = vstv %s3193_s15  ;;  %v220_v8 = vstv %s3195_s16  ;;  %s3247_s3 = sld [smem:[#allocation7 + $0x10a]]  ;;  %s3257_s12 = sld [smem:[#allocation7 + $0x10b]] }
  0x75   :  { %v200_v9 = vadd.f32 %v199_v3, %v182_v56  ;;  %v204_v10 = vadd.f32 %v203_v4, %v186_v57  ;;  %v217_v11 = vmul.f32 %v216_v7, %v214_v0  ;;  %v221_v12 = vmul.f32 %v220_v8, %v214_v0  ;;  %s3249_s5 = sld [smem:[#allocation7 + $0x18a]]  ;;  %s3259_s13 = sld [smem:[#allocation7 + $0x18b]] }
  0x76   :  { %v208_v13 = vadd.f32 %v207_v5, %v190_v1  ;;  %v212_v14 = vadd.f32 %v211_v6, %v194_v2  ;;  %v224_v15 = vstv %s3199_s17  ;;  %v228_v16 = vstv %s3201_s18  ;;  %s3265_s14 = sld [smem:[#allocation7 + $0xc]]  ;;  %s3275_s15 = sld [smem:[#allocation7 + $0xd]]  ;;  %v304_v5 = vld [vmem:[#allocation2 + $0xb] sm:$0x1] }
  0x77   :  { %v218_v18 = vadd.f32 %v217_v11, %v200_v9  ;;  %v222_v19 = vadd.f32 %v221_v12, %v204_v10  ;;  %v225_v20 = vmul.f32 %v224_v15, %v214_v0  ;;  %v229_v21 = vmul.f32 %v228_v16, %v214_v0  ;;  %s3267_s1 = sld [smem:[#allocation7 + $0x8c]]  ;;  %s3277_s16 = sld [smem:[#allocation7 + $0x8d]] }
  0x78   :  { %v234_v22 = vstv %s3203_s6  ;;  %v238_v23 = vstv %s3205_s21  ;;  %v242_v24 = vstv %s3209_s22  ;;  %v246_v25 = vstv %s3211_s23  ;;  %s3271_s2 = sld [smem:[#allocation7 + $0x10c]]  ;;  %s3281_s17 = sld [smem:[#allocation7 + $0x10d]] }
  0x79   :  { %v226_v27 = vadd.f32 %v225_v20, %v208_v13  ;;  %v230_v28 = vadd.f32 %v229_v21, %v212_v14  ;;  %v235_v29 = vmul.f32 %v234_v22, %v232_v17  ;;  %v239_v30 = vmul.f32 %v238_v23, %v232_v17  ;;  %s3273_s4 = sld [smem:[#allocation7 + $0x18c]]  ;;  %s3283_s18 = sld [smem:[#allocation7 + $0x18d]]  ;;  %v322_v14 = vld [vmem:[#allocation2 + $0xc] sm:$0x1] }
  0x7a   :  { %v243_v31 = vmul.f32 %v242_v24, %v232_v17  ;;  %v247_v32 = vmul.f32 %v246_v25, %v232_v17  ;;  %v252_v33 = vstv %s3217_s24  ;;  %v256_v34 = vstv %s3219_s25  ;;  %s3289_s6 = sld [smem:[#allocation7 + $0xe]]  ;;  %s3299_s24 = sld [smem:[#allocation7 + $0xf]] }
  0x7b   :  { %v236_v35 = vadd.f32 %v235_v29, %v218_v18  ;;  %v240_v36 = vadd.f32 %v239_v30, %v222_v19  ;;  %v253_v37 = vmul.f32 %v252_v33, %v250_v26  ;;  %v257_v38 = vmul.f32 %v256_v34, %v250_v26  ;;  %s3291_s21 = sld [smem:[#allocation7 + $0x8e]]  ;;  %s3301_s25 = sld [smem:[#allocation7 + $0x8f]] }
  0x7c   :  { %v244_v39 = vadd.f32 %v243_v31, %v226_v27  ;;  %v248_v40 = vadd.f32 %v247_v32, %v230_v28  ;;  %v260_v41 = vstv %s3223_s26  ;;  %v264_v42 = vstv %s3225_s27  ;;  %s3295_s22 = sld [smem:[#allocation7 + $0x10e]]  ;;  %v340_v31 = vld [vmem:[#allocation2 + $0xd] sm:$0x1]  ;;  %s3305_s26 = sld [smem:[#allocation7 + $0x10f]] }
  0x7d   :  { %v254_v44 = vadd.f32 %v253_v37, %v236_v35  ;;  %v258_v45 = vadd.f32 %v257_v38, %v240_v36  ;;  %v261_v46 = vmul.f32 %v260_v41, %v250_v26  ;;  %v265_v47 = vmul.f32 %v264_v42, %v250_v26  ;;  %s3297_s23 = sld [smem:[#allocation7 + $0x18e]]  ;;  %s3307_s27 = sld [smem:[#allocation7 + $0x18f]] }
  0x7e   :  { %v270_v48 = vstv %s3227_s28  ;;  %v274_v49 = vstv %s3229_s29  ;;  %v278_v50 = vstv %s3233_s30  ;;  %v282_v51 = vstv %s3235_s8  ;;  %s3313_s28 = sld [smem:[#allocation7 + $0x10]]  ;;  %s4010_s19 = sld [smem:[#allocation12 + $0x185]] }
  0x7f   :  { %v262_v53 = vadd.f32 %v261_v46, %v244_v39  ;;  %v266_v54 = vadd.f32 %v265_v47, %v248_v40  ;;  %v271_v55 = vmul.f32 %v270_v48, %v268_v43  ;;  %v275_v56 = vmul.f32 %v274_v49, %v268_v43  ;;  %v358_v40 = vld [vmem:[#allocation2 + $0xe] sm:$0x1]  ;;  %s3315_s29 = sld [smem:[#allocation7 + $0x90]]  ;;  %s4012_s20 = sld [smem:[#allocation14 + $0x5]] }
  0x80   :  { %v279_v57 = vmul.f32 %v278_v50, %v268_v43  ;;  %v283_v58 = vmul.f32 %v282_v51, %v268_v43  ;;  %v288_v59 = vstv %s3241_s9  ;;  %v292_v60 = vstv %s3243_s0  ;;  %s3319_s30 = sld [smem:[#allocation7 + $0x110]]  ;;  %s3323_s9 = sld [smem:[#allocation7 + $0x11]] }
  0x81   :  { %v272_v61 = vadd.f32 %v271_v55, %v254_v44  ;;  %v276_v62 = vadd.f32 %v275_v56, %v258_v45  ;;  %v289_v63 = vmul.f32 %v288_v59, %v286_v52  ;;  %v293_v0 = vmul.f32 %v292_v60, %v286_v52  ;;  %s3321_s8 = sld [smem:[#allocation7 + $0x190]]  ;;  %s3325_s0 = sld [smem:[#allocation7 + $0x91]] }
  0x82   :  { %v280_v1 = vadd.f32 %v279_v57, %v262_v53  ;;  %v284_v2 = vadd.f32 %v283_v58, %v266_v54  ;;  %v296_v3 = vstv %s3247_s3  ;;  %v300_v4 = vstv %s3249_s5  ;;  %v376_v57 = vld [vmem:[#allocation2 + $0xf] sm:$0x1]  ;;  %s3329_s3 = sld [smem:[#allocation7 + $0x111]]  ;;  %s4021_s7 = sld [smem:[#allocation12 + $0x6]] }
  0x83   :  { %v290_v6 = vadd.f32 %v289_v63, %v272_v61  ;;  %v294_v7 = vadd.f32 %v293_v0, %v276_v62  ;;  %v297_v8 = vmul.f32 %v296_v3, %v286_v52  ;;  %v301_v9 = vmul.f32 %v300_v4, %v286_v52  ;;  %s3331_s5 = sld [smem:[#allocation7 + $0x191]] }
  0x84   :  { %v306_v10 = vstv %s3251_s10  ;;  %v310_v11 = vstv %s3253_s11  ;;  %v314_v12 = vstv %s3257_s12  ;;  %v318_v13 = vstv %s3259_s13  ;;  %s3337_s10 = sld [smem:[#allocation7 + $0x12]] }
  0x85   :  { %v298_v15 = vadd.f32 %v297_v8, %v280_v1  ;;  %v302_v16 = vadd.f32 %v301_v9, %v284_v2  ;;  %v307_v17 = vmul.f32 %v306_v10, %v304_v5  ;;  %v311_v18 = vmul.f32 %v310_v11, %v304_v5  ;;  %v394_v2 = vld [vmem:[#allocation2 + $0x10] sm:$0x1]  ;;  %s3339_s11 = sld [smem:[#allocation7 + $0x92]]  ;;  %5298 = sst [smem:[#allocation49_spill]] %s4012_s20 }
  0x86   :  { %v315_v19 = vmul.f32 %v314_v12, %v304_v5  ;;  %v319_v20 = vmul.f32 %v318_v13, %v304_v5  ;;  %v324_v21 = vstv %s3265_s14  ;;  %v328_v22 = vstv %s3267_s1  ;;  %s3343_s12 = sld [smem:[#allocation7 + $0x112]]  ;;  %s3347_s14 = sld [smem:[#allocation7 + $0x13]] }
  0x87   :  { %v308_v23 = vadd.f32 %v307_v17, %v290_v6  ;;  %v312_v24 = vadd.f32 %v311_v18, %v294_v7  ;;  %v325_v25 = vmul.f32 %v324_v21, %v322_v14  ;;  %v329_v26 = vmul.f32 %v328_v22, %v322_v14  ;;  %s3345_s13 = sld [smem:[#allocation7 + $0x192]]  ;;  %s3349_s1 = sld [smem:[#allocation7 + $0x93]] }
  0x88   :  { %v316_v27 = vadd.f32 %v315_v19, %v298_v15  ;;  %v320_v28 = vadd.f32 %v319_v20, %v302_v16  ;;  %v332_v29 = vstv %s3271_s2  ;;  %v336_v30 = vstv %s3273_s4  ;;  %v412_v19 = vld [vmem:[#allocation2 + $0x11] sm:$0x1]  ;;  %s3353_s2 = sld [smem:[#allocation7 + $0x113]]  ;;  %5297 = sst [smem:[#allocation48_spill]] %s4010_s19 }
  0x89   :  { %v326_v32 = vadd.f32 %v325_v25, %v308_v23  ;;  %v330_v33 = vadd.f32 %v329_v26, %v312_v24  ;;  %v333_v34 = vmul.f32 %v332_v29, %v322_v14  ;;  %v337_v35 = vmul.f32 %v336_v30, %v322_v14  ;;  %s3355_s4 = sld [smem:[#allocation7 + $0x193]]  ;;  %5299 = sst [smem:[#allocation50_spill]] %s4021_s7 }
  0x8a   :  { %v342_v36 = vstv %s3275_s15  ;;  %v346_v37 = vstv %s3277_s16  ;;  %v350_v38 = vstv %s3281_s17  ;;  %v354_v39 = vstv %s3283_s18  ;;  %s3361_s15 = sld [smem:[#allocation7 + $0x14]]  ;;  %s4031_s20 = sld [smem:[#allocation12 + $0x106]] }
  0x8b   :  { %v334_v41 = vadd.f32 %v333_v34, %v316_v27  ;;  %v338_v42 = vadd.f32 %v337_v35, %v320_v28  ;;  %v343_v43 = vmul.f32 %v342_v36, %v340_v31  ;;  %v347_v44 = vmul.f32 %v346_v37, %v340_v31  ;;  %v430_v28 = vld [vmem:[#allocation2 + $0x12] sm:$0x1]  ;;  %s3363_s16 = sld [smem:[#allocation7 + $0x94]]  ;;  %s4033_s19 = sld [smem:[#allocation12 + $0x186]] }
  0x8c   :  { %v351_v45 = vmul.f32 %v350_v38, %v340_v31  ;;  %v355_v46 = vmul.f32 %v354_v39, %v340_v31  ;;  %v360_v47 = vstv %s3289_s6  ;;  %v364_v48 = vstv %s3291_s21  ;;  %s3367_s17 = sld [smem:[#allocation7 + $0x114]]  ;;  %s3371_s6 = sld [smem:[#allocation7 + $0x15]] }
  0x8d   :  { %v344_v49 = vadd.f32 %v343_v43, %v326_v32  ;;  %v348_v50 = vadd.f32 %v347_v44, %v330_v33  ;;  %v361_v51 = vmul.f32 %v360_v47, %v358_v40  ;;  %v365_v52 = vmul.f32 %v364_v48, %v358_v40  ;;  %s3369_s18 = sld [smem:[#allocation7 + $0x194]]  ;;  %s3373_s21 = sld [smem:[#allocation7 + $0x95]] }
  0x8e   :  { %v352_v53 = vadd.f32 %v351_v45, %v334_v41  ;;  %v356_v54 = vadd.f32 %v355_v46, %v338_v42  ;;  %v368_v55 = vstv %s3295_s22  ;;  %v372_v56 = vstv %s3297_s23  ;;  %v448_v45 = vld [vmem:[#allocation2 + $0x13] sm:$0x1]  ;;  %s3377_s22 = sld [smem:[#allocation7 + $0x115]]  ;;  %s4045_s7 = sld [smem:[#allocation12 + $0x7]] }
  0x8f   :  { %v362_v58 = vadd.f32 %v361_v51, %v344_v49  ;;  %v366_v59 = vadd.f32 %v365_v52, %v348_v50  ;;  %v369_v60 = vmul.f32 %v368_v55, %v358_v40  ;;  %v373_v61 = vmul.f32 %v372_v56, %v358_v40  ;;  %s3379_s23 = sld [smem:[#allocation7 + $0x195]] }
  0x90   :  { %v378_v62 = vstv %s3299_s24  ;;  %v382_v63 = vstv %s3301_s25  ;;  %v386_v0 = vstv %s3305_s26  ;;  %v390_v1 = vstv %s3307_s27  ;;  %s3385_s24 = sld [smem:[#allocation7 + $0x16]] }
  0x91   :  { %v370_v3 = vadd.f32 %v369_v60, %v352_v53  ;;  %v374_v4 = vadd.f32 %v373_v61, %v356_v54  ;;  %v379_v5 = vmul.f32 %v378_v62, %v376_v57  ;;  %v383_v6 = vmul.f32 %v382_v63, %v376_v57  ;;  %v466_v54 = vld [vmem:[#allocation2 + $0x14] sm:$0x1]  ;;  %s3387_s25 = sld [smem:[#allocation7 + $0x96]]  ;;  %5302 = sst [smem:[#allocation53_spill]] %s4033_s19 }
  0x92   :  { %v387_v7 = vmul.f32 %v386_v0, %v376_v57  ;;  %v391_v8 = vmul.f32 %v390_v1, %v376_v57  ;;  %v396_v9 = vstv %s3313_s28  ;;  %v400_v10 = vstv %s3315_s29  ;;  %s3391_s26 = sld [smem:[#allocation7 + $0x116]]  ;;  %s3395_s28 = sld [smem:[#allocation7 + $0x17]] }
  0x93   :  { %v380_v11 = vadd.f32 %v379_v5, %v362_v58  ;;  %v384_v12 = vadd.f32 %v383_v6, %v366_v59  ;;  %v397_v13 = vmul.f32 %v396_v9, %v394_v2  ;;  %v401_v14 = vmul.f32 %v400_v10, %v394_v2  ;;  %s3393_s27 = sld [smem:[#allocation7 + $0x196]]  ;;  %s3397_s29 = sld [smem:[#allocation7 + $0x97]] }
  0x94   :  { %v388_v15 = vadd.f32 %v387_v7, %v370_v3  ;;  %v392_v16 = vadd.f32 %v391_v8, %v374_v4  ;;  %v404_v17 = vstv %s3319_s30  ;;  %v408_v18 = vstv %s3321_s8  ;;  %v484_v7 = vld [vmem:[#allocation2 + $0x15] sm:$0x1]  ;;  %s3401_s30 = sld [smem:[#allocation7 + $0x117]]  ;;  %5301 = sst [smem:[#allocation52_spill]] %s4031_s20 }
  0x95   :  { %v398_v20 = vadd.f32 %v397_v13, %v380_v11  ;;  %v402_v21 = vadd.f32 %v401_v14, %v384_v12  ;;  %v405_v22 = vmul.f32 %v404_v17, %v394_v2  ;;  %v409_v23 = vmul.f32 %v408_v18, %v394_v2  ;;  %s3403_s8 = sld [smem:[#allocation7 + $0x197]]  ;;  %5304 = sst [smem:[#allocation55_spill]] %s4045_s7 }
  0x96   :  { %v414_v24 = vstv %s3323_s9  ;;  %v418_v25 = vstv %s3325_s0  ;;  %v422_v26 = vstv %s3329_s3  ;;  %v426_v27 = vstv %s3331_s5  ;;  %s3409_s9 = sld [smem:[#allocation7 + $0x18]]  ;;  %s4052_s19 = sld [smem:[#allocation12 + $0x87]] }
  0x97   :  { %v406_v29 = vadd.f32 %v405_v22, %v388_v15  ;;  %v410_v30 = vadd.f32 %v409_v23, %v392_v16  ;;  %v415_v31 = vmul.f32 %v414_v24, %v412_v19  ;;  %v419_v32 = vmul.f32 %v418_v25, %v412_v19  ;;  %v502_v16 = vld [vmem:[#allocation2 + $0x16] sm:$0x1]  ;;  %s3411_s0 = sld [smem:[#allocation7 + $0x98]]  ;;  %s4054_s20 = sld [smem:[#allocation12 + $0x107]] }
  0x98   :  { %v423_v33 = vmul.f32 %v422_v26, %v412_v19  ;;  %v427_v34 = vmul.f32 %v426_v27, %v412_v19  ;;  %v432_v35 = vstv %s3337_s10  ;;  %v436_v36 = vstv %s3339_s11  ;;  %s3415_s3 = sld [smem:[#allocation7 + $0x118]]  ;;  %s3419_s10 = sld [smem:[#allocation7 + $0x19]] }
  0x99   :  { %v416_v37 = vadd.f32 %v415_v31, %v398_v20  ;;  %v420_v38 = vadd.f32 %v419_v32, %v402_v21  ;;  %v433_v39 = vmul.f32 %v432_v35, %v430_v28  ;;  %v437_v40 = vmul.f32 %v436_v36, %v430_v28  ;;  %s3417_s5 = sld [smem:[#allocation7 + $0x198]]  ;;  %s3421_s11 = sld [smem:[#allocation7 + $0x99]] }
  0x9a   :  { %v424_v41 = vadd.f32 %v423_v33, %v406_v29  ;;  %v428_v42 = vadd.f32 %v427_v34, %v410_v30  ;;  %v440_v43 = vstv %s3343_s12  ;;  %v444_v44 = vstv %s3345_s13  ;;  %v520_v33 = vld [vmem:[#allocation2 + $0x17] sm:$0x1]  ;;  %s3425_s12 = sld [smem:[#allocation7 + $0x119]]  ;;  %s4060_s7 = sld [smem:[#allocation12 + $0x187]] }
  0x9b   :  { %v434_v46 = vadd.f32 %v433_v39, %v416_v37  ;;  %v438_v47 = vadd.f32 %v437_v40, %v420_v38  ;;  %v441_v48 = vmul.f32 %v440_v43, %v430_v28  ;;  %v445_v49 = vmul.f32 %v444_v44, %v430_v28  ;;  %s3427_s13 = sld [smem:[#allocation7 + $0x199]] }
  0x9c   :  { %v450_v50 = vstv %s3347_s14  ;;  %v454_v51 = vstv %s3349_s1  ;;  %v458_v52 = vstv %s3353_s2  ;;  %v462_v53 = vstv %s3355_s4  ;;  %s3433_s14 = sld [smem:[#allocation7 + $0x1a]] }
  0x9d   :  { %v442_v55 = vadd.f32 %v441_v48, %v424_v41  ;;  %v446_v56 = vadd.f32 %v445_v49, %v428_v42  ;;  %v451_v57 = vmul.f32 %v450_v50, %v448_v45  ;;  %v455_v58 = vmul.f32 %v454_v51, %v448_v45  ;;  %v538_v42 = vld [vmem:[#allocation2 + $0x18] sm:$0x1]  ;;  %s3435_s1 = sld [smem:[#allocation7 + $0x9a]] }
  0x9e   :  { %v459_v59 = vmul.f32 %v458_v52, %v448_v45  ;;  %v463_v60 = vmul.f32 %v462_v53, %v448_v45  ;;  %v468_v61 = vstv %s3361_s15  ;;  %v472_v62 = vstv %s3363_s16  ;;  %s3439_s2 = sld [smem:[#allocation7 + $0x11a]]  ;;  %s3443_s15 = sld [smem:[#allocation7 + $0x1b]] }
  0x9f   :  { %v452_v63 = vadd.f32 %v451_v57, %v434_v46  ;;  %v456_v0 = vadd.f32 %v455_v58, %v438_v47  ;;  %v469_v1 = vmul.f32 %v468_v61, %v466_v54  ;;  %v473_v2 = vmul.f32 %v472_v62, %v466_v54  ;;  %s3441_s4 = sld [smem:[#allocation7 + $0x19a]]  ;;  %s3445_s16 = sld [smem:[#allocation7 + $0x9b]] }
  0xa0   :  { %v460_v3 = vadd.f32 %v459_v59, %v442_v55  ;;  %v464_v4 = vadd.f32 %v463_v60, %v446_v56  ;;  %v476_v5 = vstv %s3367_s17  ;;  %v480_v6 = vstv %s3369_s18  ;;  %v556_v59 = vld [vmem:[#allocation2 + $0x19] sm:$0x1]  ;;  %s3449_s17 = sld [smem:[#allocation7 + $0x11b]]  ;;  %5305 = sst [smem:[#allocation56_spill]] %s4054_s20 }
  0xa1   :  { %v470_v8 = vadd.f32 %v469_v1, %v452_v63  ;;  %v474_v9 = vadd.f32 %v473_v2, %v456_v0  ;;  %v477_v10 = vmul.f32 %v476_v5, %v466_v54  ;;  %v481_v11 = vmul.f32 %v480_v6, %v466_v54  ;;  %s3451_s18 = sld [smem:[#allocation7 + $0x19b]]  ;;  %s4172_s20 = sld [smem:[#allocation12 + $0x18c]] }
  0xa2   :  { %v486_v12 = vstv %s3371_s6  ;;  %v490_v13 = vstv %s3373_s21  ;;  %v494_v14 = vstv %s3377_s22  ;;  %v498_v15 = vstv %s3379_s23  ;;  %s3457_s6 = sld [smem:[#allocation7 + $0x1c]]  ;;  %5306 = sst [smem:[#allocation57_spill]] %s4060_s7 }
  0xa3   :  { %v478_v17 = vadd.f32 %v477_v10, %v460_v3  ;;  %v482_v18 = vadd.f32 %v481_v11, %v464_v4  ;;  %v487_v19 = vmul.f32 %v486_v12, %v484_v7  ;;  %v491_v20 = vmul.f32 %v490_v13, %v484_v7  ;;  %v574_v4 = vld [vmem:[#allocation2 + $0x1a] sm:$0x1]  ;;  %s3459_s21 = sld [smem:[#allocation7 + $0x9c]] }
  0xa4   :  { %v495_v21 = vmul.f32 %v494_v14, %v484_v7  ;;  %v499_v22 = vmul.f32 %v498_v15, %v484_v7  ;;  %v504_v23 = vstv %s3385_s24  ;;  %v508_v24 = vstv %s3387_s25  ;;  %s3463_s22 = sld [smem:[#allocation7 + $0x11c]]  ;;  %s3467_s24 = sld [smem:[#allocation7 + $0x1d]] }
  0xa5   :  { %v488_v25 = vadd.f32 %v487_v19, %v470_v8  ;;  %v492_v26 = vadd.f32 %v491_v20, %v474_v9  ;;  %v505_v27 = vmul.f32 %v504_v23, %v502_v16  ;;  %v509_v28 = vmul.f32 %v508_v24, %v502_v16  ;;  %s3465_s23 = sld [smem:[#allocation7 + $0x19c]]  ;;  %s3469_s25 = sld [smem:[#allocation7 + $0x9d]] }
  0xa6   :  { %v496_v29 = vadd.f32 %v495_v21, %v478_v17  ;;  %v500_v30 = vadd.f32 %v499_v22, %v482_v18  ;;  %v512_v31 = vstv %s3391_s26  ;;  %v516_v32 = vstv %s3393_s27  ;;  %v592_v21 = vld [vmem:[#allocation2 + $0x1b] sm:$0x1]  ;;  %s3473_s26 = sld [smem:[#allocation7 + $0x11d]]  ;;  %s4170_s7 = sld [smem:[#allocation12 + $0x10c]] }
  0xa7   :  { %v506_v34 = vadd.f32 %v505_v27, %v488_v25  ;;  %v510_v35 = vadd.f32 %v509_v28, %v492_v26  ;;  %v513_v36 = vmul.f32 %v512_v31, %v502_v16  ;;  %v517_v37 = vmul.f32 %v516_v32, %v502_v16  ;;  %s3475_s27 = sld [smem:[#allocation7 + $0x19d]]  ;;  %5338 = sst [smem:[#allocation76_spill]] %s4172_s20 }
  0xa8   :  { %v522_v38 = vstv %s3395_s28  ;;  %v526_v39 = vstv %s3397_s29  ;;  %v530_v40 = vstv %s3401_s30  ;;  %v534_v41 = vstv %s3403_s8  ;;  %s3481_s28 = sld [smem:[#allocation7 + $0x1e]]  ;;  %s4399_s20 = sld [smem:[#allocation12 + $0x18f]] }
  0xa9   :  { %v514_v43 = vadd.f32 %v513_v36, %v496_v29  ;;  %v518_v44 = vadd.f32 %v517_v37, %v500_v30  ;;  %v523_v45 = vmul.f32 %v522_v38, %v520_v33  ;;  %v527_v46 = vmul.f32 %v526_v39, %v520_v33  ;;  %v610_v30 = vld [vmem:[#allocation2 + $0x1c] sm:$0x1]  ;;  %s3483_s29 = sld [smem:[#allocation7 + $0x9e]] }
  0xaa   :  { %v531_v47 = vmul.f32 %v530_v40, %v520_v33  ;;  %v535_v48 = vmul.f32 %v534_v41, %v520_v33  ;;  %v540_v49 = vstv %s3409_s9  ;;  %v544_v50 = vstv %s3411_s0  ;;  %s3487_s30 = sld [smem:[#allocation7 + $0x11e]]  ;;  %s3491_s9 = sld [smem:[#allocation7 + $0x1f]] }
  0xab   :  { %v524_v51 = vadd.f32 %v523_v45, %v506_v34  ;;  %v528_v52 = vadd.f32 %v527_v46, %v510_v35  ;;  %v541_v53 = vmul.f32 %v540_v49, %v538_v42  ;;  %v545_v54 = vmul.f32 %v544_v50, %v538_v42  ;;  %s3489_s8 = sld [smem:[#allocation7 + $0x19e]]  ;;  %s3493_s0 = sld [smem:[#allocation7 + $0x9f]] }
  0xac   :  { %v532_v55 = vadd.f32 %v531_v47, %v514_v43  ;;  %v536_v56 = vadd.f32 %v535_v48, %v518_v44  ;;  %v548_v57 = vstv %s3415_s3  ;;  %v552_v58 = vstv %s3417_s5  ;;  %v628_v47 = vld [vmem:[#allocation2 + $0x1d] sm:$0x1]  ;;  %s3497_s3 = sld [smem:[#allocation7 + $0x11f]]  ;;  %5337 = sst [smem:[#allocation75_spill]] %s4170_s7 }
  0xad   :  { %v542_v60 = vadd.f32 %v541_v53, %v524_v51  ;;  %v546_v61 = vadd.f32 %v545_v54, %v528_v52  ;;  %v549_v62 = vmul.f32 %v548_v57, %v538_v42  ;;  %v553_v63 = vmul.f32 %v552_v58, %v538_v42  ;;  %s3499_s5 = sld [smem:[#allocation7 + $0x19f]] }
  0xae   :  { %v558_v0 = vstv %s3419_s10  ;;  %v562_v1 = vstv %s3421_s11  ;;  %v566_v2 = vstv %s3425_s12  ;;  %v570_v3 = vstv %s3427_s13  ;;  %s3505_s10 = sld [smem:[#allocation8]]  ;;  %s3507_s11 = sld [smem:[#allocation8 + $0x1]] }
  0xaf   :  { %v550_v5 = vadd.f32 %v549_v62, %v532_v55  ;;  %v554_v6 = vadd.f32 %v553_v63, %v536_v56  ;;  %v559_v7 = vmul.f32 %v558_v0, %v556_v59  ;;  %v563_v8 = vmul.f32 %v562_v1, %v556_v59  ;;  %v646_v56 = vld [vmem:[#allocation2 + $0x1e] sm:$0x1]  ;;  %s3509_s12 = sld [smem:[#allocation8 + $0x2]]  ;;  %s3511_s13 = sld [smem:[#allocation8 + $0x3]] }
  0xb0   :  { %v567_v9 = vmul.f32 %v566_v2, %v556_v59  ;;  %v571_v10 = vmul.f32 %v570_v3, %v556_v59  ;;  %v576_v11 = vstv %s3433_s14  ;;  %v580_v12 = vstv %s3435_s1  ;;  %s3743_s14 = sld [smem:[#allocation9]]  ;;  %5352 = sst [smem:[#allocation90_spill]] %s4399_s20 }
  0xb1   :  { %v560_v13 = vadd.f32 %v559_v7, %v542_v60  ;;  %v564_v14 = vadd.f32 %v563_v8, %v546_v61  ;;  %v577_v15 = vmul.f32 %v576_v11, %v574_v4  ;;  %v581_v16 = vmul.f32 %v580_v12, %v574_v4  ;;  %s3751_s1 = sld [smem:[#allocation11]]  ;;  %s4401_s7 = sld [smem:[#allocation14 + $0xf]] }
  0xb2   :  { %v568_v17 = vadd.f32 %v567_v9, %v550_v5  ;;  %v572_v18 = vadd.f32 %v571_v10, %v554_v6  ;;  %v584_v19 = vstv %s3439_s2  ;;  %v588_v20 = vstv %s3441_s4  ;;  %v664_v9 = vld [vmem:[#allocation2 + $0x1f] sm:$0x1]  ;;  %s2715_s2 = sld [smem:[#allocation9 + $0x1]] }
  0xb3   :  { %v578_v22 = vadd.f32 %v577_v15, %v560_v13  ;;  %v582_v23 = vadd.f32 %v581_v16, %v564_v14  ;;  %v585_v24 = vmul.f32 %v584_v19, %v574_v4  ;;  %v589_v25 = vmul.f32 %v588_v20, %v574_v4  ;;  %s2716_s4 = sld [smem:[#allocation11 + $0x1]] }
  0xb4   :  { %v594_v26 = vstv %s3443_s15  ;;  %v598_v27 = vstv %s3445_s16  ;;  %v602_v28 = vstv %s3449_s17  ;;  %v606_v29 = vstv %s3451_s18  ;;  %s3830_s15 = sld [smem:[#allocation9 + $0x2]]  ;;  %s3864_s17 = sld [smem:[#allocation9 + $0x3]] }
  0xb5   :  { %v586_v31 = vadd.f32 %v585_v24, %v568_v17  ;;  %v590_v32 = vadd.f32 %v589_v25, %v572_v18  ;;  %v595_v33 = vmul.f32 %v594_v26, %v592_v21  ;;  %v599_v34 = vmul.f32 %v598_v27, %v592_v21  ;;  %s3832_s16 = sld [smem:[#allocation11 + $0x2]]  ;;  %s3875_s18 = sld [smem:[#allocation11 + $0x3]] }
  0xb6   :  { %v603_v35 = vmul.f32 %v602_v28, %v592_v21  ;;  %v607_v36 = vmul.f32 %v606_v29, %v592_v21  ;;  %v612_v37 = vstv %s3457_s6  ;;  %v616_v38 = vstv %s3459_s21  ;;  %s3893_s6 = sld [smem:[#allocation12]] }
  0xb7   :  { %v596_v39 = vadd.f32 %v595_v33, %v578_v22  ;;  %v600_v40 = vadd.f32 %v599_v34, %v582_v23  ;;  %v613_v41 = vmul.f32 %v612_v37, %v610_v30  ;;  %v617_v42 = vmul.f32 %v616_v38, %v610_v30  ;;  %s3895_s21 = sld [smem:[#allocation12 + $0x80]]  ;;  %5353 = sst [smem:[#allocation91_spill]] %s4401_s7 }
  0xb8   :  { %v604_v43 = vadd.f32 %v603_v35, %v586_v31  ;;  %v608_v44 = vadd.f32 %v607_v36, %v590_v32  ;;  %v620_v45 = vstv %s3463_s22  ;;  %v624_v46 = vstv %s3465_s23  ;;  %s3901_s22 = sld [smem:[#allocation12 + $0x100]]  ;;  %s3903_s23 = sld [smem:[#allocation12 + $0x1]] }
  0xb9   :  { %v614_v48 = vadd.f32 %v613_v41, %v596_v39  ;;  %v618_v49 = vadd.f32 %v617_v42, %v600_v40  ;;  %v621_v50 = vmul.f32 %v620_v45, %v610_v30  ;;  %v625_v51 = vmul.f32 %v624_v46, %v610_v30  ;;  %s4494_s7 = sld [smem:[#allocation12 + $0x14]] }
  0xba   :  { %v630_v52 = vstv %s3467_s24  ;;  %v634_v53 = vstv %s3469_s25  ;;  %v638_v54 = vstv %s3473_s26  ;;  %v642_v55 = vstv %s3475_s27  ;;  %s3910_s24 = sld [smem:[#allocation12 + $0x81]]  ;;  %s3924_s26 = sld [smem:[#allocation12 + $0x180]] }
  0xbb   :  { %v622_v57 = vadd.f32 %v621_v50, %v604_v43  ;;  %v626_v58 = vadd.f32 %v625_v51, %v608_v44  ;;  %v631_v59 = vmul.f32 %v630_v52, %v628_v47  ;;  %v635_v60 = vmul.f32 %v634_v53, %v628_v47  ;;  %s3912_s25 = sld [smem:[#allocation12 + $0x101]] }
  0xbc   :  { %v639_v61 = vmul.f32 %v638_v54, %v628_v47  ;;  %v643_v62 = vmul.f32 %v642_v55, %v628_v47  ;;  %v648_v63 = vstv %s3481_s28  ;;  %v652_v0 = vstv %s3483_s29  ;;  %5271 = sst [smem:[#allocation22_spill]] %s3893_s6  ;;  %s3926_s27 = sld [smem:[#allocation12 + $0x181]] }
  0xbd   :  { %v632_v1 = vadd.f32 %v631_v59, %v614_v48  ;;  %v636_v2 = vadd.f32 %v635_v60, %v618_v49  ;;  %v649_v3 = vmul.f32 %v648_v63, %v646_v56  ;;  %v653_v4 = vmul.f32 %v652_v0, %v646_v56  ;;  %5272 = sst [smem:[#allocation23_spill]] %s3895_s21  ;;  %s3936_s28 = sld [smem:[#allocation12 + $0x2]] }
  0xbe   :  { %v640_v5 = vadd.f32 %v639_v61, %v622_v57  ;;  %v644_v6 = vadd.f32 %v643_v62, %v626_v58  ;;  %v656_v7 = vstv %s3487_s30  ;;  %v660_v8 = vstv %s3489_s8  ;;  %5273 = sst [smem:[#allocation24_spill]] %s3901_s22 }
  0xbf   :  { %v650_v10 = vadd.f32 %v649_v3, %v632_v1  ;;  %v654_v11 = vadd.f32 %v653_v4, %v636_v2  ;;  %v657_v12 = vmul.f32 %v656_v7, %v646_v56  ;;  %v661_v13 = vmul.f32 %v660_v8, %v646_v56  ;;  %5274 = sst [smem:[#allocation25_spill]] %s3903_s23  ;;  %s3938_s29 = sld [smem:[#allocation12 + $0x82]] }
  0xc0   :  { %v666_v14 = vstv %s3491_s9  ;;  %v670_v15 = vstv %s3493_s0  ;;  %v674_v16 = vstv %s3497_s3  ;;  %v678_v17 = vstv %s3499_s5  ;;  %5275 = sst [smem:[#allocation26_spill]] %s3910_s24  ;;  %s3943_s30 = sld [smem:[#allocation12 + $0x102]] }
  0xc1   :  { %v658_v18 = vadd.f32 %v657_v12, %v640_v5  ;;  %v662_v19 = vadd.f32 %v661_v13, %v644_v6  ;;  %v667_v20 = vmul.f32 %v666_v14, %v664_v9  ;;  %v671_v21 = vmul.f32 %v670_v15, %v664_v9  ;;  %5276 = sst [smem:[#allocation27_spill]] %s3912_s25  ;;  %s3945_s8 = sld [smem:[#allocation12 + $0x182]] }
  0xc2   :  { %v675_v22 = vmul.f32 %v674_v16, %v664_v9  ;;  %v679_v23 = vmul.f32 %v678_v17, %v664_v9  ;;  %v682_v24 = vstv %s3505_s10  ;;  %v685_v25 = vstv %s3507_s11  ;;  %5277 = sst [smem:[#allocation28_spill]] %s3924_s26  ;;  %s3952_s9 = sld [smem:[#allocation12 + $0x3]] }
  0xc3   :  { %v668_v26 = vadd.f32 %v667_v20, %v650_v10  ;;  %v672_v27 = vadd.f32 %v671_v21, %v654_v11  ;;  %v688_v28 = vstv %s3509_s12  ;;  %v691_v29 = vstv %s3511_s13  ;;  %5278 = sst [smem:[#allocation29_spill]] %s3926_s27  ;;  %s3954_s0 = sld [smem:[#allocation12 + $0x83]] }
  0xc4   :  { %v676_v30 = vadd.f32 %v675_v22, %v658_v18  ;;  %v680_v31 = vadd.f32 %v679_v23, %v662_v19  ;;  %v3064_v14 = vmov 683565275   ;;  %v3065_v16 = vmov 2475754826   ;;  %5279 = sst [smem:[#allocation30_spill]] %s3936_s28  ;;  %s3965_s5 = sld [smem:[#allocation14 + $0x1]] }
  0xc5   :  { %v683_v32 = vadd.f32 %v682_v24, %v668_v26  ;;  %v686_v33 = vadd.f32 %v685_v25, %v672_v27  ;;  %v3066_v18 = vmov 2131351028   ;;  %v3067_v20 = vmov 2102212464   ;;  %5280 = sst [smem:[#allocation31_spill]] %s3938_s29  ;;  %s3963_s3 = sld [smem:[#allocation14]] }
  0xc6   :  { %v689_v34 = vadd.f32 %v688_v28, %v676_v30  ;;  %v3525_v35 = vadd.f32 %v691_v29, %v680_v31  ;;  %v3068_v22 = vmov 920167782   ;;  %v3069_v30 = vmov 1326507024   ;;  %5281 = sst [smem:[#allocation32_spill]] %s3943_s30  ;;  %s3973_s11 = sld [smem:[#allocation12 + $0x103]] }
  0xc7   :  { %v693_v36 = vmin.f32 %v683_v32, %v686_v33  ;;  %v696_v37 = vmax.f32 %v683_v32, %v686_v33  ;;  %5282 = sst [smem:[#allocation33_spill]] %s3945_s8  ;;  %s3971_s10 = sld [smem:[#allocation14 + $0x2]] }
  0xc8   :  { %v694_v38 = vmin.f32 %v689_v34, %v3525_v35  ;;  %v697_v39 = vmax.f32 %v689_v34, %v3525_v35  ;;  %5283 = sst [smem:[#allocation34_spill]] %s3952_s9  ;;  %s3978_s12 = sld [smem:[#allocation12 + $0x183]] }
  0xc9   :  { %5284 = sst [smem:[#allocation35_spill]] %s3954_s0  ;;  %s3980_s13 = sld [smem:[#allocation14 + $0x3]] }
  0xca   :  { %v3529_v40 = vmin.f32 %v693_v36, %v694_v38  ;;  %v698_v41 = vmax.f32 %v696_v37, %v697_v39  ;;  %5286 = sst [smem:[#allocation37_spill]] %s3965_s5  ;;  %s4109_s5 = sld [smem:[#allocation12 + $0x189]] }
  0xcb   :  { %5285 = sst [smem:[#allocation36_spill]] %s3963_s3 }
  0xcc   :  { %v699_v42 = vsub.f32 %v698_v41, %v3529_v40  ;;  %v703_v44 = vsub.f32 %v683_v32, %v3529_v40  ;;  %v912_v45 = vsub.f32 %v686_v33, %v3529_v40  ;;  %v1121_v47 = vsub.f32 %v689_v34, %v3529_v40  ;;  %5288 = sst [smem:[#allocation39_spill]] %s3973_s11 }
  0xcd   :  { %5287 = sst [smem:[#allocation38_spill]] %s3971_s10  ;;  %s4111_s10 = sld [smem:[#allocation14 + $0x9]] }
  0xce   :  { %v700_v43 = vadd.f32 1e-08, %v699_v42  ;;  %5289 = sst [smem:[#allocation40_spill]] %s3978_s12 }
  0xcf   :  { %5290 = sst [smem:[#allocation41_spill]] %s3980_s13  ;;  %s5325_s13 = sld [smem:[#allocation55_spill]] }
  0xd0   :  { %2911 = vrcp.f32 %v700_v43  ;;  %5313 = sst [smem:[#allocation64_spill]] %s4109_s5  ;;  %s4453_s5 = sld [smem:[#allocation14 + $0x11]] }
  0xd3   :  { %5314 = sst [smem:[#allocation65_spill]] %s4111_s10  ;;  %s4162_s10 = sld [smem:[#allocation12 + $0xc]] }
  0xd6   :  { %5363 = sst [smem:[#allocation101_spill]] %s4453_s5  ;;  %s4526_s5 = sld [smem:[#allocation12 + $0x195]] }
  0xd9   :  { %5335 = sst [smem:[#allocation73_spill]] %s4162_s10  ;;  %s4411_s10 = sld [smem:[#allocation12 + $0x90]] }
  0xda   :  { %v2912_v46 = vpop.eup %2911 }
  0xdb   :  { %v3535_v48 = vmul.f32 1.5707964, %v2912_v46 }
  0xdd   :  { %v3538_v49 = vmul.f32 %v703_v44, %v3535_v48  ;;  %v3541_v50 = vmul.f32 %v912_v45, %v3535_v48  ;;  %v3544_v51 = vmul.f32 %v1121_v47, %v3535_v48 }
  0xdf   :  { %v705_v52 = vand.u32 2147483647, %v3538_v49  ;;  %v708_v53 = vand.u32 2139095040, %v3538_v49  ;;  %v914_v54 = vand.u32 2147483647, %v3541_v50  ;;  %v917_v55 = vand.u32 2139095040, %v3541_v50 }
  0xe0   :  { %v1126_v60 = vand.u32 2139095040, %v3544_v51  ;;  %5355 = sst [smem:[#allocation93_spill]] %s4411_s10 }
  0xe1   :  { %v709_v56 = vshrl.u32 %v708_v53, 23  ;;  %v712_v57 = vand.u32 8388607, %v705_v52  ;;  %v918_v58 = vshrl.u32 %v917_v55, 23  ;;  %v921_v59 = vand.u32 8388607, %v914_v54 }
  0xe2   :  { %v1127_v63 = vshrl.u32 %v1126_v60, 23 }
  0xe3   :  { %v2683_v61 = vadd.s32 4294967169, %v709_v56  ;;  %v2691_v62 = vadd.s32 4294967169, %v918_v58  ;;  %v713_v1 = vor.u32 8388608, %v712_v57  ;;  %v922_v2 = vor.u32 8388608, %v921_v59 }
  0xe4   :  { %v2699_v4 = vadd.s32 4294967169, %v1127_v63 }
  0xe5   :  { %v715_v0 = vadd.s32 1, %v2683_v61  ;;  %v924_v3 = vadd.s32 1, %v2691_v62  ;;  %v3555_v9 = vshll.u32 %v713_v1, 8  ;;  %v3557_v11 = vshll.u32 %v922_v2, 8 }
  0xe6   :  { %v3559_v12 = vadd.s32 1, %v2699_v4 }
  0xe7   :  { %vm716_vm0 = vcmp.gt.s32.totalorder %v715_v0, 0  ;;  %vm925_vm1 = vcmp.gt.s32.totalorder %v924_v3, 0 }
  0xe8   :  { %v717_v5 = vsel %vm716_vm0, %v715_v0, 0  ;;  %v926_v8 = vsel %vm925_vm1, %v924_v3, 0  ;;  %vm1134_vm6 = vcmp.gt.s32.totalorder %v3559_v12, 0 }
  0xe9   :  { %v718_v6 = vshrl.u32 %v717_v5, 5  ;;  %v719_v7 = vand.u32 31, %v717_v5  ;;  %v928_v10 = vand.u32 31, %v926_v8  ;;  %v3566_v24 = vshrl.u32 %v926_v8, 5 }
  0xeb   :  { %v720_v13 = vsub.s32 32, %v719_v7  ;;  %v722_v15 = vshll.u32 %v3064_v14, %v719_v7  ;;  %v725_v17 = vshll.u32 %v3065_v16, %v719_v7  ;;  %v728_v19 = vshll.u32 %v3066_v18, %v719_v7 }
  0xec   :  { %v731_v21 = vshll.u32 %v3067_v20, %v719_v7  ;;  %v734_v23 = vshll.u32 %v3068_v22, %v719_v7  ;;  %vm737_vm2 = vcmp.lt.s32.totalorder %v718_v6, 1  ;;  %vm738_vm3 = vcmp.lt.s32.totalorder %v718_v6, 2 }
  0xed   :  { %v721_v25 = vshrl.u32 %v3064_v14, %v720_v13  ;;  %v723_v26 = vshrl.u32 %v3065_v16, %v720_v13  ;;  %v726_v27 = vshrl.u32 %v3066_v18, %v720_v13  ;;  %v729_v28 = vshrl.u32 %v3067_v20, %v720_v13 }
  0xee   :  { %v732_v29 = vshrl.u32 %v3068_v22, %v720_v13  ;;  %v735_v31 = vshrl.u32 %v3069_v30, %v720_v13  ;;  %vm740_vm4 = vcmp.lt.s32.totalorder %v718_v6, 4  ;;  %v929_v36 = vsub.s32 32, %v928_v10 }
  0xef   :  { %v724_v32 = vor.u32 %v723_v26, %v722_v15  ;;  %v727_v33 = vor.u32 %v726_v27, %v725_v17  ;;  %v730_v34 = vor.u32 %v729_v28, %v728_v19  ;;  %vm739_vm5 = vcmp.lt.s32.totalorder %v718_v6, 3 }
  0xf0   :  { %v733_v37 = vor.u32 %v732_v29, %v731_v21  ;;  %v736_v38 = vor.u32 %v735_v31, %v734_v23  ;;  %v931_v39 = vshll.u32 %v3064_v14, %v928_v10  ;;  %v934_v53 = vshll.u32 %v3065_v16, %v928_v10 }
  0xf1   :  { %v741_v41 = vsel %vm737_vm2, %v721_v25, %v724_v32  ;;  %v742_v42 = vsel %vm740_vm4, %v730_v34, 2102212464  ;;  %v745_v43 = vsel %vm737_vm2, %v724_v32, %v727_v33  ;;  %v749_v44 = vsel %vm737_vm2, %v727_v33, %v730_v34 }
  0xf2   :  { %v743_v45 = vsel %vm739_vm5, %v727_v33, %v742_v42  ;;  %v746_v46 = vsel %vm740_vm4, %v733_v37, 920167782  ;;  %v750_v47 = vsel %vm740_vm4, %v736_v38, 1326507024  ;;  %v930_v57 = vshrl.u32 %v3064_v14, %v929_v36 }
  0xf3   :  { %v747_v55 = vsel %vm739_vm5, %v730_v34, %v746_v46  ;;  %v751_v56 = vsel %vm739_vm5, %v733_v37, %v750_v47  ;;  %v932_v58 = vshrl.u32 %v3065_v16, %v929_v36  ;;  %v744_v59 = vsel %vm738_vm3, %v741_v41, %v743_v45 }
  0xf4   :  { %v748_v60 = vsel %vm738_vm3, %v745_v43, %v747_v55  ;;  %v752_v61 = vsel %vm738_vm3, %v749_v44, %v751_v56  ;;  %v935_v62 = vshrl.u32 %v3066_v18, %v929_v36  ;;  %v937_v5 = vshll.u32 %v3066_v18, %v928_v10 }
  0xf5   :  { %v3587_v63 = vmul.u32.u64.low %v3555_v9, %v752_v61  ;;  %v3588_v0 = vmul.u32.u64.high %v3555_v9, %v752_v61, %v3587_v63  ;;  %v3591_v1 = vmul.u32.u64.low %v3555_v9, %v748_v60  ;;  %v3592_v2 = vmul.u32.u64.high %v3555_v9, %v748_v60, %v3591_v1 }
  0xf6   :  { %v933_v3 = vor.u32 %v932_v58, %v931_v39  ;;  %v936_v4 = vor.u32 %v935_v62, %v934_v53  ;;  %v938_v7 = vshrl.u32 %v3067_v20, %v929_v36  ;;  %v940_v6 = vshll.u32 %v3067_v20, %v928_v10 }
  0xf7   :  { %v941_v8 = vshrl.u32 %v3068_v22, %v929_v36  ;;  %v943_v13 = vshll.u32 %v3068_v22, %v928_v10  ;;  %v944_v15 = vshrl.u32 %v3069_v30, %v929_v36  ;;  %v760_v17 = vmul.u32 %v3555_v9, %v744_v59 }
  0xf8   :  { %v939_v19 = vor.u32 %v938_v7, %v937_v5  ;;  %vm946_vm7 = vcmp.lt.s32.totalorder %v3566_v24, 1  ;;  %vm947_vm8 = vcmp.lt.s32.totalorder %v3566_v24, 2  ;;  %vm762_vm9 = vc.u32 %v3588_v0, %v3591_v1 }
  0xf9   :  { %v763_v21 = vadd.s32 1, %v3592_v2  ;;  %v942_v23 = vor.u32 %v941_v8, %v940_v6  ;;  %vm948_vm10 = vcmp.lt.s32.totalorder %v3566_v24, 3  ;;  %v945_v25 = vor.u32 %v944_v15, %v943_v13 }
  0xfa   :  { %vm949_vm11 = vcmp.lt.s32.totalorder %v3566_v24, 4  ;;  %v950_v10 = vsel %vm946_vm7, %v930_v57, %v933_v3  ;;  %v954_v26 = vsel %vm946_vm7, %v933_v3, %v936_v4  ;;  %v958_v29 = vsel %vm946_vm7, %v936_v4, %v939_v19 }
  0xfb   :  { %v764_v9 = vsel %vm762_vm9, %v763_v21, %v3592_v2  ;;  %v951_v27 = vsel %vm949_vm11, %v939_v19, 2102212464  ;;  %v955_v28 = vsel %vm949_vm11, %v942_v23, 920167782  ;;  %v959_v34 = vsel %vm949_vm11, %v945_v25, 1326507024 }
  0xfc   :  { %v765_v31 = vadd.s32 %v764_v9, %v760_v17  ;;  %v952_v32 = vsel %vm948_vm10, %v936_v4, %v951_v27  ;;  %v956_v33 = vsel %vm948_vm10, %v939_v19, %v955_v28  ;;  %v960_v38 = vsel %vm948_vm10, %v942_v23, %v959_v34 }
  0xfd   :  { %v953_v36 = vsel %vm947_vm8, %v950_v10, %v952_v32  ;;  %v957_v37 = vsel %vm947_vm8, %v954_v26, %v956_v33  ;;  %v1135_v39 = vsel %vm1134_vm6, %v3559_v12, 0  ;;  %v961_v42 = vsel %vm947_vm8, %v958_v29, %v960_v38 }
  0xfe   :  { %v766_v41 = vadd.s32 536870912, %v765_v31  ;;  %v3620_v43 = vmul.u32.u64.low %v3557_v11, %v957_v37  ;;  %v3621_v44 = vmul.u32.u64.high %v3557_v11, %v957_v37, %v3620_v43  ;;  %v1330_v47 = vsub.f32 %v3525_v35, %v3529_v40 }
  0xff   :  { %v3625_v45 = vmul.u32.u64.low %v3557_v11, %v961_v42  ;;  %v3626_v46 = vmul.u32.u64.high %v3557_v11, %v961_v42, %v3625_v45  ;;  %v1137_v55 = vand.u32 31, %v1135_v39  ;;  %v969_v12 = vmul.u32 %v3557_v11, %v953_v36 }
 0x100   :  { %v3630_v53 = vshrl.u32 %v766_v41, 30  ;;  %v972_v56 = vadd.s32 1, %v3621_v44  ;;  %v3638_v57 = vmul.f32 %v1330_v47, %v3535_v48  ;;  %v1123_v11 = vand.u32 2147483647, %v3544_v51 }
 0x101   :  { %vm971_vm12 = vc.u32 %v3626_v46, %v3620_v43  ;;  %v1138_v35 = vsub.s32 32, %v1137_v55  ;;  %v1136_v62 = vshrl.u32 %v1135_v39, 5  ;;  %v1140_v63 = vshll.u32 %v3064_v14, %v1137_v55 }
 0x102   :  { %v768_v24 = vshll.u32 %v3630_v53, 30  ;;  %v973_v59 = vsel %vm971_vm12, %v972_v56, %v3621_v44  ;;  %v1335_v2 = vand.u32 2139095040, %v3638_v57  ;;  %v1143_v4 = vshll.u32 %v3065_v16, %v1137_v55 }
 0x103   :  { %v974_v40 = vadd.s32 %v973_v59, %v969_v12  ;;  %v1141_v48 = vshrl.u32 %v3065_v16, %v1138_v35  ;;  %v1144_v5 = vshrl.u32 %v3066_v18, %v1138_v35  ;;  %v1146_v6 = vshll.u32 %v3066_v18, %v1137_v55 }
 0x104   :  { %v3640_v58 = vsub.s32 %v765_v31, %v768_v24  ;;  %v1147_v8 = vshrl.u32 %v3067_v20, %v1138_v35  ;;  %v1149_v13 = vshll.u32 %v3067_v20, %v1137_v55  ;;  %v1150_v17 = vshrl.u32 %v3068_v22, %v1138_v35 }
 0x105   :  { %v975_v61 = vadd.s32 536870912, %v974_v40  ;;  %v1130_v21 = vand.u32 8388607, %v1123_v11  ;;  %vm1158_vm13 = vcmp.lt.s32.totalorder %v1136_v62, 4  ;;  %v1336_v23 = vshrl.u32 %v1335_v2, 23 }
 0x106   :  { %v771_v60 = vsub.s32 0, %v3640_v58  ;;  %v1151_v10 = vor.u32 %v1150_v17, %v1149_v13  ;;  %v1152_v26 = vshll.u32 %v3068_v22, %v1137_v55  ;;  %v1153_v9 = vshrl.u32 %v3069_v30, %v1138_v35 }
 0x107   :  { %v3651_v7 = vshrl.u32 %v975_v61, 30  ;;  %v1142_v28 = vor.u32 %v1141_v48, %v1140_v63  ;;  %v1145_v29 = vor.u32 %v1144_v5, %v1143_v4  ;;  %v1148_v31 = vor.u32 %v1147_v8, %v1146_v6 }
 0x108   :  { %v2684_v3 = vmin.u32 %v771_v60, %v3640_v58  ;;  %vm1155_vm15 = vcmp.lt.s32.totalorder %v1136_v62, 1  ;;  %vm1157_vm0 = vcmp.lt.s32.totalorder %v1136_v62, 3  ;;  %v1164_v32 = vsel %vm1158_vm13, %v1151_v10, 920167782 }
 0x109   :  { %v977_v19 = vshll.u32 %v3651_v7, 30  ;;  %v1131_v36 = vor.u32 8388608, %v1130_v21  ;;  %v1139_v37 = vshrl.u32 %v3064_v14, %v1138_v35  ;;  %v1154_v38 = vor.u32 %v1153_v9, %v1152_v26 }
 0x10a   :  { %v773_v15 = vclz %v2684_v3  ;;  %vm1156_vm1 = vcmp.lt.s32.totalorder %v1136_v62, 2  ;;  %v1160_v39 = vsel %vm1158_vm13, %v1148_v31, 2102212464  ;;  %v1163_v44 = vsel %vm1155_vm15, %v1142_v28, %v1145_v29 }
 0x10b   :  { %v3662_v27 = vsub.s32 %v974_v40, %v977_v19  ;;  %v1165_v45 = vsel %vm1157_vm0, %v1148_v31, %v1164_v32  ;;  %v2707_v47 = vadd.s32 4294967169, %v1336_v23  ;;  %v1159_v12 = vsel %vm1155_vm15, %v1139_v37, %v1142_v28 }
 0x10c   :  { %v2685_v25 = vadd.s32 4294967294, %v773_v15  ;;  %v1161_v24 = vsel %vm1157_vm0, %v1145_v29, %v1160_v39  ;;  %v1171_v56 = vshll.u32 %v1131_v36, 8  ;;  %v1166_v59 = vsel %vm1156_vm1, %v1163_v44, %v1165_v45 }
 0x10d   :  { %v980_v34 = vsub.s32 0, %v3662_v27  ;;  %v1167_v35 = vsel %vm1155_vm15, %v1145_v29, %v1148_v31  ;;  %v1168_v40 = vsel %vm1158_vm13, %v1154_v38, 1326507024  ;;  %v761_v60 = vadd.s32 %v3591_v1, %v3588_v0 }
 0x10e   :  { %vm2686_vm14 = vcmp.lt.s32.totalorder %v2685_v25, 0  ;;  %v1162_v3 = vsel %vm1156_vm1, %v1159_v12, %v1161_v24  ;;  %v1169_v48 = vsel %vm1157_vm0, %v1151_v10, %v1168_v40  ;;  %v1342_v4 = vadd.s32 1, %v2707_v47 }
 0x10f   :  { %v776_v33 = vsel %vm2686_vm14, 0, %v2685_v25  ;;  %v2692_v42 = vmin.u32 %v980_v34, %v3662_v27  ;;  %v1170_v5 = vsel %vm1156_vm1, %v1167_v35, %v1169_v48  ;;  %v970_v23 = vadd.s32 %v3620_v43, %v3626_v46 }
 0x110   :  { %v781_v41 = vsub.s32 4294967266, %v776_v33  ;;  %v777_v61 = vsub.s32 32, %v776_v33  ;;  %v3681_v6 = vmul.u32.u64.low %v1171_v56, %v1166_v59  ;;  %v3682_v8 = vmul.u32.u64.high %v1171_v56, %v1166_v59, %v3681_v6 }
 0x111   :  { %v982_v55 = vclz %v2692_v42  ;;  %v778_v13 = vshll.u32 %v3640_v58, %v776_v33  ;;  %v3686_v17 = vmul.u32.u64.low %v1171_v56, %v1170_v5  ;;  %v3687_v0 = vmul.u32.u64.high %v1171_v56, %v1170_v5, %v3686_v17 }
 0x112   :  { %v782_v63 = vadd.s32 127, %v781_v41  ;;  %v779_v1 = vshrl.u32 %v761_v60, %v777_v61  ;;  %vm1343_vm3 = vcmp.gt.s32.totalorder %v1342_v4, 0  ;;  %v1178_v62 = vmul.u32 %v1171_v56, %v1162_v3 }
 0x113   :  { %v2693_v2 = vadd.s32 4294967294, %v982_v55  ;;  %v1344_v10 = vsel %vm1343_vm3, %v1342_v4, 0  ;;  %v1181_v9 = vadd.s32 1, %v3682_v8  ;;  %vm1180_vm4 = vc.u32 %v3687_v0, %v3681_v6 }
 0x114   :  { %v783_v19 = vshll.u32 %v782_v63, 23  ;;  %v1346_v58 = vand.u32 31, %v1344_v10  ;;  %v780_v28 = vor.u32 %v779_v1, %v778_v13  ;;  %v1332_v32 = vand.u32 2147483647, %v3638_v57 }
 0x115   :  { %vm2694_vm2 = vcmp.lt.s32.totalorder %v2693_v2, 0  ;;  %v1182_v31 = vsel %vm1180_vm4, %v1181_v9, %v3682_v8  ;;  %v3699_v42 = vshrl.u32 %v1344_v10, 5  ;;  %vm3725_vm8 = vcmp.le.f32.partialorder %v705_v52, 0.7853982 }
 0x116   :  { %v985_v15 = vsel %vm2694_vm2, 0, %v2693_v2  ;;  %v784_v29 = vor.u32 4788187, %v783_v19  ;;  %v1183_v43 = vadd.s32 %v1182_v31, %v1178_v62  ;;  %v1347_v36 = vsub.s32 32, %v1346_v58 }
 0x117   :  { %v990_v21 = vsub.s32 4294967266, %v985_v15  ;;  %v986_v25 = vsub.s32 32, %v985_v15  ;;  %v987_v33 = vshll.u32 %v3662_v27, %v985_v15  ;;  %v787_v39 = vcvt.s32.f32 %v780_v28 }
 0x118   :  { %v1184_v37 = vadd.s32 536870912, %v1183_v43  ;;  %v785_v38 = vand.u32 2147483647, %v784_v29  ;;  %v1339_v41 = vand.u32 8388607, %v1332_v32  ;;  %v1349_v47 = vshll.u32 %v3064_v14, %v1346_v58 }
 0x119   :  { %v991_v26 = vadd.s32 127, %v990_v21  ;;  %v988_v34 = vshrl.u32 %v970_v23, %v986_v25  ;;  %v1358_v55 = vshll.u32 %v3067_v20, %v1346_v58  ;;  %v1350_v12 = vshrl.u32 %v3065_v16, %v1347_v36 }
 0x11a   :  { %v3701_v45 = vshrl.u32 %v1184_v37, 30  ;;  %v1352_v24 = vshll.u32 %v3065_v16, %v1346_v58  ;;  %v1359_v56 = vshrl.u32 %v3068_v22, %v1347_v36  ;;  %v1353_v35 = vshrl.u32 %v3066_v18, %v1347_v36 }
 0x11b   :  { %v992_v46 = vshll.u32 %v991_v26, 23  ;;  %v989_v44 = vor.u32 %v988_v34, %v987_v33  ;;  %v1355_v40 = vshll.u32 %v3066_v18, %v1346_v58  ;;  %v1356_v60 = vshrl.u32 %v3067_v20, %v1347_v36 }
 0x11c   :  { %v1186_v59 = vshll.u32 %v3701_v45, 30  ;;  %v1360_v61 = vor.u32 %v1359_v56, %v1358_v55  ;;  %v788_v63 = vmul.f32 %v787_v39, %v785_v38  ;;  %v1340_v3 = vor.u32 8388608, %v1339_v41 }
 0x11d   :  { %v993_v27 = vor.u32 4788187, %v992_v46  ;;  %vm1367_vm5 = vcmp.lt.s32.totalorder %v3699_v42, 4  ;;  %v996_v4 = vcvt.s32.f32 %v989_v44  ;;  %v1361_v16 = vshll.u32 %v3068_v22, %v1346_v58 }
 0x11e   :  { %v3712_v2 = vsub.s32 %v1183_v43, %v1186_v59  ;;  %v1362_v5 = vshrl.u32 %v3069_v30, %v1347_v36  ;;  %v1351_v13 = vor.u32 %v1350_v12, %v1349_v47  ;;  %v1354_v15 = vor.u32 %v1353_v35, %v1352_v24 }
 0x11f   :  { %v994_v48 = vand.u32 2147483647, %v993_v27  ;;  %v1357_v18 = vor.u32 %v1356_v60, %v1355_v40  ;;  %v791_v20 = vsub.s32 4, %v3630_v53  ;;  %vm1364_vm6 = vcmp.lt.s32.totalorder %v3699_v42, 1 }
 0x120   :  { %v1189_v8 = vsub.s32 0, %v3712_v2  ;;  %vm1366_vm7 = vcmp.lt.s32.totalorder %v3699_v42, 3  ;;  %v1373_v17 = vsel %vm1367_vm5, %v1360_v61, 920167782  ;;  %vm707_vm9 = vcmp.lt.s32.totalorder %v3538_v49, 0 }
 0x121   :  { %v789_v1 = vxor.u32 2147483648, %v788_v63  ;;  %vm3733_vm10 = vcmp.le.f32.partialorder %v914_v54, 0.7853982  ;;  %v997_v21 = vmul.f32 %v996_v4, %v994_v48  ;;  %v1348_v23 = vshrl.u32 %v3064_v14, %v1347_v36 }
 0x122   :  { %v2700_v30 = vmin.u32 %v1189_v8, %v3712_v2  ;;  %v1363_v25 = vor.u32 %v1362_v5, %v1361_v16  ;;  %vm1365_vm11 = vcmp.lt.s32.totalorder %v3699_v42, 2  ;;  %v1372_v52 = vsel %vm1364_vm6, %v1351_v13, %v1354_v15 }
 0x123   :  { %v1374_v10 = vsel %vm1366_vm7, %v1357_v18, %v1373_v17  ;;  %v792_v54 = vsel %vm707_vm9, %v791_v20, %v3630_v53  ;;  %vm916_vm12 = vcmp.lt.s32.totalorder %v3541_v50, 0  ;;  %v1369_v14 = vsel %vm1367_vm5, %v1357_v18, 2102212464 }
 0x124   :  { %v1191_v62 = vclz %v2700_v30  ;;  %v1380_v26 = vshll.u32 %v1340_v3, 8  ;;  %v1000_v9 = vsub.s32 4, %v3651_v7  ;;  %v1179_v58 = vadd.s32 %v3681_v6, %v3687_v0 }
 0x125   :  { %v1376_v29 = vsel %vm1364_vm6, %v1354_v15, %v1357_v18  ;;  %v790_v53 = vsel %vm707_vm9, %v789_v1, %v788_v63  ;;  %v998_v31 = vxor.u32 2147483648, %v997_v21  ;;  %v1375_v33 = vsel %vm1365_vm11, %v1372_v52, %v1374_v10 }
 0x126   :  { %v2701_v28 = vadd.s32 4294967294, %v1191_v62  ;;  %v1377_v34 = vsel %vm1367_vm5, %v1363_v25, 1326507024  ;;  %v1368_v43 = vsel %vm1364_vm6, %v1348_v23, %v1351_v13  ;;  %v1370_v6 = vsel %vm1366_vm7, %v1354_v15, %v1369_v14 }
 0x127   :  { %v1378_v0 = vsel %vm1366_vm7, %v1360_v61, %v1377_v34  ;;  %v3772_v37 = vmul.u32.u64.low %v1380_v26, %v1375_v33  ;;  %v3773_v38 = vmul.u32.u64.high %v1380_v26, %v1375_v33, %v3772_v37  ;;  %v793_v39 = vsel %vm3725_vm8, %v3538_v49, %v790_v53 }
 0x128   :  { %vm2702_vm13 = vcmp.lt.s32.totalorder %v2701_v28, 0  ;;  %v1379_v36 = vsel %vm1365_vm11, %v1376_v29, %v1378_v0  ;;  %v999_v55 = vsel %vm916_vm12, %v998_v31, %v997_v21  ;;  %v1371_v27 = vsel %vm1365_vm11, %v1368_v43, %v1370_v6 }
 0x129   :  { %v1194_v46 = vsel %vm2702_vm13, 0, %v2701_v28  ;;  %v3784_v12 = vmul.u32.u64.low %v1380_v26, %v1379_v36  ;;  %v3785_v24 = vmul.u32.u64.high %v1380_v26, %v1379_v36, %v3784_v12  ;;  %v794_v56 = vsel %vm3725_vm8, 0, %v792_v54 }
 0x12a   :  { %v1195_v41 = vsub.s32 32, %v1194_v46  ;;  %v1196_v44 = vshll.u32 %v3712_v2, %v1194_v46  ;;  %v1199_v47 = vsub.s32 4294967266, %v1194_v46  ;;  %v1001_v59 = vsel %vm916_vm12, %v1000_v9, %v3651_v7 }
 0x12b   :  { %2913 = vcosq.f32 %v793_v39  ;;  %v1390_v60 = vadd.s32 1, %v3773_v38  ;;  %v3794_v61 = vstv %s3743_s14  ;;  %v3797_v63 = vstv %s3751_s1  ;;  %s3983_s14 = sld [smem:[#allocation12 + $0x4]] }
 0x12c   :  { %v1197_v35 = vshrl.u32 %v1179_v58, %v1195_v41  ;;  %v1200_v40 = vadd.s32 127, %v1199_v47  ;;  %v1002_v42 = vsel %vm3733_vm10, %v3541_v50, %v999_v55  ;;  %v1387_v48 = vmul.u32 %v1380_v26, %v1371_v27  ;;  %s3985_s1 = sld [smem:[#allocation12 + $0x84]] }
 0x12d   :  { %2915 = vsinq.f32 %v793_v39  ;;  %v1003_v7 = vsel %vm3733_vm10, 0, %v1001_v59  ;;  %vm1389_vm14 = vc.u32 %v3785_v24, %v3772_v37  ;;  %v1580_v5 = vmul.f32 0.0, %v3794_v61 }
 0x12e   :  { %v1198_v2 = vor.u32 %v1197_v35, %v1196_v44  ;;  %v1201_v3 = vshll.u32 %v1200_v40, 23  ;;  %v1581_v8 = vmul.f32 0.0, %v3797_v63  ;;  %v901_v13 = vadd.s32 3, %v794_v56 }
 0x12f   :  { %2917 = vcosq.f32 %v1002_v42  ;;  %v1209_v15 = vsub.s32 4, %v3701_v45  ;;  %v1391_v18 = vsel %vm1389_vm14, %v1390_v60, %v3773_v38  ;;  %v1110_v22 = vadd.s32 3, %v1003_v7 }
 0x130   :  { %v1202_v4 = vor.u32 4788187, %v1201_v3  ;;  %v1205_v16 = vcvt.s32.f32 %v1198_v2  ;;  %2919 = vsinq.f32 %v1002_v42  ;;  %v1392_v17 = vadd.s32 %v1391_v18, %v1387_v48 }
 0x131   :  { %vm3812_vm15 = vcmp.le.f32.partialorder %v1123_v11, 0.7853982  ;;  %vm1125_vm0 = vcmp.lt.s32.totalorder %v3544_v51, 0  ;;  %v3817_v1 = vand.u32 3, %v794_v56  ;;  %v1582_v23 = vsub.f32 %v1580_v5, %v1581_v8 }
 0x132   :  { %v1203_v20 = vand.u32 2147483647, %v1202_v4  ;;  %v1393_v21 = vadd.s32 536870912, %v1392_v17  ;;  %v3819_v25 = vand.u32 3, %v901_v13  ;;  %v1210_v62 = vsel %vm1125_vm0, %v1209_v15, %v3701_v45  ;;  %5291 = sst [smem:[#allocation42_spill]] %s3985_s1 }
 0x133   :  { %v1583_v52 = vadd.f32 %v1581_v8, %v1580_v5  ;;  %v3824_v10 = vstv %s2715_s2  ;;  %v3828_v14 = vstv %s2716_s4  ;;  %v3834_v9 = vand.u32 3, %v1003_v7  ;;  %s3991_s2 = sld [smem:[#allocation12 + $0x104]] }
 0x134   :  { %v1206_v19 = vmul.f32 %v1205_v16, %v1203_v20  ;;  %v3826_v54 = vshrl.u32 %v1393_v21, 30  ;;  %v3836_v58 = vand.u32 3, %v1110_v22  ;;  %vm799_vm1 = vcmp.lt.s32.totalorder %v3817_v1, 2  ;;  %s3993_s4 = sld [smem:[#allocation12 + $0x184]] }
 0x135   :  { %v2914_v26 = vpop.eup %2913  ;;  %v1212_v28 = vsel %vm3812_vm15, 0, %v1210_v62  ;;  %v1636_v53 = vmul.f32 %v3824_v10, %v1582_v23  ;;  %v1637_v34 = vmul.f32 %v3828_v14, %v1583_v52  ;;  %v1639_v43 = vmul.f32 %v3824_v10, %v1583_v52 }
 0x136   :  { %v1207_v11 = vxor.u32 2147483648, %v1206_v19  ;;  %v1395_v29 = vshll.u32 %v3826_v54, 30  ;;  %v1640_v6 = vmul.f32 %v3828_v14, %v1582_v23  ;;  %vm800_vm2 = vcmp.eq.s32.totalorder %v3817_v1, 0 }
 0x137   :  { %v2916_v31 = vpop.eup %2915  ;;  %vm803_vm3 = vcmp.eq.s32.totalorder %v3817_v1, 2  ;;  %vm904_vm4 = vcmp.eq.s32.totalorder %v3819_v25, 0  ;;  %vm907_vm5 = vcmp.eq.s32.totalorder %v3819_v25, 2  ;;  %vm1009_vm6 = vcmp.eq.s32.totalorder %v3834_v9, 0 }
 0x138   :  { %v1208_v45 = vsel %vm1125_vm0, %v1207_v11, %v1206_v19  ;;  %v3854_v0 = vsub.s32 %v1392_v17, %v1395_v29  ;;  %vm1012_vm7 = vcmp.eq.s32.totalorder %v3834_v9, 2  ;;  %v1319_v36 = vadd.s32 3, %v1212_v28 }
 0x139   :  { %v1211_v33 = vsel %vm3812_vm15, %v3544_v51, %v1208_v45  ;;  %v2918_v46 = vpop.eup %2917  ;;  %vm797_vm8 = vweird.f32 %v3538_v49  ;;  %v801_v39 = vxor.u32 2147483648, %v2916_v31  ;;  %v804_v41 = vxor.u32 2147483648, %v2914_v26  ;;  %5292 = sst [smem:[#allocation43_spill]] %s3991_s2 }
 0x13a   :  { %v2920_v38 = vpop.eup %2919  ;;  %vm903_vm9 = vcmp.lt.s32.totalorder %v3819_v25, 2  ;;  %vm1008_vm10 = vcmp.lt.s32.totalorder %v3834_v9, 2  ;;  %2921 = vcosq.f32 %v1211_v33  ;;  %vm1334_vm11 = vcmp.lt.s32.totalorder %v3638_v57, 0  ;;  %5293 = sst [smem:[#allocation44_spill]] %s3993_s4 }
 0x13b   :  { %v1398_v44 = vsub.s32 0, %v3854_v0  ;;  %vm1113_vm12 = vcmp.eq.s32.totalorder %v3836_v58, 0  ;;  %2923 = vsinq.f32 %v1211_v33  ;;  %v1638_v47 = vsub.f32 %v1636_v53, %v1637_v34 }
 0x13c   :  { %v1641_v55 = vadd.f32 %v1640_v6, %v1639_v43  ;;  %vm1116_vm13 = vcmp.eq.s32.totalorder %v3836_v58, 2  ;;  %v3870_v12 = vstv %s3830_s15  ;;  %v3873_v56 = vstv %s3832_s16  ;;  %s3995_s15 = sld [smem:[#allocation14 + $0x4]]  ;;  %s3997_s16 = sld [smem:[#allocation12 + $0x5]] }
 0x13d   :  { %v2708_v27 = vmin.u32 %v1398_v44, %v3854_v0  ;;  %v1010_v59 = vxor.u32 2147483648, %v2920_v38  ;;  %v1013_v35 = vxor.u32 2147483648, %v2918_v46  ;;  %v3877_v40 = vand.u32 3, %v1212_v28 }
 0x13e   :  { %v3879_v60 = vand.u32 3, %v1319_v36  ;;  %vm3883_vm14 = vcmp.le.f32.partialorder %v1332_v32, 0.7853982  ;;  %v802_v2 = vsel %vm800_vm2, %v2914_v26, %v801_v39  ;;  %v805_v3 = vsel %vm803_vm3, %v804_v41, %v2916_v31 }
 0x13f   :  { %vm1006_vm15 = vweird.f32 %v3541_v50  ;;  %v1400_v48 = vclz %v2708_v27  ;;  %v1418_v7 = vsub.s32 4, %v3826_v54  ;;  %v1694_v32 = vmul.f32 %v3870_v12, %v1638_v47 }
 0x140   :  { %v1695_v4 = vmul.f32 %v3873_v56, %v1641_v55  ;;  %v1697_v16 = vmul.f32 %v3870_v12, %v1641_v55  ;;  %v1698_v5 = vmul.f32 %v3873_v56, %v1638_v47  ;;  %v906_v8 = vsel %vm904_vm4, %v2914_v26, %v801_v39 }
 0x141   :  { %v909_v13 = vsel %vm907_vm5, %v804_v41, %v2916_v31  ;;  %vm1112_vm0 = vcmp.lt.s32.totalorder %v3836_v58, 2  ;;  %v2709_v15 = vadd.s32 4294967294, %v1400_v48  ;;  %v806_v18 = vsel %vm799_vm1, %v802_v2, %v805_v3 }
 0x142   :  { %v1011_v20 = vsel %vm1009_vm6, %v2918_v46, %v1010_v59  ;;  %v1014_v17 = vsel %vm1012_vm7, %v1013_v35, %v2920_v38  ;;  %v1118_v22 = vsel %vm1116_vm13, %v1013_v35, %v2920_v38  ;;  %vm1218_vm2 = vcmp.eq.s32.totalorder %v3877_v40, 0  ;;  %5294 = sst [smem:[#allocation45_spill]] %s3995_s15  ;;  %s4140_s15 = sld [smem:[#allocation12 + $0xb]] }
 0x143   :  { %vm1221_vm3 = vcmp.eq.s32.totalorder %v3877_v40, 2  ;;  %v1115_v30 = vsel %vm1113_vm12, %v2918_v46, %v1010_v59  ;;  %vm1322_vm1 = vcmp.eq.s32.totalorder %v3879_v60, 0  ;;  %v1388_v1 = vadd.s32 %v3772_v37, %v3785_v24 }
 0x144   :  { %vm2710_vm4 = vcmp.lt.s32.totalorder %v2709_v15, 0  ;;  %v3934_v19 = vstv %s3864_s17  ;;  %v1419_v23 = vsel %vm1334_vm11, %v1418_v7, %v3826_v54  ;;  %v1696_v62 = vsub.f32 %v1694_v32, %v1695_v4  ;;  %v2922_v37 = vpop.eup %2921  ;;  %s4002_s17 = sld [smem:[#allocation12 + $0x85]] }
 0x145   :  { %v1403_v21 = vsel %vm2710_vm4, 0, %v2709_v15  ;;  %v1699_v52 = vadd.f32 %v1698_v5, %v1697_v16  ;;  %vm1217_vm5 = vcmp.lt.s32.totalorder %v3877_v40, 2  ;;  %v3950_v45 = vstv %s3875_s18  ;;  %v2924_v54 = vpop.eup %2923  ;;  %s4004_s18 = sld [smem:[#allocation12 + $0x105]] }
 0x146   :  { %v1404_v24 = vsub.s32 32, %v1403_v21  ;;  %v1405_v11 = vshll.u32 %v3854_v0, %v1403_v21  ;;  %v1408_v26 = vsub.s32 4294967266, %v1403_v21  ;;  %v807_v28 = vsel %vm797_vm8, nan, %v806_v18 }
 0x147   :  { %v910_v29 = vsel %vm903_vm9, %v906_v8, %v909_v13  ;;  %v1015_v53 = vsel %vm1008_vm10, %v1011_v20, %v1014_v17  ;;  %vm1325_vm6 = vcmp.eq.s32.totalorder %v3879_v60, 2  ;;  %v1119_v31 = vsel %vm1112_vm0, %v1115_v30, %v1118_v22 }
 0x148   :  { %v1406_v33 = vshrl.u32 %v1388_v1, %v1404_v24  ;;  %v1409_v34 = vadd.s32 127, %v1408_v26  ;;  %v1421_v43 = vsel %vm3883_vm14, 0, %v1419_v23  ;;  %v1222_v25 = vxor.u32 2147483648, %v2922_v37  ;;  %5329 = sst [smem:[#allocation68_spill]] %s4140_s15  ;;  %s4431_s15 = sld [smem:[#allocation12 + $0x11]] }
 0x149   :  { %v1752_v9 = vmul.f32 %v3934_v19, %v1696_v62  ;;  %v1753_v6 = vmul.f32 %v3950_v45, %v1699_v52  ;;  %v1756_v0 = vmul.f32 %v3950_v45, %v1696_v62  ;;  %v1219_v58 = vxor.u32 2147483648, %v2924_v54 }
 0x14a   :  { %v1407_v46 = vor.u32 %v1406_v33, %v1405_v11  ;;  %v1410_v36 = vshll.u32 %v1409_v34, 23  ;;  %v1755_v38 = vmul.f32 %v3934_v19, %v1699_v52  ;;  %v911_v39 = vsel %vm797_vm8, nan, %v910_v29  ;;  %5295 = sst [smem:[#allocation46_spill]] %s4002_s17  ;;  %s4146_s17 = sld [smem:[#allocation12 + $0x8b]] }
 0x14b   :  { %v1016_v41 = vsel %vm1006_vm15, nan, %v1015_v53  ;;  %v1120_v55 = vsel %vm1006_vm15, nan, %v1119_v31  ;;  %vm1215_vm7 = vweird.f32 %v3544_v51  ;;  %v1528_v49 = vadd.s32 3, %v1421_v43  ;;  %5296 = sst [smem:[#allocation47_spill]] %s4004_s18  ;;  %s4023_s18 = sld [smem:[#allocation12 + $0x86]] }
 0x14c   :  { %v1411_v44 = vor.u32 4788187, %v1410_v36  ;;  %v1414_v47 = vcvt.s32.f32 %v1407_v46  ;;  %v1754_v27 = vsub.f32 %v1752_v9, %v1753_v6  ;;  %v1220_v59 = vsel %vm1218_vm2, %v2922_v37, %v1219_v58  ;;  %s5315_s3 = sld [smem:[#allocation47_spill]] }
 0x14d   :  { %v1223_v35 = vsel %vm1221_vm3, %v1222_v25, %v2924_v54  ;;  %v1757_v3 = vadd.f32 %v1756_v0, %v1755_v38  ;;  %vm1321_vm8 = vcmp.lt.s32.totalorder %v3879_v60, 2  ;;  %v1324_v50 = vsel %vm1322_vm1, %v2922_v37, %v1219_v58 }
 0x14e   :  { %v1412_v2 = vand.u32 2147483647, %v1411_v44  ;;  %v1327_v48 = vsel %vm1325_vm6, %v1222_v25, %v2924_v54  ;;  %v4019_v7 = vmul.f32 %v1016_v41, %v807_v28  ;;  %v4025_v4 = vmul.f32 %v1016_v41, %v911_v39  ;;  %5359 = sst [smem:[#allocation97_spill]] %s4431_s15 }
 0x14f   :  { %v4027_v16 = vmul.f32 %v1120_v55, %v807_v28  ;;  %v4029_v5 = vmul.f32 %v1120_v55, %v911_v39  ;;  %v1224_v8 = vsel %vm1217_vm5, %v1220_v59, %v1223_v35  ;;  %v4037_v13 = vand.u32 3, %v1421_v43 }
 0x150   :  { %v1415_v32 = vmul.f32 %v1414_v47, %v1412_v2  ;;  %v4039_v15 = vand.u32 3, %v1528_v49  ;;  %v4041_v18 = vmul.f32 %v1754_v27, %v1754_v27  ;;  %v1328_v20 = vsel %vm1321_vm8, %v1324_v50, %v1327_v48  ;;  %5330 = sst [smem:[#allocation69_spill]] %s4146_s17  ;;  %s4429_s17 = sld [smem:[#allocation14 + $0x10]] }
 0x151   :  { %5300 = sst [smem:[#allocation51_spill]] %s4023_s18  ;;  %s4043_s18 = sld [smem:[#allocation14 + $0x6]]  ;;  %v4049_v22 = vmul.f32 %v1757_v3, %v1757_v3  ;;  %v1894_v40 = vstv %s3893_s6  ;;  %v1897_v30 = vstv %s3895_s21  ;;  %v1901_v1 = vstv %s3901_s22 }
 0x152   :  { %v1416_v17 = vxor.u32 2147483648, %v1415_v32  ;;  %v1913_v21 = vstv %s3903_s23  ;;  %v1916_v23 = vstv %s3910_s24  ;;  %v4066_v60 = vsel %vm1215_vm7, nan, %v1224_v8  ;;  %s4072_s22 = sld [smem:[#allocation12 + $0x8]]  ;;  %s4094_s23 = sld [smem:[#allocation12 + $0x9]] }
 0x153   :  { %v1905_v52 = vstv %s3924_s26  ;;  %v1920_v37 = vstv %s3912_s25  ;;  %s4074_s24 = sld [smem:[#allocation12 + $0x88]]  ;;  %v4078_v24 = vsel %vm1215_vm7, nan, %v1328_v20  ;;  %v1924_v26 = vstv %s3926_s27  ;;  %s4099_s27 = sld [smem:[#allocation12 + $0x89]] }
 0x154   :  { %v1417_v62 = vsel %vm1334_vm11, %v1416_v17, %v1415_v32  ;;  %v1933_v54 = vstv %s3936_s28  ;;  %s4085_s21 = sld [smem:[#allocation12 + $0x108]]  ;;  %v1936_v51 = vstv %s3938_s29  ;;  %v1940_v29 = vstv %s3943_s30  ;;  %s4101_s28 = sld [smem:[#allocation12 + $0x109]] }
 0x155   :  { %v1420_v11 = vsel %vm3883_vm14, %v3638_v57, %v1417_v62  ;;  %s4087_s25 = sld [smem:[#allocation12 + $0x188]]  ;;  %v1944_v53 = vstv %s3945_s8  ;;  %vm1430_vm9 = vcmp.eq.s32.totalorder %v4037_v13, 2  ;;  %vm1534_vm10 = vcmp.eq.s32.totalorder %v4039_v15, 2  ;;  %s4148_s8 = sld [smem:[#allocation12 + $0x10b]] }
 0x156   :  { %2925 = vcosq.f32 %v1420_v11  ;;  %s4092_s26 = sld [smem:[#allocation14 + $0x8]]  ;;  %v1953_v33 = vstv %s3952_s9  ;;  %v1956_v34 = vstv %s3954_s0  ;;  %v1960_v43 = vstv %s3973_s11  ;;  %s5318_s0 = sld [smem:[#allocation50_spill]] }
 0x157   :  { %5303 = sst [smem:[#allocation54_spill]] %s4043_s18  ;;  %s4062_s18 = sld [smem:[#allocation14 + $0x7]]  ;;  %2927 = vsinq.f32 %v1420_v11  ;;  %v1964_v25 = vstv %s3978_s12  ;;  %vm1427_vm11 = vcmp.eq.s32.totalorder %v4037_v13, 0  ;;  %vm1531_vm12 = vcmp.eq.s32.totalorder %v4039_v15, 0 }
 0x158   :  { %5310 = sst [smem:[#allocation61_spill]] %s4094_s23  ;;  %v1973_v6 = vstv %s3983_s14  ;;  %v1976_v0 = vstv %s3985_s1  ;;  %v1980_v58 = vstv %s3991_s2  ;;  %s4119_s11 = sld [smem:[#allocation12 + $0xa]]  ;;  %vm1426_vm13 = vcmp.lt.s32.totalorder %v4037_v13, 2 }
 0x159   :  { %5311 = sst [smem:[#allocation62_spill]] %s4099_s27  ;;  %s4121_s12 = sld [smem:[#allocation12 + $0x8a]]  ;;  %vm1530_vm14 = vcmp.lt.s32.totalorder %v4039_v15, 2  ;;  %v1984_v46 = vstv %s3993_s4  ;;  %v1993_v38 = vstv %s3997_s16  ;;  %vm1424_vm15 = vweird.f32 %v3638_v57 }
 0x15a   :  { %5312 = sst [smem:[#allocation63_spill]] %s4101_s28  ;;  %s4129_s1 = sld [smem:[#allocation12 + $0x10a]] }
 0x15b   :  { %5308 = sst [smem:[#allocation59_spill]] %s4087_s25  ;;  %s4131_s2 = sld [smem:[#allocation12 + $0x18a]] }
 0x15c   :  { %5309 = sst [smem:[#allocation60_spill]] %s4092_s26  ;;  %s4138_s4 = sld [smem:[#allocation14 + $0xa]] }
 0x15d   :  { %5307 = sst [smem:[#allocation58_spill]] %s4062_s18  ;;  %s4154_s30 = sld [smem:[#allocation12 + $0x18b]] }
 0x15e   :  { %5319 = sst [smem:[#allocation47_spill]] %s4119_s11  ;;  %s4156_s29 = sld [smem:[#allocation14 + $0xb]] }
 0x15f   :  { %5320 = sst [smem:[#allocation50_spill]] %s4121_s12  ;;  %s4180_s25 = sld [smem:[#allocation12 + $0xd]] }
 0x160   :  { %5326 = sst [smem:[#allocation55_spill]] %s4129_s1  ;;  %s4164_s9 = sld [smem:[#allocation12 + $0x8c]]  ;;  %v2926_v32 = vpop.eup %2925 }
 0x161   :  { %5327 = sst [smem:[#allocation66_spill]] %s4131_s2  ;;  %v2928_v11 = vpop.eup %2927  ;;  %v1431_v47 = vxor.u32 2147483648, %v2926_v32  ;;  %s4185_s26 = sld [smem:[#allocation12 + $0x8d]] }
 0x162   :  { %5328 = sst [smem:[#allocation67_spill]] %s4138_s4  ;;  %s4178_s18 = sld [smem:[#allocation14 + $0xc]]  ;;  %v1428_v17 = vxor.u32 2147483648, %v2928_v11 }
 0x163   :  { %5331 = sst [smem:[#allocation70_spill]] %s4148_s8  ;;  %s4187_s28 = sld [smem:[#allocation12 + $0x10d]]  ;;  %v1432_v50 = vsel %vm1430_vm9, %v1431_v47, %v2928_v11  ;;  %v1536_v62 = vsel %vm1534_vm10, %v1431_v47, %v2928_v11 }
 0x164   :  { %5332 = sst [smem:[#allocation71_spill]] %s4154_s30  ;;  %s4192_s6 = sld [smem:[#allocation12 + $0x18d]]  ;;  %v1429_v8 = vsel %vm1427_vm11, %v2926_v32, %v1428_v17  ;;  %v1533_v20 = vsel %vm1531_vm12, %v2926_v32, %v1428_v17 }
 0x165   :  { %5333 = sst [smem:[#allocation72_spill]] %s4156_s29  ;;  %s4194_s11 = sld [smem:[#allocation14 + $0xd]]  ;;  %v1433_v2 = vsel %vm1426_vm13, %v1429_v8, %v1432_v50  ;;  %v1537_v47 = vsel %vm1530_vm14, %v1533_v20, %v1536_v62 }
 0x166   :  { %5336 = sst [smem:[#allocation74_spill]] %s4164_s9  ;;  %v1434_v35 = vsel %vm1424_vm15, nan, %v1433_v2  ;;  %v1538_v32 = vsel %vm1424_vm15, nan, %v1537_v47  ;;  %s4377_s29 = sld [smem:[#allocation12 + $0x10e]] }
 0x167   :  { %5340 = sst [smem:[#allocation78_spill]] %s4180_s25  ;;  %v1543_v3 = vmul.f32 %v1434_v35, %v4066_v60  ;;  %v1544_v13 = vmul.f32 %v1434_v35, %v4078_v24  ;;  %v1545_v50 = vmul.f32 %v1538_v32, %v4066_v60  ;;  %v1546_v15 = vmul.f32 %v1538_v32, %v4078_v24  ;;  %s4379_s4 = sld [smem:[#allocation12 + $0x18e]] }
 0x168   :  { %5339 = sst [smem:[#allocation77_spill]] %s4178_s18  ;;  %s4375_s18 = sld [smem:[#allocation12 + $0x8e]] }
 0x169   :  { %5341 = sst [smem:[#allocation79_spill]] %s4185_s26  ;;  %v1548_v11 = vmul.f32 %v1543_v3, %v4025_v4  ;;  %v1550_v2 = vmul.f32 %v1543_v3, %v4027_v16  ;;  %v1552_v57 = vmul.f32 %v1543_v3, %v4029_v5  ;;  %v1547_v48 = vmul.f32 %v1543_v3, %v4019_v7  ;;  %s4389_s26 = sld [smem:[#allocation12 + $0x8f]] }
 0x16a   :  { %5342 = sst [smem:[#allocation80_spill]] %s4187_s28  ;;  %v1554_v17 = vmul.f32 %v1544_v13, %v4019_v7  ;;  %v1556_v35 = vmul.f32 %v1544_v13, %v4025_v4  ;;  %v1558_v60 = vmul.f32 %v1544_v13, %v4027_v16  ;;  %v1560_v32 = vmul.f32 %v1544_v13, %v4029_v5  ;;  %s4385_s28 = sld [smem:[#allocation12 + $0xf]] }
 0x16b   :  { %5343 = sst [smem:[#allocation81_spill]] %s4192_s6  ;;  %v1549_v8 = vsub.f32 0.0, %v1548_v11  ;;  %v1551_v24 = vsub.f32 0.0, %v1550_v2  ;;  %v1561_v36 = vmul.f32 %v1545_v50, %v4019_v7  ;;  %v1553_v62 = vsub.f32 0.0, %v1552_v57  ;;  %s4383_s6 = sld [smem:[#allocation14 + $0xe]] }
 0x16c   :  { %5344 = sst [smem:[#allocation82_spill]] %s4194_s11  ;;  %v1555_v20 = vsub.f32 0.0, %v1554_v17  ;;  %v1557_v59 = vsub.f32 0.0, %v1556_v35  ;;  %v1563_v27 = vmul.f32 %v1545_v50, %v4025_v4  ;;  %v1559_v47 = vsub.f32 0.0, %v1558_v60  ;;  %s4373_s11 = sld [smem:[#allocation12 + $0xe]] }
 0x16d   :  { %v1562_v9 = vsub.f32 0.0, %v1561_v36  ;;  %v1565_v3 = vmul.f32 %v1545_v50, %v4027_v16  ;;  %v1568_v49 = vmul.f32 %v1546_v15, %v4019_v7  ;;  %v1567_v31 = vmul.f32 %v1545_v50, %v4029_v5  ;;  %5347 = sst [smem:[#allocation85_spill]] %s4377_s29  ;;  %s4409_s9 = sld [smem:[#allocation12 + $0x10]] }
 0x16e   :  { %v1564_v55 = vsub.f32 0.0, %v1563_v27  ;;  %v1570_v11 = vmul.f32 %v1546_v15, %v4025_v4  ;;  %v1571_v13 = vmul.f32 %v1546_v15, %v4027_v16  ;;  %v1572_v57 = vmul.f32 %v1546_v15, %v4029_v5  ;;  %5346 = sst [smem:[#allocation84_spill]] %s4375_s18  ;;  %s4391_s25 = sld [smem:[#allocation12 + $0x10f]] }
 0x16f   :  { %v1566_v2 = vsub.f32 0.0, %v1565_v3  ;;  %v1576_v17 = vmul.f32 %v3794_v61, %v1547_v48  ;;  %v1578_v35 = vmul.f32 %v3797_v63, %v1549_v8  ;;  %v1584_v36 = vmul.f32 %v3794_v61, %v1549_v8  ;;  %5348 = sst [smem:[#allocation86_spill]] %s4379_s4  ;;  %s4442_s2 = sld [smem:[#allocation12 + $0x91]] }
 0x170   :  { %v1585_v60 = vmul.f32 %v3797_v63, %v1547_v48  ;;  %v1587_v7 = vmul.f32 %v3794_v61, %v1551_v24  ;;  %v1588_v27 = vmul.f32 %v3797_v63, %v1553_v62  ;;  %v1569_v50 = vsub.f32 0.0, %v1568_v49  ;;  %5350 = sst [smem:[#allocation88_spill]] %s4389_s26  ;;  %s4419_s30 = sld [smem:[#allocation12 + $0x110]] }
 0x171   :  { %v1590_v4 = vmul.f32 %v3794_v61, %v1553_v62  ;;  %v1591_v16 = vmul.f32 %v3797_v63, %v1551_v24  ;;  %v1593_v3 = vmul.f32 %v3794_v61, %v1555_v20  ;;  %v1579_v5 = vadd.f32 %v1578_v35, %v1576_v17  ;;  %5349 = sst [smem:[#allocation87_spill]] %s4383_s6  ;;  %s4421_s8 = sld [smem:[#allocation12 + $0x190]] }
 0x172   :  { %v1586_v15 = vsub.f32 %v1584_v36, %v1585_v60  ;;  %v1594_v42 = vmul.f32 %v3797_v63, %v1557_v59  ;;  %v1596_v28 = vmul.f32 %v3794_v61, %v1557_v59  ;;  %v1589_v8 = vsub.f32 %v1587_v7, %v1588_v27  ;;  %5345 = sst [smem:[#allocation83_spill]] %s4373_s11  ;;  %s4444_s1 = sld [smem:[#allocation12 + $0x111]] }
 0x173   :  { %v1597_v48 = vmul.f32 %v3797_v63, %v1555_v20  ;;  %v1599_v44 = vmul.f32 %v3794_v61, %v1559_v47  ;;  %v1600_v41 = vmul.f32 %v3797_v63, %v1560_v32  ;;  %v1592_v49 = vadd.f32 %v1591_v16, %v1590_v4  ;;  %5354 = sst [smem:[#allocation92_spill]] %s4409_s9  ;;  %s4451_s12 = sld [smem:[#allocation12 + $0x191]] }
 0x174   :  { %v1602_v62 = vmul.f32 %v3794_v61, %v1560_v32  ;;  %v1603_v24 = vmul.f32 %v3797_v63, %v1559_v47  ;;  %v1605_v39 = vmul.f32 %v3794_v61, %v1562_v9  ;;  %v1595_v17 = vsub.f32 %v1593_v3, %v1594_v42  ;;  %5351 = sst [smem:[#allocation89_spill]] %s4391_s25  ;;  %s4457_s27 = sld [smem:[#allocation12 + $0x12]] }
 0x175   :  { %v1598_v35 = vadd.f32 %v1597_v48, %v1596_v28  ;;  %v1606_v36 = vmul.f32 %v3797_v63, %v1564_v55  ;;  %v1608_v59 = vmul.f32 %v3794_v61, %v1564_v55  ;;  %v1601_v60 = vadd.f32 %v1600_v41, %v1599_v44  ;;  %5358 = sst [smem:[#allocation96_spill]] %s4429_s17  ;;  %s4510_s17 = sld [smem:[#allocation14 + $0x14]] }
 0x176   :  { %v1609_v20 = vmul.f32 %v3797_v63, %v1562_v9  ;;  %v1611_v7 = vmul.f32 %v3794_v61, %v1566_v2  ;;  %v1612_v27 = vmul.f32 %v3797_v63, %v1567_v31  ;;  %v1604_v4 = vsub.f32 %v1602_v62, %v1603_v24  ;;  %5356 = sst [smem:[#allocation94_spill]] %s4419_s30  ;;  %s4459_s23 = sld [smem:[#allocation12 + $0x92]] }
 0x177   :  { %v1614_v32 = vmul.f32 %v3794_v61, %v1567_v31  ;;  %v1615_v47 = vmul.f32 %v3797_v63, %v1566_v2  ;;  %v1617_v16 = vmul.f32 %v3794_v61, %v1569_v50  ;;  %v1607_v42 = vsub.f32 %v1605_v39, %v1606_v36  ;;  %5357 = sst [smem:[#allocation95_spill]] %s4421_s8  ;;  %s5425_s14 = sld [smem:[#allocation53_spill]] }
 0x178   :  { %v1610_v28 = vadd.f32 %v1609_v20, %v1608_v59  ;;  %v1618_v3 = vmul.f32 %v3797_v63, %v1570_v11  ;;  %v1620_v55 = vmul.f32 %v3794_v61, %v1570_v11  ;;  %v1613_v41 = vadd.f32 %v1612_v27, %v1611_v7  ;;  %5360 = sst [smem:[#allocation98_spill]] %s4442_s2  ;;  %s5441_s16 = sld [smem:[#allocation62_spill]] }
 0x179   :  { %v1621_v9 = vmul.f32 %v3797_v63, %v1569_v50  ;;  %v1623_v44 = vmul.f32 %v3794_v61, %v1571_v13  ;;  %v1624_v48 = vmul.f32 %v3797_v63, %v1572_v57  ;;  %v1616_v62 = vsub.f32 %v1614_v32, %v1615_v47  ;;  %5361 = sst [smem:[#allocation99_spill]] %s4444_s1 }
 0x17a   :  { %v1626_v31 = vmul.f32 %v3794_v61, %v1572_v57  ;;  %v1627_v2 = vmul.f32 %v3797_v63, %v1571_v13  ;;  %v1632_v24 = vmul.f32 %v3824_v10, %v1579_v5  ;;  %v1619_v39 = vadd.f32 %v1618_v3, %v1617_v16  ;;  %5362 = sst [smem:[#allocation100_spill]] %s4451_s12 }
 0x17b   :  { %v1622_v36 = vsub.f32 %v1620_v55, %v1621_v9  ;;  %v1634_v59 = vmul.f32 %v3828_v14, %v1589_v8  ;;  %v1642_v11 = vmul.f32 %v3824_v10, %v1589_v8  ;;  %v1625_v20 = vsub.f32 %v1623_v44, %v1624_v48  ;;  %5364 = sst [smem:[#allocation102_spill]] %s4457_s27 }
 0x17c   :  { %v1643_v50 = vmul.f32 %v3828_v14, %v1579_v5  ;;  %v1645_v7 = vmul.f32 %v3824_v10, %v1592_v49  ;;  %v1646_v27 = vmul.f32 %v3828_v14, %v1586_v15  ;;  %v1628_v32 = vadd.f32 %v1627_v2, %v1626_v31  ;;  %5365 = sst [smem:[#allocation103_spill]] %s4459_s23 }
 0x17d   :  { %v1648_v61 = vmul.f32 %v3824_v10, %v1586_v15  ;;  %v1649_v63 = vmul.f32 %v3828_v14, %v1592_v49  ;;  %v1651_v13 = vmul.f32 %v3824_v10, %v1595_v17  ;;  %v1635_v57 = vadd.f32 %v1634_v59, %v1632_v24  ;;  %5377 = sst [smem:[#allocation115_spill]] %s4510_s17  ;;  %s4590_s17 = sld [smem:[#allocation12 + $0x19]] }
 0x17e   :  { %v1644_v47 = vsub.f32 %v1642_v11, %v1643_v50  ;;  %v1652_v16 = vmul.f32 %v3828_v14, %v1601_v60  ;;  %v1654_v8 = vmul.f32 %v3824_v10, %v1601_v60  ;;  %v1647_v3 = vadd.f32 %v1646_v27, %v1645_v7 }
 0x17f   :  { %v1655_v5 = vmul.f32 %v3828_v14, %v1595_v17  ;;  %v1657_v55 = vmul.f32 %v3824_v10, %v1604_v4  ;;  %v1658_v9 = vmul.f32 %v3828_v14, %v1598_v35  ;;  %v1650_v44 = vsub.f32 %v1648_v61, %v1649_v63 }
 0x180   :  { %v1660_v15 = vmul.f32 %v3824_v10, %v1598_v35  ;;  %v1661_v49 = vmul.f32 %v3828_v14, %v1604_v4  ;;  %v1663_v48 = vmul.f32 %v3824_v10, %v1607_v42  ;;  %v1653_v31 = vsub.f32 %v1651_v13, %v1652_v16 }
 0x181   :  { %v1656_v2 = vadd.f32 %v1655_v5, %v1654_v8  ;;  %v1664_v24 = vmul.f32 %v3828_v14, %v1613_v41  ;;  %v1666_v60 = vmul.f32 %v3824_v10, %v1613_v41  ;;  %v1659_v59 = vsub.f32 %v1657_v55, %v1658_v9 }
 0x182   :  { %v1667_v17 = vmul.f32 %v3828_v14, %v1607_v42  ;;  %v1669_v11 = vmul.f32 %v3824_v10, %v1616_v62  ;;  %v1670_v50 = vmul.f32 %v3828_v14, %v1610_v28  ;;  %v1662_v7 = vadd.f32 %v1661_v49, %v1660_v15 }
 0x183   :  { %v1672_v35 = vmul.f32 %v3824_v10, %v1610_v28  ;;  %v1673_v4 = vmul.f32 %v3828_v14, %v1616_v62  ;;  %v1675_v27 = vmul.f32 %v3824_v10, %v1619_v39  ;;  %v1665_v61 = vsub.f32 %v1663_v48, %v1664_v24  ;;  %5394 = sst [smem:[#allocation132_spill]] %s4590_s17  ;;  %s5443_s17 = sld [smem:[#allocation49_spill]] }
 0x184   :  { %v1668_v63 = vadd.f32 %v1667_v17, %v1666_v60  ;;  %v1676_v13 = vmul.f32 %v3828_v14, %v1625_v20  ;;  %v1678_v41 = vmul.f32 %v3824_v10, %v1625_v20  ;;  %v1671_v16 = vsub.f32 %v1669_v11, %v1670_v50 }
 0x185   :  { %v1679_v42 = vmul.f32 %v3828_v14, %v1619_v39  ;;  %v1681_v8 = vmul.f32 %v3824_v10, %v1628_v32  ;;  %v1682_v5 = vmul.f32 %v3828_v14, %v1622_v36  ;;  %v1674_v55 = vadd.f32 %v1673_v4, %v1672_v35 }
 0x186   :  { %v1684_v28 = vmul.f32 %v3824_v10, %v1622_v36  ;;  %v1685_v62 = vmul.f32 %v3828_v14, %v1628_v32  ;;  %v1690_v9 = vmul.f32 %v3870_v12, %v1635_v57  ;;  %v1677_v15 = vadd.f32 %v1676_v13, %v1675_v27 }
 0x187   :  { %v1680_v49 = vsub.f32 %v1678_v41, %v1679_v42  ;;  %v1692_v48 = vmul.f32 %v3873_v56, %v1653_v31  ;;  %v1700_v20 = vmul.f32 %v3870_v12, %v1653_v31  ;;  %v1683_v24 = vadd.f32 %v1682_v5, %v1681_v8 }
 0x188   :  { %v1701_v39 = vmul.f32 %v3873_v56, %v1635_v57  ;;  %v1703_v60 = vmul.f32 %v3870_v12, %v1647_v3  ;;  %v1704_v17 = vmul.f32 %v3873_v56, %v1659_v59  ;;  %v1686_v11 = vsub.f32 %v1684_v28, %v1685_v62 }
 0x189   :  { %v1706_v10 = vmul.f32 %v3870_v12, %v1659_v59  ;;  %v1707_v14 = vmul.f32 %v3873_v56, %v1647_v3  ;;  %v1709_v36 = vmul.f32 %v3870_v12, %v1656_v2  ;;  %v1693_v32 = vadd.f32 %v1692_v48, %v1690_v9 }
 0x18a   :  { %v1702_v50 = vsub.f32 %v1700_v20, %v1701_v39  ;;  %v1710_v35 = vmul.f32 %v3873_v56, %v1644_v47  ;;  %v1712_v31 = vmul.f32 %v3870_v12, %v1644_v47  ;;  %v1705_v4 = vadd.f32 %v1704_v17, %v1703_v60 }
 0x18b   :  { %v1713_v57 = vmul.f32 %v3873_v56, %v1656_v2  ;;  %v1715_v27 = vmul.f32 %v3870_v12, %v1662_v7  ;;  %v1716_v13 = vmul.f32 %v3873_v56, %v1650_v44  ;;  %v1708_v41 = vsub.f32 %v1706_v10, %v1707_v14 }
 0x18c   :  { %v1718_v59 = vmul.f32 %v3870_v12, %v1650_v44  ;;  %v1719_v3 = vmul.f32 %v3873_v56, %v1662_v7  ;;  %v1721_v42 = vmul.f32 %v3870_v12, %v1665_v61  ;;  %v1711_v8 = vadd.f32 %v1710_v35, %v1709_v36 }
 0x18d   :  { %v1714_v5 = vsub.f32 %v1712_v31, %v1713_v57  ;;  %v1722_v28 = vmul.f32 %v3873_v56, %v1677_v15  ;;  %v1724_v47 = vmul.f32 %v3870_v12, %v1677_v15  ;;  %v1717_v62 = vadd.f32 %v1716_v13, %v1715_v27 }
 0x18e   :  { %v1725_v2 = vmul.f32 %v3873_v56, %v1665_v61  ;;  %v1727_v9 = vmul.f32 %v3870_v12, %v1671_v16  ;;  %v1728_v48 = vmul.f32 %v3873_v56, %v1683_v24  ;;  %v1730_v44 = vmul.f32 %v3870_v12, %v1683_v24 }
 0x18f   :  { %v1723_v20 = vsub.f32 %v1721_v42, %v1722_v28  ;;  %v1731_v7 = vmul.f32 %v3873_v56, %v1671_v16  ;;  %v1733_v39 = vmul.f32 %v3870_v12, %v1680_v49  ;;  %v1720_v60 = vsub.f32 %v1718_v59, %v1719_v3 }
 0x190   :  { %v1729_v17 = vsub.f32 %v1727_v9, %v1728_v48  ;;  %v1734_v10 = vmul.f32 %v3873_v56, %v1668_v63  ;;  %v1736_v15 = vmul.f32 %v3870_v12, %v1668_v63  ;;  %v1726_v14 = vadd.f32 %v1725_v2, %v1724_v47 }
 0x191   :  { %v1737_v61 = vmul.f32 %v3873_v56, %v1680_v49  ;;  %v1739_v36 = vmul.f32 %v3870_v12, %v1686_v11  ;;  %v1740_v35 = vmul.f32 %v3873_v56, %v1674_v55  ;;  %v1742_v24 = vmul.f32 %v3870_v12, %v1674_v55 }
 0x192   :  { %v1735_v31 = vsub.f32 %v1733_v39, %v1734_v10  ;;  %v1743_v16 = vmul.f32 %v3873_v56, %v1686_v11  ;;  %v1748_v57 = vmul.f32 %v3934_v19, %v1693_v32  ;;  %v1732_v27 = vadd.f32 %v1731_v7, %v1730_v44 }
 0x193   :  { %v1741_v13 = vsub.f32 %v1739_v36, %v1740_v35  ;;  %v1750_v59 = vmul.f32 %v3950_v45, %v1723_v20  ;;  %v1758_v63 = vmul.f32 %v3934_v19, %v1723_v20  ;;  %v1738_v3 = vadd.f32 %v1737_v61, %v1736_v15 }
 0x194   :  { %v1759_v49 = vmul.f32 %v3950_v45, %v1693_v32  ;;  %v1761_v42 = vmul.f32 %v3934_v19, %v1705_v4  ;;  %v1762_v28 = vmul.f32 %v3950_v45, %v1729_v17  ;;  %v1744_v47 = vadd.f32 %v1743_v16, %v1742_v24 }
 0x195   :  { %v1764_v12 = vmul.f32 %v3934_v19, %v1729_v17  ;;  %v1765_v56 = vmul.f32 %v3950_v45, %v1705_v4  ;;  %v1767_v55 = vmul.f32 %v3934_v19, %v1711_v8  ;;  %v1751_v11 = vadd.f32 %v1750_v59, %v1748_v57 }
 0x196   :  { %v1760_v2 = vsub.f32 %v1758_v63, %v1759_v49  ;;  %v1768_v9 = vmul.f32 %v3950_v45, %v1735_v31  ;;  %v1770_v48 = vmul.f32 %v3934_v19, %v1735_v31  ;;  %v1763_v20 = vadd.f32 %v1762_v28, %v1761_v42 }
 0x197   :  { %v1771_v32 = vmul.f32 %v3950_v45, %v1711_v8  ;;  %v1773_v44 = vmul.f32 %v3934_v19, %v1717_v62  ;;  %v1774_v7 = vmul.f32 %v3950_v45, %v1741_v13  ;;  %v1766_v39 = vsub.f32 %v1764_v12, %v1765_v56 }
 0x198   :  { %v1776_v17 = vmul.f32 %v3934_v19, %v1741_v13  ;;  %v1777_v4 = vmul.f32 %v3950_v45, %v1717_v62  ;;  %v1779_v10 = vmul.f32 %v3934_v19, %v1726_v14  ;;  %v1769_v15 = vadd.f32 %v1768_v9, %v1767_v55 }
 0x199   :  { %v1772_v61 = vsub.f32 %v1770_v48, %v1771_v32  ;;  %v1780_v36 = vmul.f32 %v3950_v45, %v1702_v50  ;;  %v1782_v35 = vmul.f32 %v3934_v19, %v1702_v50  ;;  %v1775_v31 = vadd.f32 %v1774_v7, %v1773_v44 }
 0x19a   :  { %v1783_v8 = vmul.f32 %v3950_v45, %v1726_v14  ;;  %v1785_v24 = vmul.f32 %v3934_v19, %v1732_v27  ;;  %v1786_v16 = vmul.f32 %v3950_v45, %v1708_v41  ;;  %v1778_v57 = vsub.f32 %v1776_v17, %v1777_v4 }
 0x19b   :  { %v1788_v13 = vmul.f32 %v3934_v19, %v1708_v41  ;;  %v1789_v62 = vmul.f32 %v3950_v45, %v1732_v27  ;;  %v1791_v59 = vmul.f32 %v3934_v19, %v1738_v3  ;;  %v1781_v63 = vadd.f32 %v1780_v36, %v1779_v10 }
 0x19c   :  { %v1784_v49 = vsub.f32 %v1782_v35, %v1783_v8  ;;  %v1792_v42 = vmul.f32 %v3950_v45, %v1714_v5  ;;  %v1794_v50 = vmul.f32 %v3934_v19, %v1714_v5  ;;  %v1787_v28 = vadd.f32 %v1786_v16, %v1785_v24 }
 0x19d   :  { %v1795_v14 = vmul.f32 %v3950_v45, %v1738_v3  ;;  %v1797_v12 = vmul.f32 %v3934_v19, %v1744_v47  ;;  %v1798_v56 = vmul.f32 %v3950_v45, %v1720_v60  ;;  %v1800_v41 = vmul.f32 %v3934_v19, %v1720_v60 }
 0x19e   :  { %v1793_v55 = vadd.f32 %v1792_v42, %v1791_v59  ;;  %v1801_v27 = vmul.f32 %v3950_v45, %v1744_v47  ;;  %v1803_v9 = vmul.f32 %v1751_v11, %v1751_v11  ;;  %v1790_v48 = vsub.f32 %v1788_v13, %v1789_v62 }
 0x19f   :  { %v1799_v32 = vadd.f32 %v1798_v56, %v1797_v12  ;;  %v1806_v44 = vmul.f32 %v1763_v20, %v1763_v20  ;;  %v1808_v7 = vmul.f32 %v1769_v15, %v1769_v15  ;;  %v1796_v5 = vsub.f32 %v1794_v50, %v1795_v14 }
 0x1a0   :  { %v1802_v3 = vsub.f32 %v1800_v41, %v1801_v27  ;;  %v1810_v17 = vmul.f32 %v1775_v31, %v1775_v31  ;;  %v1812_v4 = vmul.f32 %v1781_v63, %v1781_v63  ;;  %v1805_v19 = vadd.f32 %v4041_v18, %v1803_v9 }
 0x1a1   :  { %v1807_v45 = vadd.f32 %v1806_v44, %v4041_v18  ;;  %v1814_v60 = vmul.f32 %v1787_v28, %v1787_v28  ;;  %v1816_v47 = vmul.f32 %v1793_v55, %v1793_v55  ;;  %v1809_v11 = vadd.f32 %v1808_v7, %v4041_v18 }
 0x1a2   :  { %v1811_v20 = vadd.f32 %v1810_v17, %v4041_v18  ;;  %v1818_v10 = vmul.f32 %v1799_v32, %v1799_v32  ;;  %v1821_v15 = vmul.f32 %v1766_v39, %v1766_v39  ;;  %v4394_v36 = vadd.f32 %v1812_v4, %v4041_v18 }
 0x1a3   :  { %v4397_v35 = vadd.f32 %v1814_v60, %v4041_v18  ;;  %v1823_v31 = vmul.f32 %v1760_v2, %v1760_v2  ;;  %v1825_v8 = vmul.f32 %v1778_v57, %v1778_v57  ;;  %v4404_v24 = vadd.f32 %v1816_v47, %v4041_v18 }
 0x1a4   :  { %v4407_v39 = vadd.f32 %v1818_v10, %v4041_v18  ;;  %v1827_v16 = vmul.f32 %v1772_v61, %v1772_v61  ;;  %v1829_v13 = vmul.f32 %v1790_v48, %v1790_v48  ;;  %v4414_v62 = vadd.f32 %v1821_v15, %v4049_v22 }
 0x1a5   :  { %v4417_v2 = vadd.f32 %v1823_v31, %v4049_v22  ;;  %v1831_v57 = vmul.f32 %v1784_v49, %v1784_v49  ;;  %v1833_v59 = vmul.f32 %v1802_v3, %v1802_v3  ;;  %v4424_v18 = vadd.f32 %v1825_v8, %v4049_v22 }
 0x1a6   :  { %v4427_v61 = vadd.f32 %v1827_v16, %v4049_v22  ;;  %v1835_v63 = vmul.f32 %v1796_v5, %v1796_v5  ;;  %v1837_v42 = vsub.f32 %v1805_v19, %v1807_v45  ;;  %v4434_v49 = vadd.f32 %v1829_v13, %v4049_v22 }
 0x1a7   :  { %v4437_v50 = vadd.f32 %v1831_v57, %v4049_v22  ;;  %v4440_v28 = vadd.f32 %v1833_v59, %v4049_v22  ;;  %v1852_v14 = vadd.f32 %v1807_v45, %v1805_v19  ;;  %v2173_v55 = vstv %s4373_s11  ;;  %s4466_s11 = sld [smem:[#allocation12 + $0x192]] }
 0x1a8   :  { %v4447_v12 = vadd.f32 %v1835_v63, %v4049_v22  ;;  %v1838_v56 = vadd.f32 %v1837_v42, %v1809_v11  ;;  %v2176_v41 = vstv %s4375_s18  ;;  %v2180_v48 = vstv %s4377_s29  ;;  %s4464_s18 = sld [smem:[#allocation12 + $0x112]]  ;;  %s4472_s29 = sld [smem:[#allocation12 + $0x13]] }
 0x1a9   :  { %v1853_v27 = vsub.f32 %v1852_v14, %v1809_v11  ;;  %v1867_v9 = vadd.f32 %v1852_v14, %v1809_v11  ;;  %v2184_v32 = vstv %s4379_s4  ;;  %v2188_v44 = vstv %s4383_s6  ;;  %s4470_s4 = sld [smem:[#allocation14 + $0x12]]  ;;  %s4478_s6 = sld [smem:[#allocation12 + $0x93]] }
 0x1aa   :  { %v1839_v22 = vsub.f32 %v1838_v56, %v1811_v20  ;;  %v2193_v7 = vstv %s4385_s28  ;;  %v2196_v5 = vstv %s4389_s26  ;;  %v2200_v4 = vstv %s4391_s25  ;;  %s4480_s26 = sld [smem:[#allocation12 + $0x113]]  ;;  %s4943_s28 = sld [smem:[#allocation14 + $0x18]] }
 0x1ab   :  { %v1854_v3 = vsub.f32 %v1853_v27, %v1811_v20  ;;  %v1868_v17 = vadd.f32 %v1867_v9, %v1811_v20  ;;  %v2204_v19 = vstv %s4399_s20  ;;  %v2213_v47 = vstv %s4409_s9  ;;  %s4486_s20 = sld [smem:[#allocation12 + $0x193]]  ;;  %s4504_s9 = sld [smem:[#allocation12 + $0x194]] }
 0x1ac   :  { %v1840_v45 = vadd.f32 %v1839_v22, %v4394_v36  ;;  %v2216_v11 = vstv %s4411_s10  ;;  %v2220_v31 = vstv %s4419_s30  ;;  %s4488_s25 = sld [smem:[#allocation14 + $0x13]]  ;;  %v2224_v16 = vstv %s4421_s8  ;;  %s4496_s10 = sld [smem:[#allocation12 + $0x94]] }
 0x1ad   :  { %5367 = sst [smem:[#allocation105_spill]] %s4466_s11  ;;  %v1855_v20 = vadd.f32 %v1854_v3, %v4394_v36  ;;  %v1869_v10 = vsub.f32 %v1868_v17, %v4394_v36  ;;  %v1881_v15 = vadd.f32 %v1868_v17, %v4394_v36  ;;  %v2233_v57 = vstv %s4431_s15  ;;  %s4502_s30 = sld [smem:[#allocation12 + $0x114]] }
 0x1ae   :  { %5366 = sst [smem:[#allocation104_spill]] %s4464_s18  ;;  %v1841_v8 = vsub.f32 %v1840_v45, %v4397_v35  ;;  %v2236_v42 = vstv %s4442_s2  ;;  %v2240_v56 = vstv %s4444_s1  ;;  %v2244_v27 = vstv %s4451_s12  ;;  %s4512_s15 = sld [smem:[#allocation12 + $0x15]] }
 0x1af   :  { %5368 = sst [smem:[#allocation106_spill]] %s4470_s4  ;;  %v1856_v36 = vadd.f32 %v1855_v20, %v4397_v35  ;;  %v1870_v59 = vsub.f32 %v1869_v10, %v4397_v35  ;;  %v1882_v63 = vadd.f32 %v1881_v15, %v4397_v35  ;;  %v2253_v17 = vstv %s4457_s27  ;;  %s4518_s2 = sld [smem:[#allocation12 + $0x95]] }
 0x1b0   :  { %5369 = sst [smem:[#allocation107_spill]] %s4472_s29  ;;  %v1842_v14 = vadd.f32 %v1841_v8, %v4404_v24  ;;  %v2256_v20 = vstv %s4459_s23  ;;  %v2260_v10 = vstv %s4464_s18  ;;  %v2264_v15 = vstv %s4466_s11  ;;  %s4534_s27 = sld [smem:[#allocation12 + $0x16]] }
 0x1b1   :  { %5370 = sst [smem:[#allocation108_spill]] %s4478_s6  ;;  %v1857_v35 = vsub.f32 %v1856_v36, %v4404_v24  ;;  %v1871_v22 = vsub.f32 %v1870_v59, %v4404_v24  ;;  %v1883_v3 = vadd.f32 %v1882_v63, %v4404_v24  ;;  %s4520_s8 = sld [smem:[#allocation12 + $0x115]]  ;;  %v2276_v9 = vstv %s4478_s6 }
 0x1b2   :  { %5371 = sst [smem:[#allocation109_spill]] %s4480_s26  ;;  %v1843_v45 = vsub.f32 %v1842_v14, %v4407_v39  ;;  %s4528_s12 = sld [smem:[#allocation14 + $0x15]]  ;;  %v2273_v14 = vstv %s4472_s29 }
 0x1b3   :  { %5372 = sst [smem:[#allocation110_spill]] %s4486_s20  ;;  %v1858_v24 = vsub.f32 %v1857_v35, %v4407_v39  ;;  %v1872_v8 = vsub.f32 %v1871_v22, %v4407_v39  ;;  %v1884_v36 = vadd.f32 %v1883_v3, %v4407_v39  ;;  %s4536_s1 = sld [smem:[#allocation12 + $0x96]]  ;;  %v2284_v3 = vstv %s4486_s20 }
 0x1b4   :  { %5373 = sst [smem:[#allocation111_spill]] %s4488_s25  ;;  %v1844_v63 = vadd.f32 %v1843_v45, %v4414_v62  ;;  %s4542_s11 = sld [smem:[#allocation12 + $0x116]] }
 0x1b5   :  { %5374 = sst [smem:[#allocation112_spill]] %s4496_s10  ;;  %s4544_s18 = sld [smem:[#allocation12 + $0x196]]  ;;  %v1859_v39 = vadd.f32 %v1858_v24, %v4414_v62  ;;  %v1873_v35 = vadd.f32 %v1872_v8, %v4414_v62  ;;  %v1885_v22 = vsub.f32 %v1884_v36, %v4414_v62 }
 0x1b6   :  { %5375 = sst [smem:[#allocation113_spill]] %s4502_s30  ;;  %s4550_s4 = sld [smem:[#allocation14 + $0x16]]  ;;  %v1845_v45 = vsub.f32 %v1844_v63, %v4417_v2 }
 0x1b7   :  { %5376 = sst [smem:[#allocation114_spill]] %s4504_s9  ;;  %s4552_s23 = sld [smem:[#allocation12 + $0x17]]  ;;  %v1860_v62 = vadd.f32 %v1859_v39, %v4417_v2  ;;  %v1874_v24 = vadd.f32 %v1873_v35, %v4417_v2  ;;  %v1886_v8 = vsub.f32 %v1885_v22, %v4417_v2 }
 0x1b8   :  { %5378 = sst [smem:[#allocation116_spill]] %s4512_s15  ;;  %s4558_s26 = sld [smem:[#allocation12 + $0x97]]  ;;  %v1846_v63 = vadd.f32 %v1845_v45, %v4424_v18 }
 0x1b9   :  { %5379 = sst [smem:[#allocation117_spill]] %s4518_s2  ;;  %s4574_s25 = sld [smem:[#allocation12 + $0x18]]  ;;  %v1861_v2 = vsub.f32 %v1860_v62, %v4424_v18  ;;  %v1875_v39 = vadd.f32 %v1874_v24, %v4424_v18  ;;  %v1887_v35 = vsub.f32 %v1886_v8, %v4424_v18 }
 0x1ba   :  { %5380 = sst [smem:[#allocation118_spill]] %s4528_s12  ;;  %s4560_s6 = sld [smem:[#allocation12 + $0x117]]  ;;  %v1847_v45 = vsub.f32 %v1846_v63, %v4427_v61 }
 0x1bb   :  { %5381 = sst [smem:[#allocation119_spill]] %s4534_s27  ;;  %s4566_s20 = sld [smem:[#allocation12 + $0x197]]  ;;  %v1862_v18 = vsub.f32 %v1861_v2, %v4427_v61  ;;  %v1876_v62 = vadd.f32 %v1875_v39, %v4427_v61  ;;  %v1888_v24 = vsub.f32 %v1887_v35, %v4427_v61 }
 0x1bc   :  { %5382 = sst [smem:[#allocation120_spill]] %s4536_s1  ;;  %s4568_s29 = sld [smem:[#allocation14 + $0x17]]  ;;  %v1848_v63 = vadd.f32 %v1847_v45, %v4434_v49 }
 0x1bd   :  { %5383 = sst [smem:[#allocation121_spill]] %s4542_s11  ;;  %s4576_s10 = sld [smem:[#allocation12 + $0x98]]  ;;  %v1863_v22 = vadd.f32 %v1862_v18, %v4434_v49  ;;  %v1877_v2 = vsub.f32 %v1876_v62, %v4434_v49  ;;  %v1889_v39 = vsub.f32 %v1888_v24, %v4434_v49  ;;  %v2353_v35 = vstv %s4552_s23 }
 0x1be   :  { %5384 = sst [smem:[#allocation122_spill]] %s4544_s18  ;;  %s4582_s30 = sld [smem:[#allocation12 + $0x118]]  ;;  %v1849_v61 = vsub.f32 %v1848_v63, %v4437_v50  ;;  %v2356_v8 = vstv %s4558_s26 }
 0x1bf   :  { %5385 = sst [smem:[#allocation123_spill]] %s4550_s4  ;;  %s4584_s9 = sld [smem:[#allocation12 + $0x198]]  ;;  %v1864_v13 = vadd.f32 %v1863_v22, %v4437_v50  ;;  %v1878_v60 = vsub.f32 %v1877_v2, %v4437_v50  ;;  %v1890_v18 = vsub.f32 %v1889_v39, %v4437_v50  ;;  %v2373_v24 = vstv %s4574_s25 }
 0x1c0   :  { %5386 = sst [smem:[#allocation124_spill]] %s4552_s23  ;;  %s4592_s15 = sld [smem:[#allocation12 + $0x99]]  ;;  %v2360_v45 = vstv %s4560_s6  ;;  %v1850_v49 = vadd.f32 %v1849_v61, %v4440_v28 }
 0x1c1   :  { %5387 = sst [smem:[#allocation125_spill]] %s4558_s26  ;;  %s4598_s2 = sld [smem:[#allocation12 + $0x119]]  ;;  %v2364_v59 = vstv %s4566_s20  ;;  %v1865_v36 = vsub.f32 %v1864_v13, %v4440_v28  ;;  %v1879_v22 = vsub.f32 %v1878_v60, %v4440_v28  ;;  %v1891_v2 = vsub.f32 %v1890_v18, %v4440_v28 }
 0x1c2   :  { %5388 = sst [smem:[#allocation126_spill]] %s4560_s6  ;;  %v4625_v39 = vsub.f32 %v1850_v49, %v4447_v12  ;;  %s5421_s11 = sld [smem:[#allocation41_spill]] }
 0x1c3   :  { %5389 = sst [smem:[#allocation127_spill]] %s4566_s20  ;;  %v4631_v13 = vsub.f32 %v1865_v36, %v4447_v12  ;;  %v4634_v60 = vsub.f32 %v1879_v22, %v4447_v12  ;;  %v4637_v28 = vsub.f32 %v1891_v2, %v4447_v12  ;;  %s5415_s20 = sld [smem:[#allocation46_spill]] }
 0x1c4   :  { %5390 = sst [smem:[#allocation128_spill]] %s4568_s29  ;;  %v2380_v50 = vstv %s4582_s30  ;;  %v1895_v49 = vmul.f32 %v1894_v40, %v4625_v39  ;;  %v1914_v62 = vmul.f32 %v1913_v21, %v4625_v39  ;;  %v1934_v36 = vmul.f32 %v1933_v54, %v4625_v39  ;;  %s5417_s29 = sld [smem:[#allocation36_spill]] }
 0x1c5   :  { %5391 = sst [smem:[#allocation129_spill]] %s4574_s25  ;;  %v2384_v61 = vstv %s4584_s9  ;;  %v1954_v22 = vmul.f32 %v1953_v33, %v4625_v39  ;;  %v1898_v12 = vmul.f32 %v1897_v30, %v4631_v13  ;;  %v1902_v2 = vmul.f32 %v1901_v1, %v4634_v60  ;;  %s5416_s25 = sld [smem:[#allocation48_spill]] }
 0x1c6   :  { %5392 = sst [smem:[#allocation130_spill]] %s4576_s10  ;;  %v1906_v40 = vmul.f32 %v1905_v52, %v4637_v28  ;;  %v1917_v21 = vmul.f32 %v1916_v23, %v4631_v13  ;;  %v1921_v54 = vmul.f32 %v1920_v37, %v4634_v60  ;;  %v1925_v33 = vmul.f32 %v1924_v26, %v4637_v28  ;;  %s5419_s27 = sld [smem:[#allocation38_spill]] }
 0x1c7   :  { %5393 = sst [smem:[#allocation131_spill]] %s4582_s30  ;;  %v1937_v30 = vmul.f32 %v1936_v51, %v4631_v13  ;;  %v1941_v1 = vmul.f32 %v1940_v29, %v4634_v60  ;;  %v1899_v52 = vadd.f32 %v1898_v12, %v1895_v49  ;;  %v1945_v23 = vmul.f32 %v1944_v53, %v4637_v28  ;;  %s5418_s30 = sld [smem:[#allocation37_spill]] }
 0x1c8   :  { %5395 = sst [smem:[#allocation133_spill]] %s4592_s15  ;;  %v1918_v18 = vadd.f32 %v1917_v21, %v1914_v62  ;;  %v1957_v37 = vmul.f32 %v1956_v34, %v4631_v13  ;;  %v1961_v26 = vmul.f32 %v1960_v43, %v4634_v60  ;;  %v1965_v51 = vmul.f32 %v1964_v25, %v4637_v28  ;;  %s5420_s10 = sld [smem:[#allocation51_spill]] }
 0x1c9   :  { %v1938_v63 = vadd.f32 %v1937_v30, %v1934_v36  ;;  %v1974_v29 = vmul.f32 %v1973_v6, %v4625_v39  ;;  %v1903_v62 = vadd.f32 %v1902_v2, %v1899_v52  ;;  %v1977_v34 = vmul.f32 %v1976_v0, %v4631_v13  ;;  %s5423_s12 = sld [smem:[#allocation52_spill]]  ;;  %s5430_s1 = sld [smem:[#allocation45_spill]] }
 0x1ca   :  { %v1922_v49 = vadd.f32 %v1921_v54, %v1918_v18  ;;  %v1958_v53 = vadd.f32 %v1957_v37, %v1954_v22  ;;  %v1981_v43 = vmul.f32 %v1980_v58, %v4634_v60  ;;  %v1985_v25 = vmul.f32 %v1984_v46, %v4637_v28  ;;  %s5434_s4 = sld [smem:[#allocation57_spill]]  ;;  %s5439_s15 = sld [smem:[#allocation61_spill]] }
 0x1cb   :  { %v1942_v36 = vadd.f32 %v1941_v1, %v1938_v63  ;;  %v1994_v6 = vmul.f32 %v1993_v38, %v4625_v39  ;;  %v1907_v12 = vadd.f32 %v1906_v40, %v1903_v62  ;;  %v1978_v22 = vadd.f32 %v1977_v34, %v1974_v29  ;;  %s5448_s18 = sld [smem:[#allocation63_spill]]  ;;  %s5455_s6 = sld [smem:[#allocation50_spill]] }
 0x1cc   :  { %v1926_v18 = vadd.f32 %v1925_v33, %v1922_v49  ;;  %v1962_v2 = vadd.f32 %v1961_v26, %v1958_v53  ;;  %v5422_v0 = vstv %s5415_s20  ;;  %v5424_v58 = vstv %s5315_s3  ;;  %s5432_s3 = sld [smem:[#allocation56_spill]]  ;;  %s5450_s23 = sld [smem:[#allocation47_spill]] }
 0x1cd   :  { %v1946_v21 = vadd.f32 %v1945_v23, %v1942_v36  ;;  %v1997_v63 = vmul.f32 %v5422_v0, %v4631_v13  ;;  %v2001_v54 = vmul.f32 %v5424_v58, %v4634_v60  ;;  %v5426_v46 = vstv %s5416_s25  ;;  %s5460_s26 = sld [smem:[#allocation66_spill]]  ;;  %s5467_s25 = sld [smem:[#allocation70_spill]] }
 0x1ce   :  { %v2005_v30 = vmul.f32 %v5426_v46, %v4637_v28  ;;  %v5427_v1 = vstv %s5417_s29  ;;  %v5428_v52 = vstv %s5418_s30  ;;  %v1966_v33 = vadd.f32 %v1965_v51, %v1962_v2  ;;  %s5462_s20 = sld [smem:[#allocation58_spill]]  ;;  %s5469_s29 = sld [smem:[#allocation71_spill]] }
 0x1cf   :  { %v1910_v38 = vadd.f32 %v5427_v1, %v1907_v12  ;;  %v1929_v40 = vadd.f32 %v5428_v52, %v1926_v18  ;;  %v1982_v37 = vadd.f32 %v1981_v43, %v1978_v22  ;;  %v5429_v23 = vstv %s5419_s27  ;;  %s5470_s30 = sld [smem:[#allocation73_spill]]  ;;  %s5472_s27 = sld [smem:[#allocation60_spill]] }
 0x1d0   :  { %v1949_v26 = vadd.f32 %v5429_v23, %v1946_v21  ;;  %v1998_v29 = vadd.f32 %v1997_v63, %v1994_v6  ;;  %v5431_v62 = vstv %s5318_s0  ;;  %v5433_v53 = vstv %s5420_s10  ;;  %s5438_s0 = sld [smem:[#allocation59_spill]]  ;;  %s5475_s10 = sld [smem:[#allocation74_spill]] }
 0x1d1   :  { %v2014_v49 = vmul.f32 %v5431_v62, %v4625_v39  ;;  %v2017_v34 = vmul.f32 %v5433_v53, %v4631_v13  ;;  %1911 = vst [vmem:[#allocation15] sm:$0x1] %v1910_v38  ;;  %1931 = vst [vmem:[#allocation15 + $0x1] sm:$0x1] %v1929_v40  ;;  %v5435_v36 = vstv %s5421_s11  ;;  %v1986_v51 = vadd.f32 %v1985_v25, %v1982_v37  ;;  %s5477_s11 = sld [smem:[#allocation65_spill]]  ;;  %s5019_s9 = sld [smem:[#allocation12 + $0x1c]] }
 0x1d2   :  { %v1969_v12 = vadd.f32 %v5435_v36, %v1966_v33  ;;  %v5436_v43 = vstv %s5423_s12  ;;  %v5437_v6 = vstv %s5425_s14  ;;  %1951 = vst [vmem:[#allocation15 + $0x2] sm:$0x1] %v1949_v26  ;;  %v2002_v22 = vadd.f32 %v2001_v54, %v1998_v29  ;;  %s5478_s12 = sld [smem:[#allocation75_spill]]  ;;  %s5480_s14 = sld [smem:[#allocation76_spill]] }
 0x1d3   :  { %v2021_v18 = vmul.f32 %v5436_v43, %v4634_v60  ;;  %v2025_v2 = vmul.f32 %v5437_v6, %v4637_v28  ;;  %v2018_v21 = vadd.f32 %v2017_v34, %v2014_v49  ;;  %v5440_v0 = vstv %s5325_s13  ;;  %s5449_s13 = sld [smem:[#allocation64_spill]] }
 0x1d4   :  { %v2034_v63 = vmul.f32 %v5440_v0, %v4625_v39  ;;  %v5442_v58 = vstv %s4052_s19  ;;  %1971 = vst [vmem:[#allocation15 + $0x3] sm:$0x1] %v1969_v12  ;;  %v5444_v46 = vstv %s5430_s1  ;;  %v5445_v38 = vstv %s5432_s3  ;;  %s5452_s19 = sld [smem:[#allocation54_spill]]  ;;  %s5485_s3 = sld [smem:[#allocation79_spill]] }
 0x1d5   :  { %v2037_v25 = vmul.f32 %v5442_v58, %v4631_v13  ;;  %v1989_v1 = vadd.f32 %v5444_v46, %v1986_v51  ;;  %v2041_v52 = vmul.f32 %v5445_v38, %v4634_v60  ;;  %v5446_v40 = vstv %s5434_s4  ;;  %s5481_s1 = sld [smem:[#allocation78_spill]]  ;;  %s5487_s4 = sld [smem:[#allocation80_spill]] }
 0x1d6   :  { %v2045_v33 = vmul.f32 %v5446_v40, %v4637_v28  ;;  %v5447_v54 = vstv %s4072_s22  ;;  %v2006_v23 = vadd.f32 %v2005_v30, %v2002_v22  ;;  %v2022_v26 = vadd.f32 %v2021_v18, %v2018_v21  ;;  %s5458_s22 = sld [smem:[#allocation55_spill]] }
 0x1d7   :  { %v2054_v37 = vmul.f32 %v5447_v54, %v4625_v39  ;;  %v2038_v29 = vadd.f32 %v2037_v25, %v2034_v63  ;;  %v5451_v62 = vstv %s4074_s24  ;;  %1991 = vst [vmem:[#allocation15 + $0x4] sm:$0x1] %v1989_v1  ;;  %v5453_v53 = vstv %s4085_s21  ;;  %s5461_s24 = sld [smem:[#allocation68_spill]]  ;;  %s5465_s21 = sld [smem:[#allocation69_spill]] }
 0x1d8   :  { %v2057_v49 = vmul.f32 %v5451_v62, %v4631_v13  ;;  %v2061_v34 = vmul.f32 %v5453_v53, %v4634_v60  ;;  %v5454_v36 = vstv %s5438_s0  ;;  %v5456_v51 = vstv %s5439_s15  ;;  %s5489_s0 = sld [smem:[#allocation81_spill]]  ;;  %s5528_s15 = sld [smem:[#allocation91_spill]] }
 0x1d9   :  { %v2065_v12 = vmul.f32 %v5454_v36, %v4637_v28  ;;  %v2074_v43 = vmul.f32 %v5456_v51, %v4625_v39  ;;  %v5457_v30 = vstv %s5441_s16  ;;  %v5459_v6 = vstv %s5443_s17  ;;  %s5493_s17 = sld [smem:[#allocation67_spill]]  ;;  %s5529_s16 = sld [smem:[#allocation109_spill]] }
 0x1da   :  { %v2077_v18 = vmul.f32 %v5457_v30, %v4631_v13  ;;  %v2009_v22 = vadd.f32 %v5459_v6, %v2006_v23  ;;  %v2026_v21 = vadd.f32 %v2025_v2, %v2022_v26  ;;  %v2042_v0 = vadd.f32 %v2041_v52, %v2038_v29 }
 0x1db   :  { %v2058_v63 = vadd.f32 %v2057_v49, %v2054_v37  ;;  %v5463_v25 = vstv %s5448_s18  ;;  %v5464_v1 = vstv %s5449_s13  ;;  %v5466_v40 = vstv %s5450_s23  ;;  %s5501_s23 = sld [smem:[#allocation72_spill]] }
 0x1dc   :  { %v2078_v58 = vadd.f32 %v2077_v18, %v2074_v43  ;;  %v2081_v46 = vmul.f32 %v5463_v25, %v4634_v60  ;;  %v2085_v38 = vmul.f32 %v5464_v1, %v4637_v28  ;;  %v2094_v54 = vmul.f32 %v5466_v40, %v4625_v39  ;;  %2011 = vst [vmem:[#allocation15 + $0x5] sm:$0x1] %v2009_v22  ;;  %s5531_s18 = sld [smem:[#allocation96_spill]] }
 0x1dd   :  { %v5468_v62 = vstv %s5452_s19  ;;  %v2046_v2 = vadd.f32 %v2045_v33, %v2042_v0  ;;  %v2062_v52 = vadd.f32 %v2061_v34, %v2058_v63  ;;  %v5471_v37 = vstv %s5455_s6  ;;  %s5532_s13 = sld [smem:[#allocation112_spill]]  ;;  %s5535_s19 = sld [smem:[#allocation114_spill]] }
 0x1de   :  { %v2029_v23 = vadd.f32 %v5468_v62, %v2026_v21  ;;  %v2097_v26 = vmul.f32 %v5471_v37, %v4631_v13  ;;  %v2082_v29 = vadd.f32 %v2081_v46, %v2078_v58  ;;  %v5473_v49 = vstv %s5458_s22  ;;  %s5536_s6 = sld [smem:[#allocation116_spill]]  ;;  %s5537_s22 = sld [smem:[#allocation101_spill]] }
 0x1df   :  { %v2101_v53 = vmul.f32 %v5473_v49, %v4634_v60  ;;  %v5474_v36 = vstv %s5460_s26  ;;  %v5476_v43 = vstv %s5461_s24  ;;  %v5479_v33 = vstv %s5462_s20  ;;  %s5509_s24 = sld [smem:[#allocation77_spill]]  ;;  %s5545_s20 = sld [smem:[#allocation106_spill]] }
 0x1e0   :  { %v2105_v51 = vmul.f32 %v5474_v36, %v4637_v28  ;;  %v2114_v30 = vmul.f32 %v5476_v43, %v4625_v39  ;;  %2031 = vst [vmem:[#allocation15 + $0x6] sm:$0x1] %v2029_v23  ;;  %v2049_v34 = vadd.f32 %v5479_v33, %v2046_v2  ;;  %v2066_v18 = vadd.f32 %v2065_v12, %v2062_v52  ;;  %s5539_s26 = sld [smem:[#allocation117_spill]] }
 0x1e1   :  { %v2098_v6 = vadd.f32 %v2097_v26, %v2094_v54  ;;  %v5482_v22 = vstv %s5465_s21  ;;  %v2086_v0 = vadd.f32 %v2085_v38, %v2082_v29  ;;  %v5483_v63 = vstv %s5467_s25  ;;  %s5550_s21 = sld [smem:[#allocation111_spill]]  ;;  %s5551_s25 = sld [smem:[#allocation121_spill]] }
 0x1e2   :  { %v2117_v21 = vmul.f32 %v5482_v22, %v4631_v13  ;;  %v2121_v58 = vmul.f32 %v5483_v63, %v4634_v60  ;;  %v5484_v25 = vstv %s5469_s29  ;;  %v5486_v1 = vstv %s5470_s30  ;;  %2051 = vst [vmem:[#allocation15 + $0x7] sm:$0x1] %v2049_v34  ;;  %s5515_s30 = sld [smem:[#allocation82_spill]] }
 0x1e3   :  { %v2125_v46 = vmul.f32 %v5484_v25, %v4637_v28  ;;  %v2134_v40 = vmul.f32 %v5486_v1, %v4625_v39  ;;  %v5488_v62 = vstv %s5472_s27  ;;  %v2102_v54 = vadd.f32 %v2101_v53, %v2098_v6  ;;  %s5553_s29 = sld [smem:[#allocation122_spill]]  ;;  %s4945_s27 = sld [smem:[#allocation12 + $0x199]] }
 0x1e4   :  { %v2069_v12 = vadd.f32 %v5488_v62, %v2066_v18  ;;  %v2118_v23 = vadd.f32 %v2117_v21, %v2114_v30  ;;  %v5492_v38 = vstv %s5475_s10  ;;  %v5494_v52 = vstv %s5477_s11  ;;  %s5052_s10 = sld [smem:[#allocation12 + $0x19d]]  ;;  %s5058_s11 = sld [smem:[#allocation12 + $0x1e]] }
 0x1e5   :  { %v2137_v2 = vmul.f32 %v5492_v38, %v4631_v13  ;;  %v2089_v37 = vadd.f32 %v5494_v52, %v2086_v0  ;;  %v5495_v26 = vstv %s5478_s12  ;;  %v5496_v49 = vstv %s5480_s14  ;;  %s4952_s12 = sld [smem:[#allocation12 + $0x1a]]  ;;  %s5565_s14 = sld [smem:[#allocation130_spill]] }
 0x1e6   :  { %v2141_v29 = vmul.f32 %v5495_v26, %v4634_v60  ;;  %v2145_v36 = vmul.f32 %v5496_v49, %v4637_v28  ;;  %v5497_v43 = vstv %s5481_s1  ;;  %2071 = vst [vmem:[#allocation15 + $0x8] sm:$0x1] %v2069_v12  ;;  %v2106_v53 = vadd.f32 %v2105_v51, %v2102_v54  ;;  %s5568_s1 = sld [smem:[#allocation115_spill]] }
 0x1e7   :  { %v2154_v33 = vmul.f32 %v5497_v43, %v4625_v39  ;;  %v2122_v30 = vadd.f32 %v2121_v58, %v2118_v23  ;;  %v2138_v34 = vadd.f32 %v2137_v2, %v2134_v40  ;;  %v5500_v18 = vstv %s5485_s3  ;;  %2091 = vst [vmem:[#allocation15 + $0x9] sm:$0x1] %v2089_v37  ;;  %s4965_s3 = sld [smem:[#allocation12 + $0x9a]] }
 0x1e8   :  { %v2157_v6 = vmul.f32 %v5500_v18, %v4631_v13  ;;  %v5502_v22 = vstv %s5487_s4  ;;  %v5503_v0 = vstv %s5489_s0  ;;  %v2174_v25 = vmul.f32 %v2173_v55, %v4625_v39  ;;  %s4967_s4 = sld [smem:[#allocation12 + $0x11a]]  ;;  %s5091_s0 = sld [smem:[#allocation12 + $0x19f]] }
 0x1e9   :  { %v2161_v21 = vmul.f32 %v5502_v22, %v4634_v60  ;;  %v2165_v63 = vmul.f32 %v5503_v0, %v4637_v28  ;;  %v2177_v51 = vmul.f32 %v2176_v41, %v4631_v13  ;;  %v5506_v58 = vstv %s5493_s17  ;;  %s4984_s17 = sld [smem:[#allocation14 + $0x19]] }
 0x1ea   :  { %v2109_v1 = vadd.f32 %v5506_v58, %v2106_v53  ;;  %v2126_v40 = vadd.f32 %v2125_v46, %v2122_v30  ;;  %v2142_v62 = vadd.f32 %v2141_v29, %v2138_v34  ;;  %v2158_v12 = vadd.f32 %v2157_v6, %v2154_v33 }
 0x1eb   :  { %v2178_v54 = vadd.f32 %v2177_v51, %v2174_v25  ;;  %v2181_v23 = vmul.f32 %v2180_v48, %v4634_v60  ;;  %v2185_v55 = vmul.f32 %v2184_v32, %v4637_v28  ;;  %v2194_v38 = vmul.f32 %v2193_v7, %v4625_v39 }
 0x1ec   :  { %2111 = vst [vmem:[#allocation15 + $0xa] sm:$0x1] %v2109_v1  ;;  %v5512_v41 = vstv %s5501_s23  ;;  %v2146_v46 = vadd.f32 %v2145_v36, %v2142_v62  ;;  %v2162_v52 = vadd.f32 %v2161_v21, %v2158_v12  ;;  %v2197_v37 = vmul.f32 %v2196_v5, %v4631_v13  ;;  %s5533_s23 = sld [smem:[#allocation113_spill]] }
 0x1ed   :  { %v2129_v2 = vadd.f32 %v5512_v41, %v2126_v40  ;;  %v2182_v48 = vadd.f32 %v2181_v23, %v2178_v54  ;;  %v2201_v26 = vmul.f32 %v2200_v4, %v4634_v60  ;;  %v2205_v32 = vmul.f32 %v2204_v19, %v4637_v28 }
 0x1ee   :  { %v2214_v7 = vmul.f32 %v2213_v47, %v4625_v39  ;;  %v5519_v29 = vstv %s5509_s24  ;;  %v2166_v36 = vadd.f32 %v2165_v63, %v2162_v52  ;;  %v2198_v5 = vadd.f32 %v2197_v37, %v2194_v38  ;;  %s5542_s24 = sld [smem:[#allocation119_spill]] }
 0x1ef   :  { %2131 = vst [vmem:[#allocation15 + $0xb] sm:$0x1] %v2129_v2  ;;  %v2149_v49 = vadd.f32 %v5519_v29, %v2146_v46  ;;  %v2217_v43 = vmul.f32 %v2216_v11, %v4631_v13  ;;  %v2186_v4 = vadd.f32 %v2185_v55, %v2182_v48  ;;  %v2221_v33 = vmul.f32 %v2220_v31, %v4634_v60 }
 0x1f0   :  { %v2225_v19 = vmul.f32 %v2224_v16, %v4637_v28  ;;  %v2234_v47 = vmul.f32 %v2233_v57, %v4625_v39  ;;  %v5524_v53 = vstv %s5515_s30  ;;  %v2202_v34 = vadd.f32 %v2201_v26, %v2198_v5  ;;  %s5044_s30 = sld [smem:[#allocation12 + $0x9d]] }
 0x1f1   :  { %2151 = vst [vmem:[#allocation15 + $0xc] sm:$0x1] %v2149_v49  ;;  %v2169_v30 = vadd.f32 %v5524_v53, %v2166_v36  ;;  %v2218_v11 = vadd.f32 %v2217_v43, %v2214_v7  ;;  %v2237_v31 = vmul.f32 %v2236_v42, %v4631_v13  ;;  %v2189_v18 = vadd.f32 %v2188_v44, %v2186_v4 }
 0x1f2   :  { %v2241_v16 = vmul.f32 %v2240_v56, %v4634_v60  ;;  %v2245_v57 = vmul.f32 %v2244_v27, %v4637_v28  ;;  %v2254_v6 = vmul.f32 %v2253_v17, %v4625_v39  ;;  %v2206_v22 = vadd.f32 %v2205_v32, %v2202_v34 }
 0x1f3   :  { %2171 = vst [vmem:[#allocation15 + $0xd] sm:$0x1] %v2169_v30  ;;  %v2222_v21 = vadd.f32 %v2221_v33, %v2218_v11  ;;  %v2238_v0 = vadd.f32 %v2237_v31, %v2234_v47  ;;  %v2257_v44 = vmul.f32 %v2256_v20, %v4631_v13  ;;  %2191 = vst [vmem:[#allocation15 + $0xe] sm:$0x1] %v2189_v18  ;;  %v5534_v63 = vstv %s5528_s15  ;;  %s5570_s15 = sld [smem:[#allocation132_spill]] }
 0x1f4   :  { %v2261_v42 = vmul.f32 %v2260_v10, %v4634_v60  ;;  %v2265_v56 = vmul.f32 %v2264_v15, %v4637_v28  ;;  %v2274_v27 = vmul.f32 %v2273_v14, %v4625_v39  ;;  %v2277_v17 = vmul.f32 %v2276_v9, %v4631_v13 }
 0x1f5   :  { %v2209_v25 = vadd.f32 %v5534_v63, %v2206_v22  ;;  %v2226_v20 = vadd.f32 %v2225_v19, %v2222_v21  ;;  %v2242_v51 = vadd.f32 %v2241_v16, %v2238_v0  ;;  %v2258_v58 = vadd.f32 %v2257_v44, %v2254_v6 }
 0x1f6   :  { %v2278_v10 = vadd.f32 %v2277_v17, %v2274_v27  ;;  %v5538_v1 = vstv %s5529_s16  ;;  %v2285_v15 = vmul.f32 %v2284_v3, %v4637_v28  ;;  %v5540_v14 = vstv %s4494_s7  ;;  %s5548_s7 = sld [smem:[#allocation120_spill]]  ;;  %s5572_s16 = sld [smem:[#allocation118_spill]] }
 0x1f7   :  { %v2281_v40 = vmul.f32 %v5538_v1, %v4634_v60  ;;  %v2294_v62 = vmul.f32 %v5540_v14, %v4625_v39  ;;  %2211 = vst [vmem:[#allocation15 + $0xf] sm:$0x1] %v2209_v25  ;;  %v5541_v9 = vstv %s5531_s18  ;;  %v2246_v54 = vadd.f32 %v2245_v57, %v2242_v51  ;;  %s4986_s18 = sld [smem:[#allocation12 + $0x19a]] }
 0x1f8   :  { %v2229_v12 = vadd.f32 %v5541_v9, %v2226_v20  ;;  %v2262_v23 = vadd.f32 %v2261_v42, %v2258_v58  ;;  %v5543_v55 = vstv %s5532_s13  ;;  %v5544_v2 = vstv %s5533_s23  ;;  %s5574_s13 = sld [smem:[#allocation133_spill]]  ;;  %s4990_s23 = sld [smem:[#allocation12 + $0x1b]] }
 0x1f9   :  { %v2297_v38 = vmul.f32 %v5543_v55, %v4631_v13  ;;  %v2282_v41 = vadd.f32 %v2281_v40, %v2278_v10  ;;  %v2301_v46 = vmul.f32 %v5544_v2, %v4634_v60  ;;  %v5546_v3 = vstv %s5535_s19  ;;  %s4992_s19 = sld [smem:[#allocation12 + $0x9b]] }
 0x1fa   :  { %v2305_v52 = vmul.f32 %v5546_v3, %v4637_v28  ;;  %v5547_v37 = vstv %s5536_s6  ;;  %2231 = vst [vmem:[#allocation15 + $0x10] sm:$0x1] %v2229_v12  ;;  %v5549_v26 = vstv %s5537_s22  ;;  %v2266_v7 = vadd.f32 %v2265_v56, %v2262_v23  ;;  %s5576_s6 = sld [smem:[#allocation123_spill]]  ;;  %s5003_s22 = sld [smem:[#allocation12 + $0x11b]] }
 0x1fb   :  { %v2314_v48 = vmul.f32 %v5547_v37, %v4625_v39  ;;  %v2249_v32 = vadd.f32 %v5549_v26, %v2246_v54  ;;  %v2298_v29 = vadd.f32 %v2297_v38, %v2294_v62  ;;  %v5552_v49 = vstv %s5539_s26  ;;  %s5005_s26 = sld [smem:[#allocation12 + $0x19b]] }
 0x1fc   :  { %v2317_v36 = vmul.f32 %v5552_v49, %v4631_v13  ;;  %v2286_v5 = vadd.f32 %v2285_v15, %v2282_v41  ;;  %v5555_v43 = vstv %s4520_s8  ;;  %v5556_v33 = vstv %s4526_s5  ;;  %s5060_s8 = sld [smem:[#allocation12 + $0x9e]] }
 0x1fd   :  { %v2321_v4 = vmul.f32 %v5555_v43, %v4634_v60  ;;  %v2325_v19 = vmul.f32 %v5556_v33, %v4637_v28  ;;  %v5557_v47 = vstv %s5542_s24  ;;  %2251 = vst [vmem:[#allocation15 + $0x11] sm:$0x1] %v2249_v32  ;;  %v5558_v30 = vstv %s5545_s20  ;;  %s5012_s24 = sld [smem:[#allocation14 + $0x1a]]  ;;  %s5068_s5 = sld [smem:[#allocation12 + $0x11e]] }
 0x1fe   :  { %v2334_v53 = vmul.f32 %v5557_v47, %v4625_v39  ;;  %v2269_v34 = vadd.f32 %v5558_v30, %v2266_v7  ;;  %v2302_v11 = vadd.f32 %v2301_v46, %v2298_v29  ;;  %v2318_v31 = vadd.f32 %v2317_v36, %v2314_v48  ;;  %s5580_s20 = sld [smem:[#allocation128_spill]] }
 0x1ff   :  { %v5561_v18 = vstv %s5548_s7  ;;  %v5564_v57 = vstv %s5550_s21  ;;  %v5566_v22 = vstv %s5551_s25  ;;  %v5567_v0 = vstv %s5553_s29  ;;  %s5021_s7 = sld [smem:[#allocation12 + $0x9c]]  ;;  %s5026_s21 = sld [smem:[#allocation14 + $0x1b]] }
 0x200   :  { %v2337_v16 = vmul.f32 %v5561_v18, %v4631_v13  ;;  %v2289_v6 = vadd.f32 %v5564_v57, %v2286_v5  ;;  %v2341_v21 = vmul.f32 %v5566_v22, %v4634_v60  ;;  %v2345_v44 = vmul.f32 %v5567_v0, %v4637_v28  ;;  %2271 = vst [vmem:[#allocation15 + $0x12] sm:$0x1] %v2269_v34  ;;  %s5028_s25 = sld [smem:[#allocation12 + $0x11c]]  ;;  %s5035_s29 = sld [smem:[#allocation12 + $0x1d]] }
 0x201   :  { %v2354_v42 = vmul.f32 %v2353_v35, %v4625_v39  ;;  %v2306_v56 = vadd.f32 %v2305_v52, %v2302_v11  ;;  %v2322_v27 = vadd.f32 %v2321_v4, %v2318_v31  ;;  %v2357_v63 = vmul.f32 %v2356_v8, %v4631_v13 }
 0x202   :  { %v2338_v17 = vadd.f32 %v2337_v16, %v2334_v53  ;;  %2291 = vst [vmem:[#allocation15 + $0x13] sm:$0x1] %v2289_v6  ;;  %v2361_v25 = vmul.f32 %v2360_v45, %v4634_v60  ;;  %v2365_v35 = vmul.f32 %v2364_v59, %v4637_v28  ;;  %v2374_v20 = vmul.f32 %v2373_v24, %v4625_v39 }
 0x203   :  { %v5571_v51 = vstv %s5565_s14  ;;  %v5573_v8 = vstv %s5568_s1  ;;  %v2326_v1 = vadd.f32 %v2325_v19, %v2322_v27  ;;  %v2358_v45 = vadd.f32 %v2357_v63, %v2354_v42  ;;  %s5074_s14 = sld [smem:[#allocation14 + $0x1d]]  ;;  %s5080_s1 = sld [smem:[#allocation12 + $0x1f]] }
 0x204   :  { %v2377_v58 = vmul.f32 %v5571_v51, %v4631_v13  ;;  %v2309_v10 = vadd.f32 %v5573_v8, %v2306_v56  ;;  %v2342_v40 = vadd.f32 %v2341_v21, %v2338_v17  ;;  %v2381_v24 = vmul.f32 %v2380_v50, %v4634_v60 }
 0x205   :  { %v2385_v15 = vmul.f32 %v2384_v61, %v4637_v28  ;;  %v5575_v14 = vstv %s5570_s15  ;;  %v5577_v9 = vstv %s5572_s16  ;;  %v2362_v23 = vadd.f32 %v2361_v25, %v2358_v45  ;;  %s5095_s15 = sld [smem:[#allocation14 + $0x1e]]  ;;  %s5106_s16 = sld [smem:[#allocation14 + $0x1f]] }
 0x206   :  { %v2378_v59 = vadd.f32 %v2377_v58, %v2374_v20  ;;  %v2394_v62 = vmul.f32 %v5575_v14, %v4625_v39  ;;  %2311 = vst [vmem:[#allocation15 + $0x14] sm:$0x1] %v2309_v10  ;;  %v2329_v12 = vadd.f32 %v5577_v9, %v2326_v1  ;;  %v2346_v54 = vadd.f32 %v2345_v44, %v2342_v40 }
 0x207   :  { %v5578_v55 = vstv %s5574_s13  ;;  %v2388_v61 = vstv %s4943_s28  ;;  %v5579_v41 = vstv %s4598_s2  ;;  %v2404_v46 = vstv %s4945_s27  ;;  %s5033_s2 = sld [smem:[#allocation12 + $0x19c]]  ;;  %s5046_s28 = sld [smem:[#allocation12 + $0x11d]] }
 0x208   :  { %v2397_v38 = vmul.f32 %v5578_v55, %v4631_v13  ;;  %v2382_v50 = vadd.f32 %v2381_v24, %v2378_v59  ;;  %v2401_v2 = vmul.f32 %v5579_v41, %v4634_v60  ;;  %2331 = vst [vmem:[#allocation15 + $0x15] sm:$0x1] %v2329_v12  ;;  %v5581_v3 = vstv %s5576_s6  ;;  %s5050_s27 = sld [smem:[#allocation14 + $0x1c]] }
 0x209   :  { %v2349_v52 = vadd.f32 %v5581_v3, %v2346_v54  ;;  %v2366_v37 = vadd.f32 %v2365_v35, %v2362_v23  ;;  %v2405_v26 = vmul.f32 %v2404_v46, %v4637_v28  ;;  %v2413_v7 = vstv %s4952_s12  ;;  %s5070_s12 = sld [smem:[#allocation12 + $0x19e]] }
 0x20a   :  { %v2398_v48 = vadd.f32 %v2397_v38, %v2394_v62  ;;  %v2386_v32 = vadd.f32 %v2385_v15, %v2382_v50  ;;  %v2416_v29 = vstv %s4965_s3  ;;  %v2420_v49 = vstv %s4967_s4  ;;  %s5082_s3 = sld [smem:[#allocation12 + $0x9f]] }
 0x20b   :  { %2351 = vst [vmem:[#allocation15 + $0x16] sm:$0x1] %v2349_v52  ;;  %v5582_v36 = vstv %s5580_s20  ;;  %v2414_v4 = vmul.f32 %v2413_v7, %v4625_v39  ;;  %v2417_v33 = vmul.f32 %v2416_v29, %v4631_v13  ;;  %v2408_v47 = vstv %s4984_s17  ;;  %s5085_s4 = sld [smem:[#allocation12 + $0x11f]]  ;;  %s3070_s17 = smov [#allocation15]  }
 0x20c   :  { %v2369_v5 = vadd.f32 %v5582_v36, %v2366_v37  ;;  %v2402_v43 = vadd.f32 %v2401_v2, %v2398_v48  ;;  %v2389_v19 = vadd.f32 %v2388_v61, %v2386_v32  ;;  %v2421_v53 = vmul.f32 %v2420_v49, %v4634_v60 }
 0x20d   :  { %v2424_v30 = vstv %s4986_s18  ;;  %v2418_v11 = vadd.f32 %v2417_v33, %v2414_v4  ;;  %v2433_v18 = vstv %s4990_s23  ;;  %v2436_v57 = vstv %s4992_s19  ;;  %s2537_s18 = sshll.u32 %s3070_s17, 4  ;;  %s2538_s18 = int_to_ptr.vmem [resolvable:$true] %s2537_s18 }
 0x20e   :  { %2371 = vst [vmem:[#allocation15 + $0x17] sm:$0x1] %v2369_v5  ;;  %v2406_v34 = vadd.f32 %v2405_v26, %v2402_v43  ;;  %v2425_v31 = vmul.f32 %v2424_v30, %v4637_v28  ;;  %2391 = vst [vmem:[#allocation15 + $0x18] sm:$0x1] %v2389_v19  ;;  %v2434_v16 = vmul.f32 %v2433_v18, %v4625_v39  ;;  %v2440_v6 = vstv %s5003_s22  ;;  %s3021_s13 = scalar_lea.vmem %s2538_s18, 512  ;;  %p3026_p9 = scmp.lt.s32.totalorder %s2538_s18, %s2538_s18 }
 0x20f   :  { %v2444_v22 = vstv %s5005_s26  ;;  %v2422_v0 = vadd.f32 %v2421_v53, %v2418_v11  ;;  %v2437_v44 = vmul.f32 %v2436_v57, %v4631_v13  ;;  %v2441_v42 = vmul.f32 %v2440_v6, %v4634_v60  ;;  %p3022_p8 = scmp.ne.s32.totalorder %s2538_s18, %s3021_s13  ;;  %p3027_p10 = scmp.lt.s32.totalorder %s3021_s13, %s3021_s13 }
 0x210   :  { %v2409_v21 = vadd.f32 %v2408_v47, %v2406_v34  ;;  %v2428_v56 = vstv %s5012_s24  ;;  %v2445_v27 = vmul.f32 %v2444_v22, %v4637_v28  ;;  %v2453_v17 = vstv %s5019_s9 }
 0x211   :  { %v2456_v63 = vstv %s5021_s7  ;;  %v2426_v25 = vadd.f32 %v2425_v31, %v2422_v0  ;;  %v2438_v35 = vadd.f32 %v2437_v44, %v2434_v16  ;;  %v2454_v20 = vmul.f32 %v2453_v17, %v4625_v39  ;;  %p3028_p11 = por %p3027_p10, %p3026_p9 }
 0x212   :  { %2411 = vst [vmem:[#allocation15 + $0x19] sm:$0x1] %v2409_v21  ;;  %v2457_v51 = vmul.f32 %v2456_v63, %v4631_v13  ;;  %v2448_v58 = vstv %s5026_s21  ;;  %v2460_v8 = vstv %s5028_s25  ;;  %v2464_v10 = vstv %s5033_s2 }
 0x213   :  { %v2473_v1 = vstv %s5035_s29  ;;  %v2429_v40 = vadd.f32 %v2428_v56, %v2426_v25  ;;  %v2442_v45 = vadd.f32 %v2441_v42, %v2438_v35  ;;  %v2461_v24 = vmul.f32 %v2460_v8, %v4634_v60  ;;  %p3029_p12 = pnand %p3028_p11, %p3022_p8 }
 0x214   :  { %v2458_v59 = vadd.f32 %v2457_v51, %v2454_v20  ;;  %v2465_v15 = vmul.f32 %v2464_v10, %v4637_v28  ;;  %v2474_v14 = vmul.f32 %v2473_v1, %v4625_v39  ;;  %v2476_v62 = vstv %s5044_s30 }
 0x215   :  { %v2480_v9 = vstv %s5046_s28  ;;  %2431 = vst [vmem:[#allocation15 + $0x1a] sm:$0x1] %v2429_v40  ;;  %v2446_v12 = vadd.f32 %v2445_v27, %v2442_v45  ;;  %v2477_v23 = vmul.f32 %v2476_v62, %v4631_v13  ;;  %v2468_v38 = vstv %s5050_s27 }
 0x216   :  { %v2462_v54 = vadd.f32 %v2461_v24, %v2458_v59  ;;  %v2481_v55 = vmul.f32 %v2480_v9, %v4634_v60  ;;  %v2484_v50 = vstv %s5052_s10  ;;  %v2493_v61 = vstv %s5058_s11 }
 0x217   :  { %v2496_v41 = vstv %s5060_s8  ;;  %v2449_v2 = vadd.f32 %v2448_v58, %v2446_v12  ;;  %v2478_v3 = vadd.f32 %v2477_v23, %v2474_v14  ;;  %v2485_v52 = vmul.f32 %v2484_v50, %v4637_v28 }
 0x218   :  { %v2466_v46 = vadd.f32 %v2465_v15, %v2462_v54  ;;  %v2494_v37 = vmul.f32 %v2493_v61, %v4625_v39  ;;  %v2497_v48 = vmul.f32 %v2496_v41, %v4631_v13  ;;  %v2500_v26 = vstv %s5068_s5 }
 0x219   :  { %v2504_v32 = vstv %s5070_s12  ;;  %2451 = vst [vmem:[#allocation15 + $0x1b] sm:$0x1] %v2449_v2  ;;  %v2482_v29 = vadd.f32 %v2481_v55, %v2478_v3  ;;  %v2488_v49 = vstv %s5074_s14  ;;  %v2501_v36 = vmul.f32 %v2500_v26, %v4634_v60 }
 0x21a   :  { %v2469_v7 = vadd.f32 %v2468_v38, %v2466_v46  ;;  %v2498_v5 = vadd.f32 %v2497_v48, %v2494_v37  ;;  %v2505_v43 = vmul.f32 %v2504_v32, %v4637_v28  ;;  %v2513_v4 = vstv %s5080_s1 }
 0x21b   :  { %v2516_v33 = vstv %s5082_s3  ;;  %v2486_v19 = vadd.f32 %v2485_v52, %v2482_v29  ;;  %v2514_v47 = vmul.f32 %v2513_v4, %v4625_v39  ;;  %v2520_v30 = vstv %s5085_s4 }
 0x21c   :  { %2471 = vst [vmem:[#allocation15 + $0x1c] sm:$0x1] %v2469_v7  ;;  %v2517_v53 = vmul.f32 %v2516_v33, %v4631_v13  ;;  %v2502_v34 = vadd.f32 %v2501_v36, %v2498_v5  ;;  %v2521_v11 = vmul.f32 %v2520_v30, %v4634_v60  ;;  %v2524_v31 = vstv %s5091_s0 }
 0x21d   :  { %v2489_v18 = vadd.f32 %v2488_v49, %v2486_v19  ;;  %v2508_v16 = vstv %s5095_s15  ;;  %v2525_v6 = vmul.f32 %v2524_v31, %v4637_v28  ;;  %v2528_v44 = vstv %s5106_s16 }
 0x21e   :  { %v2518_v57 = vadd.f32 %v2517_v53, %v2514_v47  ;;  %v2506_v22 = vadd.f32 %v2505_v43, %v2502_v34 }
 0x21f   :  { %2491 = vst [vmem:[#allocation15 + $0x1d] sm:$0x1] %v2489_v18 }
 0x220   :  { %v2522_v21 = vadd.f32 %v2521_v11, %v2518_v57  ;;  %v2509_v0 = vadd.f32 %v2508_v16, %v2506_v22 }
 0x222   :  { %v2526_v39 = vadd.f32 %v2525_v6, %v2522_v21  ;;  %2511 = vst [vmem:[#allocation15 + $0x1e] sm:$0x1] %v2509_v0 }
 0x224   :  { %v2529_v13 = vadd.f32 %v2528_v44, %v2526_v39 }
 0x226   :  { %2531 = vst [vmem:[#allocation15 + $0x1f] sm:$0x1] %v2529_v13 }
 0x227   :  { %3032 = shalt.err (!%p3029_p12)
}
 0x228   :  { %s5583_s6 = sld [smem:[#allocation134_spill]] }
 0x22e   :  { %s3033_s22 = scalar_lea.hbm %s5583_s6, 512 }
 0x22f   :  { %p3034_p13 = scmp.ne.s32.totalorder %s5583_s6, %s3033_s22  ;;  %p3037_p0 = scmp.lt.u32.totalorder %s3033_s22, %s5583_s6 }
 0x231   :  { %p3039_p1 = pnand %p3037_p0, %p3034_p13 }
 0x233   :  { %3042 = shalt.err (!%p3039_p1)
}
 0x234   :  { %s5584_s7 = smov 1   ;;  %s5585_s21 = smov 16  }
 0x235   :  { %2543 = dma.vmem_to_hbm [thread:$0]  %s2538_s18, 512, %s5583_s6, [#allocation4], %s5585_s21, %s5585_s21, %s5584_s7  }
 0x236   :  { %3053 = dma.done.wait [#allocation4], 512  }
 0x237   :  { %3054 = vsyncadd [#allocation4], 4294966784 }
 0x238   :  { %2547 = vsyncpa [#allocation3], 1 }
 0x239   :  { %2548 = vsyncpa [#allocation4], 1 }
 0x23a   :  { %2549 = vsyncpa [#allocation5], 1 }
 0x23b   :  { %2550 = vsyncpa [#allocation6], 1 }
 0x23c   :  { %2551 = vsyncpa [#allocation10], 1 }
 0x23d   :  { %2552 = vsyncpa [#allocation13], 1 }

</bundles_post_ra>
